<compile_context>
chip_gen: v5e
topology: v5e:2x2
jax: 0.10.0
libtpu: 0.0.40
codegen_flags: <defaults>
</compile_context>

<pallas_src>
import functools

import jax
import jax.numpy as jnp
from jax.experimental import pallas as pl
from jax.experimental.pallas import tpu as pltpu

LN_EPS = 1e-5     # PyTorch nn.LayerNorm default
LANE = 128


# ----------------------------------------------------------------------------- kernel
def _layernorm(x, gamma, beta):
    mu = jnp.mean(x, axis=-1, keepdims=True)
    var = jnp.mean((x - mu) ** 2, axis=-1, keepdims=True)
    return (x - mu) * jax.lax.rsqrt(var + LN_EPS) * gamma + beta


def stage_kernel(*refs, depth, num_heads, scale, batch, seq_len, with_head):
    """One whole CvT stage (+ optional classifier head) in a single kernel.

    Ref order: patches, embed weights, per-block weights (x depth), [head weights],
    then the single output ref.  Tokens stay in VMEM across all blocks.
    """
    it = iter(refs)

    patches = next(it)[...]                 # (B*L, Kpad) bf16 im2col patches
    emb_w = next(it)[...]                   # (Kpad, E)   bf16
    emb_b = next(it)[...]                   # (1, E)      f32
    emb_g = next(it)[...]                   # (1, E)      f32
    emb_beta = next(it)[...]                # (1, E)      f32

    blocks = []
    for _ in range(depth):
        blocks.append(dict(
            ln1_g=next(it)[...], ln1_b=next(it)[...],
            wqkv=next(it)[...], bqkv=next(it)[...],
            wo=next(it)[...], bo=next(it)[...],
            ln2_g=next(it)[...], ln2_b=next(it)[...],
            w1=next(it)[...], b1=next(it)[...],
            w2=next(it)[...], b2=next(it)[...],
        ))

    if with_head:
        head_g = next(it)[...]
        head_b = next(it)[...]
        head_w = next(it)[...]               # (E, Cpad) bf16
        head_bias = next(it)[...]            # (1, Cpad) f32

    out_ref = next(it)

    B, L = batch, seq_len
    E = emb_w.shape[1]
    dh = E // num_heads
    bf16 = jnp.bfloat16

    # --- patch embedding: im2col matmul + bias + LayerNorm ---------------------------
    tok = jnp.dot(patches, emb_w, preferred_element_type=jnp.float32) + emb_b
    tok = _layernorm(tok, emb_g, emb_beta)                    # (B*L, E) f32

    # --- transformer blocks (B*L flattened for all row-wise matmuls) -----------------
    for blk in blocks:
        xn = _layernorm(tok, blk["ln1_g"], blk["ln1_b"])
        qkv = jnp.dot(xn.astype(bf16), blk["wqkv"],
                      preferred_element_type=jnp.float32) + blk["bqkv"]   # (B*L, 3E)
        q = qkv[:, :E].reshape(B, L, E)
        k = qkv[:, E:2 * E].reshape(B, L, E)
        v = qkv[:, 2 * E:].reshape(B, L, E)

        head_outs = []
        for h in range(num_heads):            # static unroll (H = 2 or 4)
            sl = slice(h * dh, (h + 1) * dh)
            qh = q[:, :, sl].astype(bf16)
            kh = k[:, :, sl].astype(bf16)
            vh = v[:, :, sl].astype(bf16)
            s = jnp.einsum("bld,bmd->blm", qh, kh,
                           preferred_element_type=jnp.float32) * scale
            s = s - jnp.max(s, axis=-1, keepdims=True)
            p = jnp.exp(s)
            p = p * pl.reciprocal(jnp.sum(p, axis=-1, keepdims=True), approx=True)
            head_outs.append(jnp.einsum("blm,bmd->bld", p.astype(bf16), vh,
                                        preferred_element_type=jnp.float32))
        attn = jnp.concatenate(head_outs, axis=-1).reshape(B * L, E)
        attn = jnp.dot(attn.astype(bf16), blk["wo"],
                       preferred_element_type=jnp.float32) + blk["bo"]
        tok = tok + attn                                       # residual (drop_path 0)

        xn2 = _layernorm(tok, blk["ln2_g"], blk["ln2_b"])
        h1 = jnp.dot(xn2.astype(bf16), blk["w1"],
                     preferred_element_type=jnp.float32) + blk["b1"]
        h1 = h1 * jax.nn.sigmoid(1.702 * h1)                   # QuickGELU
        h2 = jnp.dot(h1.astype(bf16), blk["w2"],
                     preferred_element_type=jnp.float32) + blk["b2"]
        tok = tok + h2                                         # residual

    if with_head:
        # head: mean over tokens -> LayerNorm -> Linear (matches the nn.Sequential order)
        pooled = jnp.mean(tok.reshape(B, L, E), axis=1)        # (B, E)
        pooled = _layernorm(pooled, head_g, head_b)
        out_ref[...] = jnp.dot(pooled.astype(bf16), head_w,
                               preferred_element_type=jnp.float32) + head_bias
    else:
        out_ref[...] = tok


# ----------------------------------------------------------------------------- glue
def _im2col(x, k, s, p):
    """x: (B, Cin, H, W) NCHW -> (B*Ho*Wo, Cin*k*k) patches matching the PyTorch conv
    weight flatten order (Cin outer, then kh, kw)."""
    xp = jnp.pad(x, ((0, 0), (0, 0), (p, p), (p, p)))
    B, C, Hp, Wp = xp.shape
    Ho = (Hp - k) // s + 1
    Wo = (Wp - k) // s + 1
    cols = []
    for i in range(k):
        for j in range(k):
            cols.append(xp[:, :, i:i + Ho * s:s, j:j + Wo * s:s])   # (B, C, Ho, Wo)
    pt = jnp.stack(cols, axis=2)                    # (B, C, k*k, Ho, Wo)
    pt = pt.reshape(B, C * k * k, Ho * Wo)
    pt = pt.transpose(0, 2, 1).reshape(B * Ho * Wo, C * k * k)
    return pt, Ho, Wo


def _full_spec(shape):
    return pl.BlockSpec(shape, lambda *_: (0,) * len(shape))


def _round_up(n, m):
    return ((n + m - 1) // m) * m


def run_stage(x_nchw, sp, cfg, s, head_params=None, num_classes=None):
    k = cfg["patch_size"][s]
    st = cfg["patch_stride"][s]
    pd = cfg["patch_padding"][s]
    E = cfg["embedding_dim"][s]
    F = cfg["ff_hidden_dim"][s]
    depth = cfg["depth"][s]
    H = cfg["num_heads"][s]
    B = x_nchw.shape[0]
    bf16 = jnp.bfloat16

    patches, Ho, Wo = _im2col(x_nchw, k, st, pd)               # (B*L, K) f32
    L = Ho * Wo
    K = patches.shape[1]
    Kpad = _round_up(K, LANE)                                  # lane-dense contraction

    patches = jnp.pad(patches, ((0, 0), (0, Kpad - K))).astype(bf16)
    w2d = sp["conv_w"].reshape(E, -1).T                        # (K, E)
    w2d = jnp.pad(w2d, ((0, Kpad - K), (0, 0))).astype(bf16)

    args = [patches, w2d,
            sp["conv_b"].reshape(1, E),
            sp["embed_ln_g"].reshape(1, E), sp["embed_ln_b"].reshape(1, E)]

    for bp in sp["blocks"]:
        wqkv = jnp.concatenate([bp["wq"], bp["wk"], bp["wv"]], axis=1).astype(bf16)
        bqkv = jnp.concatenate([bp["bq"], bp["bk"], bp["bv"]]).reshape(1, 3 * E)
        args += [bp["ln1_g"].reshape(1, E), bp["ln1_b"].reshape(1, E),
                 wqkv, bqkv,
                 bp["wo"].astype(bf16), bp["bo"].reshape(1, E),
                 bp["ln2_g"].reshape(1, E), bp["ln2_b"].reshape(1, E),
                 bp["w1"].astype(bf16), bp["b1"].reshape(1, F),
                 bp["w2"].astype(bf16), bp["b2"].reshape(1, E)]

    with_head = head_params is not None
    if with_head:
        C = num_classes
        Cpad = _round_up(C, LANE)                              # lane-dense logits
        hw = jnp.pad(head_params["w"], ((0, 0), (0, Cpad - C))).astype(bf16)
        hb = jnp.pad(head_params["b"], (0, Cpad - C)).reshape(1, Cpad)
        args += [head_params["ln_g"].reshape(1, E), head_params["ln_b"].reshape(1, E),
                 hw, hb]
        out_shape = jax.ShapeDtypeStruct((B, Cpad), jnp.float32)
    else:
        out_shape = jax.ShapeDtypeStruct((B * L, E), jnp.float32)

    kernel = functools.partial(stage_kernel, depth=depth, num_heads=H,
                               scale=float(E) ** -0.5, batch=B, seq_len=L,
                               with_head=with_head)
    out = pl.pallas_call(
        kernel,
        out_shape=out_shape,
        grid=(1,),
        in_specs=[_full_spec(a.shape) for a in args],
        out_specs=_full_spec(out_shape.shape),
        compiler_params=pltpu.CompilerParams(dimension_semantics=("arbitrary",)),
    )(*args)

    if with_head:
        return out[:, :C]
    return out, Ho, Wo


# ----------------------------------------------------------------------------- model
CONFIG = dict(
    in_channels=4,
    num_classes=10,
    patch_size=[3, 3],
    patch_stride=[2, 2],
    patch_padding=[1, 1],
    embedding_dim=[32, 64],
    depth=[1, 1],
    num_heads=[2, 4],
    ff_hidden_dim=[64, 128],
    qkv_bias=[True, True],
    drop_rate=[0.0, 0.0],
    attn_drop_rate=[0.0, 0.0],
    drop_path_rate=[0.0, 0.0],
    kernel_size=[3, 3],
    stride_kv=[1, 1],
    stride_q=[1, 1],
    padding_kv=[1, 1],
    padding_q=[1, 1],
    method=["linear", "linear"],
)


def init_params(key, cfg):
    def normal(key, shape, scale=0.02):
        return scale * jax.random.normal(key, shape, jnp.float32)

    params = {"stages": [], "head": None}
    c_in = cfg["in_channels"]
    for s in range(len(cfg["patch_size"])):
        k = cfg["patch_size"][s]
        E = cfg["embedding_dim"][s]
        F = cfg["ff_hidden_dim"][s]
        key, k1 = jax.random.split(key)
        stage = {
            "conv_w": normal(k1, (E, c_in, k, k)),
            "conv_b": jnp.zeros((E,), jnp.float32),
            "embed_ln_g": jnp.ones((E,), jnp.float32),
            "embed_ln_b": jnp.zeros((E,), jnp.float32),
            "blocks": [],
        }
        for _ in range(cfg["depth"][s]):
            keys = jax.random.split(key, 8)
            key = keys[0]
            stage["blocks"].append({
                "ln1_g": jnp.ones((E,), jnp.float32), "ln1_b": jnp.zeros((E,), jnp.float32),
                "wq": normal(keys[1], (E, E)), "bq": jnp.zeros((E,), jnp.float32),
                "wk": normal(keys[2], (E, E)), "bk": jnp.zeros((E,), jnp.float32),
                "wv": normal(keys[3], (E, E)), "bv": jnp.zeros((E,), jnp.float32),
                "wo": normal(keys[4], (E, E)), "bo": jnp.zeros((E,), jnp.float32),
                "ln2_g": jnp.ones((E,), jnp.float32), "ln2_b": jnp.zeros((E,), jnp.float32),
                "w1": normal(keys[5], (E, F)), "b1": jnp.zeros((F,), jnp.float32),
                "w2": normal(keys[6], (F, E)), "b2": jnp.zeros((E,), jnp.float32),
            })
        params["stages"].append(stage)
        c_in = E
    key, kh = jax.random.split(key)
    params["head"] = {
        "ln_g": jnp.ones((c_in,), jnp.float32),
        "ln_b": jnp.zeros((c_in,), jnp.float32),
        "w": normal(kh, (c_in, cfg["num_classes"])),
        "b": jnp.zeros((cfg["num_classes"],), jnp.float32),
    }
    return params


def conv_vision_transformer(x_nchw, params, cfg):
    x = x_nchw
    n_stages = len(params["stages"])
    for s, stage in enumerate(params["stages"]):
        if s == n_stages - 1:
            # final stage: classifier head fused into the same kernel
            return run_stage(x, stage, cfg, s,
                             head_params=params["head"],
                             num_classes=cfg["num_classes"])
        tokens, Ho, Wo = run_stage(x, stage, cfg, s)
        B = x.shape[0]
        E = cfg["embedding_dim"][s]
        # rearrange 'b (h w) c -> b c h w' between stages (glue)
        x = tokens.reshape(B, Ho, Wo, E).transpose(0, 3, 1, 2)


if __name__ == "__main__":
    key = jax.random.PRNGKey(0)
    key_x, key_p = jax.random.split(key)
    x = jax.random.normal(key_x, (2, 4, 16, 16), jnp.float32)   # NCHW, like PyTorch
    params = init_params(key_p, CONFIG)

    fwd = jax.jit(functools.partial(conv_vision_transformer, cfg=CONFIG))
    out = fwd(x, params)
    out = jax.block_until_ready(out)
    assert out.shape == (2, CONFIG["num_classes"])
    assert bool(jnp.all(jnp.isfinite(out)))
    print("KERNEL_OK")
</pallas_src>

<mosaic_0001>
module attributes {stable_mosaic.version = 11 : i64} {
  func.func @stage_kernel(%arg0: i32, %arg1: memref<128x128xbf16, #tpu.memory_space<vmem>>, %arg2: memref<128x32xbf16, #tpu.memory_space<vmem>>, %arg3: memref<1x32xf32, #tpu.memory_space<vmem>>, %arg4: memref<1x32xf32, #tpu.memory_space<vmem>>, %arg5: memref<1x32xf32, #tpu.memory_space<vmem>>, %arg6: memref<1x32xf32, #tpu.memory_space<vmem>>, %arg7: memref<1x32xf32, #tpu.memory_space<vmem>>, %arg8: memref<32x96xbf16, #tpu.memory_space<vmem>>, %arg9: memref<1x96xf32, #tpu.memory_space<vmem>>, %arg10: memref<32x32xbf16, #tpu.memory_space<vmem>>, %arg11: memref<1x32xf32, #tpu.memory_space<vmem>>, %arg12: memref<1x32xf32, #tpu.memory_space<vmem>>, %arg13: memref<1x32xf32, #tpu.memory_space<vmem>>, %arg14: memref<32x64xbf16, #tpu.memory_space<vmem>>, %arg15: memref<1x64xf32, #tpu.memory_space<vmem>>, %arg16: memref<64x32xbf16, #tpu.memory_space<vmem>>, %arg17: memref<1x32xf32, #tpu.memory_space<vmem>>, %arg18: memref<128x32xf32, #tpu.memory_space<vmem>>) attributes {dimension_semantics = [#tpu.dimension_semantics<arbitrary>], iteration_bounds = array<i64: 1>, scalar_prefetch = 0 : i64, scratch_operands = 0 : i64, tpu.core_type = #tpu.core_type<tc>, window_params = [{pipeline_mode = #tpu.pipeline_mode<synchronous>, transform_indices = @transform_0, window_bounds = array<i64: 128, 128>}, {pipeline_mode = #tpu.pipeline_mode<synchronous>, transform_indices = @transform_1, window_bounds = array<i64: 128, 32>}, {pipeline_mode = #tpu.pipeline_mode<synchronous>, transform_indices = @transform_2, window_bounds = array<i64: 1, 32>}, {pipeline_mode = #tpu.pipeline_mode<synchronous>, transform_indices = @transform_3, window_bounds = array<i64: 1, 32>}, {pipeline_mode = #tpu.pipeline_mode<synchronous>, transform_indices = @transform_4, window_bounds = array<i64: 1, 32>}, {pipeline_mode = #tpu.pipeline_mode<synchronous>, transform_indices = @transform_5, window_bounds = array<i64: 1, 32>}, {pipeline_mode = #tpu.pipeline_mode<synchronous>, transform_indices = @transform_6, window_bounds = array<i64: 1, 32>}, {pipeline_mode = #tpu.pipeline_mode<synchronous>, transform_indices = @transform_7, window_bounds = array<i64: 32, 96>}, {pipeline_mode = #tpu.pipeline_mode<synchronous>, transform_indices = @transform_8, window_bounds = array<i64: 1, 96>}, {pipeline_mode = #tpu.pipeline_mode<synchronous>, transform_indices = @transform_9, window_bounds = array<i64: 32, 32>}, {pipeline_mode = #tpu.pipeline_mode<synchronous>, transform_indices = @transform_10, window_bounds = array<i64: 1, 32>}, {pipeline_mode = #tpu.pipeline_mode<synchronous>, transform_indices = @transform_11, window_bounds = array<i64: 1, 32>}, {pipeline_mode = #tpu.pipeline_mode<synchronous>, transform_indices = @transform_12, window_bounds = array<i64: 1, 32>}, {pipeline_mode = #tpu.pipeline_mode<synchronous>, transform_indices = @transform_13, window_bounds = array<i64: 32, 64>}, {pipeline_mode = #tpu.pipeline_mode<synchronous>, transform_indices = @transform_14, window_bounds = array<i64: 1, 64>}, {pipeline_mode = #tpu.pipeline_mode<synchronous>, transform_indices = @transform_15, window_bounds = array<i64: 64, 32>}, {pipeline_mode = #tpu.pipeline_mode<synchronous>, transform_indices = @transform_16, window_bounds = array<i64: 1, 32>}, {pipeline_mode = #tpu.pipeline_mode<synchronous>, transform_indices = @transform_17, window_bounds = array<i64: 128, 32>}]} {
    %c0 = arith.constant 0 : index
    %c0_0 = arith.constant 0 : index
    %0 = vector.load %arg1[%c0, %c0_0] : memref<128x128xbf16, #tpu.memory_space<vmem>>, vector<128x128xbf16>
    %c0_1 = arith.constant 0 : index
    %c0_2 = arith.constant 0 : index
    %1 = vector.load %arg2[%c0_1, %c0_2] : memref<128x32xbf16, #tpu.memory_space<vmem>>, vector<128x32xbf16>
    %c0_3 = arith.constant 0 : index
    %c0_4 = arith.constant 0 : index
    %2 = vector.load %arg3[%c0_3, %c0_4] : memref<1x32xf32, #tpu.memory_space<vmem>>, vector<1x32xf32>
    %c0_5 = arith.constant 0 : index
    %c0_6 = arith.constant 0 : index
    %3 = vector.load %arg4[%c0_5, %c0_6] : memref<1x32xf32, #tpu.memory_space<vmem>>, vector<1x32xf32>
    %c0_7 = arith.constant 0 : index
    %c0_8 = arith.constant 0 : index
    %4 = vector.load %arg5[%c0_7, %c0_8] : memref<1x32xf32, #tpu.memory_space<vmem>>, vector<1x32xf32>
    %c0_9 = arith.constant 0 : index
    %c0_10 = arith.constant 0 : index
    %5 = vector.load %arg6[%c0_9, %c0_10] : memref<1x32xf32, #tpu.memory_space<vmem>>, vector<1x32xf32>
    %c0_11 = arith.constant 0 : index
    %c0_12 = arith.constant 0 : index
    %6 = vector.load %arg7[%c0_11, %c0_12] : memref<1x32xf32, #tpu.memory_space<vmem>>, vector<1x32xf32>
    %c0_13 = arith.constant 0 : index
    %c0_14 = arith.constant 0 : index
    %7 = vector.load %arg8[%c0_13, %c0_14] : memref<32x96xbf16, #tpu.memory_space<vmem>>, vector<32x96xbf16>
    %c0_15 = arith.constant 0 : index
    %c0_16 = arith.constant 0 : index
    %8 = vector.load %arg9[%c0_15, %c0_16] : memref<1x96xf32, #tpu.memory_space<vmem>>, vector<1x96xf32>
    %c0_17 = arith.constant 0 : index
    %c0_18 = arith.constant 0 : index
    %9 = vector.load %arg10[%c0_17, %c0_18] : memref<32x32xbf16, #tpu.memory_space<vmem>>, vector<32x32xbf16>
    %c0_19 = arith.constant 0 : index
    %c0_20 = arith.constant 0 : index
    %10 = vector.load %arg11[%c0_19, %c0_20] : memref<1x32xf32, #tpu.memory_space<vmem>>, vector<1x32xf32>
    %c0_21 = arith.constant 0 : index
    %c0_22 = arith.constant 0 : index
    %11 = vector.load %arg12[%c0_21, %c0_22] : memref<1x32xf32, #tpu.memory_space<vmem>>, vector<1x32xf32>
    %c0_23 = arith.constant 0 : index
    %c0_24 = arith.constant 0 : index
    %12 = vector.load %arg13[%c0_23, %c0_24] : memref<1x32xf32, #tpu.memory_space<vmem>>, vector<1x32xf32>
    %c0_25 = arith.constant 0 : index
    %c0_26 = arith.constant 0 : index
    %13 = vector.load %arg14[%c0_25, %c0_26] : memref<32x64xbf16, #tpu.memory_space<vmem>>, vector<32x64xbf16>
    %c0_27 = arith.constant 0 : index
    %c0_28 = arith.constant 0 : index
    %14 = vector.load %arg15[%c0_27, %c0_28] : memref<1x64xf32, #tpu.memory_space<vmem>>, vector<1x64xf32>
    %c0_29 = arith.constant 0 : index
    %c0_30 = arith.constant 0 : index
    %15 = vector.load %arg16[%c0_29, %c0_30] : memref<64x32xbf16, #tpu.memory_space<vmem>>, vector<64x32xbf16>
    %c0_31 = arith.constant 0 : index
    %c0_32 = arith.constant 0 : index
    %16 = vector.load %arg17[%c0_31, %c0_32] : memref<1x32xf32, #tpu.memory_space<vmem>>, vector<1x32xf32>
    %cst = arith.constant dense<0.000000e+00> : vector<128x32xf32>
    %17 = tpu.matmul %0, %1, %cst {dimension_numbers = #tpu.dot_dimension_numbers<[1], [0], [0], [1], [0, 0, 1, 1], [], []>} : vector<128x128xbf16>, vector<128x32xbf16>, vector<128x32xf32> -> vector<128x32xf32>
    %18 = vector.broadcast %2 : vector<1x32xf32> to vector<128x32xf32>
    %19 = arith.addf %17, %18 : vector<128x32xf32>
    %cst_33 = arith.constant dense<0.000000e+00> : vector<128xf32>
    %20 = vector.multi_reduction <add>, %19, %cst_33 [1] : vector<128x32xf32> to vector<128xf32>
    %21 = vector.shape_cast %20 : vector<128xf32> to vector<128x1xf32>
    %cst_34 = arith.constant 3.200000e+01 : f32
    %22 = vector.broadcast %cst_34 : f32 to vector<128x1xf32>
    %23 = arith.divf %21, %22 : vector<128x1xf32>
    %24 = vector.broadcast %23 : vector<128x1xf32> to vector<128x32xf32>
    %25 = arith.subf %19, %24 : vector<128x32xf32>
    %26 = arith.mulf %25, %25 : vector<128x32xf32>
    %cst_35 = arith.constant dense<0.000000e+00> : vector<128xf32>
    %27 = vector.multi_reduction <add>, %26, %cst_35 [1] : vector<128x32xf32> to vector<128xf32>
    %28 = vector.shape_cast %27 : vector<128xf32> to vector<128x1xf32>
    %cst_36 = arith.constant 3.200000e+01 : f32
    %29 = vector.broadcast %cst_36 : f32 to vector<128x1xf32>
    %30 = arith.divf %28, %29 : vector<128x1xf32>
    %31 = vector.broadcast %23 : vector<128x1xf32> to vector<128x32xf32>
    %32 = arith.subf %19, %31 : vector<128x32xf32>
    %cst_37 = arith.constant 9.99999974E-6 : f32
    %33 = vector.broadcast %cst_37 : f32 to vector<128x1xf32>
    %34 = arith.addf %30, %33 : vector<128x1xf32>
    %35 = math.rsqrt %34 : vector<128x1xf32>
    %36 = vector.broadcast %35 : vector<128x1xf32> to vector<128x32xf32>
    %37 = arith.mulf %32, %36 : vector<128x32xf32>
    %38 = vector.broadcast %3 : vector<1x32xf32> to vector<128x32xf32>
    %39 = arith.mulf %37, %38 : vector<128x32xf32>
    %40 = vector.broadcast %4 : vector<1x32xf32> to vector<128x32xf32>
    %41 = arith.addf %39, %40 : vector<128x32xf32>
    %cst_38 = arith.constant dense<0.000000e+00> : vector<128xf32>
    %42 = vector.multi_reduction <add>, %41, %cst_38 [1] : vector<128x32xf32> to vector<128xf32>
    %43 = vector.shape_cast %42 : vector<128xf32> to vector<128x1xf32>
    %cst_39 = arith.constant 3.200000e+01 : f32
    %44 = vector.broadcast %cst_39 : f32 to vector<128x1xf32>
    %45 = arith.divf %43, %44 : vector<128x1xf32>
    %46 = vector.broadcast %45 : vector<128x1xf32> to vector<128x32xf32>
    %47 = arith.subf %41, %46 : vector<128x32xf32>
    %48 = arith.mulf %47, %47 : vector<128x32xf32>
    %cst_40 = arith.constant dense<0.000000e+00> : vector<128xf32>
    %49 = vector.multi_reduction <add>, %48, %cst_40 [1] : vector<128x32xf32> to vector<128xf32>
    %50 = vector.shape_cast %49 : vector<128xf32> to vector<128x1xf32>
    %cst_41 = arith.constant 3.200000e+01 : f32
    %51 = vector.broadcast %cst_41 : f32 to vector<128x1xf32>
    %52 = arith.divf %50, %51 : vector<128x1xf32>
    %53 = vector.broadcast %45 : vector<128x1xf32> to vector<128x32xf32>
    %54 = arith.subf %41, %53 : vector<128x32xf32>
    %cst_42 = arith.constant 9.99999974E-6 : f32
    %55 = vector.broadcast %cst_42 : f32 to vector<128x1xf32>
    %56 = arith.addf %52, %55 : vector<128x1xf32>
    %57 = math.rsqrt %56 : vector<128x1xf32>
    %58 = vector.broadcast %57 : vector<128x1xf32> to vector<128x32xf32>
    %59 = arith.mulf %54, %58 : vector<128x32xf32>
    %60 = vector.broadcast %5 : vector<1x32xf32> to vector<128x32xf32>
    %61 = arith.mulf %59, %60 : vector<128x32xf32>
    %62 = vector.broadcast %6 : vector<1x32xf32> to vector<128x32xf32>
    %63 = arith.addf %61, %62 : vector<128x32xf32>
    %64 = arith.truncf %63 : vector<128x32xf32> to vector<128x32xbf16>
    %cst_43 = arith.constant dense<0.000000e+00> : vector<128x96xf32>
    %65 = tpu.matmul %64, %7, %cst_43 {dimension_numbers = #tpu.dot_dimension_numbers<[1], [0], [0], [1], [0, 0, 1, 1], [], []>} : vector<128x32xbf16>, vector<32x96xbf16>, vector<128x96xf32> -> vector<128x96xf32>
    %66 = vector.broadcast %8 : vector<1x96xf32> to vector<128x96xf32>
    %67 = arith.addf %65, %66 : vector<128x96xf32>
    %68 = vector.extract_strided_slice %67 {offsets = [0, 0], sizes = [128, 32], strides = [1, 1]} : vector<128x96xf32> to vector<128x32xf32>
    %69 = vector.shape_cast %68 : vector<128x32xf32> to vector<2x64x32xf32>
    %70 = vector.extract_strided_slice %67 {offsets = [0, 32], sizes = [128, 32], strides = [1, 1]} : vector<128x96xf32> to vector<128x32xf32>
    %71 = vector.shape_cast %70 : vector<128x32xf32> to vector<2x64x32xf32>
    %72 = vector.extract_strided_slice %67 {offsets = [0, 64], sizes = [128, 32], strides = [1, 1]} : vector<128x96xf32> to vector<128x32xf32>
    %73 = vector.shape_cast %72 : vector<128x32xf32> to vector<2x64x32xf32>
    %74 = vector.extract_strided_slice %69 {offsets = [0, 0, 0], sizes = [2, 64, 16], strides = [1, 1, 1]} : vector<2x64x32xf32> to vector<2x64x16xf32>
    %75 = arith.truncf %74 : vector<2x64x16xf32> to vector<2x64x16xbf16>
    %76 = vector.extract_strided_slice %71 {offsets = [0, 0, 0], sizes = [2, 64, 16], strides = [1, 1, 1]} : vector<2x64x32xf32> to vector<2x64x16xf32>
    %77 = arith.truncf %76 : vector<2x64x16xf32> to vector<2x64x16xbf16>
    %78 = vector.extract_strided_slice %73 {offsets = [0, 0, 0], sizes = [2, 64, 16], strides = [1, 1, 1]} : vector<2x64x32xf32> to vector<2x64x16xf32>
    %79 = arith.truncf %78 : vector<2x64x16xf32> to vector<2x64x16xbf16>
    "tpu.trace_start"() <{level = 10 : i32, message = "bld,bmd->blm"}> : () -> ()
    %cst_44 = arith.constant dense<0.000000e+00> : vector<2x64x64xf32>
    %80 = tpu.matmul %75, %77, %cst_44 {dimension_numbers = #tpu.dot_dimension_numbers<[2], [2], [1], [1], [0, 0, 0, 1, 1, 1], [0], [0]>} : vector<2x64x16xbf16>, vector<2x64x16xbf16>, vector<2x64x64xf32> -> vector<2x64x64xf32>
    "tpu.trace_stop"() : () -> ()
    %cst_45 = arith.constant 0.176776692 : f32
    %81 = vector.broadcast %cst_45 : f32 to vector<2x64x64xf32>
    %82 = arith.mulf %80, %81 : vector<2x64x64xf32>
    %cst_46 = arith.constant dense<0xFF800000> : vector<2x64xf32>
    %83 = vector.multi_reduction <maximumf>, %82, %cst_46 [2] : vector<2x64x64xf32> to vector<2x64xf32>
    %84 = vector.shape_cast %83 : vector<2x64xf32> to vector<2x64x1xf32>
    %85 = vector.broadcast %84 : vector<2x64x1xf32> to vector<2x64x64xf32>
    %86 = arith.subf %82, %85 : vector<2x64x64xf32>
    %87 = math.exp %86 : vector<2x64x64xf32>
    %cst_47 = arith.constant dense<0.000000e+00> : vector<2x64xf32>
    %88 = vector.multi_reduction <add>, %87, %cst_47 [2] : vector<2x64x64xf32> to vector<2x64xf32>
    %89 = vector.shape_cast %88 : vector<2x64xf32> to vector<2x64x1xf32>
    %90 = tpu.reciprocal %89 {approx = true} : vector<2x64x1xf32> -> vector<2x64x1xf32>
    %91 = vector.broadcast %90 : vector<2x64x1xf32> to vector<2x64x64xf32>
    %92 = arith.mulf %87, %91 : vector<2x64x64xf32>
    %93 = arith.truncf %92 : vector<2x64x64xf32> to vector<2x64x64xbf16>
    "tpu.trace_start"() <{level = 10 : i32, message = "blm,bmd->bld"}> : () -> ()
    %cst_48 = arith.constant dense<0.000000e+00> : vector<2x64x16xf32>
    %94 = tpu.matmul %93, %79, %cst_48 {dimension_numbers = #tpu.dot_dimension_numbers<[2], [1], [1], [2], [0, 0, 0, 1, 1, 2], [0], [0]>} : vector<2x64x64xbf16>, vector<2x64x16xbf16>, vector<2x64x16xf32> -> vector<2x64x16xf32>
    "tpu.trace_stop"() : () -> ()
    %95 = vector.extract_strided_slice %69 {offsets = [0, 0, 16], sizes = [2, 64, 16], strides = [1, 1, 1]} : vector<2x64x32xf32> to vector<2x64x16xf32>
    %96 = arith.truncf %95 : vector<2x64x16xf32> to vector<2x64x16xbf16>
    %97 = vector.extract_strided_slice %71 {offsets = [0, 0, 16], sizes = [2, 64, 16], strides = [1, 1, 1]} : vector<2x64x32xf32> to vector<2x64x16xf32>
    %98 = arith.truncf %97 : vector<2x64x16xf32> to vector<2x64x16xbf16>
    %99 = vector.extract_strided_slice %73 {offsets = [0, 0, 16], sizes = [2, 64, 16], strides = [1, 1, 1]} : vector<2x64x32xf32> to vector<2x64x16xf32>
    %100 = arith.truncf %99 : vector<2x64x16xf32> to vector<2x64x16xbf16>
    "tpu.trace_start"() <{level = 10 : i32, message = "bld,bmd->blm"}> : () -> ()
    %cst_49 = arith.constant dense<0.000000e+00> : vector<2x64x64xf32>
    %101 = tpu.matmul %96, %98, %cst_49 {dimension_numbers = #tpu.dot_dimension_numbers<[2], [2], [1], [1], [0, 0, 0, 1, 1, 1], [0], [0]>} : vector<2x64x16xbf16>, vector<2x64x16xbf16>, vector<2x64x64xf32> -> vector<2x64x64xf32>
    "tpu.trace_stop"() : () -> ()
    %cst_50 = arith.constant 0.176776692 : f32
    %102 = vector.broadcast %cst_50 : f32 to vector<2x64x64xf32>
    %103 = arith.mulf %101, %102 : vector<2x64x64xf32>
    %cst_51 = arith.constant dense<0xFF800000> : vector<2x64xf32>
    %104 = vector.multi_reduction <maximumf>, %103, %cst_51 [2] : vector<2x64x64xf32> to vector<2x64xf32>
    %105 = vector.shape_cast %104 : vector<2x64xf32> to vector<2x64x1xf32>
    %106 = vector.broadcast %105 : vector<2x64x1xf32> to vector<2x64x64xf32>
    %107 = arith.subf %103, %106 : vector<2x64x64xf32>
    %108 = math.exp %107 : vector<2x64x64xf32>
    %cst_52 = arith.constant dense<0.000000e+00> : vector<2x64xf32>
    %109 = vector.multi_reduction <add>, %108, %cst_52 [2] : vector<2x64x64xf32> to vector<2x64xf32>
    %110 = vector.shape_cast %109 : vector<2x64xf32> to vector<2x64x1xf32>
    %111 = tpu.reciprocal %110 {approx = true} : vector<2x64x1xf32> -> vector<2x64x1xf32>
    %112 = vector.broadcast %111 : vector<2x64x1xf32> to vector<2x64x64xf32>
    %113 = arith.mulf %108, %112 : vector<2x64x64xf32>
    %114 = arith.truncf %113 : vector<2x64x64xf32> to vector<2x64x64xbf16>
    "tpu.trace_start"() <{level = 10 : i32, message = "blm,bmd->bld"}> : () -> ()
    %cst_53 = arith.constant dense<0.000000e+00> : vector<2x64x16xf32>
    %115 = tpu.matmul %114, %100, %cst_53 {dimension_numbers = #tpu.dot_dimension_numbers<[2], [1], [1], [2], [0, 0, 0, 1, 1, 2], [0], [0]>} : vector<2x64x64xbf16>, vector<2x64x16xbf16>, vector<2x64x16xf32> -> vector<2x64x16xf32>
    "tpu.trace_stop"() : () -> ()
    %116 = tpu.concatenate %94, %115 in 2 : vector<2x64x16xf32>, vector<2x64x16xf32> -> vector<2x64x32xf32>
    %117 = vector.shape_cast %116 : vector<2x64x32xf32> to vector<128x32xf32>
    %118 = arith.truncf %117 : vector<128x32xf32> to vector<128x32xbf16>
    %cst_54 = arith.constant dense<0.000000e+00> : vector<128x32xf32>
    %119 = tpu.matmul %118, %9, %cst_54 {dimension_numbers = #tpu.dot_dimension_numbers<[1], [0], [0], [1], [0, 0, 1, 1], [], []>} : vector<128x32xbf16>, vector<32x32xbf16>, vector<128x32xf32> -> vector<128x32xf32>
    %120 = vector.broadcast %10 : vector<1x32xf32> to vector<128x32xf32>
    %121 = arith.addf %119, %120 : vector<128x32xf32>
    %122 = arith.addf %41, %121 : vector<128x32xf32>
    %cst_55 = arith.constant dense<0.000000e+00> : vector<128xf32>
    %123 = vector.multi_reduction <add>, %122, %cst_55 [1] : vector<128x32xf32> to vector<128xf32>
    %124 = vector.shape_cast %123 : vector<128xf32> to vector<128x1xf32>
    %cst_56 = arith.constant 3.200000e+01 : f32
    %125 = vector.broadcast %cst_56 : f32 to vector<128x1xf32>
    %126 = arith.divf %124, %125 : vector<128x1xf32>
    %127 = vector.broadcast %126 : vector<128x1xf32> to vector<128x32xf32>
    %128 = arith.subf %122, %127 : vector<128x32xf32>
    %129 = arith.mulf %128, %128 : vector<128x32xf32>
    %cst_57 = arith.constant dense<0.000000e+00> : vector<128xf32>
    %130 = vector.multi_reduction <add>, %129, %cst_57 [1] : vector<128x32xf32> to vector<128xf32>
    %131 = vector.shape_cast %130 : vector<128xf32> to vector<128x1xf32>
    %cst_58 = arith.constant 3.200000e+01 : f32
    %132 = vector.broadcast %cst_58 : f32 to vector<128x1xf32>
    %133 = arith.divf %131, %132 : vector<128x1xf32>
    %134 = vector.broadcast %126 : vector<128x1xf32> to vector<128x32xf32>
    %135 = arith.subf %122, %134 : vector<128x32xf32>
    %cst_59 = arith.constant 9.99999974E-6 : f32
    %136 = vector.broadcast %cst_59 : f32 to vector<128x1xf32>
    %137 = arith.addf %133, %136 : vector<128x1xf32>
    %138 = math.rsqrt %137 : vector<128x1xf32>
    %139 = vector.broadcast %138 : vector<128x1xf32> to vector<128x32xf32>
    %140 = arith.mulf %135, %139 : vector<128x32xf32>
    %141 = vector.broadcast %11 : vector<1x32xf32> to vector<128x32xf32>
    %142 = arith.mulf %140, %141 : vector<128x32xf32>
    %143 = vector.broadcast %12 : vector<1x32xf32> to vector<128x32xf32>
    %144 = arith.addf %142, %143 : vector<128x32xf32>
    %145 = arith.truncf %144 : vector<128x32xf32> to vector<128x32xbf16>
    %cst_60 = arith.constant dense<0.000000e+00> : vector<128x64xf32>
    %146 = tpu.matmul %145, %13, %cst_60 {dimension_numbers = #tpu.dot_dimension_numbers<[1], [0], [0], [1], [0, 0, 1, 1], [], []>} : vector<128x32xbf16>, vector<32x64xbf16>, vector<128x64xf32> -> vector<128x64xf32>
    %147 = vector.broadcast %14 : vector<1x64xf32> to vector<128x64xf32>
    %148 = arith.addf %146, %147 : vector<128x64xf32>
    %cst_61 = arith.constant 1.702000e+00 : f32
    %149 = vector.broadcast %cst_61 : f32 to vector<128x64xf32>
    %150 = arith.mulf %149, %148 : vector<128x64xf32>
    %151 = arith.negf %150 : vector<128x64xf32>
    %152 = math.exp %151 : vector<128x64xf32>
    %cst_62 = arith.constant 1.000000e+00 : f32
    %153 = vector.broadcast %cst_62 : f32 to vector<128x64xf32>
    %154 = arith.addf %153, %152 : vector<128x64xf32>
    %155 = arith.divf %153, %154 : vector<128x64xf32>
    %156 = arith.mulf %148, %155 : vector<128x64xf32>
    %157 = arith.truncf %156 : vector<128x64xf32> to vector<128x64xbf16>
    %cst_63 = arith.constant dense<0.000000e+00> : vector<128x32xf32>
    %158 = tpu.matmul %157, %15, %cst_63 {dimension_numbers = #tpu.dot_dimension_numbers<[1], [0], [0], [1], [0, 0, 1, 1], [], []>} : vector<128x64xbf16>, vector<64x32xbf16>, vector<128x32xf32> -> vector<128x32xf32>
    %159 = vector.broadcast %16 : vector<1x32xf32> to vector<128x32xf32>
    %160 = arith.addf %158, %159 : vector<128x32xf32>
    %161 = arith.addf %122, %160 : vector<128x32xf32>
    %c0_64 = arith.constant 0 : index
    %c0_65 = arith.constant 0 : index
    %162 = vector.load %arg18[%c0_64, %c0_65] : memref<128x32xf32, #tpu.memory_space<vmem>>, vector<128x32xf32>
    tpu.vector_store %arg18[%c0_64, %c0_65], %161 {strides = array<i32>} : memref<128x32xf32, #tpu.memory_space<vmem>>, vector<128x32xf32>,
    return
  }
  func.func @transform_0(%arg0: i32) -> (i32, i32) {
    %c0_i32 = arith.constant 0 : i32
    %c0_i32_0 = arith.constant 0 : i32
    %c0_i32_1 = arith.constant 0 : i32
    return %c0_i32, %c0_i32_0 : i32, i32
  }
  func.func @transform_1(%arg0: i32) -> (i32, i32) {
    %c0_i32 = arith.constant 0 : i32
    %c0_i32_0 = arith.constant 0 : i32
    %c0_i32_1 = arith.constant 0 : i32
    return %c0_i32, %c0_i32_0 : i32, i32
  }
  func.func @transform_2(%arg0: i32) -> (i32, i32) {
    %c0_i32 = arith.constant 0 : i32
    %c0_i32_0 = arith.constant 0 : i32
    %c0_i32_1 = arith.constant 0 : i32
    return %c0_i32, %c0_i32_0 : i32, i32
  }
  func.func @transform_3(%arg0: i32) -> (i32, i32) {
    %c0_i32 = arith.constant 0 : i32
    %c0_i32_0 = arith.constant 0 : i32
    %c0_i32_1 = arith.constant 0 : i32
    return %c0_i32, %c0_i32_0 : i32, i32
  }
  func.func @transform_4(%arg0: i32) -> (i32, i32) {
    %c0_i32 = arith.constant 0 : i32
    %c0_i32_0 = arith.constant 0 : i32
    %c0_i32_1 = arith.constant 0 : i32
    return %c0_i32, %c0_i32_0 : i32, i32
  }
  func.func @transform_5(%arg0: i32) -> (i32, i32) {
    %c0_i32 = arith.constant 0 : i32
    %c0_i32_0 = arith.constant 0 : i32
    %c0_i32_1 = arith.constant 0 : i32
    return %c0_i32, %c0_i32_0 : i32, i32
  }
  func.func @transform_6(%arg0: i32) -> (i32, i32) {
    %c0_i32 = arith.constant 0 : i32
    %c0_i32_0 = arith.constant 0 : i32
    %c0_i32_1 = arith.constant 0 : i32
    return %c0_i32, %c0_i32_0 : i32, i32
  }
  func.func @transform_7(%arg0: i32) -> (i32, i32) {
    %c0_i32 = arith.constant 0 : i32
    %c0_i32_0 = arith.constant 0 : i32
    %c0_i32_1 = arith.constant 0 : i32
    return %c0_i32, %c0_i32_0 : i32, i32
  }
  func.func @transform_8(%arg0: i32) -> (i32, i32) {
    %c0_i32 = arith.constant 0 : i32
    %c0_i32_0 = arith.constant 0 : i32
    %c0_i32_1 = arith.constant 0 : i32
    return %c0_i32, %c0_i32_0 : i32, i32
  }
  func.func @transform_9(%arg0: i32) -> (i32, i32) {
    %c0_i32 = arith.constant 0 : i32
    %c0_i32_0 = arith.constant 0 : i32
    %c0_i32_1 = arith.constant 0 : i32
    return %c0_i32, %c0_i32_0 : i32, i32
  }
  func.func @transform_10(%arg0: i32) -> (i32, i32) {
    %c0_i32 = arith.constant 0 : i32
    %c0_i32_0 = arith.constant 0 : i32
    %c0_i32_1 = arith.constant 0 : i32
    return %c0_i32, %c0_i32_0 : i32, i32
  }
  func.func @transform_11(%arg0: i32) -> (i32, i32) {
    %c0_i32 = arith.constant 0 : i32
    %c0_i32_0 = arith.constant 0 : i32
    %c0_i32_1 = arith.constant 0 : i32
    return %c0_i32, %c0_i32_0 : i32, i32
  }
  func.func @transform_12(%arg0: i32) -> (i32, i32) {
    %c0_i32 = arith.constant 0 : i32
    %c0_i32_0 = arith.constant 0 : i32
    %c0_i32_1 = arith.constant 0 : i32
    return %c0_i32, %c0_i32_0 : i32, i32
  }
  func.func @transform_13(%arg0: i32) -> (i32, i32) {
    %c0_i32 = arith.constant 0 : i32
    %c0_i32_0 = arith.constant 0 : i32
    %c0_i32_1 = arith.constant 0 : i32
    return %c0_i32, %c0_i32_0 : i32, i32
  }
  func.func @transform_14(%arg0: i32) -> (i32, i32) {
    %c0_i32 = arith.constant 0 : i32
    %c0_i32_0 = arith.constant 0 : i32
    %c0_i32_1 = arith.constant 0 : i32
    return %c0_i32, %c0_i32_0 : i32, i32
  }
  func.func @transform_15(%arg0: i32) -> (i32, i32) {
    %c0_i32 = arith.constant 0 : i32
    %c0_i32_0 = arith.constant 0 : i32
    %c0_i32_1 = arith.constant 0 : i32
    return %c0_i32, %c0_i32_0 : i32, i32
  }
  func.func @transform_16(%arg0: i32) -> (i32, i32) {
    %c0_i32 = arith.constant 0 : i32
    %c0_i32_0 = arith.constant 0 : i32
    %c0_i32_1 = arith.constant 0 : i32
    return %c0_i32, %c0_i32_0 : i32, i32
  }
  func.func @transform_17(%arg0: i32) -> (i32, i32) {
    %c0_i32 = arith.constant 0 : i32
    %c0_i32_0 = arith.constant 0 : i32
    %c0_i32_1 = arith.constant 0 : i32
    return %c0_i32, %c0_i32_0 : i32, i32
  }
}

module attributes {stable_mosaic.version = 11 : i64} {
  func.func @stage_kernel(%arg0: i32, %arg1: memref<32x384xbf16, #tpu.memory_space<vmem>>, %arg2: memref<384x64xbf16, #tpu.memory_space<vmem>>, %arg3: memref<1x64xf32, #tpu.memory_space<vmem>>, %arg4: memref<1x64xf32, #tpu.memory_space<vmem>>, %arg5: memref<1x64xf32, #tpu.memory_space<vmem>>, %arg6: memref<1x64xf32, #tpu.memory_space<vmem>>, %arg7: memref<1x64xf32, #tpu.memory_space<vmem>>, %arg8: memref<64x192xbf16, #tpu.memory_space<vmem>>, %arg9: memref<1x192xf32, #tpu.memory_space<vmem>>, %arg10: memref<64x64xbf16, #tpu.memory_space<vmem>>, %arg11: memref<1x64xf32, #tpu.memory_space<vmem>>, %arg12: memref<1x64xf32, #tpu.memory_space<vmem>>, %arg13: memref<1x64xf32, #tpu.memory_space<vmem>>, %arg14: memref<64x128xbf16, #tpu.memory_space<vmem>>, %arg15: memref<1x128xf32, #tpu.memory_space<vmem>>, %arg16: memref<128x64xbf16, #tpu.memory_space<vmem>>, %arg17: memref<1x64xf32, #tpu.memory_space<vmem>>, %arg18: memref<1x64xf32, #tpu.memory_space<vmem>>, %arg19: memref<1x64xf32, #tpu.memory_space<vmem>>, %arg20: memref<64x128xbf16, #tpu.memory_space<vmem>>, %arg21: memref<1x128xf32, #tpu.memory_space<vmem>>, %arg22: memref<2x128xf32, #tpu.memory_space<vmem>>) attributes {dimension_semantics = [#tpu.dimension_semantics<arbitrary>], iteration_bounds = array<i64: 1>, scalar_prefetch = 0 : i64, scratch_operands = 0 : i64, tpu.core_type = #tpu.core_type<tc>, window_params = [{pipeline_mode = #tpu.pipeline_mode<synchronous>, transform_indices = @transform_0, window_bounds = array<i64: 32, 384>}, {pipeline_mode = #tpu.pipeline_mode<synchronous>, transform_indices = @transform_1, window_bounds = array<i64: 384, 64>}, {pipeline_mode = #tpu.pipeline_mode<synchronous>, transform_indices = @transform_2, window_bounds = array<i64: 1, 64>}, {pipeline_mode = #tpu.pipeline_mode<synchronous>, transform_indices = @transform_3, window_bounds = array<i64: 1, 64>}, {pipeline_mode = #tpu.pipeline_mode<synchronous>, transform_indices = @transform_4, window_bounds = array<i64: 1, 64>}, {pipeline_mode = #tpu.pipeline_mode<synchronous>, transform_indices = @transform_5, window_bounds = array<i64: 1, 64>}, {pipeline_mode = #tpu.pipeline_mode<synchronous>, transform_indices = @transform_6, window_bounds = array<i64: 1, 64>}, {pipeline_mode = #tpu.pipeline_mode<synchronous>, transform_indices = @transform_7, window_bounds = array<i64: 64, 192>}, {pipeline_mode = #tpu.pipeline_mode<synchronous>, transform_indices = @transform_8, window_bounds = array<i64: 1, 192>}, {pipeline_mode = #tpu.pipeline_mode<synchronous>, transform_indices = @transform_9, window_bounds = array<i64: 64, 64>}, {pipeline_mode = #tpu.pipeline_mode<synchronous>, transform_indices = @transform_10, window_bounds = array<i64: 1, 64>}, {pipeline_mode = #tpu.pipeline_mode<synchronous>, transform_indices = @transform_11, window_bounds = array<i64: 1, 64>}, {pipeline_mode = #tpu.pipeline_mode<synchronous>, transform_indices = @transform_12, window_bounds = array<i64: 1, 64>}, {pipeline_mode = #tpu.pipeline_mode<synchronous>, transform_indices = @transform_13, window_bounds = array<i64: 64, 128>}, {pipeline_mode = #tpu.pipeline_mode<synchronous>, transform_indices = @transform_14, window_bounds = array<i64: 1, 128>}, {pipeline_mode = #tpu.pipeline_mode<synchronous>, transform_indices = @transform_15, window_bounds = array<i64: 128, 64>}, {pipeline_mode = #tpu.pipeline_mode<synchronous>, transform_indices = @transform_16, window_bounds = array<i64: 1, 64>}, {pipeline_mode = #tpu.pipeline_mode<synchronous>, transform_indices = @transform_17, window_bounds = array<i64: 1, 64>}, {pipeline_mode = #tpu.pipeline_mode<synchronous>, transform_indices = @transform_18, window_bounds = array<i64: 1, 64>}, {pipeline_mode = #tpu.pipeline_mode<synchronous>, transform_indices = @transform_19, window_bounds = array<i64: 64, 128>}, {pipeline_mode = #tpu.pipeline_mode<synchronous>, transform_indices = @transform_20, window_bounds = array<i64: 1, 128>}, {pipeline_mode = #tpu.pipeline_mode<synchronous>, transform_indices = @transform_21, window_bounds = array<i64: 2, 128>}]} {
    %c0 = arith.constant 0 : index
    %c0_0 = arith.constant 0 : index
    %0 = vector.load %arg1[%c0, %c0_0] : memref<32x384xbf16, #tpu.memory_space<vmem>>, vector<32x384xbf16>
    %c0_1 = arith.constant 0 : index
    %c0_2 = arith.constant 0 : index
    %1 = vector.load %arg2[%c0_1, %c0_2] : memref<384x64xbf16, #tpu.memory_space<vmem>>, vector<384x64xbf16>
    %c0_3 = arith.constant 0 : index
    %c0_4 = arith.constant 0 : index
    %2 = vector.load %arg3[%c0_3, %c0_4] : memref<1x64xf32, #tpu.memory_space<vmem>>, vector<1x64xf32>
    %c0_5 = arith.constant 0 : index
    %c0_6 = arith.constant 0 : index
    %3 = vector.load %arg4[%c0_5, %c0_6] : memref<1x64xf32, #tpu.memory_space<vmem>>, vector<1x64xf32>
    %c0_7 = arith.constant 0 : index
    %c0_8 = arith.constant 0 : index
    %4 = vector.load %arg5[%c0_7, %c0_8] : memref<1x64xf32, #tpu.memory_space<vmem>>, vector<1x64xf32>
    %c0_9 = arith.constant 0 : index
    %c0_10 = arith.constant 0 : index
    %5 = vector.load %arg6[%c0_9, %c0_10] : memref<1x64xf32, #tpu.memory_space<vmem>>, vector<1x64xf32>
    %c0_11 = arith.constant 0 : index
    %c0_12 = arith.constant 0 : index
    %6 = vector.load %arg7[%c0_11, %c0_12] : memref<1x64xf32, #tpu.memory_space<vmem>>, vector<1x64xf32>
    %c0_13 = arith.constant 0 : index
    %c0_14 = arith.constant 0 : index
    %7 = vector.load %arg8[%c0_13, %c0_14] : memref<64x192xbf16, #tpu.memory_space<vmem>>, vector<64x192xbf16>
    %c0_15 = arith.constant 0 : index
    %c0_16 = arith.constant 0 : index
    %8 = vector.load %arg9[%c0_15, %c0_16] : memref<1x192xf32, #tpu.memory_space<vmem>>, vector<1x192xf32>
    %c0_17 = arith.constant 0 : index
    %c0_18 = arith.constant 0 : index
    %9 = vector.load %arg10[%c0_17, %c0_18] : memref<64x64xbf16, #tpu.memory_space<vmem>>, vector<64x64xbf16>
    %c0_19 = arith.constant 0 : index
    %c0_20 = arith.constant 0 : index
    %10 = vector.load %arg11[%c0_19, %c0_20] : memref<1x64xf32, #tpu.memory_space<vmem>>, vector<1x64xf32>
    %c0_21 = arith.constant 0 : index
    %c0_22 = arith.constant 0 : index
    %11 = vector.load %arg12[%c0_21, %c0_22] : memref<1x64xf32, #tpu.memory_space<vmem>>, vector<1x64xf32>
    %c0_23 = arith.constant 0 : index
    %c0_24 = arith.constant 0 : index
    %12 = vector.load %arg13[%c0_23, %c0_24] : memref<1x64xf32, #tpu.memory_space<vmem>>, vector<1x64xf32>
    %c0_25 = arith.constant 0 : index
    %c0_26 = arith.constant 0 : index
    %13 = vector.load %arg14[%c0_25, %c0_26] : memref<64x128xbf16, #tpu.memory_space<vmem>>, vector<64x128xbf16>
    %c0_27 = arith.constant 0 : index
    %c0_28 = arith.constant 0 : index
    %14 = vector.load %arg15[%c0_27, %c0_28] : memref<1x128xf32, #tpu.memory_space<vmem>>, vector<1x128xf32>
    %c0_29 = arith.constant 0 : index
    %c0_30 = arith.constant 0 : index
    %15 = vector.load %arg16[%c0_29, %c0_30] : memref<128x64xbf16, #tpu.memory_space<vmem>>, vector<128x64xbf16>
    %c0_31 = arith.constant 0 : index
    %c0_32 = arith.constant 0 : index
    %16 = vector.load %arg17[%c0_31, %c0_32] : memref<1x64xf32, #tpu.memory_space<vmem>>, vector<1x64xf32>
    %c0_33 = arith.constant 0 : index
    %c0_34 = arith.constant 0 : index
    %17 = vector.load %arg18[%c0_33, %c0_34] : memref<1x64xf32, #tpu.memory_space<vmem>>, vector<1x64xf32>
    %c0_35 = arith.constant 0 : index
    %c0_36 = arith.constant 0 : index
    %18 = vector.load %arg19[%c0_35, %c0_36] : memref<1x64xf32, #tpu.memory_space<vmem>>, vector<1x64xf32>
    %c0_37 = arith.constant 0 : index
    %c0_38 = arith.constant 0 : index
    %19 = vector.load %arg20[%c0_37, %c0_38] : memref<64x128xbf16, #tpu.memory_space<vmem>>, vector<64x128xbf16>
    %c0_39 = arith.constant 0 : index
    %c0_40 = arith.constant 0 : index
    %20 = vector.load %arg21[%c0_39, %c0_40] : memref<1x128xf32, #tpu.memory_space<vmem>>, vector<1x128xf32>
    %cst = arith.constant dense<0.000000e+00> : vector<32x64xf32>
    %21 = tpu.matmul %0, %1, %cst {dimension_numbers = #tpu.dot_dimension_numbers<[1], [0], [0], [1], [0, 0, 1, 1], [], []>} : vector<32x384xbf16>, vector<384x64xbf16>, vector<32x64xf32> -> vector<32x64xf32>
    %22 = vector.broadcast %2 : vector<1x64xf32> to vector<32x64xf32>
    %23 = arith.addf %21, %22 : vector<32x64xf32>
    %cst_41 = arith.constant dense<0.000000e+00> : vector<32xf32>
    %24 = vector.multi_reduction <add>, %23, %cst_41 [1] : vector<32x64xf32> to vector<32xf32>
    %25 = vector.shape_cast %24 : vector<32xf32> to vector<32x1xf32>
    %cst_42 = arith.constant 6.400000e+01 : f32
    %26 = vector.broadcast %cst_42 : f32 to vector<32x1xf32>
    %27 = arith.divf %25, %26 : vector<32x1xf32>
    %28 = vector.broadcast %27 : vector<32x1xf32> to vector<32x64xf32>
    %29 = arith.subf %23, %28 : vector<32x64xf32>
    %30 = arith.mulf %29, %29 : vector<32x64xf32>
    %cst_43 = arith.constant dense<0.000000e+00> : vector<32xf32>
    %31 = vector.multi_reduction <add>, %30, %cst_43 [1] : vector<32x64xf32> to vector<32xf32>
    %32 = vector.shape_cast %31 : vector<32xf32> to vector<32x1xf32>
    %cst_44 = arith.constant 6.400000e+01 : f32
    %33 = vector.broadcast %cst_44 : f32 to vector<32x1xf32>
    %34 = arith.divf %32, %33 : vector<32x1xf32>
    %35 = vector.broadcast %27 : vector<32x1xf32> to vector<32x64xf32>
    %36 = arith.subf %23, %35 : vector<32x64xf32>
    %cst_45 = arith.constant 9.99999974E-6 : f32
    %37 = vector.broadcast %cst_45 : f32 to vector<32x1xf32>
    %38 = arith.addf %34, %37 : vector<32x1xf32>
    %39 = math.rsqrt %38 : vector<32x1xf32>
    %40 = vector.broadcast %39 : vector<32x1xf32> to vector<32x64xf32>
    %41 = arith.mulf %36, %40 : vector<32x64xf32>
    %42 = vector.broadcast %3 : vector<1x64xf32> to vector<32x64xf32>
    %43 = arith.mulf %41, %42 : vector<32x64xf32>
    %44 = vector.broadcast %4 : vector<1x64xf32> to vector<32x64xf32>
    %45 = arith.addf %43, %44 : vector<32x64xf32>
    %cst_46 = arith.constant dense<0.000000e+00> : vector<32xf32>
    %46 = vector.multi_reduction <add>, %45, %cst_46 [1] : vector<32x64xf32> to vector<32xf32>
    %47 = vector.shape_cast %46 : vector<32xf32> to vector<32x1xf32>
    %cst_47 = arith.constant 6.400000e+01 : f32
    %48 = vector.broadcast %cst_47 : f32 to vector<32x1xf32>
    %49 = arith.divf %47, %48 : vector<32x1xf32>
    %50 = vector.broadcast %49 : vector<32x1xf32> to vector<32x64xf32>
    %51 = arith.subf %45, %50 : vector<32x64xf32>
    %52 = arith.mulf %51, %51 : vector<32x64xf32>
    %cst_48 = arith.constant dense<0.000000e+00> : vector<32xf32>
    %53 = vector.multi_reduction <add>, %52, %cst_48 [1] : vector<32x64xf32> to vector<32xf32>
    %54 = vector.shape_cast %53 : vector<32xf32> to vector<32x1xf32>
    %cst_49 = arith.constant 6.400000e+01 : f32
    %55 = vector.broadcast %cst_49 : f32 to vector<32x1xf32>
    %56 = arith.divf %54, %55 : vector<32x1xf32>
    %57 = vector.broadcast %49 : vector<32x1xf32> to vector<32x64xf32>
    %58 = arith.subf %45, %57 : vector<32x64xf32>
    %cst_50 = arith.constant 9.99999974E-6 : f32
    %59 = vector.broadcast %cst_50 : f32 to vector<32x1xf32>
    %60 = arith.addf %56, %59 : vector<32x1xf32>
    %61 = math.rsqrt %60 : vector<32x1xf32>
    %62 = vector.broadcast %61 : vector<32x1xf32> to vector<32x64xf32>
    %63 = arith.mulf %58, %62 : vector<32x64xf32>
    %64 = vector.broadcast %5 : vector<1x64xf32> to vector<32x64xf32>
    %65 = arith.mulf %63, %64 : vector<32x64xf32>
    %66 = vector.broadcast %6 : vector<1x64xf32> to vector<32x64xf32>
    %67 = arith.addf %65, %66 : vector<32x64xf32>
    %68 = arith.truncf %67 : vector<32x64xf32> to vector<32x64xbf16>
    %cst_51 = arith.constant dense<0.000000e+00> : vector<32x192xf32>
    %69 = tpu.matmul %68, %7, %cst_51 {dimension_numbers = #tpu.dot_dimension_numbers<[1], [0], [0], [1], [0, 0, 1, 1], [], []>} : vector<32x64xbf16>, vector<64x192xbf16>, vector<32x192xf32> -> vector<32x192xf32>
    %70 = vector.broadcast %8 : vector<1x192xf32> to vector<32x192xf32>
    %71 = arith.addf %69, %70 : vector<32x192xf32>
    %72 = vector.extract_strided_slice %71 {offsets = [0, 0], sizes = [32, 64], strides = [1, 1]} : vector<32x192xf32> to vector<32x64xf32>
    %73 = vector.shape_cast %72 : vector<32x64xf32> to vector<2x16x64xf32>
    %74 = vector.extract_strided_slice %71 {offsets = [0, 64], sizes = [32, 64], strides = [1, 1]} : vector<32x192xf32> to vector<32x64xf32>
    %75 = vector.shape_cast %74 : vector<32x64xf32> to vector<2x16x64xf32>
    %76 = vector.extract_strided_slice %71 {offsets = [0, 128], sizes = [32, 64], strides = [1, 1]} : vector<32x192xf32> to vector<32x64xf32>
    %77 = vector.shape_cast %76 : vector<32x64xf32> to vector<2x16x64xf32>
    %78 = vector.extract_strided_slice %73 {offsets = [0, 0, 0], sizes = [2, 16, 16], strides = [1, 1, 1]} : vector<2x16x64xf32> to vector<2x16x16xf32>
    %79 = arith.truncf %78 : vector<2x16x16xf32> to vector<2x16x16xbf16>
    %80 = vector.extract_strided_slice %75 {offsets = [0, 0, 0], sizes = [2, 16, 16], strides = [1, 1, 1]} : vector<2x16x64xf32> to vector<2x16x16xf32>
    %81 = arith.truncf %80 : vector<2x16x16xf32> to vector<2x16x16xbf16>
    %82 = vector.extract_strided_slice %77 {offsets = [0, 0, 0], sizes = [2, 16, 16], strides = [1, 1, 1]} : vector<2x16x64xf32> to vector<2x16x16xf32>
    %83 = arith.truncf %82 : vector<2x16x16xf32> to vector<2x16x16xbf16>
    "tpu.trace_start"() <{level = 10 : i32, message = "bld,bmd->blm"}> : () -> ()
    %cst_52 = arith.constant dense<0.000000e+00> : vector<2x16x16xf32>
    %84 = tpu.matmul %79, %81, %cst_52 {dimension_numbers = #tpu.dot_dimension_numbers<[2], [2], [1], [1], [0, 0, 0, 1, 1, 1], [0], [0]>} : vector<2x16x16xbf16>, vector<2x16x16xbf16>, vector<2x16x16xf32> -> vector<2x16x16xf32>
    "tpu.trace_stop"() : () -> ()
    %cst_53 = arith.constant 1.250000e-01 : f32
    %85 = vector.broadcast %cst_53 : f32 to vector<2x16x16xf32>
    %86 = arith.mulf %84, %85 : vector<2x16x16xf32>
    %cst_54 = arith.constant dense<0xFF800000> : vector<2x16xf32>
    %87 = vector.multi_reduction <maximumf>, %86, %cst_54 [2] : vector<2x16x16xf32> to vector<2x16xf32>
    %88 = vector.shape_cast %87 : vector<2x16xf32> to vector<2x16x1xf32>
    %89 = vector.broadcast %88 : vector<2x16x1xf32> to vector<2x16x16xf32>
    %90 = arith.subf %86, %89 : vector<2x16x16xf32>
    %91 = math.exp %90 : vector<2x16x16xf32>
    %cst_55 = arith.constant dense<0.000000e+00> : vector<2x16xf32>
    %92 = vector.multi_reduction <add>, %91, %cst_55 [2] : vector<2x16x16xf32> to vector<2x16xf32>
    %93 = vector.shape_cast %92 : vector<2x16xf32> to vector<2x16x1xf32>
    %94 = tpu.reciprocal %93 {approx = true} : vector<2x16x1xf32> -> vector<2x16x1xf32>
    %95 = vector.broadcast %94 : vector<2x16x1xf32> to vector<2x16x16xf32>
    %96 = arith.mulf %91, %95 : vector<2x16x16xf32>
    %97 = arith.truncf %96 : vector<2x16x16xf32> to vector<2x16x16xbf16>
    "tpu.trace_start"() <{level = 10 : i32, message = "blm,bmd->bld"}> : () -> ()
    %cst_56 = arith.constant dense<0.000000e+00> : vector<2x16x16xf32>
    %98 = tpu.matmul %97, %83, %cst_56 {dimension_numbers = #tpu.dot_dimension_numbers<[2], [1], [1], [2], [0, 0, 0, 1, 1, 2], [0], [0]>} : vector<2x16x16xbf16>, vector<2x16x16xbf16>, vector<2x16x16xf32> -> vector<2x16x16xf32>
    "tpu.trace_stop"() : () -> ()
    %99 = vector.extract_strided_slice %73 {offsets = [0, 0, 16], sizes = [2, 16, 16], strides = [1, 1, 1]} : vector<2x16x64xf32> to vector<2x16x16xf32>
    %100 = arith.truncf %99 : vector<2x16x16xf32> to vector<2x16x16xbf16>
    %101 = vector.extract_strided_slice %75 {offsets = [0, 0, 16], sizes = [2, 16, 16], strides = [1, 1, 1]} : vector<2x16x64xf32> to vector<2x16x16xf32>
    %102 = arith.truncf %101 : vector<2x16x16xf32> to vector<2x16x16xbf16>
    %103 = vector.extract_strided_slice %77 {offsets = [0, 0, 16], sizes = [2, 16, 16], strides = [1, 1, 1]} : vector<2x16x64xf32> to vector<2x16x16xf32>
    %104 = arith.truncf %103 : vector<2x16x16xf32> to vector<2x16x16xbf16>
    "tpu.trace_start"() <{level = 10 : i32, message = "bld,bmd->blm"}> : () -> ()
    %cst_57 = arith.constant dense<0.000000e+00> : vector<2x16x16xf32>
    %105 = tpu.matmul %100, %102, %cst_57 {dimension_numbers = #tpu.dot_dimension_numbers<[2], [2], [1], [1], [0, 0, 0, 1, 1, 1], [0], [0]>} : vector<2x16x16xbf16>, vector<2x16x16xbf16>, vector<2x16x16xf32> -> vector<2x16x16xf32>
    "tpu.trace_stop"() : () -> ()
    %cst_58 = arith.constant 1.250000e-01 : f32
    %106 = vector.broadcast %cst_58 : f32 to vector<2x16x16xf32>
    %107 = arith.mulf %105, %106 : vector<2x16x16xf32>
    %cst_59 = arith.constant dense<0xFF800000> : vector<2x16xf32>
    %108 = vector.multi_reduction <maximumf>, %107, %cst_59 [2] : vector<2x16x16xf32> to vector<2x16xf32>
    %109 = vector.shape_cast %108 : vector<2x16xf32> to vector<2x16x1xf32>
    %110 = vector.broadcast %109 : vector<2x16x1xf32> to vector<2x16x16xf32>
    %111 = arith.subf %107, %110 : vector<2x16x16xf32>
    %112 = math.exp %111 : vector<2x16x16xf32>
    %cst_60 = arith.constant dense<0.000000e+00> : vector<2x16xf32>
    %113 = vector.multi_reduction <add>, %112, %cst_60 [2] : vector<2x16x16xf32> to vector<2x16xf32>
    %114 = vector.shape_cast %113 : vector<2x16xf32> to vector<2x16x1xf32>
    %115 = tpu.reciprocal %114 {approx = true} : vector<2x16x1xf32> -> vector<2x16x1xf32>
    %116 = vector.broadcast %115 : vector<2x16x1xf32> to vector<2x16x16xf32>
    %117 = arith.mulf %112, %116 : vector<2x16x16xf32>
    %118 = arith.truncf %117 : vector<2x16x16xf32> to vector<2x16x16xbf16>
    "tpu.trace_start"() <{level = 10 : i32, message = "blm,bmd->bld"}> : () -> ()
    %cst_61 = arith.constant dense<0.000000e+00> : vector<2x16x16xf32>
    %119 = tpu.matmul %118, %104, %cst_61 {dimension_numbers = #tpu.dot_dimension_numbers<[2], [1], [1], [2], [0, 0, 0, 1, 1, 2], [0], [0]>} : vector<2x16x16xbf16>, vector<2x16x16xbf16>, vector<2x16x16xf32> -> vector<2x16x16xf32>
    "tpu.trace_stop"() : () -> ()
    %120 = vector.extract_strided_slice %73 {offsets = [0, 0, 32], sizes = [2, 16, 16], strides = [1, 1, 1]} : vector<2x16x64xf32> to vector<2x16x16xf32>
    %121 = arith.truncf %120 : vector<2x16x16xf32> to vector<2x16x16xbf16>
    %122 = vector.extract_strided_slice %75 {offsets = [0, 0, 32], sizes = [2, 16, 16], strides = [1, 1, 1]} : vector<2x16x64xf32> to vector<2x16x16xf32>
    %123 = arith.truncf %122 : vector<2x16x16xf32> to vector<2x16x16xbf16>
    %124 = vector.extract_strided_slice %77 {offsets = [0, 0, 32], sizes = [2, 16, 16], strides = [1, 1, 1]} : vector<2x16x64xf32> to vector<2x16x16xf32>
    %125 = arith.truncf %124 : vector<2x16x16xf32> to vector<2x16x16xbf16>
    "tpu.trace_start"() <{level = 10 : i32, message = "bld,bmd->blm"}> : () -> ()
    %cst_62 = arith.constant dense<0.000000e+00> : vector<2x16x16xf32>
    %126 = tpu.matmul %121, %123, %cst_62 {dimension_numbers = #tpu.dot_dimension_numbers<[2], [2], [1], [1], [0, 0, 0, 1, 1, 1], [0], [0]>} : vector<2x16x16xbf16>, vector<2x16x16xbf16>, vector<2x16x16xf32> -> vector<2x16x16xf32>
    "tpu.trace_stop"() : () -> ()
    %cst_63 = arith.constant 1.250000e-01 : f32
    %127 = vector.broadcast %cst_63 : f32 to vector<2x16x16xf32>
    %128 = arith.mulf %126, %127 : vector<2x16x16xf32>
    %cst_64 = arith.constant dense<0xFF800000> : vector<2x16xf32>
    %129 = vector.multi_reduction <maximumf>, %128, %cst_64 [2] : vector<2x16x16xf32> to vector<2x16xf32>
    %130 = vector.shape_cast %129 : vector<2x16xf32> to vector<2x16x1xf32>
    %131 = vector.broadcast %130 : vector<2x16x1xf32> to vector<2x16x16xf32>
    %132 = arith.subf %128, %131 : vector<2x16x16xf32>
    %133 = math.exp %132 : vector<2x16x16xf32>
    %cst_65 = arith.constant dense<0.000000e+00> : vector<2x16xf32>
    %134 = vector.multi_reduction <add>, %133, %cst_65 [2] : vector<2x16x16xf32> to vector<2x16xf32>
    %135 = vector.shape_cast %134 : vector<2x16xf32> to vector<2x16x1xf32>
    %136 = tpu.reciprocal %135 {approx = true} : vector<2x16x1xf32> -> vector<2x16x1xf32>
    %137 = vector.broadcast %136 : vector<2x16x1xf32> to vector<2x16x16xf32>
    %138 = arith.mulf %133, %137 : vector<2x16x16xf32>
    %139 = arith.truncf %138 : vector<2x16x16xf32> to vector<2x16x16xbf16>
    "tpu.trace_start"() <{level = 10 : i32, message = "blm,bmd->bld"}> : () -> ()
    %cst_66 = arith.constant dense<0.000000e+00> : vector<2x16x16xf32>
    %140 = tpu.matmul %139, %125, %cst_66 {dimension_numbers = #tpu.dot_dimension_numbers<[2], [1], [1], [2], [0, 0, 0, 1, 1, 2], [0], [0]>} : vector<2x16x16xbf16>, vector<2x16x16xbf16>, vector<2x16x16xf32> -> vector<2x16x16xf32>
    "tpu.trace_stop"() : () -> ()
    %141 = vector.extract_strided_slice %73 {offsets = [0, 0, 48], sizes = [2, 16, 16], strides = [1, 1, 1]} : vector<2x16x64xf32> to vector<2x16x16xf32>
    %142 = arith.truncf %141 : vector<2x16x16xf32> to vector<2x16x16xbf16>
    %143 = vector.extract_strided_slice %75 {offsets = [0, 0, 48], sizes = [2, 16, 16], strides = [1, 1, 1]} : vector<2x16x64xf32> to vector<2x16x16xf32>
    %144 = arith.truncf %143 : vector<2x16x16xf32> to vector<2x16x16xbf16>
    %145 = vector.extract_strided_slice %77 {offsets = [0, 0, 48], sizes = [2, 16, 16], strides = [1, 1, 1]} : vector<2x16x64xf32> to vector<2x16x16xf32>
    %146 = arith.truncf %145 : vector<2x16x16xf32> to vector<2x16x16xbf16>
    "tpu.trace_start"() <{level = 10 : i32, message = "bld,bmd->blm"}> : () -> ()
    %cst_67 = arith.constant dense<0.000000e+00> : vector<2x16x16xf32>
    %147 = tpu.matmul %142, %144, %cst_67 {dimension_numbers = #tpu.dot_dimension_numbers<[2], [2], [1], [1], [0, 0, 0, 1, 1, 1], [0], [0]>} : vector<2x16x16xbf16>, vector<2x16x16xbf16>, vector<2x16x16xf32> -> vector<2x16x16xf32>
    "tpu.trace_stop"() : () -> ()
    %cst_68 = arith.constant 1.250000e-01 : f32
    %148 = vector.broadcast %cst_68 : f32 to vector<2x16x16xf32>
    %149 = arith.mulf %147, %148 : vector<2x16x16xf32>
    %cst_69 = arith.constant dense<0xFF800000> : vector<2x16xf32>
    %150 = vector.multi_reduction <maximumf>, %149, %cst_69 [2] : vector<2x16x16xf32> to vector<2x16xf32>
    %151 = vector.shape_cast %150 : vector<2x16xf32> to vector<2x16x1xf32>
    %152 = vector.broadcast %151 : vector<2x16x1xf32> to vector<2x16x16xf32>
    %153 = arith.subf %149, %152 : vector<2x16x16xf32>
    %154 = math.exp %153 : vector<2x16x16xf32>
    %cst_70 = arith.constant dense<0.000000e+00> : vector<2x16xf32>
    %155 = vector.multi_reduction <add>, %154, %cst_70 [2] : vector<2x16x16xf32> to vector<2x16xf32>
    %156 = vector.shape_cast %155 : vector<2x16xf32> to vector<2x16x1xf32>
    %157 = tpu.reciprocal %156 {approx = true} : vector<2x16x1xf32> -> vector<2x16x1xf32>
    %158 = vector.broadcast %157 : vector<2x16x1xf32> to vector<2x16x16xf32>
    %159 = arith.mulf %154, %158 : vector<2x16x16xf32>
    %160 = arith.truncf %159 : vector<2x16x16xf32> to vector<2x16x16xbf16>
    "tpu.trace_start"() <{level = 10 : i32, message = "blm,bmd->bld"}> : () -> ()
    %cst_71 = arith.constant dense<0.000000e+00> : vector<2x16x16xf32>
    %161 = tpu.matmul %160, %146, %cst_71 {dimension_numbers = #tpu.dot_dimension_numbers<[2], [1], [1], [2], [0, 0, 0, 1, 1, 2], [0], [0]>} : vector<2x16x16xbf16>, vector<2x16x16xbf16>, vector<2x16x16xf32> -> vector<2x16x16xf32>
    "tpu.trace_stop"() : () -> ()
    %162 = tpu.concatenate %98, %119, %140, %161 in 2 : vector<2x16x16xf32>, vector<2x16x16xf32>, vector<2x16x16xf32>, vector<2x16x16xf32> -> vector<2x16x64xf32>
    %163 = vector.shape_cast %162 : vector<2x16x64xf32> to vector<32x64xf32>
    %164 = arith.truncf %163 : vector<32x64xf32> to vector<32x64xbf16>
    %cst_72 = arith.constant dense<0.000000e+00> : vector<32x64xf32>
    %165 = tpu.matmul %164, %9, %cst_72 {dimension_numbers = #tpu.dot_dimension_numbers<[1], [0], [0], [1], [0, 0, 1, 1], [], []>} : vector<32x64xbf16>, vector<64x64xbf16>, vector<32x64xf32> -> vector<32x64xf32>
    %166 = vector.broadcast %10 : vector<1x64xf32> to vector<32x64xf32>
    %167 = arith.addf %165, %166 : vector<32x64xf32>
    %168 = arith.addf %45, %167 : vector<32x64xf32>
    %cst_73 = arith.constant dense<0.000000e+00> : vector<32xf32>
    %169 = vector.multi_reduction <add>, %168, %cst_73 [1] : vector<32x64xf32> to vector<32xf32>
    %170 = vector.shape_cast %169 : vector<32xf32> to vector<32x1xf32>
    %cst_74 = arith.constant 6.400000e+01 : f32
    %171 = vector.broadcast %cst_74 : f32 to vector<32x1xf32>
    %172 = arith.divf %170, %171 : vector<32x1xf32>
    %173 = vector.broadcast %172 : vector<32x1xf32> to vector<32x64xf32>
    %174 = arith.subf %168, %173 : vector<32x64xf32>
    %175 = arith.mulf %174, %174 : vector<32x64xf32>
    %cst_75 = arith.constant dense<0.000000e+00> : vector<32xf32>
    %176 = vector.multi_reduction <add>, %175, %cst_75 [1] : vector<32x64xf32> to vector<32xf32>
    %177 = vector.shape_cast %176 : vector<32xf32> to vector<32x1xf32>
    %cst_76 = arith.constant 6.400000e+01 : f32
    %178 = vector.broadcast %cst_76 : f32 to vector<32x1xf32>
    %179 = arith.divf %177, %178 : vector<32x1xf32>
    %180 = vector.broadcast %172 : vector<32x1xf32> to vector<32x64xf32>
    %181 = arith.subf %168, %180 : vector<32x64xf32>
    %cst_77 = arith.constant 9.99999974E-6 : f32
    %182 = vector.broadcast %cst_77 : f32 to vector<32x1xf32>
    %183 = arith.addf %179, %182 : vector<32x1xf32>
    %184 = math.rsqrt %183 : vector<32x1xf32>
    %185 = vector.broadcast %184 : vector<32x1xf32> to vector<32x64xf32>
    %186 = arith.mulf %181, %185 : vector<32x64xf32>
    %187 = vector.broadcast %11 : vector<1x64xf32> to vector<32x64xf32>
    %188 = arith.mulf %186, %187 : vector<32x64xf32>
    %189 = vector.broadcast %12 : vector<1x64xf32> to vector<32x64xf32>
    %190 = arith.addf %188, %189 : vector<32x64xf32>
    %191 = arith.truncf %190 : vector<32x64xf32> to vector<32x64xbf16>
    %cst_78 = arith.constant dense<0.000000e+00> : vector<32x128xf32>
    %192 = tpu.matmul %191, %13, %cst_78 {dimension_numbers = #tpu.dot_dimension_numbers<[1], [0], [0], [1], [0, 0, 1, 1], [], []>} : vector<32x64xbf16>, vector<64x128xbf16>, vector<32x128xf32> -> vector<32x128xf32>
    %193 = vector.broadcast %14 : vector<1x128xf32> to vector<32x128xf32>
    %194 = arith.addf %192, %193 : vector<32x128xf32>
    %cst_79 = arith.constant 1.702000e+00 : f32
    %195 = vector.broadcast %cst_79 : f32 to vector<32x128xf32>
    %196 = arith.mulf %195, %194 : vector<32x128xf32>
    %197 = arith.negf %196 : vector<32x128xf32>
    %198 = math.exp %197 : vector<32x128xf32>
    %cst_80 = arith.constant 1.000000e+00 : f32
    %199 = vector.broadcast %cst_80 : f32 to vector<32x128xf32>
    %200 = arith.addf %199, %198 : vector<32x128xf32>
    %201 = arith.divf %199, %200 : vector<32x128xf32>
    %202 = arith.mulf %194, %201 : vector<32x128xf32>
    %203 = arith.truncf %202 : vector<32x128xf32> to vector<32x128xbf16>
    %cst_81 = arith.constant dense<0.000000e+00> : vector<32x64xf32>
    %204 = tpu.matmul %203, %15, %cst_81 {dimension_numbers = #tpu.dot_dimension_numbers<[1], [0], [0], [1], [0, 0, 1, 1], [], []>} : vector<32x128xbf16>, vector<128x64xbf16>, vector<32x64xf32> -> vector<32x64xf32>
    %205 = vector.broadcast %16 : vector<1x64xf32> to vector<32x64xf32>
    %206 = arith.addf %204, %205 : vector<32x64xf32>
    %207 = arith.addf %168, %206 : vector<32x64xf32>
    %208 = vector.shape_cast %207 : vector<32x64xf32> to vector<2x16x64xf32>
    %cst_82 = arith.constant dense<0.000000e+00> : vector<2x64xf32>
    %209 = vector.multi_reduction <add>, %208, %cst_82 [1] : vector<2x16x64xf32> to vector<2x64xf32>
    %cst_83 = arith.constant 1.600000e+01 : f32
    %210 = vector.broadcast %cst_83 : f32 to vector<2x64xf32>
    %211 = arith.divf %209, %210 : vector<2x64xf32>
    %cst_84 = arith.constant dense<0.000000e+00> : vector<2xf32>
    %212 = vector.multi_reduction <add>, %211, %cst_84 [1] : vector<2x64xf32> to vector<2xf32>
    %213 = vector.shape_cast %212 : vector<2xf32> to vector<2x1xf32>
    %cst_85 = arith.constant 6.400000e+01 : f32
    %214 = vector.broadcast %cst_85 : f32 to vector<2x1xf32>
    %215 = arith.divf %213, %214 : vector<2x1xf32>
    %216 = vector.broadcast %215 : vector<2x1xf32> to vector<2x64xf32>
    %217 = arith.subf %211, %216 : vector<2x64xf32>
    %218 = arith.mulf %217, %217 : vector<2x64xf32>
    %cst_86 = arith.constant dense<0.000000e+00> : vector<2xf32>
    %219 = vector.multi_reduction <add>, %218, %cst_86 [1] : vector<2x64xf32> to vector<2xf32>
    %220 = vector.shape_cast %219 : vector<2xf32> to vector<2x1xf32>
    %cst_87 = arith.constant 6.400000e+01 : f32
    %221 = vector.broadcast %cst_87 : f32 to vector<2x1xf32>
    %222 = arith.divf %220, %221 : vector<2x1xf32>
    %223 = vector.broadcast %215 : vector<2x1xf32> to vector<2x64xf32>
    %224 = arith.subf %211, %223 : vector<2x64xf32>
    %cst_88 = arith.constant 9.99999974E-6 : f32
    %225 = vector.broadcast %cst_88 : f32 to vector<2x1xf32>
    %226 = arith.addf %222, %225 : vector<2x1xf32>
    %227 = math.rsqrt %226 : vector<2x1xf32>
    %228 = vector.broadcast %227 : vector<2x1xf32> to vector<2x64xf32>
    %229 = arith.mulf %224, %228 : vector<2x64xf32>
    %230 = vector.broadcast %17 : vector<1x64xf32> to vector<2x64xf32>
    %231 = arith.mulf %229, %230 : vector<2x64xf32>
    %232 = vector.broadcast %18 : vector<1x64xf32> to vector<2x64xf32>
    %233 = arith.addf %231, %232 : vector<2x64xf32>
    %234 = arith.truncf %233 : vector<2x64xf32> to vector<2x64xbf16>
    %cst_89 = arith.constant dense<0.000000e+00> : vector<2x128xf32>
    %235 = tpu.matmul %234, %19, %cst_89 {dimension_numbers = #tpu.dot_dimension_numbers<[1], [0], [0], [1], [0, 0, 1, 1], [], []>} : vector<2x64xbf16>, vector<64x128xbf16>, vector<2x128xf32> -> vector<2x128xf32>
    %236 = vector.broadcast %20 : vector<1x128xf32> to vector<2x128xf32>
    %237 = arith.addf %235, %236 : vector<2x128xf32>
    %c0_90 = arith.constant 0 : index
    %c0_91 = arith.constant 0 : index
    %238 = vector.load %arg22[%c0_90, %c0_91] : memref<2x128xf32, #tpu.memory_space<vmem>>, vector<2x128xf32>
    tpu.vector_store %arg22[%c0_90, %c0_91], %237 {strides = array<i32>} : memref<2x128xf32, #tpu.memory_space<vmem>>, vector<2x128xf32>,
    return
  }
  func.func @transform_0(%arg0: i32) -> (i32, i32) {
    %c0_i32 = arith.constant 0 : i32
    %c0_i32_0 = arith.constant 0 : i32
    %c0_i32_1 = arith.constant 0 : i32
    return %c0_i32, %c0_i32_0 : i32, i32
  }
  func.func @transform_1(%arg0: i32) -> (i32, i32) {
    %c0_i32 = arith.constant 0 : i32
    %c0_i32_0 = arith.constant 0 : i32
    %c0_i32_1 = arith.constant 0 : i32
    return %c0_i32, %c0_i32_0 : i32, i32
  }
  func.func @transform_2(%arg0: i32) -> (i32, i32) {
    %c0_i32 = arith.constant 0 : i32
    %c0_i32_0 = arith.constant 0 : i32
    %c0_i32_1 = arith.constant 0 : i32
    return %c0_i32, %c0_i32_0 : i32, i32
  }
  func.func @transform_3(%arg0: i32) -> (i32, i32) {
    %c0_i32 = arith.constant 0 : i32
    %c0_i32_0 = arith.constant 0 : i32
    %c0_i32_1 = arith.constant 0 : i32
    return %c0_i32, %c0_i32_0 : i32, i32
  }
  func.func @transform_4(%arg0: i32) -> (i32, i32) {
    %c0_i32 = arith.constant 0 : i32
    %c0_i32_0 = arith.constant 0 : i32
    %c0_i32_1 = arith.constant 0 : i32
    return %c0_i32, %c0_i32_0 : i32, i32
  }
  func.func @transform_5(%arg0: i32) -> (i32, i32) {
    %c0_i32 = arith.constant 0 : i32
    %c0_i32_0 = arith.constant 0 : i32
    %c0_i32_1 = arith.constant 0 : i32
    return %c0_i32, %c0_i32_0 : i32, i32
  }
  func.func @transform_6(%arg0: i32) -> (i32, i32) {
    %c0_i32 = arith.constant 0 : i32
    %c0_i32_0 = arith.constant 0 : i32
    %c0_i32_1 = arith.constant 0 : i32
    return %c0_i32, %c0_i32_0 : i32, i32
  }
  func.func @transform_7(%arg0: i32) -> (i32, i32) {
    %c0_i32 = arith.constant 0 : i32
    %c0_i32_0 = arith.constant 0 : i32
    %c0_i32_1 = arith.constant 0 : i32
    return %c0_i32, %c0_i32_0 : i32, i32
  }
  func.func @transform_8(%arg0: i32) -> (i32, i32) {
    %c0_i32 = arith.constant 0 : i32
    %c0_i32_0 = arith.constant 0 : i32
    %c0_i32_1 = arith.constant 0 : i32
    return %c0_i32, %c0_i32_0 : i32, i32
  }
  func.func @transform_9(%arg0: i32) -> (i32, i32) {
    %c0_i32 = arith.constant 0 : i32
    %c0_i32_0 = arith.constant 0 : i32
    %c0_i32_1 = arith.constant 0 : i32
    return %c0_i32, %c0_i32_0 : i32, i32
  }
  func.func @transform_10(%arg0: i32) -> (i32, i32) {
    %c0_i32 = arith.constant 0 : i32
    %c0_i32_0 = arith.constant 0 : i32
    %c0_i32_1 = arith.constant 0 : i32
    return %c0_i32, %c0_i32_0 : i32, i32
  }
  func.func @transform_11(%arg0: i32) -> (i32, i32) {
    %c0_i32 = arith.constant 0 : i32
    %c0_i32_0 = arith.constant 0 : i32
    %c0_i32_1 = arith.constant 0 : i32
    return %c0_i32, %c0_i32_0 : i32, i32
  }
  func.func @transform_12(%arg0: i32) -> (i32, i32) {
    %c0_i32 = arith.constant 0 : i32
    %c0_i32_0 = arith.constant 0 : i32
    %c0_i32_1 = arith.constant 0 : i32
    return %c0_i32, %c0_i32_0 : i32, i32
  }
  func.func @transform_13(%arg0: i32) -> (i32, i32) {
    %c0_i32 = arith.constant 0 : i32
    %c0_i32_0 = arith.constant 0 : i32
    %c0_i32_1 = arith.constant 0 : i32
    return %c0_i32, %c0_i32_0 : i32, i32
  }
  func.func @transform_14(%arg0: i32) -> (i32, i32) {
    %c0_i32 = arith.constant 0 : i32
    %c0_i32_0 = arith.constant 0 : i32
    %c0_i32_1 = arith.constant 0 : i32
    return %c0_i32, %c0_i32_0 : i32, i32
  }
  func.func @transform_15(%arg0: i32) -> (i32, i32) {
    %c0_i32 = arith.constant 0 : i32
    %c0_i32_0 = arith.constant 0 : i32
    %c0_i32_1 = arith.constant 0 : i32
    return %c0_i32, %c0_i32_0 : i32, i32
  }
  func.func @transform_16(%arg0: i32) -> (i32, i32) {
    %c0_i32 = arith.constant 0 : i32
    %c0_i32_0 = arith.constant 0 : i32
    %c0_i32_1 = arith.constant 0 : i32
    return %c0_i32, %c0_i32_0 : i32, i32
  }
  func.func @transform_17(%arg0: i32) -> (i32, i32) {
    %c0_i32 = arith.constant 0 : i32
    %c0_i32_0 = arith.constant 0 : i32
    %c0_i32_1 = arith.constant 0 : i32
    return %c0_i32, %c0_i32_0 : i32, i32
  }
  func.func @transform_18(%arg0: i32) -> (i32, i32) {
    %c0_i32 = arith.constant 0 : i32
    %c0_i32_0 = arith.constant 0 : i32
    %c0_i32_1 = arith.constant 0 : i32
    return %c0_i32, %c0_i32_0 : i32, i32
  }
  func.func @transform_19(%arg0: i32) -> (i32, i32) {
    %c0_i32 = arith.constant 0 : i32
    %c0_i32_0 = arith.constant 0 : i32
    %c0_i32_1 = arith.constant 0 : i32
    return %c0_i32, %c0_i32_0 : i32, i32
  }
  func.func @transform_20(%arg0: i32) -> (i32, i32) {
    %c0_i32 = arith.constant 0 : i32
    %c0_i32_0 = arith.constant 0 : i32
    %c0_i32_1 = arith.constant 0 : i32
    return %c0_i32, %c0_i32_0 : i32, i32
  }
  func.func @transform_21(%arg0: i32) -> (i32, i32) {
    %c0_i32 = arith.constant 0 : i32
    %c0_i32_0 = arith.constant 0 : i32
    %c0_i32_1 = arith.constant 0 : i32
    return %c0_i32, %c0_i32_0 : i32, i32
  }
}

</mosaic_0001>

<bundles_post_ra>
// kernel: conv_vision_transformer.2
= control target key start
LH: loop header
LB: loop body
LE: loop exit
PB: predicated region body
PF: predicated region fallthrough
CT: control target
= control target key end

     0   :  { %vm268_vm0 = vcmask 261120   ;;  %v3899_v38 = vmov 32.0   ;;  %s3900_s23 = smov 96   ;;  %s3902_s24 = smov 112   ;;  %s5800_s1 = inlined_call_operand.vmem [shape: bf16[128,32], index: 1, kind: input, shape index: {}]   ;;  %s5801_s2 = inlined_call_operand.vmem [shape: f32[1,32], index: 2, kind: input, shape index: {}]   ;;  %s5802_s0 = inlined_call_operand.vmem [shape: bf16[128,128], index: 0, kind: input, shape index: {}]   ;;  %s5803_s3 = inlined_call_operand.vmem [shape: f32[1,32], index: 3, kind: input, shape index: {}]   ;;  %s5804_s4 = inlined_call_operand.vmem [shape: f32[1,32], index: 4, kind: input, shape index: {}]   ;;  %s5805_s5 = inlined_call_operand.vmem [shape: f32[1,32], index: 5, kind: input, shape index: {}]   ;;  %s5806_s6 = inlined_call_operand.vmem [shape: f32[1,32], index: 6, kind: input, shape index: {}]   ;;  %s5807_s7 = inlined_call_operand.vmem [shape: bf16[32,96], index: 7, kind: input, shape index: {}]   ;;  %s5808_s8 = inlined_call_operand.vmem [shape: f32[1,96], index: 8, kind: input, shape index: {}]   ;;  %s5809_s9 = inlined_call_operand.vmem [shape: bf16[32,32], index: 9, kind: input, shape index: {}]   ;;  %s5810_s10 = inlined_call_operand.vmem [shape: f32[1,32], index: 10, kind: input, shape index: {}]   ;;  %s5811_s11 = inlined_call_operand.vmem [shape: f32[1,32], index: 11, kind: input, shape index: {}]   ;;  %s5812_s12 = inlined_call_operand.vmem [shape: f32[1,32], index: 12, kind: input, shape index: {}]   ;;  %s5813_s13 = inlined_call_operand.vmem [shape: bf16[32,64], index: 13, kind: input, shape index: {}]   ;;  %s5814_s14 = inlined_call_operand.vmem [shape: f32[1,64], index: 14, kind: input, shape index: {}]   ;;  %s5815_s15 = inlined_call_operand.vmem [shape: bf16[64,32], index: 15, kind: input, shape index: {}]   ;;  %s5816_s16 = inlined_call_operand.vmem [shape: f32[1,32], index: 16, kind: input, shape index: {}]   ;;  %s5817_s17 = inlined_call_operand.vmem [shape: f32[128,32], index: 17, kind: output, shape index: {}]  }
   0x1   :  { %5819 = sst [smem:[#allocation2_spill]] %s5800_s1  ;;  %v3520_v8 = vld [vmem:[%s5802_s0] sm:$0xff]  ;;  %v3521_v9 = vld [vmem:[%s5802_s0 + $0x8] sm:$0xff]  ;;  %v3522_v10 = vld [vmem:[%s5802_s0 + $0x10] sm:$0xff]  ;;  %3608 = vrcp.f32 %v3899_v38  ;;  %s3904_s27 = smov 48  }
   0x2   :  { %5820 = sst [smem:[#allocation3_spill]] %s5801_s2  ;;  %v3523_v11 = vld [vmem:[%s5802_s0 + $0x18] sm:$0xff]  ;;  %v3524_v12 = vld [vmem:[%s5802_s0 + $0x20] sm:$0xff]  ;;  %v3525_v13 = vld [vmem:[%s5802_s0 + $0x28] sm:$0xff]  ;;  %s3905_s28 = smov 16  }
   0x3   :  { %s5821_s26 = sld [smem:[#allocation2_spill]]  ;;  %v3526_v21 = vld [vmem:[%s5802_s0 + $0x30] sm:$0xff]  ;;  %v3527_v27 = vld [vmem:[%s5802_s0 + $0x38] sm:$0xff] }
   0x4   :  { %s5822_s25 = sld [smem:[#allocation3_spill]] }
   0x7   :  { %v3609_v39 = vpop.eup %3608 }
   0x8   :  { %v318_v40 = vmul.f32 32.0, %v3609_v39  ;;  %vm322_vm1 = vweird.f32 %v3609_v39 }
   0x9   :  { %v3535_v0 = vld [vmem:[%s5821_s26 + $0x38] sm:$0xff]  ;;  %v3534_v1 = vld [vmem:[%s5821_s26 + $0x30] sm:$0xff]  ;;  %v3533_v2 = vld [vmem:[%s5821_s26 + $0x28] sm:$0xff] }
   0xa   :  { %219 = vmatpush.bf16.msra.mxu0 %v3535_v0  ;;  %v3532_v3 = vld [vmem:[%s5821_s26 + $0x20] sm:$0xff]  ;;  %v3531_v4 = vld [vmem:[%s5821_s26 + $0x18] sm:$0xff]  ;;  %v3530_v5 = vld [vmem:[%s5821_s26 + $0x10] sm:$0xff]  ;;  %v319_v41 = vsub.f32 1.0, %v318_v40 }
   0xb   :  { %v3529_v6 = vld [vmem:[%s5821_s26 + $0x8] sm:$0xff]  ;;  %v3528_v7 = vld [vmem:[%s5821_s26] sm:$0xff] }
   0xc   :  { %v4041_v14 = vld [vmem:[%s5822_s25] ss:$0 sm:$0xff]  ;;  %v320_v42 = vmul.f32 %v3609_v39, %v319_v41  ;;  %s3903_s25 = smov 64  }
   0xe   :  { %220 = vmatpush.bf16.msra.mxu0 %v3534_v1  ;;  %v321_v43 = vadd.f32 %v3609_v39, %v320_v42 }
  0x10   :  { %v4072_v45 = vsel %vm322_vm1, %v3609_v39, %v321_v43 }
  0x12   :  { %221 = vmatpush.bf16.msra.mxu0 %v3533_v2 }
  0x16   :  { %222 = vmatpush.bf16.msra.mxu0 %v3532_v3 }
  0x1a   :  { %223 = vmatpush.bf16.msra.mxu0 %v3531_v4 }
  0x1e   :  { %224 = vmatpush.bf16.msra.mxu0 %v3530_v5 }
  0x22   :  { %225 = vmatpush.bf16.msra.mxu0 %v3529_v6 }
  0x26   :  { %226 = vmatpush.bf16.msra.mxu0 %v3528_v7 }
  0x29   :  { %227 = vmatmul.bf16.vlgmr.msra.gmra.mxu0 %v3520_v8 }
  0x39   :  { %232 = vmatmul.bf16.gmra.mxu0 %v3521_v9 }
  0x49   :  { %237 = vmatmul.bf16.gmra.mxu0 %v3522_v10 }
  0x59   :  { %242 = vmatmul.bf16.gmra.mxu0 %v3523_v11 }
  0x69   :  { %247 = vmatmul.bf16.gmra.mxu0 %v3524_v12 }
  0x79   :  { %252 = vmatmul.bf16.gmra.mxu0 %v3525_v13 }
  0x89   :  { %257 = vmatmul.bf16.gmra.mxu0 %v3526_v21 }
  0x99   :  { %262 = vmatmul.bf16.gmra.mxu0 %v3527_v27 }
  0xa6   :  { %v228_v15 = vpop.f32.mrf.mxu0 }
  0xa7   :  { %v229_v16 = vadd.f32 %v4041_v14, %v228_v15 }
  0xa9   :  { %v269_v17 = vsel %vm268_vm0, %v229_v16, 0.0 }
  0xaa   :  { %270 = vadd.xlane.f32.xlu0 %v269_v17 }
  0xae   :  { %v230_v18 = vpop.f32.mrf.mxu0 }
  0xaf   :  { %v231_v19 = vadd.f32 %v4041_v14, %v230_v18 }
  0xb1   :  { %v272_v20 = vsel %vm268_vm0, %v231_v19, 0.0 }
  0xb2   :  { %273 = vadd.xlane.f32.xlu0 %v272_v20 }
  0xb6   :  { %v233_v22 = vpop.f32.mrf.mxu0 }
  0xb7   :  { %v234_v23 = vadd.f32 %v4041_v14, %v233_v22 }
  0xb9   :  { %v275_v24 = vsel %vm268_vm0, %v234_v23, 0.0 }
  0xba   :  { %276 = vadd.xlane.f32.xlu1 %v275_v24 }
  0xbe   :  { %v235_v25 = vpop.f32.mrf.mxu0 }
  0xbf   :  { %v236_v26 = vadd.f32 %v4041_v14, %v235_v25 }
  0xc1   :  { %v278_v28 = vsel %vm268_vm0, %v236_v26, 0.0 }
  0xc2   :  { %279 = vadd.xlane.f32.xlu1 %v278_v28 }
  0xc6   :  { %v238_v29 = vpop.f32.mrf.mxu0 }
  0xc7   :  { %v4058_v30 = vadd.f32 %v4041_v14, %v238_v29 }
  0xc9   :  { %v281_v31 = vsel %vm268_vm0, %v4058_v30, 0.0 }
  0xca   :  { %282 = vadd.xlane.f32.xlu2 %v281_v31 }
  0xce   :  { %v240_v32 = vpop.f32.mrf.mxu0 }
  0xcf   :  { %v4063_v33 = vadd.f32 %v4041_v14, %v240_v32 }
  0xd1   :  { %v284_v34 = vsel %vm268_vm0, %v4063_v33, 0.0 }
  0xd2   :  { %285 = vadd.xlane.f32.xlu2 %v284_v34 }
  0xd6   :  { %v243_v35 = vpop.f32.mrf.mxu0 }
  0xd7   :  { %v4068_v36 = vadd.f32 %v4041_v14, %v243_v35 }
  0xd9   :  { %v287_v37 = vsel %vm268_vm0, %v4068_v36, 0.0 }
  0xda   :  { %288 = vadd.xlane.f32.xlu2 %v287_v37 }
  0xde   :  { %v245_v44 = vpop.f32.mrf.mxu0 }
  0xdf   :  { %v4082_v54 = vadd.f32 %v4041_v14, %v245_v44 }
  0xe1   :  { %v290_v58 = vsel %vm268_vm0, %v4082_v54, 0.0 }
  0xe6   :  { %v248_v49 = vpop.f32.mrf.mxu0 }
  0xe7   :  { %v4092_v61 = vadd.f32 %v4041_v14, %v248_v49 }
  0xe9   :  { %v293_v0 = vsel %vm268_vm0, %v4092_v61, 0.0 }
  0xee   :  { %v250_v57 = vpop.f32.mrf.mxu0 }
  0xef   :  { %v4104_v6 = vadd.f32 %v4041_v14, %v250_v57 }
  0xf1   :  { %v296_v10 = vsel %vm268_vm0, %v4104_v6, 0.0 }
  0xf6   :  { %v253_v2 = vpop.f32.mrf.mxu0 }
  0xf7   :  { %v4115_v15 = vadd.f32 %v4041_v14, %v253_v2 }
  0xf9   :  { %v299_v18 = vsel %vm268_vm0, %v4115_v15, 0.0 }
  0xfe   :  { %v255_v12 = vpop.f32.mrf.mxu0 }
  0xff   :  { %v4127_v22 = vadd.f32 %v4041_v14, %v255_v12 }
 0x101   :  { %v302_v25 = vsel %vm268_vm0, %v4127_v22, 0.0 }
 0x11d   :  { %v271_v46 = vpop.xlane.xlu0 %270 }
 0x11e   :  { %v324_v47 = vmul.f32 %v4072_v45, %v271_v46 }
 0x120   :  { %v4075_v48 = vsub.f32 %v229_v16, %v324_v47 }
 0x122   :  { %v356_v50 = vmul.f32 %v4075_v48, %v4075_v48 }
 0x124   :  { %v372_v51 = vsel %vm268_vm0, %v356_v50, 0.0 }
 0x125   :  { %373 = vadd.xlane.f32.xlu0 %v372_v51  ;;  %v274_v52 = vpop.xlane.xlu0 %273 }
 0x126   :  { %v325_v53 = vmul.f32 %v4072_v45, %v274_v52 }
 0x128   :  { %v4084_v55 = vsub.f32 %v231_v19, %v325_v53 }
 0x12a   :  { %v357_v56 = vmul.f32 %v4084_v55, %v4084_v55 }
 0x12c   :  { %v375_v59 = vsel %vm268_vm0, %v357_v56, 0.0 }
 0x12d   :  { %v277_v60 = vpop.xlane.xlu1 %276  ;;  %291 = vadd.xlane.f32.xlu0 %v290_v58  ;;  %376 = vadd.xlane.f32.xlu1 %v375_v59 }
 0x12e   :  { %v326_v62 = vmul.f32 %v4072_v45, %v277_v60 }
 0x130   :  { %v4095_v63 = vsub.f32 %v234_v23, %v326_v62  ;;  %v258_v23 = vpop.f32.mrf.mxu0 }
 0x132   :  { %v358_v1 = vmul.f32 %v4095_v63, %v4095_v63 }
 0x134   :  { %v378_v3 = vsel %vm268_vm0, %v358_v1, 0.0 }
 0x135   :  { %v280_v4 = vpop.xlane.xlu1 %279  ;;  %294 = vadd.xlane.f32.xlu0 %v293_v0  ;;  %379 = vadd.xlane.f32.xlu1 %v378_v3 }
 0x136   :  { %v327_v5 = vmul.f32 %v4072_v45, %v280_v4 }
 0x138   :  { %v4106_v7 = vsub.f32 %v236_v26, %v327_v5  ;;  %v260_v32 = vpop.f32.mrf.mxu0 }
 0x139   :  { %v4150_v37 = vadd.f32 %v4041_v14, %v260_v32 }
 0x13a   :  { %v359_v8 = vmul.f32 %v4106_v7, %v4106_v7 }
 0x13b   :  { %v308_v38 = vsel %vm268_vm0, %v4150_v37, 0.0 }
 0x13c   :  { %v381_v9 = vsel %vm268_vm0, %v359_v8, 0.0 }
 0x13d   :  { %v283_v11 = vpop.xlane.xlu2 %282  ;;  %382 = vadd.xlane.f32.xlu2 %v381_v9  ;;  %297 = vadd.xlane.f32.xlu1 %v296_v10 }
 0x13e   :  { %v328_v13 = vmul.f32 %v4072_v45, %v283_v11 }
 0x140   :  { %v4118_v16 = vsub.f32 %v4058_v30, %v328_v13  ;;  %v4139_v30 = vadd.f32 %v4041_v14, %v258_v23  ;;  %v263_v39 = vpop.f32.mrf.mxu0 }
 0x142   :  { %v360_v17 = vmul.f32 %v4118_v16, %v4118_v16 }
 0x144   :  { %v384_v19 = vsel %vm268_vm0, %v360_v17, 0.0 }
 0x145   :  { %v286_v20 = vpop.xlane.xlu2 %285  ;;  %385 = vadd.xlane.f32.xlu2 %v384_v19  ;;  %300 = vadd.xlane.f32.xlu1 %v299_v18 }
 0x146   :  { %v329_v21 = vmul.f32 %v4072_v45, %v286_v20 }
 0x148   :  { %v4130_v24 = vsub.f32 %v4063_v33, %v329_v21  ;;  %v305_v33 = vsel %vm268_vm0, %v4139_v30, 0.0  ;;  %v265_v12 = vpop.f32.mrf.mxu0 }
 0x14a   :  { %v361_v26 = vmul.f32 %v4130_v24, %v4130_v24 }
 0x14c   :  { %v387_v27 = vsel %vm268_vm0, %v361_v26, 0.0  ;;  %v4185_v26 = vadd.f32 %v4041_v14, %v265_v12 }
 0x14d   :  { %v289_v28 = vpop.xlane.xlu2 %288  ;;  %303 = vadd.xlane.f32.xlu2 %v302_v25  ;;  %388 = vadd.xlane.f32.xlu0 %v387_v27 }
 0x14e   :  { %v330_v29 = vmul.f32 %v4072_v45, %v289_v28 }
 0x150   :  { %v4142_v31 = vsub.f32 %v4068_v36, %v330_v29  ;;  %v4155_v36 = vadd.f32 %v4041_v14, %v263_v39  ;;  %v4193_v29 = vld [vmem:[%s5803_s3] ss:$0 sm:$0xff]  ;;  %v314_v39 = vsel %vm268_vm0, %v4185_v26, 0.0 }
 0x152   :  { %v362_v34 = vmul.f32 %v4142_v31, %v4142_v31  ;;  %v311_v40 = vsel %vm268_vm0, %v4155_v36, 0.0 }
 0x154   :  { %v390_v35 = vsel %vm268_vm0, %v362_v34, 0.0 }
 0x155   :  { %306 = vadd.xlane.f32.xlu2 %v305_v33  ;;  %391 = vadd.xlane.f32.xlu0 %v390_v35 }
 0x15d   :  { %309 = vadd.xlane.f32.xlu0 %v308_v38 }
 0x165   :  { %312 = vadd.xlane.f32.xlu0 %v311_v40 }
 0x198   :  { %v374_v41 = vpop.xlane.xlu0 %373 }
 0x199   :  { %v420_v42 = vmul.f32 %v374_v41, %v4072_v45 }
 0x19b   :  { %v436_v43 = vadd.f32 1e-05, %v420_v42 }
 0x19d   :  { %3610 = vrsqrt.f32 %v436_v43  ;;  %vm458_vm3 = vweird.f32 %v436_v43 }
 0x1a0   :  { %v377_v44 = vpop.xlane.xlu1 %376  ;;  %v292_v46 = vpop.xlane.xlu0 %291 }
 0x1a1   :  { %v421_v47 = vmul.f32 %v377_v44, %v4072_v45  ;;  %v331_v49 = vmul.f32 %v4072_v45, %v292_v46 }
 0x1a3   :  { %v3611_v50 = vpop.eup %3610  ;;  %v437_v51 = vadd.f32 1e-05, %v421_v47  ;;  %v4163_v52 = vsub.f32 %v4082_v54, %v331_v49 }
 0x1a4   :  { %v453_v53 = vmul.f32 %v3611_v50, %v436_v43  ;;  %vm459_vm2 = vweird.f32 %v3611_v50 }
 0x1a5   :  { %3612 = vrsqrt.f32 %v437_v51  ;;  %v363_v56 = vmul.f32 %v4163_v52, %v4163_v52  ;;  %vm4175_vm4 = vmor %vm458_vm3, %vm459_vm2  ;;  %vm468_vm6 = vweird.f32 %v437_v51 }
 0x1a6   :  { %v454_v57 = vmul.f32 %v3611_v50, %v453_v53 }
 0x1a7   :  { %v393_v58 = vsel %vm268_vm0, %v363_v56, 0.0 }
 0x1a8   :  { %v455_v59 = vmul.f32 0.5, %v454_v57  ;;  %v380_v60 = vpop.xlane.xlu1 %379  ;;  %394 = vadd.xlane.f32.xlu1 %v393_v58  ;;  %v295_v62 = vpop.xlane.xlu0 %294 }
 0x1a9   :  { %v422_v0 = vmul.f32 %v380_v60, %v4072_v45  ;;  %v332_v1 = vmul.f32 %v4072_v45, %v295_v62 }
 0x1aa   :  { %v456_v2 = vsub.f32 1.5, %v455_v59 }
 0x1ab   :  { %v3613_v3 = vpop.eup %3612  ;;  %v438_v54 = vadd.f32 1e-05, %v422_v0  ;;  %v4171_v4 = vsub.f32 %v4092_v61, %v332_v1 }
 0x1ac   :  { %v457_v5 = vmul.f32 %v3611_v50, %v456_v2  ;;  %v463_v8 = vmul.f32 %v3613_v3, %v437_v51  ;;  %vm469_vm5 = vweird.f32 %v3613_v3 }
 0x1ad   :  { %3614 = vrsqrt.f32 %v438_v54  ;;  %v364_v9 = vmul.f32 %v4171_v4, %v4171_v4  ;;  %vm470_vm7 = vmor %vm468_vm6, %vm469_vm5  ;;  %vm478_vm9 = vweird.f32 %v438_v54 }
 0x1ae   :  { %v464_v10 = vmul.f32 %v3613_v3, %v463_v8  ;;  %v461_v19 = vsel %vm4175_vm4, %v3611_v50, %v457_v5 }
 0x1af   :  { %v396_v13 = vsel %vm268_vm0, %v364_v9, 0.0  ;;  %v612_v32 = vmul.f32 %v461_v19, %v4075_v48  ;;  %v4205_v48 = vld [vmem:[%s5804_s4] ss:$0 sm:$0xff] }
 0x1b0   :  { %v465_v17 = vmul.f32 0.5, %v464_v10  ;;  %v383_v18 = vpop.xlane.xlu2 %382  ;;  %v298_v61 = vpop.xlane.xlu1 %297  ;;  %397 = vadd.xlane.f32.xlu1 %v396_v13 }
 0x1b1   :  { %v423_v20 = vmul.f32 %v383_v18, %v4072_v45  ;;  %v333_v21 = vmul.f32 %v4072_v45, %v298_v61  ;;  %v631_v41 = vmul.f32 %v4193_v29, %v612_v32 }
 0x1b2   :  { %v466_v23 = vsub.f32 1.5, %v465_v17 }
 0x1b3   :  { %v3615_v25 = vpop.eup %3614  ;;  %v439_v27 = vadd.f32 1e-05, %v423_v20  ;;  %v4188_v28 = vsub.f32 %v4104_v6, %v333_v21  ;;  %v4218_v57 = vadd.f32 %v4205_v48, %v631_v41 }
 0x1b4   :  { %v467_v33 = vmul.f32 %v3613_v3, %v466_v23  ;;  %v473_v34 = vmul.f32 %v3615_v25, %v438_v54  ;;  %vm479_vm8 = vweird.f32 %v3615_v25 }
 0x1b5   :  { %3616 = vrsqrt.f32 %v439_v27  ;;  %v365_v14 = vmul.f32 %v4188_v28, %v4188_v28  ;;  %vm480_vm10 = vmor %vm478_vm9, %vm479_vm8  ;;  %v666_v1 = vsel %vm268_vm0, %v4218_v57, 0.0  ;;  %vm488_vm12 = vweird.f32 %v439_v27 }
 0x1b6   :  { %v474_v35 = vmul.f32 %v3615_v25, %v473_v34  ;;  %v471_v38 = vsel %vm470_vm7, %v3613_v3, %v467_v33 }
 0x1b7   :  { %v399_v6 = vsel %vm268_vm0, %v365_v14, 0.0  ;;  %v613_v40 = vmul.f32 %v471_v38, %v4084_v55 }
 0x1b8   :  { %v475_v42 = vmul.f32 0.5, %v474_v35  ;;  %v386_v43 = vpop.xlane.xlu2 %385  ;;  %400 = vadd.xlane.f32.xlu2 %v399_v6  ;;  %v301_v44 = vpop.xlane.xlu1 %300  ;;  %315 = vadd.xlane.f32.xlu1 %v314_v39 }
 0x1b9   :  { %v424_v46 = vmul.f32 %v386_v43, %v4072_v45  ;;  %v334_v47 = vmul.f32 %v4072_v45, %v301_v44  ;;  %v632_v49 = vmul.f32 %v4193_v29, %v613_v40 }
 0x1ba   :  { %v476_v50 = vsub.f32 1.5, %v475_v42 }
 0x1bb   :  { %v3617_v55 = vpop.eup %3616  ;;  %v440_v51 = vadd.f32 1e-05, %v424_v46  ;;  %v4212_v53 = vsub.f32 %v4115_v15, %v334_v47  ;;  %v4215_v56 = vadd.f32 %v4205_v48, %v632_v49 }
 0x1bc   :  { %v477_v58 = vmul.f32 %v3615_v25, %v476_v50  ;;  %v483_v59 = vmul.f32 %v3617_v55, %v439_v27  ;;  %vm489_vm11 = vweird.f32 %v3617_v55 }
 0x1bd   :  { %3618 = vrsqrt.f32 %v440_v51  ;;  %v669_v60 = vsel %vm268_vm0, %v4215_v56, 0.0  ;;  %v366_v62 = vmul.f32 %v4212_v53, %v4212_v53  ;;  %vm490_vm13 = vmor %vm488_vm12, %vm489_vm11  ;;  %vm498_vm15 = vweird.f32 %v440_v51 }
 0x1be   :  { %v484_v0 = vmul.f32 %v3617_v55, %v483_v59  ;;  %670 = vadd.xlane.f32.xlu0 %v669_v60  ;;  %v481_v15 = vsel %vm480_vm10, %v3615_v25, %v477_v58 }
 0x1bf   :  { %v402_v2 = vsel %vm268_vm0, %v366_v62, 0.0  ;;  %v614_v3 = vmul.f32 %v481_v15, %v4095_v63 }
 0x1c0   :  { %v485_v54 = vmul.f32 0.5, %v484_v0  ;;  %v304_v5 = vpop.xlane.xlu2 %303  ;;  %667 = vadd.xlane.f32.xlu2 %v666_v1  ;;  %403 = vadd.xlane.f32.xlu1 %v402_v2  ;;  %v389_v8 = vpop.xlane.xlu0 %388 }
 0x1c1   :  { %v335_v9 = vmul.f32 %v4072_v45, %v304_v5  ;;  %v425_v10 = vmul.f32 %v389_v8, %v4072_v45  ;;  %v633_v11 = vmul.f32 %v4193_v29, %v614_v3 }
 0x1c2   :  { %v486_v12 = vsub.f32 1.5, %v485_v54 }
 0x1c3   :  { %v3619_v13 = vpop.eup %3618  ;;  %v4232_v17 = vsub.f32 %v4127_v22, %v335_v9  ;;  %v441_v18 = vadd.f32 1e-05, %v425_v10  ;;  %v4235_v63 = vadd.f32 %v4205_v48, %v633_v11 }
 0x1c4   :  { %v487_v61 = vmul.f32 %v3617_v55, %v486_v12  ;;  %v493_v19 = vmul.f32 %v3619_v13, %v440_v51  ;;  %vm499_vm14 = vweird.f32 %v3619_v13 }
 0x1c5   :  { %3620 = vrsqrt.f32 %v441_v18  ;;  %v672_v20 = vsel %vm268_vm0, %v4235_v63, 0.0  ;;  %v367_v21 = vmul.f32 %v4232_v17, %v4232_v17  ;;  %vm500_vm1 = vmor %vm498_vm15, %vm499_vm14  ;;  %vm508_vm3 = vweird.f32 %v441_v18 }
 0x1c6   :  { %v494_v23 = vmul.f32 %v3619_v13, %v493_v19  ;;  %673 = vadd.xlane.f32.xlu0 %v672_v20  ;;  %v491_v25 = vsel %vm490_vm13, %v3617_v55, %v487_v61 }
 0x1c7   :  { %v405_v22 = vsel %vm268_vm0, %v367_v21, 0.0  ;;  %v615_v32 = vmul.f32 %v491_v25, %v4106_v7 }
 0x1c8   :  { %v495_v33 = vmul.f32 0.5, %v494_v23  ;;  %v307_v34 = vpop.xlane.xlu2 %306  ;;  %406 = vadd.xlane.f32.xlu2 %v405_v22  ;;  %v392_v27 = vpop.xlane.xlu0 %391 }
 0x1c9   :  { %v336_v14 = vmul.f32 %v4072_v45, %v307_v34  ;;  %v634_v35 = vmul.f32 %v4193_v29, %v615_v32  ;;  %v426_v11 = vmul.f32 %v392_v27, %v4072_v45 }
 0x1ca   :  { %v496_v38 = vsub.f32 1.5, %v495_v33 }
 0x1cb   :  { %v3621_v6 = vpop.eup %3620  ;;  %v4246_v39 = vsub.f32 %v4139_v30, %v336_v14  ;;  %v4249_v40 = vadd.f32 %v4205_v48, %v634_v35  ;;  %v442_v12 = vadd.f32 1e-05, %v426_v11 }
 0x1cc   :  { %v497_v41 = vmul.f32 %v3619_v13, %v496_v38  ;;  %v503_v7 = vmul.f32 %v3621_v6, %v441_v18  ;;  %vm509_vm2 = vweird.f32 %v3621_v6 }
 0x1cd   :  { %v675_v42 = vsel %vm268_vm0, %v4249_v40, 0.0  ;;  %v368_v43 = vmul.f32 %v4246_v39, %v4246_v39  ;;  %vm510_vm4 = vmor %vm508_vm3, %vm509_vm2  ;;  %3622 = vrsqrt.f32 %v442_v12  ;;  %vm518_vm6 = vweird.f32 %v442_v12 }
 0x1ce   :  { %v504_v44 = vmul.f32 %v3621_v6, %v503_v7  ;;  %676 = vadd.xlane.f32.xlu1 %v675_v42  ;;  %v501_v46 = vsel %vm500_vm1, %v3619_v13, %v497_v41 }
 0x1cf   :  { %v408_v47 = vsel %vm268_vm0, %v368_v43, 0.0  ;;  %v616_v30 = vmul.f32 %v501_v46, %v4118_v16 }
 0x1d0   :  { %v505_v49 = vmul.f32 0.5, %v504_v44  ;;  %409 = vadd.xlane.f32.xlu2 %v408_v47  ;;  %v310_v50 = vpop.xlane.xlu0 %309 }
 0x1d1   :  { %v337_v55 = vmul.f32 %v4072_v45, %v310_v50  ;;  %v635_v51 = vmul.f32 %v4193_v29, %v616_v30 }
 0x1d2   :  { %v506_v58 = vsub.f32 1.5, %v505_v49 }
 0x1d3   :  { %v4260_v59 = vsub.f32 %v4150_v37, %v337_v55  ;;  %v4263_v60 = vadd.f32 %v4205_v48, %v635_v51  ;;  %v3623_v13 = vpop.eup %3622 }
 0x1d4   :  { %v507_v62 = vmul.f32 %v3621_v6, %v506_v58  ;;  %vm519_vm5 = vweird.f32 %v3623_v13 }
 0x1d5   :  { %v678_v16 = vsel %vm268_vm0, %v4263_v60, 0.0  ;;  %v369_v0 = vmul.f32 %v4260_v59, %v4260_v59  ;;  %vm520_vm7 = vmor %vm518_vm6, %vm519_vm5 }
 0x1d6   :  { %679 = vadd.xlane.f32.xlu1 %v678_v16  ;;  %v511_v15 = vsel %vm510_vm4, %v3621_v6, %v507_v62 }
 0x1d7   :  { %v411_v1 = vsel %vm268_vm0, %v369_v0, 0.0  ;;  %v617_v2 = vmul.f32 %v511_v15, %v4130_v24 }
 0x1d8   :  { %412 = vadd.xlane.f32.xlu0 %v411_v1  ;;  %v313_v37 = vpop.xlane.xlu0 %312 }
 0x1d9   :  { %v338_v3 = vmul.f32 %v4072_v45, %v313_v37  ;;  %v636_v54 = vmul.f32 %v4193_v29, %v617_v2 }
 0x1db   :  { %v4274_v5 = vsub.f32 %v4155_v36, %v338_v3  ;;  %v4277_v8 = vadd.f32 %v4205_v48, %v636_v54  ;;  %v513_v36 = vmul.f32 %v3623_v13, %v442_v12 }
 0x1dd   :  { %v681_v9 = vsel %vm268_vm0, %v4277_v8, 0.0  ;;  %v370_v10 = vmul.f32 %v4274_v5, %v4274_v5  ;;  %v514_v18 = vmul.f32 %v3623_v13, %v513_v36 }
 0x1de   :  { %682 = vadd.xlane.f32.xlu2 %v681_v9 }
 0x1df   :  { %v414_v24 = vsel %vm268_vm0, %v370_v10, 0.0  ;;  %v515_v20 = vmul.f32 0.5, %v514_v18 }
 0x1e0   :  { %415 = vadd.xlane.f32.xlu0 %v414_v24 }
 0x1e1   :  { %v516_v23 = vsub.f32 1.5, %v515_v20 }
 0x1e3   :  { %v517_v33 = vmul.f32 %v3623_v13, %v516_v23 }
 0x1e5   :  { %v521_v35 = vsel %vm520_vm7, %v3623_v13, %v517_v33 }
 0x1e6   :  { %v618_v44 = vmul.f32 %v521_v35, %v4142_v31 }
 0x1e8   :  { %v637_v62 = vmul.f32 %v4193_v29, %v618_v44 }
 0x1ea   :  { %v4310_v10 = vadd.f32 %v4205_v48, %v637_v62 }
 0x21b   :  { %v395_v61 = vpop.xlane.xlu1 %394 }
 0x21c   :  { %v427_v19 = vmul.f32 %v395_v61, %v4072_v45 }
 0x21e   :  { %v443_v21 = vadd.f32 1e-05, %v427_v19 }
 0x220   :  { %3624 = vrsqrt.f32 %v443_v21  ;;  %vm528_vm9 = vweird.f32 %v443_v21 }
 0x223   :  { %v398_v25 = vpop.xlane.xlu1 %397 }
 0x224   :  { %v428_v22 = vmul.f32 %v398_v25, %v4072_v45 }
 0x226   :  { %v3625_v32 = vpop.eup %3624  ;;  %v444_v34 = vadd.f32 1e-05, %v428_v22 }
 0x227   :  { %v523_v27 = vmul.f32 %v3625_v32, %v443_v21  ;;  %vm529_vm8 = vweird.f32 %v3625_v32 }
 0x228   :  { %3626 = vrsqrt.f32 %v444_v34  ;;  %vm4296_vm10 = vmor %vm528_vm9, %vm529_vm8  ;;  %vm538_vm12 = vweird.f32 %v444_v34 }
 0x229   :  { %v524_v14 = vmul.f32 %v3625_v32, %v523_v27 }
 0x22b   :  { %v525_v38 = vmul.f32 0.5, %v524_v14  ;;  %v401_v6 = vpop.xlane.xlu2 %400  ;;  %v316_v41 = vpop.xlane.xlu1 %315 }
 0x22c   :  { %v429_v7 = vmul.f32 %v401_v6, %v4072_v45  ;;  %v339_v42 = vmul.f32 %v4072_v45, %v316_v41 }
 0x22d   :  { %v526_v43 = vsub.f32 1.5, %v525_v38 }
 0x22e   :  { %v3627_v46 = vpop.eup %3626  ;;  %v445_v47 = vadd.f32 1e-05, %v429_v7  ;;  %v4291_v30 = vsub.f32 %v4185_v26, %v339_v42 }
 0x22f   :  { %v527_v49 = vmul.f32 %v3625_v32, %v526_v43  ;;  %v533_v50 = vmul.f32 %v3627_v46, %v444_v34  ;;  %vm539_vm11 = vweird.f32 %v3627_v46 }
 0x230   :  { %3628 = vrsqrt.f32 %v445_v47  ;;  %v371_v55 = vmul.f32 %v4291_v30, %v4291_v30  ;;  %vm4324_vm13 = vmor %vm538_vm12, %vm539_vm11  ;;  %vm548_vm15 = vweird.f32 %v445_v47 }
 0x231   :  { %v534_v51 = vmul.f32 %v3627_v46, %v533_v50  ;;  %v671_v58 = vpop.xlane.xlu0 %670  ;;  %v531_v2 = vsel %vm4296_vm10, %v3625_v32, %v527_v49  ;;  %v684_v32 = vsel %vm268_vm0, %v4310_v10, 0.0 }
 0x232   :  { %v715_v31 = vmul.f32 %v671_v58, %v4072_v45  ;;  %v417_v26 = vsel %vm268_vm0, %v371_v55, 0.0  ;;  %v619_v36 = vmul.f32 %v531_v2, %v4163_v52 }
 0x233   :  { %v535_v0 = vmul.f32 0.5, %v534_v51  ;;  %v668_v15 = vpop.xlane.xlu2 %667  ;;  %418 = vadd.xlane.f32.xlu1 %v417_v26  ;;  %v404_v1 = vpop.xlane.xlu1 %403 }
 0x234   :  { %v4305_v37 = vsub.f32 %v4215_v56, %v715_v31  ;;  %v714_v3 = vmul.f32 %v668_v15, %v4072_v45  ;;  %v430_v54 = vmul.f32 %v404_v1, %v4072_v45  ;;  %v638_v33 = vmul.f32 %v4193_v29, %v619_v36 }
 0x235   :  { %v536_v9 = vsub.f32 1.5, %v535_v0 }
 0x236   :  { %v3629_v24 = vpop.eup %3628  ;;  %v4313_v11 = vsub.f32 %v4218_v57, %v714_v3  ;;  %v4315_v12 = vadd.f32 1e-05, %v430_v54  ;;  %v747_v13 = vmul.f32 %v4305_v37, %v4305_v37  ;;  %v4342_v43 = vadd.f32 %v4205_v48, %v638_v33 }
 0x237   :  { %v537_v18 = vmul.f32 %v3627_v46, %v536_v9  ;;  %v543_v61 = vmul.f32 %v3629_v24, %v445_v47  ;;  %vm549_vm14 = vweird.f32 %v3629_v24 }
 0x238   :  { %3630 = vrsqrt.f32 %v4315_v12  ;;  %v765_v19 = vsel %vm268_vm0, %v747_v13, 0.0  ;;  %v746_v20 = vmul.f32 %v4313_v11, %v4313_v11  ;;  %vm550_vm1 = vmor %vm548_vm15, %vm549_vm14  ;;  %v687_v16 = vsel %vm268_vm0, %v4342_v43, 0.0 }
 0x239   :  { %v544_v21 = vmul.f32 %v3629_v24, %v543_v61  ;;  %766 = vadd.xlane.f32.xlu0 %v765_v19  ;;  %v674_v23 = vpop.xlane.xlu0 %673  ;;  %v541_v34 = vsel %vm4324_vm13, %v3627_v46, %v537_v18  ;;  %vm558_vm3 = vweird.f32 %v4315_v12 }
 0x23a   :  { %v716_v52 = vmul.f32 %v674_v23, %v4072_v45  ;;  %v762_v22 = vsel %vm268_vm0, %v746_v20, 0.0  ;;  %v620_v44 = vmul.f32 %v541_v34, %v4171_v4 }
 0x23b   :  { %v545_v27 = vmul.f32 0.5, %v544_v21  ;;  %v407_v14 = vpop.xlane.xlu2 %406  ;;  %763 = vadd.xlane.f32.xlu2 %v762_v22  ;;  %685 = vadd.xlane.f32.xlu1 %v684_v32 }
 0x23c   :  { %v4336_v35 = vsub.f32 %v4235_v63, %v716_v52  ;;  %v431_v38 = vmul.f32 %v407_v14, %v4072_v45  ;;  %v639_v4 = vmul.f32 %v4193_v29, %v620_v44 }
 0x23d   :  { %v546_v6 = vsub.f32 1.5, %v545_v27 }
 0x23e   :  { %v3631_v41 = vpop.eup %3630  ;;  %v447_v7 = vadd.f32 1e-05, %v431_v38  ;;  %v748_v42 = vmul.f32 %v4336_v35, %v4336_v35 }
 0x23f   :  { %v547_v49 = vmul.f32 %v3629_v24, %v546_v6  ;;  %v553_v46 = vmul.f32 %v3631_v41, %v4315_v12  ;;  %vm559_vm2 = vweird.f32 %v3631_v41 }
 0x240   :  { %3632 = vrsqrt.f32 %v447_v7  ;;  %v768_v50 = vsel %vm268_vm0, %v748_v42, 0.0  ;;  %vm560_vm4 = vmor %vm558_vm3, %vm559_vm2  ;;  %vm568_vm6 = vweird.f32 %v447_v7 }
 0x241   :  { %v554_v55 = vmul.f32 %v3631_v41, %v553_v46  ;;  %v677_v51 = vpop.xlane.xlu1 %676  ;;  %769 = vadd.xlane.f32.xlu0 %v768_v50  ;;  %v551_v58 = vsel %vm550_vm1, %v3629_v24, %v547_v49  ;;  %v4363_v24 = vadd.f32 %v4205_v48, %v639_v4 }
 0x242   :  { %v717_v62 = vmul.f32 %v677_v51, %v4072_v45  ;;  %v621_v31 = vmul.f32 %v551_v58, %v4188_v28 }
 0x243   :  { %v555_v47 = vmul.f32 0.5, %v554_v55  ;;  %v410_v26 = vpop.xlane.xlu2 %409  ;;  %688 = vadd.xlane.f32.xlu2 %v687_v16  ;;  %v690_v25 = vsel %vm268_vm0, %v4363_v24, 0.0 }
 0x244   :  { %v4353_v0 = vsub.f32 %v4249_v40, %v717_v62  ;;  %v432_v15 = vmul.f32 %v410_v26, %v4072_v45  ;;  %v640_v1 = vmul.f32 %v4193_v29, %v621_v31 }
 0x245   :  { %v556_v2 = vsub.f32 1.5, %v555_v47 }
 0x246   :  { %v3633_v3 = vpop.eup %3632  ;;  %v448_v54 = vadd.f32 1e-05, %v432_v15  ;;  %v749_v9 = vmul.f32 %v4353_v0, %v4353_v0  ;;  %v4360_v28 = vadd.f32 %v4205_v48, %v640_v1 }
 0x247   :  { %v557_v13 = vmul.f32 %v3631_v41, %v556_v2  ;;  %v563_v36 = vmul.f32 %v3633_v3, %v447_v7  ;;  %vm569_vm5 = vweird.f32 %v3633_v3 }
 0x248   :  { %3634 = vrsqrt.f32 %v448_v54  ;;  %v771_v18 = vsel %vm268_vm0, %v749_v9, 0.0  ;;  %v693_v61 = vsel %vm268_vm0, %v4360_v28, 0.0  ;;  %vm570_vm7 = vmor %vm568_vm6, %vm569_vm5  ;;  %vm578_vm9 = vweird.f32 %v448_v54 }
 0x249   :  { %v564_v19 = vmul.f32 %v3633_v3, %v563_v36  ;;  %v680_v20 = vpop.xlane.xlu1 %679  ;;  %772 = vadd.xlane.f32.xlu1 %v771_v18  ;;  %694 = vadd.xlane.f32.xlu0 %v693_v61  ;;  %v561_v21 = vsel %vm560_vm4, %v3631_v41, %v557_v13 }
 0x24a   :  { %v718_v23 = vmul.f32 %v680_v20, %v4072_v45  ;;  %v622_v12 = vmul.f32 %v561_v21, %v4212_v53 }
 0x24b   :  { %v565_v52 = vmul.f32 0.5, %v564_v19  ;;  %691 = vadd.xlane.f32.xlu2 %v690_v25 }
 0x24c   :  { %v4374_v22 = vsub.f32 %v4263_v60, %v718_v23  ;;  %v641_v32 = vmul.f32 %v4193_v29, %v622_v12 }
 0x24d   :  { %v566_v33 = vsub.f32 1.5, %v565_v52 }
 0x24e   :  { %v3635_v27 = vpop.eup %3634  ;;  %v750_v14 = vmul.f32 %v4374_v22, %v4374_v22  ;;  %v4380_v34 = vadd.f32 %v4205_v48, %v641_v32  ;;  %v3537_v32 = vld [vmem:[%s5807_s7 + $0x8] sm:$0xff] }
 0x24f   :  { %v567_v38 = vmul.f32 %v3633_v3, %v566_v33  ;;  %v573_v6 = vmul.f32 %v3635_v27, %v448_v54  ;;  %vm579_vm8 = vweird.f32 %v3635_v27  ;;  %1109 = vmatpush.bf16.msra.mxu1 %v3537_v32 }
 0x250   :  { %v774_v53 = vsel %vm268_vm0, %v750_v14, 0.0  ;;  %v696_v41 = vsel %vm268_vm0, %v4380_v34, 0.0  ;;  %vm580_vm10 = vmor %vm578_vm9, %vm579_vm8 }
 0x251   :  { %v574_v42 = vmul.f32 %v3635_v27, %v573_v6  ;;  %v683_v44 = vpop.xlane.xlu2 %682  ;;  %775 = vadd.xlane.f32.xlu1 %v774_v53  ;;  %697 = vadd.xlane.f32.xlu0 %v696_v41  ;;  %v571_v49 = vsel %vm570_vm7, %v3633_v3, %v567_v38  ;;  %v413_v3 = vpop.xlane.xlu0 %412  ;;  %v3536_v53 = vld [vmem:[%s5807_s7] sm:$0xff] }
 0x252   :  { %v719_v46 = vmul.f32 %v683_v44, %v4072_v45  ;;  %v623_v50 = vmul.f32 %v571_v49, %v4232_v17  ;;  %v433_v54 = vmul.f32 %v413_v3, %v4072_v45 }
 0x253   :  { %v575_v55 = vmul.f32 0.5, %v574_v42  ;;  %1110 = vmatpush.bf16.msra.mxu1 %v3536_v53 }
 0x254   :  { %v4388_v51 = vsub.f32 %v4277_v8, %v719_v46  ;;  %v642_v7 = vmul.f32 %v4193_v29, %v623_v50  ;;  %v449_v13 = vadd.f32 1e-05, %v433_v54 }
 0x255   :  { %v576_v58 = vsub.f32 1.5, %v575_v55 }
 0x256   :  { %v751_v62 = vmul.f32 %v4388_v51, %v4388_v51  ;;  %v4394_v16 = vadd.f32 %v4205_v48, %v642_v7  ;;  %3636 = vrsqrt.f32 %v449_v13  ;;  %vm588_vm12 = vweird.f32 %v449_v13 }
 0x257   :  { %v577_v31 = vmul.f32 %v3635_v27, %v576_v58 }
 0x258   :  { %v777_v4 = vsel %vm268_vm0, %v751_v62, 0.0  ;;  %v699_v17 = vsel %vm268_vm0, %v4394_v16, 0.0 }
 0x259   :  { %778 = vadd.xlane.f32.xlu2 %v777_v4  ;;  %700 = vadd.xlane.f32.xlu1 %v699_v17  ;;  %v581_v47 = vsel %vm580_vm10, %v3635_v27, %v577_v31  ;;  %v416_v9 = vpop.xlane.xlu0 %415 }
 0x25a   :  { %v624_v26 = vmul.f32 %v581_v47, %v4246_v39  ;;  %v434_v36 = vmul.f32 %v416_v9, %v4072_v45 }
 0x25c   :  { %v643_v15 = vmul.f32 %v4193_v29, %v624_v26  ;;  %v450_v18 = vadd.f32 1e-05, %v434_v36  ;;  %v3637_v39 = vpop.eup %3636 }
 0x25d   :  { %v583_v61 = vmul.f32 %v3637_v39, %v449_v13  ;;  %vm589_vm11 = vweird.f32 %v3637_v39 }
 0x25e   :  { %v4402_v1 = vadd.f32 %v4205_v48, %v643_v15  ;;  %3638 = vrsqrt.f32 %v450_v18  ;;  %vm590_vm13 = vmor %vm588_vm12, %vm589_vm11  ;;  %vm598_vm15 = vweird.f32 %v450_v18 }
 0x25f   :  { %v584_v20 = vmul.f32 %v3637_v39, %v583_v61 }
 0x260   :  { %v702_v2 = vsel %vm268_vm0, %v4402_v1, 0.0 }
 0x261   :  { %703 = vadd.xlane.f32.xlu1 %v702_v2  ;;  %v585_v23 = vmul.f32 0.5, %v584_v20 }
 0x263   :  { %v586_v12 = vsub.f32 1.5, %v585_v23 }
 0x264   :  { %v3639_v19 = vpop.eup %3638 }
 0x265   :  { %v593_v21 = vmul.f32 %v3639_v19, %v450_v18  ;;  %v587_v14 = vmul.f32 %v3637_v39, %v586_v12  ;;  %vm599_vm14 = vweird.f32 %v3639_v19 }
 0x266   :  { %vm600_vm1 = vmor %vm598_vm15, %vm599_vm14 }
 0x267   :  { %v594_v25 = vmul.f32 %v3639_v19, %v593_v21  ;;  %v591_v49 = vsel %vm590_vm13, %v3637_v39, %v587_v14 }
 0x268   :  { %v625_v62 = vmul.f32 %v591_v49, %v4260_v59 }
 0x269   :  { %v595_v52 = vmul.f32 0.5, %v594_v25 }
 0x26a   :  { %v644_v54 = vmul.f32 %v4193_v29, %v625_v62 }
 0x26b   :  { %v596_v38 = vsub.f32 1.5, %v595_v52 }
 0x26c   :  { %v4439_v23 = vadd.f32 %v4205_v48, %v644_v54 }
 0x26d   :  { %v597_v42 = vmul.f32 %v3639_v19, %v596_v38 }
 0x26f   :  { %v601_v47 = vsel %vm600_vm1, %v3639_v19, %v597_v42 }
 0x270   :  { %v626_v59 = vmul.f32 %v601_v47, %v4274_v5 }
 0x272   :  { %v645_v5 = vmul.f32 %v4193_v29, %v626_v59 }
 0x274   :  { %v4456_v49 = vadd.f32 %v4205_v48, %v645_v5 }
 0x2a6   :  { %v419_v33 = vpop.xlane.xlu1 %418 }
 0x2a7   :  { %v435_v27 = vmul.f32 %v419_v33, %v4072_v45 }
 0x2a9   :  { %v451_v6 = vadd.f32 1e-05, %v435_v27 }
 0x2ab   :  { %3640 = vrsqrt.f32 %v451_v6  ;;  %vm608_vm3 = vweird.f32 %v451_v6 }
 0x2ac   :  { %v767_v41 = vpop.xlane.xlu0 %766 }
 0x2ad   :  { %v811_v44 = vmul.f32 %v767_v41, %v4072_v45 }
 0x2ae   :  { %v764_v46 = vpop.xlane.xlu2 %763  ;;  %v686_v50 = vpop.xlane.xlu1 %685 }
 0x2af   :  { %v4416_v55 = vadd.f32 1e-05, %v811_v44  ;;  %v810_v7 = vmul.f32 %v764_v46, %v4072_v45  ;;  %v720_v58 = vmul.f32 %v686_v50, %v4072_v45  ;;  %v705_v44 = vsel %vm268_vm0, %v4439_v23, 0.0 }
 0x2b1   :  { %v3641_v31 = vpop.eup %3640  ;;  %3642 = vrsqrt.f32 %v4416_v55  ;;  %v4422_v4 = vadd.f32 1e-05, %v810_v7  ;;  %v4425_v17 = vsub.f32 %v4310_v10, %v720_v58  ;;  %vm858_vm5 = vweird.f32 %v4416_v55 }
 0x2b2   :  { %v603_v26 = vmul.f32 %v3641_v31, %v451_v6  ;;  %vm609_vm2 = vweird.f32 %v3641_v31 }
 0x2b3   :  { %3644 = vrsqrt.f32 %v4422_v4  ;;  %v752_v15 = vmul.f32 %v4425_v17, %v4425_v17  ;;  %vm4449_vm4 = vmor %vm608_vm3, %vm609_vm2  ;;  %vm848_vm9 = vweird.f32 %v4422_v4 }
 0x2b4   :  { %v604_v2 = vmul.f32 %v3641_v31, %v603_v26  ;;  %v770_v3 = vpop.xlane.xlu0 %769 }
 0x2b5   :  { %v812_v9 = vmul.f32 %v770_v3, %v4072_v45  ;;  %v780_v13 = vsel %vm268_vm0, %v752_v15, 0.0 }
 0x2b6   :  { %v605_v36 = vmul.f32 0.5, %v604_v2  ;;  %v689_v18 = vpop.xlane.xlu2 %688  ;;  %781 = vadd.xlane.f32.xlu2 %v780_v13 }
 0x2b7   :  { %v3643_v39 = vpop.eup %3642  ;;  %v4434_v61 = vadd.f32 1e-05, %v812_v9  ;;  %v721_v19 = vmul.f32 %v689_v18, %v4072_v45 }
 0x2b8   :  { %v606_v20 = vsub.f32 1.5, %v605_v36  ;;  %v853_v21 = vmul.f32 %v3643_v39, %v4416_v55  ;;  %vm859_vm6 = vweird.f32 %v3643_v39 }
 0x2b9   :  { %v3645_v25 = vpop.eup %3644  ;;  %3646 = vrsqrt.f32 %v4434_v61  ;;  %v4444_v12 = vsub.f32 %v4342_v43, %v721_v19  ;;  %vm860_vm8 = vmor %vm858_vm5, %vm859_vm6  ;;  %vm868_vm12 = vweird.f32 %v4434_v61 }
 0x2ba   :  { %v607_v52 = vmul.f32 %v3641_v31, %v606_v20  ;;  %v854_v32 = vmul.f32 %v3643_v39, %v853_v21  ;;  %v843_v33 = vmul.f32 %v3645_v25, %v4422_v4  ;;  %vm849_vm7 = vweird.f32 %v3645_v25 }
 0x2bb   :  { %v753_v27 = vmul.f32 %v4444_v12, %v4444_v12  ;;  %vm850_vm10 = vmor %vm848_vm9, %vm849_vm7 }
 0x2bc   :  { %v855_v38 = vmul.f32 0.5, %v854_v32  ;;  %v844_v53 = vmul.f32 %v3645_v25, %v843_v33  ;;  %v773_v41 = vpop.xlane.xlu1 %772  ;;  %v695_v42 = vpop.xlane.xlu0 %694  ;;  %v611_v7 = vsel %vm4449_vm4, %v3641_v31, %v607_v52  ;;  %v708_v33 = vsel %vm268_vm0, %v4456_v49, 0.0 }
 0x2bd   :  { %v813_v46 = vmul.f32 %v773_v41, %v4072_v45  ;;  %v723_v6 = vmul.f32 %v695_v42, %v4072_v45  ;;  %v783_v50 = vsel %vm268_vm0, %v753_v27, 0.0  ;;  %v627_v9 = vmul.f32 %v611_v7, %v4291_v30  ;;  %v4488_v30 = vld [vmem:[%s5805_s5] ss:$0 sm:$0xff] }
 0x2be   :  { %v856_v58 = vsub.f32 1.5, %v855_v38  ;;  %v845_v62 = vmul.f32 0.5, %v844_v53  ;;  %v692_v47 = vpop.xlane.xlu2 %691  ;;  %784 = vadd.xlane.f32.xlu0 %v783_v50  ;;  %706 = vadd.xlane.f32.xlu2 %v705_v44 }
 0x2bf   :  { %v4464_v26 = vpop.eup %3646  ;;  %v4466_v15 = vadd.f32 1e-05, %v813_v46  ;;  %v4469_v2 = vsub.f32 %v4360_v28, %v723_v6  ;;  %v722_v3 = vmul.f32 %v692_v47, %v4072_v45  ;;  %v646_v27 = vmul.f32 %v4193_v29, %v627_v9 }
 0x2c0   :  { %v857_v54 = vmul.f32 %v3643_v39, %v856_v58  ;;  %v846_v31 = vsub.f32 1.5, %v845_v62  ;;  %v863_v59 = vmul.f32 %v4464_v26, %v4434_v61  ;;  %vm869_vm11 = vweird.f32 %v4464_v26 }
 0x2c1   :  { %3648 = vrsqrt.f32 %v4466_v15  ;;  %v4479_v13 = vsub.f32 %v4363_v24, %v722_v3  ;;  %v755_v36 = vmul.f32 %v4469_v2, %v4469_v2  ;;  %v4516_v50 = vadd.f32 %v4205_v48, %v646_v27  ;;  %vm4527_vm13 = vmor %vm868_vm12, %vm869_vm11 }
 0x2c2   :  { %v861_v18 = vsel %vm860_vm8, %v3643_v39, %v857_v54  ;;  %v847_v19 = vmul.f32 %v3645_v25, %v846_v31  ;;  %v864_v20 = vmul.f32 %v4464_v26, %v863_v59  ;;  %vm878_vm15 = vweird.f32 %v4466_v15 }
 0x2c3   :  { %v789_v55 = vsel %vm268_vm0, %v755_v36, 0.0  ;;  %v754_v21 = vmul.f32 %v4479_v13, %v4479_v13  ;;  %v1003_v5 = vmul.f32 %v861_v18, %v4305_v37  ;;  %v4505_v37 = vld [vmem:[%s5806_s6] ss:$0 sm:$0xff] }
 0x2c4   :  { %v851_v39 = vsel %vm850_vm10, %v3645_v25, %v847_v19  ;;  %v865_v52 = vmul.f32 0.5, %v864_v20  ;;  %v776_v32 = vpop.xlane.xlu1 %775  ;;  %790 = vadd.xlane.f32.xlu1 %v789_v55  ;;  %v698_v4 = vpop.xlane.xlu0 %697  ;;  %v711_v20 = vsel %vm268_vm0, %v4516_v50, 0.0 }
 0x2c5   :  { %v814_v14 = vmul.f32 %v776_v32, %v4072_v45  ;;  %v724_v38 = vmul.f32 %v698_v4, %v4072_v45  ;;  %v786_v53 = vsel %vm268_vm0, %v754_v21, 0.0  ;;  %v1002_v41 = vmul.f32 %v851_v39, %v4313_v11 }
 0x2c6   :  { %v866_v25 = vsub.f32 1.5, %v865_v52  ;;  %787 = vadd.xlane.f32.xlu0 %v786_v53  ;;  %709 = vadd.xlane.f32.xlu2 %v708_v33  ;;  %v1022_v42 = vmul.f32 %v4488_v30, %v1003_v5 }
 0x2c7   :  { %v3649_v44 = vpop.eup %3648  ;;  %v4508_v29 = vadd.f32 1e-05, %v814_v14  ;;  %v4511_v46 = vsub.f32 %v4380_v34, %v724_v38  ;;  %v1021_v6 = vmul.f32 %v4488_v30, %v1002_v41 }
 0x2c8   :  { %v873_v11 = vmul.f32 %v3649_v44, %v4466_v15  ;;  %v1041_v62 = vadd.f32 %v4505_v37, %v1022_v42  ;;  %v867_v47 = vmul.f32 %v4464_v26, %v866_v25  ;;  %vm879_vm14 = vweird.f32 %v3649_v44 }
 0x2c9   :  { %3650 = vrsqrt.f32 %v4508_v29  ;;  %v756_v7 = vmul.f32 %v4511_v46, %v4511_v46  ;;  %v1040_v58 = vadd.f32 %v4505_v37, %v1021_v6  ;;  %vm880_vm1 = vmor %vm878_vm15, %vm879_vm14  ;;  %vm888_vm3 = vweird.f32 %v4508_v29 }
 0x2ca   :  { %v874_v3 = vmul.f32 %v3649_v44, %v873_v11  ;;  %v871_v61 = vsel %vm4527_vm13, %v4464_v26, %v867_v47 }
 0x2cb   :  { %v792_v54 = vsel %vm268_vm0, %v756_v7, 0.0  ;;  %v1056_v31 = vpack.c.bf16 %v1041_v62, %v1040_v58  ;;  %v1004_v26 = vmul.f32 %v871_v61, %v4336_v35 }
 0x2cc   :  { %v875_v48 = vmul.f32 0.5, %v874_v3  ;;  %v779_v59 = vpop.xlane.xlu2 %778  ;;  %v701_v9 = vpop.xlane.xlu1 %700  ;;  %793 = vadd.xlane.f32.xlu1 %v792_v54 }
 0x2cd   :  { %v815_v18 = vmul.f32 %v779_v59, %v4072_v45  ;;  %v725_v19 = vmul.f32 %v701_v9, %v4072_v45  ;;  %3408 = vmatmul.msk.bf16.vlgmr.msra.gmra.mxu1 %vm268_vm0, %v1056_v31  ;;  %v1023_v25 = vmul.f32 %v4488_v30, %v1004_v26 }
 0x2ce   :  { %v876_v55 = vsub.f32 1.5, %v875_v48  ;;  %712 = vadd.xlane.f32.xlu0 %v711_v20 }
 0x2cf   :  { %v3651_v21 = vpop.eup %3650  ;;  %v831_v5 = vadd.f32 1e-05, %v815_v18  ;;  %v4540_v39 = vsub.f32 %v4394_v16, %v725_v19  ;;  %v1042_v58 = vadd.f32 %v4505_v37, %v1023_v25 }
 0x2d0   :  { %v877_v52 = vmul.f32 %v3649_v44, %v876_v55  ;;  %v883_v32 = vmul.f32 %v3651_v21, %v4508_v29  ;;  %vm889_vm2 = vweird.f32 %v3651_v21 }
 0x2d1   :  { %3652 = vrsqrt.f32 %v831_v5  ;;  %v757_v4 = vmul.f32 %v4540_v39, %v4540_v39  ;;  %vm890_vm4 = vmor %vm888_vm3, %vm889_vm2  ;;  %vm898_vm6 = vweird.f32 %v831_v5 }
 0x2d2   :  { %v881_v33 = vsel %vm880_vm1, %v3649_v44, %v877_v52  ;;  %v884_v27 = vmul.f32 %v3651_v21, %v883_v32 }
 0x2d3   :  { %v795_v14 = vsel %vm268_vm0, %v757_v4, 0.0  ;;  %v1005_v38 = vmul.f32 %v881_v33, %v4353_v0 }
 0x2d4   :  { %v885_v53 = vmul.f32 0.5, %v884_v27  ;;  %v704_v41 = vpop.xlane.xlu1 %703  ;;  %796 = vadd.xlane.f32.xlu2 %v795_v14 }
 0x2d5   :  { %v726_v15 = vmul.f32 %v704_v41, %v4072_v45  ;;  %v1024_v42 = vmul.f32 %v4488_v30, %v1005_v38 }
 0x2d6   :  { %v886_v6 = vsub.f32 1.5, %v885_v53 }
 0x2d7   :  { %v3653_v11 = vpop.eup %3652  ;;  %v4553_v7 = vsub.f32 %v4402_v1, %v726_v15  ;;  %v1043_v35 = vadd.f32 %v4505_v37, %v1024_v42 }
 0x2d8   :  { %v893_v44 = vmul.f32 %v3653_v11, %v831_v5  ;;  %v887_v62 = vmul.f32 %v3651_v21, %v886_v6  ;;  %vm899_vm5 = vweird.f32 %v3653_v11 }
 0x2d9   :  { %v758_v0 = vmul.f32 %v4553_v7, %v4553_v7  ;;  %v1057_v54 = vpack.c.bf16 %v1043_v35, %v1042_v58  ;;  %vm900_vm7 = vmor %vm898_vm6, %vm899_vm5 }
 0x2da   :  { %v894_v47 = vmul.f32 %v3653_v11, %v893_v44  ;;  %v891_v48 = vsel %vm890_vm4, %v3651_v21, %v887_v62 }
 0x2db   :  { %v798_v3 = vsel %vm268_vm0, %v758_v0, 0.0  ;;  %v1006_v36 = vmul.f32 %v891_v48, %v4374_v22 }
 0x2dc   :  { %v895_v31 = vmul.f32 0.5, %v894_v47  ;;  %799 = vadd.xlane.f32.xlu0 %v798_v3 }
 0x2dd   :  { %3409 = vmatmul.msk.bf16.gmra.mxu1 %vm268_vm0, %v1057_v54  ;;  %v1025_v20 = vmul.f32 %v4488_v30, %v1006_v36 }
 0x2de   :  { %v896_v59 = vsub.f32 1.5, %v895_v31 }
 0x2df   :  { %v1044_v55 = vadd.f32 %v4505_v37, %v1025_v20 }
 0x2e0   :  { %v897_v9 = vmul.f32 %v3653_v11, %v896_v59 }
 0x2e2   :  { %v901_v18 = vsel %vm900_vm7, %v3653_v11, %v897_v9 }
 0x2e3   :  { %v1007_v19 = vmul.f32 %v901_v18, %v4388_v51 }
 0x2e5   :  { %v1026_v29 = vmul.f32 %v4488_v30, %v1007_v19 }
 0x2e7   :  { %v1045_v61 = vadd.f32 %v4505_v37, %v1026_v29 }
 0x2e9   :  { %v1058_v52 = vpack.c.bf16 %v1045_v61, %v1044_v55 }
 0x2ed   :  { %3410 = vmatmul.msk.bf16.gmra.mxu1 %vm268_vm0, %v1058_v52 }
 0x329   :  { %v782_v21 = vpop.xlane.xlu2 %781 }
 0x32a   :  { %v816_v5 = vmul.f32 %v782_v21, %v4072_v45 }
 0x32c   :  { %v832_v32 = vadd.f32 1e-05, %v816_v5 }
 0x32e   :  { %3654 = vrsqrt.f32 %v832_v32  ;;  %vm908_vm9 = vweird.f32 %v832_v32 }
 0x331   :  { %v707_v22 = vpop.xlane.xlu2 %706  ;;  %v785_v4 = vpop.xlane.xlu0 %784 }
 0x332   :  { %v727_v51 = vmul.f32 %v707_v22, %v4072_v45  ;;  %v817_v26 = vmul.f32 %v785_v4, %v4072_v45 }
 0x334   :  { %v3655_v33 = vpop.eup %3654  ;;  %v4573_v27 = vsub.f32 %v4439_v23, %v727_v51  ;;  %v833_v14 = vadd.f32 1e-05, %v817_v26 }
 0x335   :  { %v903_v38 = vmul.f32 %v3655_v33, %v832_v32  ;;  %vm909_vm8 = vweird.f32 %v3655_v33 }
 0x336   :  { %3656 = vrsqrt.f32 %v833_v14  ;;  %v759_v53 = vmul.f32 %v4573_v27, %v4573_v27  ;;  %vm4589_vm10 = vmor %vm908_vm9, %vm909_vm8  ;;  %vm918_vm12 = vweird.f32 %v833_v14 }
 0x337   :  { %v904_v41 = vmul.f32 %v3655_v33, %v903_v38  ;;  %v791_v15 = vpop.xlane.xlu1 %790 }
 0x338   :  { %v819_v25 = vmul.f32 %v791_v15, %v4072_v45  ;;  %v801_v42 = vsel %vm268_vm0, %v759_v53, 0.0 }
 0x339   :  { %v905_v6 = vmul.f32 0.5, %v904_v41  ;;  %v710_v11 = vpop.xlane.xlu2 %709  ;;  %802 = vadd.xlane.f32.xlu1 %v801_v42  ;;  %v788_v35 = vpop.xlane.xlu0 %787 }
 0x33a   :  { %v4579_v44 = vadd.f32 1e-05, %v819_v25  ;;  %v728_v0 = vmul.f32 %v710_v11, %v4072_v45  ;;  %v818_v58 = vmul.f32 %v788_v35, %v4072_v45 }
 0x33b   :  { %v906_v62 = vsub.f32 1.5, %v905_v6 }
 0x33c   :  { %v3657_v47 = vpop.eup %3656  ;;  %3658 = vrsqrt.f32 %v4579_v44  ;;  %v4585_v3 = vsub.f32 %v4456_v49, %v728_v0  ;;  %v834_v54 = vadd.f32 1e-05, %v818_v58  ;;  %vm938_vm3 = vweird.f32 %v4579_v44 }
 0x33d   :  { %v907_v31 = vmul.f32 %v3655_v33, %v906_v62  ;;  %v913_v48 = vmul.f32 %v3657_v47, %v833_v14  ;;  %vm919_vm11 = vweird.f32 %v3657_v47 }
 0x33e   :  { %3660 = vrsqrt.f32 %v834_v54  ;;  %v760_v59 = vmul.f32 %v4585_v3, %v4585_v3  ;;  %vm920_vm13 = vmor %vm918_vm12, %vm919_vm11  ;;  %vm928_vm15 = vweird.f32 %v834_v54 }
 0x33f   :  { %v914_v9 = vmul.f32 %v3657_v47, %v913_v48  ;;  %v794_v36 = vpop.xlane.xlu1 %793  ;;  %v911_v29 = vsel %vm4589_vm10, %v3655_v33, %v907_v31 }
 0x340   :  { %v820_v19 = vmul.f32 %v794_v36, %v4072_v45  ;;  %v804_v20 = vsel %vm268_vm0, %v760_v59, 0.0  ;;  %v1008_v26 = vmul.f32 %v911_v29, %v4425_v17 }
 0x341   :  { %v915_v61 = vmul.f32 0.5, %v914_v9  ;;  %805 = vadd.xlane.f32.xlu2 %v804_v20  ;;  %v713_v55 = vpop.xlane.xlu0 %712 }
 0x342   :  { %v3659_v52 = vpop.eup %3658  ;;  %v4597_v21 = vadd.f32 1e-05, %v820_v19  ;;  %v729_v5 = vmul.f32 %v713_v55, %v4072_v45  ;;  %v1027_v17 = vmul.f32 %v4488_v30, %v1008_v26 }
 0x343   :  { %v916_v32 = vsub.f32 1.5, %v915_v61  ;;  %v933_v22 = vmul.f32 %v3659_v52, %v4579_v44  ;;  %vm939_vm1 = vweird.f32 %v3659_v52 }
 0x344   :  { %v3661_v4 = vpop.eup %3660  ;;  %3662 = vrsqrt.f32 %v4597_v21  ;;  %v4603_v51 = vsub.f32 %v4516_v50, %v729_v5  ;;  %vm940_vm4 = vmor %vm938_vm3, %vm939_vm1  ;;  %vm948_vm9 = vweird.f32 %v4597_v21 }
 0x345   :  { %v917_v33 = vmul.f32 %v3657_v47, %v916_v32  ;;  %v934_v38 = vmul.f32 %v3659_v52, %v933_v22  ;;  %v923_v53 = vmul.f32 %v3661_v4, %v834_v54  ;;  %vm929_vm14 = vweird.f32 %v3661_v4 }
 0x346   :  { %v761_v41 = vmul.f32 %v4603_v51, %v4603_v51  ;;  %vm930_vm2 = vmor %vm928_vm15, %vm929_vm14 }
 0x347   :  { %v921_v15 = vsel %vm920_vm13, %v3657_v47, %v917_v33  ;;  %v935_v25 = vmul.f32 0.5, %v934_v38  ;;  %v924_v42 = vmul.f32 %v3661_v4, %v923_v53  ;;  %v797_v6 = vpop.xlane.xlu2 %796  ;;  %v1046_v47 = vadd.f32 %v4505_v37, %v1027_v17 }
 0x348   :  { %v821_v11 = vmul.f32 %v797_v6, %v4072_v45  ;;  %v807_v35 = vsel %vm268_vm0, %v761_v41, 0.0  ;;  %v1009_v0 = vmul.f32 %v921_v15, %v4444_v12 }
 0x349   :  { %v936_v58 = vsub.f32 1.5, %v935_v25  ;;  %v925_v14 = vmul.f32 0.5, %v924_v42  ;;  %808 = vadd.xlane.f32.xlu0 %v807_v35 }
 0x34a   :  { %v3663_v62 = vpop.eup %3662  ;;  %v837_v31 = vadd.f32 1e-05, %v821_v11  ;;  %v1028_v48 = vmul.f32 %v4488_v30, %v1009_v0 }
 0x34b   :  { %v926_v59 = vsub.f32 1.5, %v925_v14  ;;  %v937_v36 = vmul.f32 %v3659_v52, %v936_v58  ;;  %v943_v18 = vmul.f32 %v3663_v62, %v4597_v21  ;;  %vm949_vm6 = vweird.f32 %v3663_v62  ;;  %v4633_v21 = vpop.f32.mrf.mxu1 }
 0x34c   :  { %3664 = vrsqrt.f32 %v837_v31  ;;  %v1047_v9 = vadd.f32 %v4505_v37, %v1028_v48  ;;  %vm958_vm7 = vweird.f32 %v837_v31  ;;  %vm950_vm10 = vmor %vm948_vm9, %vm949_vm6  ;;  %vm1347_vm9 = vcmask 523264  }
 0x34d   :  { %v927_v12 = vmul.f32 %v3661_v4, %v926_v59  ;;  %v941_v29 = vsel %vm940_vm4, %v3659_v52, %v937_v36  ;;  %v944_v54 = vmul.f32 %v3663_v62, %v943_v18 }
 0x34e   :  { %v1059_v19 = vpack.c.bf16 %v1047_v9, %v1046_v47  ;;  %v1011_v32 = vmul.f32 %v941_v29, %v4469_v2 }
 0x34f   :  { %v931_v20 = vsel %vm930_vm2, %v3661_v4, %v927_v12  ;;  %v945_v22 = vmul.f32 0.5, %v944_v54 }
 0x350   :  { %3411 = vmatmul.msk.bf16.gmra.mxu1 %vm268_vm0, %v1059_v19  ;;  %v1010_v55 = vmul.f32 %v931_v20, %v4479_v13  ;;  %v1030_v53 = vmul.f32 %v4488_v30, %v1011_v32 }
 0x351   :  { %v946_v44 = vsub.f32 1.5, %v945_v22 }
 0x352   :  { %v3665_v61 = vpop.eup %3664  ;;  %v1029_v33 = vmul.f32 %v4488_v30, %v1010_v55  ;;  %v1049_v52 = vadd.f32 %v4505_v37, %v1030_v53 }
 0x353   :  { %v953_v5 = vmul.f32 %v3665_v61, %v837_v31  ;;  %vm959_vm5 = vweird.f32 %v3665_v61  ;;  %v947_v25 = vmul.f32 %v3663_v62, %v946_v44  ;;  %v800_v31 = vpop.xlane.xlu0 %799 }
 0x354   :  { %v1048_v41 = vadd.f32 %v4505_v37, %v1029_v33  ;;  %vm960_vm8 = vmor %vm958_vm7, %vm959_vm5 }
 0x355   :  { %v954_v26 = vmul.f32 %v3665_v61, %v953_v5  ;;  %v951_v42 = vsel %vm950_vm10, %v3663_v62, %v947_v25  ;;  %v822_v62 = vmul.f32 %v800_v31, %v4072_v45 }
 0x356   :  { %v1060_v2 = vpack.c.bf16 %v1049_v52, %v1048_v41  ;;  %v1012_v11 = vmul.f32 %v951_v42, %v4511_v46 }
 0x357   :  { %v955_v38 = vmul.f32 0.5, %v954_v26  ;;  %v838_v48 = vadd.f32 1e-05, %v822_v62 }
 0x358   :  { %v1031_v0 = vmul.f32 %v4488_v30, %v1012_v11 }
 0x359   :  { %v956_v4 = vsub.f32 1.5, %v955_v38  ;;  %3666 = vrsqrt.f32 %v838_v48  ;;  %vm968_vm12 = vweird.f32 %v838_v48 }
 0x35a   :  { %v1050_v58 = vadd.f32 %v4505_v37, %v1031_v0 }
 0x35b   :  { %v957_v15 = vmul.f32 %v3665_v61, %v956_v4 }
 0x35d   :  { %v961_v13 = vsel %vm960_vm8, %v3665_v61, %v957_v15  ;;  %vm1196_vm8 = vcmask 130048  }
 0x35e   :  { %v1013_v6 = vmul.f32 %v961_v13, %v4540_v39  ;;  %v4636_v39 = vpop.f32.mrf.mxu1 }
 0x35f   :  { %v3667_v46 = vpop.eup %3666 }
 0x360   :  { %3412 = vmatmul.msk.bf16.gmra.mxu1 %vm268_vm0, %v1060_v2  ;;  %v1032_v35 = vmul.f32 %v4488_v30, %v1013_v6  ;;  %v963_v47 = vmul.f32 %v3667_v46, %v838_v48  ;;  %vm969_vm11 = vweird.f32 %v3667_v46 }
 0x361   :  { %vm970_vm13 = vmor %vm968_vm12, %vm969_vm11 }
 0x362   :  { %v1051_v17 = vadd.f32 %v4505_v37, %v1032_v35  ;;  %v964_v9 = vmul.f32 %v3667_v46, %v963_v47 }
 0x364   :  { %v1061_v14 = vpack.c.bf16 %v1051_v17, %v1050_v58  ;;  %v965_v19 = vmul.f32 0.5, %v964_v9 }
 0x366   :  { %v4638_v59 = vpop.f32.mrf.mxu1  ;;  %v966_v29 = vsub.f32 1.5, %v965_v19 }
 0x368   :  { %v967_v32 = vmul.f32 %v3667_v46, %v966_v29 }
 0x36a   :  { %v971_v38 = vsel %vm970_vm13, %v3667_v46, %v967_v32 }
 0x36b   :  { %v1014_v52 = vmul.f32 %v971_v38, %v4553_v7 }
 0x36d   :  { %v1033_v35 = vmul.f32 %v4488_v30, %v1014_v52 }
 0x36e   :  { %v4641_v20 = vpop.f32.mrf.mxu1 }
 0x36f   :  { %v1052_v7 = vadd.f32 %v4505_v37, %v1033_v35 }
 0x370   :  { %3413 = vmatmul.msk.bf16.gmra.mxu1 %vm268_vm0, %v1061_v14 }
 0x376   :  { %v1122_v33 = vpop.f32.mrf.mxu1 }
 0x37e   :  { %v1124_v17 = vpop.f32.mrf.mxu1 }
 0x3ac   :  { %v803_v36 = vpop.xlane.xlu1 %802 }
 0x3ad   :  { %v823_v12 = vmul.f32 %v803_v36, %v4072_v45 }
 0x3af   :  { %v839_v18 = vadd.f32 1e-05, %v823_v12 }
 0x3b1   :  { %3668 = vrsqrt.f32 %v839_v18  ;;  %vm978_vm15 = vweird.f32 %v839_v18 }
 0x3b4   :  { %v806_v54 = vpop.xlane.xlu2 %805 }
 0x3b5   :  { %v824_v61 = vmul.f32 %v806_v54, %v4072_v45 }
 0x3b7   :  { %v3669_v55 = vpop.eup %3668  ;;  %v840_v5 = vadd.f32 1e-05, %v824_v61 }
 0x3b8   :  { %v973_v22 = vmul.f32 %v3669_v55, %v839_v18  ;;  %vm979_vm14 = vweird.f32 %v3669_v55 }
 0x3b9   :  { %3670 = vrsqrt.f32 %v840_v5  ;;  %vm980_vm1 = vmor %vm978_vm15, %vm979_vm14  ;;  %vm988_vm3 = vweird.f32 %v840_v5 }
 0x3ba   :  { %v974_v26 = vmul.f32 %v3669_v55, %v973_v22 }
 0x3bc   :  { %v975_v53 = vmul.f32 0.5, %v974_v26  ;;  %v809_v44 = vpop.xlane.xlu0 %808 }
 0x3bd   :  { %v825_v4 = vmul.f32 %v809_v44, %v4072_v45 }
 0x3be   :  { %v976_v41 = vsub.f32 1.5, %v975_v53 }
 0x3bf   :  { %v3671_v15 = vpop.eup %3670  ;;  %v841_v25 = vadd.f32 1e-05, %v825_v4  ;;  %v3602_v4 = vld [vmem:[%s5808_s8] ss:$0 sm:$0xff]  ;;  %s3901_s8 = smov 80  }
 0x3c0   :  { %v977_v2 = vmul.f32 %v3669_v55, %v976_v41  ;;  %v983_v13 = vmul.f32 %v3671_v15, %v840_v5  ;;  %vm989_vm2 = vweird.f32 %v3671_v15 }
 0x3c1   :  { %3672 = vrsqrt.f32 %v841_v25  ;;  %vm990_vm4 = vmor %vm988_vm3, %vm989_vm2  ;;  %vm998_vm6 = vweird.f32 %v841_v25 }
 0x3c2   :  { %v981_v42 = vsel %vm980_vm1, %v3669_v55, %v977_v2  ;;  %v984_v6 = vmul.f32 %v3671_v15, %v983_v13  ;;  %v1123_v2 = vadd.f32 %v3602_v4, %v1122_v33  ;;  %v1120_v33 = vadd.f32 %v3602_v4, %v4641_v20 }
 0x3c3   :  { %v1015_v11 = vmul.f32 %v981_v42, %v4573_v27 }
 0x3c4   :  { %v985_v0 = vmul.f32 0.5, %v984_v6 }
 0x3c5   :  { %v1034_v58 = vmul.f32 %v4488_v30, %v1015_v11  ;;  %v1156_v11 = vpack.c.bf16 %v1123_v2, %v1123_v2 }
 0x3c6   :  { %v986_v14 = vsub.f32 1.5, %v985_v0 }
 0x3c7   :  { %v3673_v31 = vpop.eup %3672  ;;  %v1053_v62 = vadd.f32 %v4505_v37, %v1034_v58  ;;  %v1180_v58 = vunpack.c.l.b16 %v1156_v11 }
 0x3c8   :  { %v987_v48 = vmul.f32 %v3671_v15, %v986_v14  ;;  %v993_v46 = vmul.f32 %v3673_v31, %v841_v25  ;;  %vm999_vm5 = vweird.f32 %v3673_v31  ;;  %v1125_v25 = vadd.f32 %v3602_v4, %v1124_v17 }
 0x3c9   :  { %v1062_v47 = vpack.c.bf16 %v1053_v62, %v1052_v7  ;;  %vm1000_vm7 = vmor %vm998_vm6, %vm999_vm5 }
 0x3ca   :  { %v994_v9 = vmul.f32 %v3673_v31, %v993_v46  ;;  %v991_v27 = vsel %vm990_vm4, %v3671_v15, %v987_v48  ;;  %v1118_v48 = vadd.f32 %v3602_v4, %v4638_v59 }
 0x3cb   :  { %3414 = vmatmul.msk.bf16.gmra.mxu1 %vm268_vm0, %v1062_v47  ;;  %v1016_v19 = vmul.f32 %v991_v27, %v4585_v3  ;;  %v1155_v47 = vpack.c.bf16 %v1120_v33, %v1120_v33 }
 0x3cc   :  { %v995_v36 = vmul.f32 0.5, %v994_v9  ;;  %v1154_v27 = vpack.c.bf16 %v1118_v48, %v1118_v48 }
 0x3cd   :  { %v1127_v12 = vpop.f32.mrf.mxu1  ;;  %v1035_v55 = vmul.f32 %v4488_v30, %v1016_v19 }
 0x3ce   :  { %v996_v18 = vsub.f32 1.5, %v995_v36  ;;  %v1128_v14 = vadd.f32 %v3602_v4, %v1127_v12  ;;  %v1179_v36 = vunpack.c.l.b16 %v1155_v47  ;;  %v1178_v12 = vunpack.c.l.b16 %v1154_v27 }
 0x3cf   :  { %v1054_v22 = vadd.f32 %v4505_v37, %v1035_v55 }
 0x3d0   :  { %v997_v29 = vmul.f32 %v3673_v31, %v996_v18  ;;  %v1158_v17 = vpack.c.bf16 %v1128_v14, %v1128_v14  ;;  %v4676_v18 = vpack.c.b16 %v1179_v36, %v1178_v12 }
 0x3d2   :  { %v1001_v54 = vsel %vm1000_vm7, %v3673_v31, %v997_v29  ;;  %v1182_v46 = vunpack.c.l.b16 %v1158_v17 }
 0x3d3   :  { %v1017_v61 = vmul.f32 %v1001_v54, %v4603_v51 }
 0x3d5   :  { %v1129_v5 = vpop.f32.mrf.mxu1  ;;  %v1036_v32 = vmul.f32 %v4488_v30, %v1017_v61 }
 0x3d6   :  { %v1130_v0 = vadd.f32 %v3602_v4, %v1129_v5 }
 0x3d7   :  { %v1055_v26 = vadd.f32 %v4505_v37, %v1036_v32  ;;  %v1157_v37 = vpack.c.bf16 %v1125_v25, %v1125_v25 }
 0x3d8   :  { %v1159_v7 = vpack.c.bf16 %v1130_v0, %v1130_v0 }
 0x3d9   :  { %v1063_v38 = vpack.c.bf16 %v1055_v26, %v1054_v22  ;;  %v1181_v35 = vunpack.c.l.b16 %v1157_v37 }
 0x3da   :  { %v1183_v62 = vunpack.c.l.b16 %v1159_v7 }
 0x3db   :  { %3415 = vmatmul.msk.bf16.gmra.mxu1 %vm268_vm0, %v1063_v38  ;;  %v4666_v31 = vpack.c.b16 %v1181_v35, %v1180_v58 }
 0x3dc   :  { %v4672_v9 = vpack.c.b16 %v1183_v62, %v1182_v46 }
 0x3dd   :  { %v1132_v53 = vpop.f32.mrf.mxu1 }
 0x3de   :  { %v1133_v5 = vadd.f32 %v3602_v4, %v1132_v53  ;;  %v1115_v53 = vadd.f32 %v3602_v4, %v4636_v39 }
 0x3e0   :  { %v1153_v35 = vpack.c.bf16 %v1115_v53, %v1115_v53 }
 0x3e2   :  { %v1177_v14 = vunpack.c.l.b16 %v1153_v35 }
 0x3e5   :  { %v1134_v3 = vpop.f32.mrf.mxu1 }
 0x3e6   :  { %v1135_v61 = vadd.f32 %v3602_v4, %v1134_v3 }
 0x3e8   :  { %v1161_v26 = vpack.c.bf16 %v1135_v61, %v1135_v61 }
 0x3ed   :  { %v1137_v44 = vpop.f32.mrf.mxu1 }
 0x3ee   :  { %v1138_v51 = vadd.f32 %v3602_v4, %v1137_v44 }
 0x3f0   :  { %v1162_v15 = vpack.c.bf16 %v1138_v51, %v1138_v51  ;;  %v1160_v51 = vpack.c.bf16 %v1133_v5, %v1133_v5 }
 0x3f2   :  { %v1260_v13 = vunpack.c.l.b16 %v1162_v15  ;;  %v1258_v15 = vunpack.c.l.b16 %v1160_v51 }
 0x3f5   :  { %v1139_v41 = vpop.f32.mrf.mxu1 }
 0x3f6   :  { %v1140_v52 = vadd.f32 %v3602_v4, %v1139_v41  ;;  %v1259_v41 = vunpack.c.l.b16 %v1161_v26 }
 0x3f8   :  { %v1163_v30 = vpack.c.bf16 %v1140_v52, %v1140_v52  ;;  %v4684_v25 = vpack.c.b16 %v1259_v41, %v1258_v15 }
 0x3fa   :  { %v1261_v42 = vunpack.c.l.b16 %v1163_v30 }
 0x3fc   :  { %v4662_v6 = vpack.c.b16 %v1261_v42, %v1260_v13  ;;  %v1113_v42 = vadd.f32 %v3602_v4, %v4633_v21 }
 0x3fe   :  { %1272 = vrot.lane.b32.xlu0 %v4662_v6, %s3900_s23  ;;  %v1152_v58 = vpack.c.bf16 %v1113_v42, %v1113_v42 }
 0x400   :  { %v1176_v7 = vunpack.c.l.b16 %v1152_v58 }
 0x402   :  { %v4696_v17 = vpack.c.b16 %v1177_v14, %v1176_v7 }
 0x406   :  { %1192 = vrot.lane.b32.xlu0 %v4666_v31, %s3900_s23 }
 0x40e   :  { %1700 = vrot.lane.b32.xlu0 %v4672_v9, %s3901_s8 }
 0x416   :  { %1688 = vrot.lane.b32.xlu0 %v4676_v18, %s3902_s24 }
 0x448   :  { %v1142_v20 = vpop.f32.mrf.mxu1 }
 0x449   :  { %v1143_v19 = vadd.f32 %v3602_v4, %v1142_v20 }
 0x44b   :  { %v1164_v29 = vpack.c.bf16 %v1143_v19, %v1143_v19 }
 0x44d   :  { %v1262_v32 = vunpack.c.l.b16 %v1164_v29 }
 0x450   :  { %v1144_v59 = vpop.f32.mrf.mxu1 }
 0x451   :  { %v1145_v54 = vadd.f32 %v3602_v4, %v1144_v59 }
 0x453   :  { %v1165_v55 = vpack.c.bf16 %v1145_v54, %v1145_v54 }
 0x455   :  { %v1263_v22 = vunpack.c.l.b16 %v1165_v55 }
 0x457   :  { %v4680_v38 = vpack.c.b16 %v1263_v22, %v1262_v32 }
 0x458   :  { %v1147_v44 = vpop.f32.mrf.mxu1 }
 0x459   :  { %1274 = vrot.lane.b32.xlu2 %v4680_v38, %s3900_s23  ;;  %v1148_v52 = vadd.f32 %v3602_v4, %v1147_v44 }
 0x45b   :  { %v1166_v2 = vpack.c.bf16 %v1148_v52, %v1148_v52 }
 0x45d   :  { %v1264_v37 = vunpack.c.l.b16 %v1166_v2 }
 0x460   :  { %v1149_v30 = vpop.f32.mrf.mxu1 }
 0x461   :  { %v1150_v3 = vadd.f32 %v3602_v4, %v1149_v30  ;;  %1270 = vrot.lane.b32.xlu2 %v4684_v25, %s3900_s23 }
 0x463   :  { %v1167_v13 = vpack.c.bf16 %v1150_v3, %v1150_v3 }
 0x465   :  { %v1265_v11 = vunpack.c.l.b16 %v1167_v13 }
 0x467   :  { %v4690_v0 = vpack.c.b16 %v1265_v11, %v1264_v37 }
 0x469   :  { %1190 = vrot.lane.b32.xlu2 %v4676_v18, %s3900_s23  ;;  %1276 = vrot.lane.b32.xlu1 %v4690_v0, %s3900_s23 }
 0x470   :  { %v1273_v39 = vpop.permute.xlu0 %1272 }
 0x471   :  { %1188 = vrot.lane.b32.xlu2 %v4696_v17, %s3900_s23  ;;  %1194 = vrot.lane.b32.xlu1 %v4672_v9, %s3900_s23  ;;  %v1294_v22 = vsel %vm1196_vm8, %v1273_v39, 0 }
 0x478   :  { %v1193_v21 = vpop.permute.xlu0 %1192 }
 0x479   :  { %1698 = vrot.lane.b32.xlu2 %v4666_v31, %s3901_s8  ;;  %1635 = vrot.lane.b32.xlu1 %v4662_v6, %s3903_s25  ;;  %v1216_v32 = vsel %vm1196_vm8, %v1193_v21, 0 }
 0x480   :  { %v1701_v4 = vpop.permute.xlu0 %1700 }
 0x481   :  { %1637 = vrot.lane.b32.xlu2 %v4680_v38, %s3903_s25  ;;  %1694 = vrot.lane.b32.xlu1 %v4696_v17, %s3901_s8  ;;  %v1724_v33 = vsel %vm1196_vm8, %v1701_v4, 0 }
 0x482   :  { %1730 = vmatpush.bf16.xpose.msrb.mxu1 %v1724_v33 }
 0x488   :  { %v1689_v53 = vpop.permute.xlu0 %1688 }
 0x489   :  { %1696 = vrot.lane.b32.xlu2 %v4676_v18, %s3901_s8  ;;  %1686 = vrot.lane.b32.xlu1 %v4696_v17, %s3902_s24 }
 0x491   :  { %1633 = vrot.lane.b32.xlu2 %v4684_v25, %s3903_s25  ;;  %1690 = vrot.lane.b32.xlu1 %v4666_v31, %s3902_s24 }
 0x499   :  { %1767 = vrot.lane.b32.xlu2 %v4680_v38, %s3901_s8  ;;  %1765 = vrot.lane.b32.xlu1 %v4662_v6, %s3901_s8 }
 0x4a1   :  { %1769 = vrot.lane.b32.xlu2 %v4690_v0, %s3901_s8  ;;  %1639 = vrot.lane.b32.xlu1 %v4690_v0, %s3903_s25 }
 0x4b3   :  { %v1275_v62 = vpop.permute.xlu2 %1274 }
 0x4b4   :  { %v1297_v55 = vsel %vm1196_vm8, %v1275_v62, 0 }
 0x4bb   :  { %v1271_v48 = vpop.permute.xlu2 %1270 }
 0x4bc   :  { %v1291_v41 = vsel %vm1196_vm8, %v1271_v48, 0 }
 0x4c3   :  { %v1191_v46 = vpop.permute.xlu2 %1190 }
 0x4c4   :  { %v1213_v44 = vsel %vm1196_vm8, %v1191_v46, 0 }
 0x4cb   :  { %v1189_v47 = vpop.permute.xlu2 %1188 }
 0x4cc   :  { %v1210_v52 = vsel %vm1196_vm8, %v1189_v47, 0 }
 0x4d3   :  { %v1699_v27 = vpop.permute.xlu2 %1698 }
 0x4d4   :  { %v1721_v36 = vsel %vm1196_vm8, %v1699_v27, 0 }
 0x4d5   :  { %1731 = vmatpush.bf16.xpose.msrb.mxu1 %v1721_v36 }
 0x4db   :  { %v1638_v12 = vpop.permute.xlu2 %1637  ;;  %v1277_v20 = vpop.permute.xlu1 %1276 }
 0x4dc   :  { %v1300_v19 = vsel %vm1196_vm8, %v1277_v20, 0 }
 0x4dd   :  { %1306 = vmatpush.bf16.xpose.msra.mxu3 %v1300_v19 }
 0x4e3   :  { %v1697_v59 = vpop.permute.xlu2 %1696  ;;  %v1195_v29 = vpop.permute.xlu1 %1194 }
 0x4e4   :  { %v1219_v54 = vsel %vm1196_vm8, %v1195_v29, 0  ;;  %v1718_v61 = vsel %vm1196_vm8, %v1697_v59, 0 }
 0x4e5   :  { %1225 = vmatpush.bf16.xpose.msrb.mxu0 %v1219_v54  ;;  %3546 = vmatpush.bf16.xpose.msra.mxu2 %v1219_v54 }
 0x4e6   :  { %1307 = vmatpush.bf16.xpose.msra.mxu3 %v1297_v55  ;;  %1732 = vmatpush.bf16.xpose.msrb.mxu1 %v1718_v61 }
 0x4eb   :  { %v1636_v5 = vpop.permute.xlu1 %1635  ;;  %v1634_v2 = vpop.permute.xlu2 %1633 }
 0x4ed   :  { %1226 = vmatpush.bf16.xpose.msrb.mxu0 %v1216_v32  ;;  %3547 = vmatpush.bf16.xpose.msra.mxu2 %v1216_v32 }
 0x4ee   :  { %1308 = vmatpush.bf16.xpose.msra.mxu3 %v1294_v22 }
 0x4f3   :  { %v1695_v26 = vpop.permute.xlu1 %1694  ;;  %v1768_v13 = vpop.permute.xlu2 %1767 }
 0x4f4   :  { %v1715_v51 = vsel %vm1196_vm8, %v1695_v26, 0  ;;  %v1790_v35 = vsel %vm1196_vm8, %v1768_v13, 0 }
 0x4f5   :  { %1227 = vmatpush.bf16.xpose.msrb.mxu0 %v1213_v44  ;;  %3548 = vmatpush.bf16.xpose.msra.mxu2 %v1213_v44 }
 0x4f6   :  { %1309 = vmatpush.bf16.xpose.msra.mxu3 %v1291_v41  ;;  %1733 = vmatpush.bf16.xpose.msrb.mxu1 %v1715_v51 }
 0x4fb   :  { %v1687_v15 = vpop.permute.xlu1 %1686  ;;  %v1770_v37 = vpop.permute.xlu2 %1769 }
 0x4fc   :  { %v1793_v11 = vsel %vm1196_vm8, %v1770_v37, 0 }
 0x4fd   :  { %3420 = vmatmul.msk.bf16.vlgmr.msra.gmra.mxu3 %vm1196_vm8, %v4684_v25  ;;  %3432 = vmatmul.msk.bf16.vlgmr.msrb.gmra.mxu1 %vm1196_vm8, %v1687_v15 }
 0x4fe   :  { %1228 = vmatpush.bf16.xpose.msrb.mxu0 %v1210_v52  ;;  %3549 = vmatpush.bf16.xpose.msra.mxu2 %v1210_v52 }
 0x503   :  { %v1691_v30 = vpop.permute.xlu1 %1690 }
 0x505   :  { %3416 = vmatmul.msk.bf16.vlgmr.msrb.gmra.mxu0 %vm1196_vm8, %v4696_v17  ;;  %3418 = vmatmul.msk.bf16.vlgmr.msra.gmra.mxu2 %vm1196_vm8, %v4666_v31 }
 0x50b   :  { %v1766_v3 = vpop.permute.xlu1 %1765 }
 0x50c   :  { %v1787_v58 = vsel %vm1196_vm8, %v1766_v3, 0 }
 0x50d   :  { %3421 = vmatmul.msk.bf16.gmra.mxu3 %vm1196_vm8, %v4662_v6  ;;  %3433 = vmatmul.msk.bf16.gmra.mxu1 %vm1196_vm8, %v1689_v53 }
 0x513   :  { %v1640_v42 = vpop.permute.xlu1 %1639 }
 0x514   :  { %1661 = vmatpush.bf16.msrb.mxu3 %v1640_v42 }
 0x515   :  { %3417 = vmatmul.msk.bf16.gmra.mxu0 %vm1196_vm8, %v4676_v18  ;;  %3419 = vmatmul.msk.bf16.gmra.mxu2 %vm1196_vm8, %v4672_v9 }
 0x518   :  { %1662 = vmatpush.bf16.msrb.mxu3 %v1638_v12 }
 0x51c   :  { %1663 = vmatpush.bf16.msrb.mxu3 %v1636_v5 }
 0x51d   :  { %3422 = vmatmul.msk.bf16.gmra.mxu3 %vm1196_vm8, %v4680_v38  ;;  %3434 = vmatmul.msk.bf16.gmra.mxu1 %vm1196_vm8, %v1691_v30 }
 0x520   :  { %1664 = vmatpush.bf16.msrb.mxu3 %v1634_v2 }
 0x524   :  { %1799 = vmatpush.bf16.xpose.msra.mxu3 %v1793_v11 }
 0x52c   :  { %1800 = vmatpush.bf16.xpose.msra.mxu3 %v1790_v35 }
 0x52d   :  { %3423 = vmatmul.msk.bf16.gmra.mxu3 %vm1196_vm8, %v4690_v0 }
 0x534   :  { %1801 = vmatpush.bf16.xpose.msra.mxu3 %v1787_v58 }
 0x580   :  { %v1311_v14 = vpop.f32.mrf.mxu3 }
 0x581   :  { %v1339_v7 = vmul.f32 0.17677669, %v1311_v14 }
 0x583   :  { %v1372_v39 = vsel %vm1347_vm9, %v1339_v7, -inf }
 0x584   :  { %1373 = vmax.xlane.f32.xlu1 %v1372_v39 }
 0x588   :  { %v1313_v21 = vpop.f32.mrf.mxu3 }
 0x589   :  { %v1340_v4 = vmul.f32 0.17677669, %v1313_v21 }
 0x58b   :  { %v1375_v33 = vsel %vm1347_vm9, %v1340_v4, -inf }
 0x58c   :  { %1376 = vmax.xlane.f32.xlu0 %v1375_v33 }
 0x590   :  { %v1316_v62 = vpop.f32.mrf.mxu3 }
 0x591   :  { %v1341_v48 = vmul.f32 0.17677669, %v1316_v62 }
 0x593   :  { %v1378_v46 = vsel %vm1347_vm9, %v1341_v48, -inf }
 0x594   :  { %1379 = vmax.xlane.f32.xlu2 %v1378_v46 }
 0x598   :  { %v1318_v47 = vpop.f32.mrf.mxu3 }
 0x599   :  { %v1342_v27 = vmul.f32 0.17677669, %v1318_v47 }
 0x59b   :  { %v1381_v36 = vsel %vm1347_vm9, %v1342_v27, -inf }
 0x59c   :  { %1382 = vmax.xlane.f32.xlu1 %v1381_v36 }
 0x5a0   :  { %v1321_v12 = vpop.f32.mrf.mxu3 }
 0x5a1   :  { %v1343_v20 = vmul.f32 0.17677669, %v1321_v12 }
 0x5a3   :  { %v1384_v19 = vsel %vm1347_vm9, %v1343_v20, -inf }
 0x5a4   :  { %1385 = vmax.xlane.f32.xlu0 %v1384_v19 }
 0x5a8   :  { %v1323_v59 = vpop.f32.mrf.mxu3 }
 0x5a9   :  { %v1344_v29 = vmul.f32 0.17677669, %v1323_v59 }
 0x5ab   :  { %v1387_v54 = vsel %vm1347_vm9, %v1344_v29, -inf }
 0x5ac   :  { %1388 = vmax.xlane.f32.xlu1 %v1387_v54 }
 0x5b0   :  { %v1326_v61 = vpop.f32.mrf.mxu3 }
 0x5b1   :  { %v4766_v55 = vmul.f32 0.17677669, %v1326_v61 }
 0x5b3   :  { %v1390_v5 = vsel %vm1347_vm9, %v4766_v55, -inf }
 0x5b4   :  { %1391 = vmax.xlane.f32.xlu2 %v1390_v5 }
 0x5b8   :  { %v1328_v32 = vpop.f32.mrf.mxu3 }
 0x5b9   :  { %v4770_v22 = vmul.f32 0.17677669, %v1328_v32 }
 0x5bb   :  { %v1393_v26 = vsel %vm1347_vm9, %v4770_v22, -inf }
 0x5bc   :  { %1394 = vmax.xlane.f32.xlu1 %v1393_v26 }
 0x5cc   :  { %1763 = vrot.lane.b32.xlu2 %v4684_v25, %s3901_s8 }
 0x5d4   :  { %1757 = vrot.lane.b32.xlu2 %v4662_v6, %s3902_s24 }
 0x5f7   :  { %v1374_v44 = vpop.xlane.xlu1 %1373 }
 0x5f8   :  { %v1404_v51 = vsub.f32 %v1339_v7, %v1374_v44 }
 0x5fa   :  { %v1428_v41 = vmul.f32 1.442695, %v1404_v51 }
 0x5fc   :  { %3674 = vpow2.f32 %v1428_v41 }
 0x5ff   :  { %v1377_v15 = vpop.xlane.xlu0 %1376 }
 0x600   :  { %v1405_v52 = vsub.f32 %v1340_v4, %v1377_v15 }
 0x602   :  { %v4778_v30 = vpop.eup %3674  ;;  %v1430_v2 = vmul.f32 1.442695, %v1405_v52 }
 0x603   :  { %v1468_v3 = vsel %vm1347_vm9, %v4778_v30, 0.0 }
 0x604   :  { %3676 = vpow2.f32 %v1430_v2  ;;  %1469 = vadd.xlane.f32.xlu1 %v1468_v3 }
 0x607   :  { %v1380_v53 = vpop.xlane.xlu2 %1379 }
 0x608   :  { %v1406_v13 = vsub.f32 %v1341_v48, %v1380_v53  ;;  %v1230_v48 = vpop.f32.mrf.mxu0 }
 0x609   :  { %v4813_v41 = vmul.f32 0.17677669, %v1230_v48 }
 0x60a   :  { %v4782_v42 = vpop.eup %3676  ;;  %v1432_v37 = vmul.f32 1.442695, %v1406_v13 }
 0x60b   :  { %v1471_v11 = vsel %vm1347_vm9, %v4782_v42, 0.0  ;;  %v1348_v3 = vsel %vm1347_vm9, %v4813_v41, -inf }
 0x60c   :  { %3678 = vpow2.f32 %v1432_v37  ;;  %1472 = vadd.xlane.f32.xlu0 %v1471_v11 }
 0x60f   :  { %v1383_v7 = vpop.xlane.xlu1 %1382 }
 0x610   :  { %v1407_v62 = vsub.f32 %v1342_v27, %v1383_v7  ;;  %v1232_v59 = vpop.f32.mrf.mxu0 }
 0x612   :  { %v4786_v35 = vpop.eup %3678  ;;  %v1434_v47 = vmul.f32 1.442695, %v1407_v62 }
 0x613   :  { %v1474_v58 = vsel %vm1347_vm9, %v4786_v35, 0.0 }
 0x614   :  { %1475 = vadd.xlane.f32.xlu2 %v1474_v58 }
 0x617   :  { %v1386_v36 = vpop.xlane.xlu0 %1385 }
 0x618   :  { %v1408_v12 = vsub.f32 %v1343_v20, %v1386_v36  ;;  %v1235_v32 = vpop.f32.mrf.mxu0 }
 0x619   :  { %v4807_v20 = vmul.f32 0.17677669, %v1235_v32 }
 0x61a   :  { %v1436_v54 = vmul.f32 1.442695, %v1408_v12 }
 0x61b   :  { %v1354_v51 = vsel %vm1347_vm9, %v4807_v20, -inf }
 0x61d   :  { %1755 = vrot.lane.b32.xlu1 %v4684_v25, %s3902_s24 }
 0x61f   :  { %v1389_v4 = vpop.xlane.xlu1 %1388 }
 0x620   :  { %1692 = vrot.lane.b32.xlu0 %v4672_v9, %s3902_s24  ;;  %v1409_v33 = vsub.f32 %v1344_v29, %v1389_v4  ;;  %v1240_v29 = vpop.f32.mrf.mxu2  ;;  %v1237_v53 = vpop.f32.mrf.mxu0 }
 0x621   :  { %v4822_v11 = vmul.f32 0.17677669, %v1237_v53 }
 0x622   :  { %v1438_v46 = vmul.f32 1.442695, %v1409_v33 }
 0x623   :  { %v1357_v58 = vsel %vm1347_vm9, %v4822_v11, -inf }
 0x624   :  { %3680 = vpow2.f32 %v1438_v46 }
 0x625   :  { %3682 = vpow2.f32 %v1434_v47  ;;  %v4837_v47 = vmul.f32 0.17677669, %v1232_v59 }
 0x626   :  { %3684 = vpow2.f32 %v1436_v54 }
 0x627   :  { %v1392_v14 = vpop.xlane.xlu2 %1391 }
 0x628   :  { %v1242_v15 = vpop.f32.mrf.mxu2  ;;  %v1410_v2 = vsub.f32 %v4766_v55, %v1392_v14 }
 0x629   :  { %v4815_v52 = vmul.f32 0.17677669, %v1242_v15 }
 0x62a   :  { %v4797_v19 = vpop.eup %3680  ;;  %v1440_v13 = vmul.f32 1.442695, %v1410_v2 }
 0x62b   :  { %v4799_v61 = vpop.eup %3682  ;;  %v1483_v5 = vsel %vm1347_vm9, %v4797_v19, 0.0  ;;  %v1363_v37 = vsel %vm1347_vm9, %v4815_v52, -inf }
 0x62c   :  { %1761 = vrot.lane.b32.xlu2 %v4690_v0, %s3902_s24  ;;  %v1477_v27 = vsel %vm1347_vm9, %v4799_v61, 0.0  ;;  %v4805_v26 = vpop.eup %3684  ;;  %3686 = vpow2.f32 %v1440_v13 }
 0x62d   :  { %v1480_v44 = vsel %vm1347_vm9, %v4805_v26, 0.0 }
 0x62f   :  { %v1764_v39 = vpop.permute.xlu2 %1763 }
 0x630   :  { %v1784_v21 = vsel %vm1196_vm8, %v1764_v39, 0  ;;  %v1245_v7 = vpop.f32.mrf.mxu2 }
 0x631   :  { %1802 = vmatpush.bf16.xpose.msra.mxu3 %v1784_v21  ;;  %v4832_v39 = vmul.f32 0.17677669, %v1245_v7  ;;  %v1395_v21 = vpop.xlane.xlu1 %1394 }
 0x632   :  { %v4828_v55 = vpop.eup %3686 }
 0x633   :  { %v1486_v14 = vsel %vm1347_vm9, %v4828_v55, 0.0  ;;  %v1366_v4 = vsel %vm1347_vm9, %v4832_v39, -inf }
 0x637   :  { %v4852_v53 = vpop.permute.xlu2 %1757 }
 0x638   :  { %v1247_v59 = vpop.f32.mrf.mxu2 }
 0x647   :  { %1484 = vadd.xlane.f32.xlu1 %v1483_v5 }
 0x64a   :  { %1478 = vadd.xlane.f32.xlu0 %v1477_v27  ;;  %v1351_v27 = vsel %vm1347_vm9, %v4837_v47, -inf }
 0x652   :  { %1481 = vadd.xlane.f32.xlu0 %v1480_v44 }
 0x655   :  { %1355 = vmax.xlane.f32.xlu2 %v1354_v51  ;;  %v4842_v51 = vmul.f32 0.17677669, %v1240_v29 }
 0x65a   :  { %1349 = vmax.xlane.f32.xlu0 %v1348_v3 }
 0x65d   :  { %1364 = vmax.xlane.f32.xlu2 %v1363_v37 }
 0x660   :  { %1759 = vrot.lane.b32.xlu1 %v4680_v38, %s3902_s24 }
 0x662   :  { %1358 = vmax.xlane.f32.xlu0 %v1357_v58 }
 0x66a   :  { %1487 = vadd.xlane.f32.xlu0 %v1486_v14 }
 0x672   :  { %1367 = vmax.xlane.f32.xlu0 %v1366_v4  ;;  %v1735_v4 = vpop.f32.mrf.mxu1 }
 0x677   :  { %v1470_v33 = vpop.xlane.xlu1 %1469 }
 0x678   :  { %3688 = vrcp.f32 %v1470_v33 }
 0x67e   :  { %v3689_v48 = vpop.eup %3688 }
 0x67f   :  { %v1473_v62 = vpop.xlane.xlu0 %1472  ;;  %v1516_v46 = vmul.f32 %v3689_v48, %v4778_v30  ;;  %v1360_v30 = vsel %vm1347_vm9, %v4842_v51, -inf }
 0x680   :  { %3690 = vrcp.f32 %v1473_v62 }
 0x681   :  { %v1532_v12 = vpack.c.bf16 %v1516_v46, %v1516_v46 }
 0x683   :  { %v1621_v32 = vunpack.c.l.b16 %v1532_v12 }
 0x686   :  { %v3691_v36 = vpop.eup %3690 }
 0x687   :  { %v1517_v54 = vmul.f32 %v3691_v36, %v4782_v42  ;;  %v4848_v42 = vmul.f32 0.17677669, %v1247_v59  ;;  %v1476_v29 = vpop.xlane.xlu2 %1475  ;;  %v1411_v59 = vsub.f32 %v4770_v22, %v1395_v21 }
 0x688   :  { %3692 = vrcp.f32 %v1476_v29 }
 0x689   :  { %v1533_v5 = vpack.c.bf16 %v1517_v54, %v1517_v54  ;;  %v1369_v3 = vsel %vm1347_vm9, %v4848_v42, -inf  ;;  %v1442_v29 = vmul.f32 1.442695, %v1411_v59 }
 0x68a   :  { %1352 = vmax.xlane.f32.xlu1 %v1351_v27 }
 0x68b   :  { %v1622_v44 = vunpack.c.l.b16 %v1533_v5 }
 0x68d   :  { %v1629_v15 = vpack.c.b16 %v1622_v44, %v1621_v32 }
 0x68e   :  { %v3693_v58 = vpop.eup %3692 }
 0x68f   :  { %3428 = vmatmul.msk.bf16.vlgmr.msrb.gmra.mxu3 %vm1347_vm9, %v1629_v15  ;;  %v4856_v13 = vpop.permute.xlu1 %1755  ;;  %v1518_v14 = vmul.f32 %v3693_v58, %v4786_v35  ;;  %v1737_v15 = vpop.f32.mrf.mxu1 }
 0x691   :  { %v1534_v46 = vpack.c.bf16 %v1518_v14, %v1518_v14 }
 0x692   :  { %1361 = vmax.xlane.f32.xlu1 %v1360_v30  ;;  %v1693_v2 = vpop.permute.xlu0 %1692 }
 0x693   :  { %3435 = vmatmul.msk.bf16.gmra.mxu1 %vm1196_vm8, %v1693_v2  ;;  %v1623_v12 = vunpack.c.l.b16 %v1534_v46 }
 0x69a   :  { %1370 = vmax.xlane.f32.xlu1 %v1369_v3 }
 0x6b3   :  { %1566 = vrot.lane.b32.xlu1 %v4672_v9, %s3903_s25 }
 0x6ba   :  { %v1485_v33 = vpop.xlane.xlu1 %1484 }
 0x6bd   :  { %v1479_v37 = vpop.xlane.xlu0 %1478 }
 0x6be   :  { %3694 = vrcp.f32 %v1479_v37 }
 0x6c4   :  { %v3695_v7 = vpop.eup %3694 }
 0x6c5   :  { %v1482_v62 = vpop.xlane.xlu0 %1481  ;;  %v1519_v48 = vmul.f32 %v3695_v7, %v4799_v61 }
 0x6c6   :  { %3696 = vrcp.f32 %v1482_v62  ;;  %v4868_v62 = vmul.f32 0.17677669, %v1735_v4 }
 0x6c7   :  { %v1535_v36 = vpack.c.bf16 %v1519_v48, %v1519_v48  ;;  %3698 = vrcp.f32 %v1485_v33 }
 0x6c8   :  { %v1840_v48 = vsel %vm1347_vm9, %v4868_v62, -inf }
 0x6c9   :  { %v1624_v54 = vunpack.c.l.b16 %v1535_v36 }
 0x6cb   :  { %v1630_v5 = vpack.c.b16 %v1624_v54, %v1623_v12 }
 0x6cc   :  { %v3697_v27 = vpop.eup %3696 }
 0x6cd   :  { %3429 = vmatmul.msk.bf16.gmra.mxu3 %vm1347_vm9, %v1630_v5  ;;  %v1350_v32 = vpop.xlane.xlu0 %1349  ;;  %v3699_v44 = vpop.eup %3698  ;;  %v1520_v30 = vmul.f32 %v3697_v27, %v4805_v26 }
 0x6ce   :  { %v1396_v35 = vsub.f32 %v4813_v41, %v1350_v32  ;;  %v1521_v2 = vmul.f32 %v3699_v44, %v4797_v19  ;;  %v1740_v26 = vpop.f32.mrf.mxu1 }
 0x6cf   :  { %v1536_v3 = vpack.c.bf16 %v1520_v30, %v1520_v30 }
 0x6d0   :  { %v1412_v61 = vmul.f32 1.442695, %v1396_v35  ;;  %v1537_v58 = vpack.c.bf16 %v1521_v2, %v1521_v2 }
 0x6d1   :  { %v1625_v7 = vunpack.c.l.b16 %v1536_v3 }
 0x6d2   :  { %3700 = vpow2.f32 %v1412_v61  ;;  %v1626_v21 = vunpack.c.l.b16 %v1537_v58  ;;  %v4891_v35 = vpop.permute.xlu1 %1759 }
 0x6d3   :  { %3702 = vpow2.f32 %v1442_v29 }
 0x6d4   :  { %v1631_v19 = vpack.c.b16 %v1626_v21, %v1625_v7 }
 0x6d5   :  { %v1359_v37 = vpop.xlane.xlu0 %1358 }
 0x6d6   :  { %v1399_v14 = vsub.f32 %v4822_v11, %v1359_v37  ;;  %v1742_v36 = vpop.f32.mrf.mxu1 }
 0x6d7   :  { %v4883_v54 = vmul.f32 0.17677669, %v1742_v36 }
 0x6d8   :  { %v4866_v33 = vpop.eup %3700  ;;  %v1418_v41 = vmul.f32 1.442695, %v1399_v14 }
 0x6d9   :  { %v1444_v22 = vsel %vm1347_vm9, %v4866_v33, 0.0  ;;  %v4875_v11 = vpop.eup %3702  ;;  %v1849_v5 = vsel %vm1347_vm9, %v4883_v54, -inf }
 0x6da   :  { %1445 = vadd.xlane.f32.xlu2 %v1444_v22  ;;  %3704 = vpow2.f32 %v1418_v41  ;;  %v1489_v46 = vsel %vm1347_vm9, %v4875_v11, 0.0 }
 0x6dd   :  { %1841 = vmax.xlane.f32.xlu1 %v1840_v48  ;;  %3430 = vmatmul.msk.bf16.gmra.mxu3 %vm1347_vm9, %v1631_v19  ;;  %v4912_v48 = vmul.f32 0.17677669, %v1740_v26 }
 0x6de   :  { %v1745_v27 = vpop.f32.mrf.mxu1 }
 0x6df   :  { %v4887_v32 = vmul.f32 0.17677669, %v1745_v27 }
 0x6e0   :  { %v4877_v4 = vpop.eup %3704 }
 0x6e1   :  { %v1453_v12 = vsel %vm1347_vm9, %v4877_v4, 0.0  ;;  %v1852_v44 = vsel %vm1347_vm9, %v4887_v32, -inf }
 0x6e2   :  { %1490 = vadd.xlane.f32.xlu2 %v1489_v46 }
 0x6e5   :  { %1454 = vadd.xlane.f32.xlu1 %v1453_v12 }
 0x6e6   :  { %v1747_v12 = vpop.f32.mrf.mxu1 }
 0x6e7   :  { %v4924_v26 = vmul.f32 0.17677669, %v1747_v12 }
 0x6e9   :  { %v1855_v27 = vsel %vm1347_vm9, %v4924_v26, -inf }
 0x6ed   :  { %1850 = vmax.xlane.f32.xlu1 %v1849_v5 }
 0x6f5   :  { %1853 = vmax.xlane.f32.xlu1 %v1852_v44 }
 0x6fa   :  { %1564 = vrot.lane.b32.xlu2 %v4666_v31, %s3903_s25 }
 0x6fd   :  { %v1353_v30 = vpop.xlane.xlu1 %1352 }
 0x6fe   :  { %v1397_v59 = vsub.f32 %v4837_v47, %v1353_v30  ;;  %v4905_v47 = vmul.f32 0.17677669, %v1737_v15  ;;  %v1846_v15 = vsel %vm1347_vm9, %v4912_v48, -inf }
 0x700   :  { %v1414_v61 = vmul.f32 1.442695, %v1397_v59  ;;  %v1843_v21 = vsel %vm1347_vm9, %v4905_v47, -inf }
 0x702   :  { %3706 = vpow2.f32 %v1414_v61  ;;  %v1488_v61 = vpop.xlane.xlu0 %1487 }
 0x705   :  { %v1362_v2 = vpop.xlane.xlu1 %1361 }
 0x706   :  { %v1400_v22 = vsub.f32 %v4842_v51, %v1362_v2  ;;  %v4920_v51 = vpop.permute.xlu2 %1761 }
 0x708   :  { %v4896_v3 = vpop.eup %3706 }
 0x709   :  { %v1447_v29 = vsel %vm1347_vm9, %v4896_v3, 0.0 }
 0x70a   :  { %1448 = vadd.xlane.f32.xlu0 %v1447_v29 }
 0x70d   :  { %v1371_v37 = vpop.xlane.xlu1 %1370 }
 0x70e   :  { %v1403_v58 = vsub.f32 %v4848_v42, %v1371_v37  ;;  %v1420_v42 = vmul.f32 1.442695, %v1400_v22  ;;  %v1356_v5 = vpop.xlane.xlu2 %1355 }
 0x70f   :  { %v1398_v30 = vsub.f32 %v4807_v20, %v1356_v5 }
 0x710   :  { %v1426_v14 = vmul.f32 1.442695, %v1403_v58  ;;  %v1750_v44 = vpop.f32.mrf.mxu1 }
 0x711   :  { %v4929_v59 = vmul.f32 0.17677669, %v1750_v44  ;;  %v1416_v2 = vmul.f32 1.442695, %v1398_v30 }
 0x712   :  { %3708 = vpow2.f32 %v1426_v14  ;;  %v1368_v14 = vpop.xlane.xlu0 %1367 }
 0x713   :  { %3710 = vpow2.f32 %v1420_v42  ;;  %v1858_v29 = vsel %vm1347_vm9, %v4929_v59, -inf }
 0x714   :  { %3712 = vpow2.f32 %v1416_v2 }
 0x716   :  { %v1365_v37 = vpop.xlane.xlu2 %1364 }
 0x717   :  { %v1401_v58 = vsub.f32 %v4815_v52, %v1365_v37 }
 0x718   :  { %v4901_v7 = vpop.eup %3708 }
 0x719   :  { %v1465_v41 = vsel %vm1347_vm9, %v4901_v7, 0.0  ;;  %v4918_v46 = vpop.eup %3710 }
 0x71a   :  { %1466 = vadd.xlane.f32.xlu1 %v1465_v41  ;;  %v1456_v36 = vsel %vm1347_vm9, %v4918_v46, 0.0  ;;  %v1422_v41 = vmul.f32 1.442695, %v1401_v58  ;;  %v4934_v22 = vpop.eup %3712 }
 0x71b   :  { %v1450_v20 = vsel %vm1347_vm9, %v4934_v22, 0.0 }
 0x71c   :  { %3714 = vpow2.f32 %v1422_v41 }
 0x71d   :  { %3716 = vrcp.f32 %v1488_v61 }
 0x71e   :  { %1562 = vrot.lane.b32.xlu0 %v4676_v18, %s3903_s25 }
 0x722   :  { %v4940_v5 = vpop.eup %3714 }
 0x723   :  { %1844 = vmax.xlane.f32.xlu2 %v1843_v21  ;;  %v1402_v21 = vsub.f32 %v4832_v39, %v1368_v14  ;;  %v1459_v39 = vsel %vm1347_vm9, %v4940_v5, 0.0 }
 0x725   :  { %v1567_v19 = vpop.permute.xlu1 %1566 }
 0x726   :  { %1588 = vmatpush.bf16.msrb.mxu2 %v1567_v19  ;;  %1560 = vrot.lane.b32.xlu0 %v4696_v17, %s3903_s25  ;;  %v1424_v19 = vmul.f32 1.442695, %v1402_v21  ;;  %v1752_v21 = vpop.f32.mrf.mxu1 }
 0x728   :  { %3718 = vpow2.f32 %v1424_v19  ;;  %v4954_v19 = vmul.f32 0.17677669, %v1752_v21 }
 0x72b   :  { %1847 = vmax.xlane.f32.xlu2 %v1846_v15 }
 0x733   :  { %1457 = vadd.xlane.f32.xlu2 %v1456_v36 }
 0x73b   :  { %1856 = vmax.xlane.f32.xlu2 %v1855_v27  ;;  %v3717_v27 = vpop.eup %3716 }
 0x73c   :  { %v1522_v44 = vmul.f32 %v3717_v27, %v4828_v55  ;;  %v4945_v30 = vpop.eup %3718 }
 0x73d   :  { %v1462_v14 = vsel %vm1347_vm9, %v4945_v30, 0.0 }
 0x73e   :  { %v1538_v58 = vpack.c.bf16 %v1522_v44, %v1522_v44 }
 0x740   :  { %v1627_v55 = vunpack.c.l.b16 %v1538_v58 }
 0x743   :  { %1859 = vmax.xlane.f32.xlu2 %v1858_v29 }
 0x74d   :  { %v1446_v42 = vpop.xlane.xlu2 %1445 }
 0x750   :  { %v1842_v15 = vpop.xlane.xlu1 %1841  ;;  %1451 = vadd.xlane.f32.xlu0 %v1450_v20 }
 0x751   :  { %v1888_v36 = vsub.f32 %v4868_v62, %v1842_v15 }
 0x753   :  { %v1904_v12 = vmul.f32 1.442695, %v1888_v36  ;;  %v1861_v36 = vsel %vm1347_vm9, %v4954_v19, -inf }
 0x755   :  { %3720 = vpow2.f32 %v1904_v12  ;;  %v1491_v52 = vpop.xlane.xlu2 %1490 }
 0x756   :  { %3722 = vrcp.f32 %v1491_v52 }
 0x758   :  { %1460 = vadd.xlane.f32.xlu0 %v1459_v39  ;;  %v1455_v12 = vpop.xlane.xlu1 %1454 }
 0x75b   :  { %v4947_v61 = vpop.eup %3720 }
 0x75c   :  { %v3723_v2 = vpop.eup %3722  ;;  %v1936_v62 = vsel %vm1347_vm9, %v4947_v61, 0.0 }
 0x75d   :  { %v1565_v29 = vpop.permute.xlu2 %1564  ;;  %1937 = vadd.xlane.f32.xlu1 %v1936_v62  ;;  %v1523_v37 = vmul.f32 %v3723_v2, %v4875_v11 }
 0x75e   :  { %1589 = vmatpush.bf16.msrb.mxu2 %v1565_v29 }
 0x75f   :  { %v1539_v41 = vpack.c.bf16 %v1523_v37, %v1523_v37 }
 0x760   :  { %1463 = vadd.xlane.f32.xlu0 %v1462_v14  ;;  %v1851_v39 = vpop.xlane.xlu1 %1850 }
 0x761   :  { %v1628_v20 = vunpack.c.l.b16 %v1539_v41 }
 0x763   :  { %v1632_v15 = vpack.c.b16 %v1628_v20, %v1627_v55 }
 0x765   :  { %3431 = vmatmul.msk.bf16.gmra.mxu3 %vm1347_vm9, %v1632_v15 }
 0x768   :  { %1862 = vmax.xlane.f32.xlu0 %v1861_v36 }
 0x775   :  { %3436 = vmatmul.msk.bf16.vlgmr.msra.gmra.mxu3 %vm1196_vm8, %v4856_v13 }
 0x776   :  { %2056 = vrot.lane.b32.xlu1 %v4666_v31, %s3904_s27 }
 0x77c   :  { %2058 = vrot.lane.b32.xlu0 %v4672_v9, %s3904_s27 }
 0x77d   :  { %v1449_v11 = vpop.xlane.xlu0 %1448 }
 0x77e   :  { %2052 = vrot.lane.b32.xlu1 %v4696_v17, %s3904_s27  ;;  %3724 = vrcp.f32 %v1449_v11  ;;  %v1891_v17 = vsub.f32 %v4883_v54, %v1851_v39 }
 0x77f   :  { %3726 = vrcp.f32 %v1446_v42 }
 0x780   :  { %v1910_v37 = vmul.f32 1.442695, %v1891_v17 }
 0x784   :  { %v3725_v52 = vpop.eup %3724 }
 0x785   :  { %3437 = vmatmul.msk.bf16.gmra.mxu3 %vm1196_vm8, %v4852_v53  ;;  %v3727_v27 = vpop.eup %3726  ;;  %v1509_v13 = vmul.f32 %v3725_v52, %v4896_v3  ;;  %v1854_v3 = vpop.xlane.xlu1 %1853 }
 0x786   :  { %v1508_v31 = vmul.f32 %v3727_v27, %v4866_v33  ;;  %v1892_v41 = vsub.f32 %v4887_v32, %v1854_v3  ;;  %v4996_v27 = vpop.f32.mrf.mxu3 }
 0x787   :  { %v1525_v9 = vpack.c.bf16 %v1509_v13, %v1509_v13 }
 0x788   :  { %v1524_v2 = vpack.c.bf16 %v1508_v31, %v1508_v31  ;;  %v1912_v21 = vmul.f32 1.442695, %v1892_v41 }
 0x789   :  { %v1549_v62 = vunpack.c.l.b16 %v1525_v9 }
 0x78a   :  { %v1548_v42 = vunpack.c.l.b16 %v1524_v2 }
 0x78c   :  { %v1556_v33 = vpack.c.b16 %v1549_v62, %v1548_v42 }
 0x78e   :  { %v4998_v13 = vpop.f32.mrf.mxu3 }
 0x790   :  { %v1563_v44 = vpop.permute.xlu0 %1562 }
 0x791   :  { %1590 = vmatpush.bf16.msrb.mxu2 %v1563_v44 }
 0x795   :  { %3438 = vmatmul.msk.bf16.gmra.mxu3 %vm1196_vm8, %v4891_v35 }
 0x796   :  { %v1845_v29 = vpop.xlane.xlu2 %1844 }
 0x797   :  { %v1889_v53 = vsub.f32 %v4905_v47, %v1845_v29 }
 0x798   :  { %v1561_v58 = vpop.permute.xlu0 %1560 }
 0x799   :  { %v1906_v14 = vmul.f32 1.442695, %v1889_v53  ;;  %1591 = vmatpush.bf16.msrb.mxu2 %v1561_v58 }
 0x79b   :  { %3728 = vpow2.f32 %v1906_v14 }
 0x79c   :  { %3730 = vpow2.f32 %v1910_v37  ;;  %3424 = vmatmul.msk.bf16.vlgmr.msrb.gmra.mxu2 %vm1347_vm9, %v1556_v33 }
 0x79e   :  { %v1848_v54 = vpop.xlane.xlu2 %1847 }
 0x79f   :  { %v1890_v35 = vsub.f32 %v4912_v48, %v1848_v54 }
 0x7a1   :  { %v4978_v55 = vpop.eup %3728  ;;  %v1908_v47 = vmul.f32 1.442695, %v1890_v35 }
 0x7a2   :  { %v4980_v20 = vpop.eup %3730  ;;  %v1939_v15 = vsel %vm1347_vm9, %v4978_v55, 0.0 }
 0x7a3   :  { %3732 = vpow2.f32 %v1908_v47  ;;  %1940 = vadd.xlane.f32.xlu2 %v1939_v15  ;;  %v1945_v32 = vsel %vm1347_vm9, %v4980_v20, 0.0 }
 0x7a4   :  { %3734 = vpow2.f32 %v1912_v21 }
 0x7a5   :  { %3439 = vmatmul.msk.bf16.gmra.mxu3 %vm1196_vm8, %v4920_v51  ;;  %3736 = vrcp.f32 %v1455_v12  ;;  %v5002_v51 = vpop.f32.mrf.mxu3 }
 0x7a6   :  { %1946 = vadd.xlane.f32.xlu0 %v1945_v32  ;;  %v1458_v39 = vpop.xlane.xlu2 %1457  ;;  %v1467_v32 = vpop.xlane.xlu1 %1466 }
 0x7a9   :  { %v4988_v48 = vpop.eup %3732 }
 0x7aa   :  { %v4990_v36 = vpop.eup %3734  ;;  %v1942_v11 = vsel %vm1347_vm9, %v4988_v48, 0.0 }
 0x7ab   :  { %1943 = vadd.xlane.f32.xlu1 %v1942_v11  ;;  %v1948_v52 = vsel %vm1347_vm9, %v4990_v36, 0.0  ;;  %v3737_v44 = vpop.eup %3736 }
 0x7ac   :  { %v1511_v9 = vmul.f32 %v3737_v44, %v4877_v4 }
 0x7ad   :  { %v5006_v53 = vpop.f32.mrf.mxu3 }
 0x7ae   :  { %1949 = vadd.xlane.f32.xlu0 %v1948_v52  ;;  %v1527_v29 = vpack.c.bf16 %v1511_v9, %v1511_v9  ;;  %v1857_v42 = vpop.xlane.xlu2 %1856 }
 0x7af   :  { %v1893_v14 = vsub.f32 %v4924_v26, %v1857_v42 }
 0x7b0   :  { %v1551_v12 = vunpack.c.l.b16 %v1527_v29 }
 0x7b1   :  { %v1914_v54 = vmul.f32 1.442695, %v1893_v14 }
 0x7b6   :  { %v1860_v35 = vpop.xlane.xlu2 %1859 }
 0x7b7   :  { %v1894_v15 = vsub.f32 %v4929_v59, %v1860_v35 }
 0x7bb   :  { %2054 = vrot.lane.b32.xlu2 %v4676_v18, %s3904_s27 }
 0x7c3   :  { %v1452_v31 = vpop.xlane.xlu0 %1451 }
 0x7c4   :  { %3738 = vrcp.f32 %v1452_v31  ;;  %v1916_v31 = vmul.f32 1.442695, %v1894_v15 }
 0x7ca   :  { %v3739_v2 = vpop.eup %3738 }
 0x7cb   :  { %v1461_v17 = vpop.xlane.xlu0 %1460  ;;  %v1510_v62 = vmul.f32 %v3739_v2, %v4934_v22  ;;  %v5011_v22 = vpop.f32.mrf.mxu3 }
 0x7cc   :  { %3740 = vrcp.f32 %v1461_v17 }
 0x7cd   :  { %v1526_v37 = vpack.c.bf16 %v1510_v62, %v1510_v62  ;;  %3742 = vrcp.f32 %v1458_v39 }
 0x7ce   :  { %3744 = vpow2.f32 %v1914_v54 }
 0x7cf   :  { %v1550_v18 = vunpack.c.l.b16 %v1526_v37 }
 0x7d1   :  { %v1557_v58 = vpack.c.b16 %v1551_v12, %v1550_v18 }
 0x7d2   :  { %v3741_v3 = vpop.eup %3740 }
 0x7d3   :  { %3425 = vmatmul.msk.bf16.gmra.mxu2 %vm1347_vm9, %v1557_v58  ;;  %v1464_v4 = vpop.xlane.xlu0 %1463  ;;  %v3743_v33 = vpop.eup %3742  ;;  %v1513_v41 = vmul.f32 %v3741_v3, %v4940_v5 }
 0x7d4   :  { %v1512_v21 = vmul.f32 %v3743_v33, %v4918_v46  ;;  %3746 = vrcp.f32 %v1464_v4  ;;  %v5016_v9 = vpop.eup %3744  ;;  %v5018_v2 = vpop.f32.mrf.mxu3 }
 0x7d5   :  { %v1529_v47 = vpack.c.bf16 %v1513_v41, %v1513_v41  ;;  %3748 = vrcp.f32 %v1467_v32  ;;  %v1951_v59 = vsel %vm1347_vm9, %v5016_v9, 0.0  ;;  %v1938_v3 = vpop.xlane.xlu1 %1937 }
 0x7d6   :  { %v1528_v52 = vpack.c.bf16 %v1512_v21, %v1512_v21 }
 0x7d7   :  { %v1553_v39 = vunpack.c.l.b16 %v1529_v47 }
 0x7d8   :  { %v1552_v44 = vunpack.c.l.b16 %v1528_v52 }
 0x7da   :  { %v1558_v46 = vpack.c.b16 %v1553_v39, %v1552_v44  ;;  %v3747_v17 = vpop.eup %3746 }
 0x7db   :  { %v1863_v11 = vpop.xlane.xlu0 %1862  ;;  %v3749_v62 = vpop.eup %3748 }
 0x7dc   :  { %v1895_v26 = vsub.f32 %v4954_v19, %v1863_v11  ;;  %v1514_v19 = vmul.f32 %v3747_v17, %v4945_v30  ;;  %v1515_v37 = vmul.f32 %v3749_v62, %v4901_v7 }
 0x7de   :  { %v1918_v5 = vmul.f32 1.442695, %v1895_v26  ;;  %v1530_v58 = vpack.c.bf16 %v1514_v19, %v1514_v19  ;;  %v1531_v4 = vpack.c.bf16 %v1515_v37, %v1515_v37 }
 0x7e0   :  { %3750 = vpow2.f32 %v1918_v5  ;;  %v1554_v30 = vunpack.c.l.b16 %v1530_v58  ;;  %v1555_v41 = vunpack.c.l.b16 %v1531_v4 }
 0x7e1   :  { %3752 = vpow2.f32 %v1916_v31 }
 0x7e2   :  { %v1559_v35 = vpack.c.b16 %v1555_v41, %v1554_v30  ;;  %3754 = vrcp.f32 %v1938_v3 }
 0x7e3   :  { %3426 = vmatmul.msk.bf16.gmra.mxu2 %vm1347_vm9, %v1558_v46 }
 0x7e4   :  { %1952 = vadd.xlane.f32.xlu2 %v1951_v59 }
 0x7e6   :  { %v5024_v29 = vpop.eup %3750 }
 0x7e7   :  { %v1957_v42 = vsel %vm1347_vm9, %v5024_v29, 0.0  ;;  %v5029_v18 = vpop.eup %3752 }
 0x7e8   :  { %v5031_v12 = vpop.f32.mrf.mxu3  ;;  %1958 = vadd.xlane.f32.xlu1 %v1957_v42  ;;  %v1954_v14 = vsel %vm1347_vm9, %v5029_v18, 0.0  ;;  %v2057_v7 = vpop.permute.xlu1 %2056 }
 0x7e9   :  { %v3755_v17 = vpop.eup %3754 }
 0x7ea   :  { %v2000_v19 = vmul.f32 %v3755_v17, %v4947_v61 }
 0x7ec   :  { %1955 = vadd.xlane.f32.xlu2 %v1954_v14  ;;  %v2016_v14 = vpack.c.bf16 %v2000_v19, %v2000_v19 }
 0x7ee   :  { %v2059_v33 = vpop.permute.xlu0 %2058 }
 0x7ef   :  { %2080 = vmatpush.bf16.msra.mxu2 %v2059_v33 }
 0x7f0   :  { %v5035_v54 = vpop.f32.mrf.mxu3  ;;  %v2053_v44 = vpop.permute.xlu1 %2052 }
 0x7f3   :  { %3427 = vmatmul.msk.bf16.gmra.mxu2 %vm1347_vm9, %v1559_v35  ;;  %v2040_v35 = vunpack.c.l.b16 %v2016_v14 }
 0x7f4   :  { %2081 = vmatpush.bf16.msra.mxu2 %v2057_v7 }
 0x7f8   :  { %v1804_v21 = vpop.f32.mrf.mxu3 }
 0x7f9   :  { %v5038_v47 = vmul.f32 0.17677669, %v1804_v21 }
 0x7fb   :  { %v1864_v15 = vsel %vm1347_vm9, %v5038_v47, -inf }
 0x7fc   :  { %1865 = vmax.xlane.f32.xlu0 %v1864_v15 }
 0x800   :  { %v1806_v32 = vpop.f32.mrf.mxu3 }
 0x801   :  { %v5042_v11 = vmul.f32 0.17677669, %v1806_v32 }
 0x803   :  { %v1867_v52 = vsel %vm1347_vm9, %v5042_v11, -inf }
 0x804   :  { %1868 = vmax.xlane.f32.xlu2 %v1867_v52 }
 0x808   :  { %v1809_v26 = vpop.f32.mrf.mxu3 }
 0x809   :  { %v5046_v39 = vmul.f32 0.17677669, %v1809_v26 }
 0x80b   :  { %v1870_v31 = vsel %vm1347_vm9, %v5046_v39, -inf }
 0x80c   :  { %1871 = vmax.xlane.f32.xlu0 %v1870_v31 }
 0x810   :  { %v1811_v5 = vpop.f32.mrf.mxu3 }
 0x816   :  { %v1941_v46 = vpop.xlane.xlu2 %1940 }
 0x817   :  { %3756 = vrcp.f32 %v1941_v46 }
 0x818   :  { %v1814_v59 = vpop.f32.mrf.mxu3 }
 0x819   :  { %v5050_v62 = vmul.f32 0.17677669, %v1814_v59  ;;  %v1947_v58 = vpop.xlane.xlu0 %1946 }
 0x81b   :  { %v1876_v42 = vsel %vm1347_vm9, %v5050_v62, -inf }
 0x81c   :  { %2131 = vrot.lane.b32.xlu2 %v4690_v0, %s3904_s27  ;;  %1877 = vmax.xlane.f32.xlu1 %v1876_v42 }
 0x81d   :  { %v3757_v37 = vpop.eup %3756 }
 0x81e   :  { %v2001_v3 = vmul.f32 %v3757_v37, %v4978_v55  ;;  %v2055_v4 = vpop.permute.xlu2 %2054  ;;  %v1944_v30 = vpop.xlane.xlu1 %1943  ;;  %v5070_v37 = vmul.f32 0.17677669, %v1811_v5 }
 0x81f   :  { %3758 = vrcp.f32 %v1944_v30  ;;  %2082 = vmatpush.bf16.msra.mxu2 %v2055_v4 }
 0x820   :  { %v2017_v33 = vpack.c.bf16 %v2001_v3, %v2001_v3  ;;  %v1816_v41 = vpop.f32.mrf.mxu3  ;;  %3760 = vrcp.f32 %v1947_v58 }
 0x821   :  { %v5058_v61 = vmul.f32 0.17677669, %v1816_v41  ;;  %v1950_v3 = vpop.xlane.xlu0 %1949 }
 0x822   :  { %v2041_v7 = vunpack.c.l.b16 %v2017_v33  ;;  %3762 = vrcp.f32 %v1950_v3 }
 0x823   :  { %2083 = vmatpush.bf16.msra.mxu2 %v2053_v44  ;;  %v1879_v0 = vsel %vm1347_vm9, %v5058_v61, -inf }
 0x824   :  { %v2048_v21 = vpack.c.b16 %v2041_v7, %v2040_v35  ;;  %1880 = vmax.xlane.f32.xlu0 %v1879_v0 }
 0x825   :  { %v3759_v15 = vpop.eup %3758 }
 0x826   :  { %3440 = vmatmul.msk.bf16.vlgmr.msra.gmra.mxu2 %vm1347_vm9, %v2048_v21  ;;  %v3761_v55 = vpop.eup %3760  ;;  %v2002_v52 = vmul.f32 %v3759_v15, %v4988_v48  ;;  %v1873_v48 = vsel %vm1347_vm9, %v5070_v37, -inf }
 0x827   :  { %v2003_v31 = vmul.f32 %v3761_v55, %v4980_v20 }
 0x828   :  { %v1819_v32 = vpop.f32.mrf.mxu3  ;;  %v2018_v44 = vpack.c.bf16 %v2002_v52, %v2002_v52  ;;  %v3763_v30 = vpop.eup %3762 }
 0x829   :  { %v5064_v26 = vmul.f32 0.17677669, %v1819_v32  ;;  %v2019_v17 = vpack.c.bf16 %v2003_v31, %v2003_v31  ;;  %v2004_v33 = vmul.f32 %v3763_v30, %v4990_v36 }
 0x82a   :  { %v2042_v59 = vunpack.c.l.b16 %v2018_v44 }
 0x82b   :  { %v1882_v46 = vsel %vm1347_vm9, %v5064_v26, -inf  ;;  %v2043_v19 = vunpack.c.l.b16 %v2019_v17  ;;  %v2020_v0 = vpack.c.bf16 %v2004_v33, %v2004_v33 }
 0x82c   :  { %1883 = vmax.xlane.f32.xlu0 %v1882_v46 }
 0x82d   :  { %v2049_v42 = vpack.c.b16 %v2043_v19, %v2042_v59  ;;  %v2044_v15 = vunpack.c.l.b16 %v2020_v0 }
 0x830   :  { %v1821_v58 = vpop.f32.mrf.mxu3 }
 0x831   :  { %v5074_v14 = vmul.f32 0.17677669, %v1821_v58 }
 0x833   :  { %v1885_v20 = vsel %vm1347_vm9, %v5074_v14, -inf }
 0x836   :  { %3441 = vmatmul.msk.bf16.gmra.mxu2 %vm1347_vm9, %v2049_v42 }
 0x845   :  { %1874 = vmax.xlane.f32.xlu2 %v1873_v48 }
 0x84d   :  { %1886 = vmax.xlane.f32.xlu2 %v1885_v20 }
 0x857   :  { %v1953_v4 = vpop.xlane.xlu2 %1952 }
 0x858   :  { %3764 = vrcp.f32 %v1953_v4 }
 0x85b   :  { %v1959_v41 = vpop.xlane.xlu1 %1958 }
 0x85e   :  { %v3765_v5 = vpop.eup %3764 }
 0x85f   :  { %v1956_v35 = vpop.xlane.xlu2 %1955  ;;  %v2005_v7 = vmul.f32 %v3765_v5, %v5016_v9 }
 0x860   :  { %3766 = vrcp.f32 %v1956_v35 }
 0x861   :  { %v2021_v21 = vpack.c.bf16 %v2005_v7, %v2005_v7  ;;  %3768 = vrcp.f32 %v1959_v41 }
 0x863   :  { %v2045_v55 = vunpack.c.l.b16 %v2021_v21 }
 0x865   :  { %2125 = vrot.lane.b32.xlu2 %v4684_v25, %s3904_s27  ;;  %v2050_v32 = vpack.c.b16 %v2045_v55, %v2044_v15  ;;  %v5086_v25 = vpop.f32.mrf.mxu2 }
 0x866   :  { %v3767_v52 = vpop.eup %3766 }
 0x867   :  { %3442 = vmatmul.msk.bf16.gmra.mxu2 %vm1347_vm9, %v2050_v32  ;;  %v3769_v31 = vpop.eup %3768  ;;  %v2006_v36 = vmul.f32 %v3767_v52, %v5029_v18 }
 0x868   :  { %v2007_v46 = vmul.f32 %v3769_v31, %v5024_v29 }
 0x869   :  { %v2022_v44 = vpack.c.bf16 %v2006_v36, %v2006_v36 }
 0x86a   :  { %v2023_v17 = vpack.c.bf16 %v2007_v46, %v2007_v46 }
 0x86b   :  { %v2046_v19 = vunpack.c.l.b16 %v2022_v44 }
 0x86c   :  { %v2047_v48 = vunpack.c.l.b16 %v2023_v17 }
 0x86d   :  { %v5094_v30 = vpop.f32.mrf.mxu2 }
 0x86e   :  { %v2051_v58 = vpack.c.b16 %v2047_v48, %v2046_v19 }
 0x86f   :  { %v1866_v9 = vpop.xlane.xlu0 %1865 }
 0x870   :  { %v1896_v59 = vsub.f32 %v5038_v47, %v1866_v9 }
 0x872   :  { %v1920_v42 = vmul.f32 1.442695, %v1896_v59 }
 0x874   :  { %3770 = vpow2.f32 %v1920_v42 }
 0x875   :  { %v5100_v41 = vpop.f32.mrf.mxu2 }
 0x877   :  { %v1869_v20 = vpop.xlane.xlu2 %1868  ;;  %3443 = vmatmul.msk.bf16.gmra.mxu2 %vm1347_vm9, %v2051_v58 }
 0x878   :  { %v1897_v3 = vsub.f32 %v5042_v11, %v1869_v20 }
 0x87a   :  { %v5090_v18 = vpop.eup %3770  ;;  %v1922_v29 = vmul.f32 1.442695, %v1897_v3 }
 0x87b   :  { %v1960_v4 = vsel %vm1347_vm9, %v5090_v18, 0.0 }
 0x87c   :  { %3772 = vpow2.f32 %v1922_v29  ;;  %1961 = vadd.xlane.f32.xlu1 %v1960_v4 }
 0x87d   :  { %v5103_v0 = vpop.f32.mrf.mxu2 }
 0x87f   :  { %v2132_v47 = vpop.permute.xlu2 %2131  ;;  %v1872_v32 = vpop.xlane.xlu0 %1871 }
 0x880   :  { %2153 = vmatpush.bf16.msrb.mxu3 %v2132_v47  ;;  %v1898_v31 = vsub.f32 %v5046_v39, %v1872_v32 }
 0x882   :  { %v5096_v33 = vpop.eup %3772 }
 0x883   :  { %v1963_v5 = vsel %vm1347_vm9, %v5096_v33, 0.0 }
 0x884   :  { %1964 = vadd.xlane.f32.xlu0 %v1963_v5 }
 0x885   :  { %v5113_v55 = vpop.f32.mrf.mxu2 }
 0x88f   :  { %v1878_v11 = vpop.xlane.xlu1 %1877 }
 0x890   :  { %v1900_v35 = vsub.f32 %v5050_v62, %v1878_v11  ;;  %v5115_v62 = vpop.f32.mrf.mxu2 }
 0x892   :  { %v1928_v7 = vmul.f32 1.442695, %v1900_v35 }
 0x894   :  { %3774 = vpow2.f32 %v1928_v7 }
 0x895   :  { %2129 = vrot.lane.b32.xlu1 %v4680_v38, %s3904_s27  ;;  %v1924_v38 = vmul.f32 1.442695, %v1898_v31 }
 0x897   :  { %v1881_v52 = vpop.xlane.xlu0 %1880  ;;  %3776 = vpow2.f32 %v1924_v38 }
 0x898   :  { %2127 = vrot.lane.b32.xlu0 %v4662_v6, %s3904_s27  ;;  %v5118_v36 = vpop.f32.mrf.mxu2  ;;  %v1901_v6 = vsub.f32 %v5058_v61, %v1881_v52 }
 0x89a   :  { %v5109_v21 = vpop.eup %3774  ;;  %v1930_v42 = vmul.f32 1.442695, %v1901_v6 }
 0x89b   :  { %v1972_v15 = vsel %vm1347_vm9, %v5109_v21, 0.0 }
 0x89c   :  { %1973 = vadd.xlane.f32.xlu2 %v1972_v15 }
 0x89d   :  { %v5125_v48 = vpop.eup %3776 }
 0x89e   :  { %v1966_v61 = vsel %vm1347_vm9, %v5125_v48, 0.0 }
 0x89f   :  { %v1884_v46 = vpop.xlane.xlu0 %1883 }
 0x8a0   :  { %v5122_v17 = vpop.f32.mrf.mxu2  ;;  %v1902_v59 = vsub.f32 %v5064_v26, %v1884_v46 }
 0x8a2   :  { %v1932_v39 = vmul.f32 1.442695, %v1902_v59 }
 0x8b8   :  { %v1875_v44 = vpop.xlane.xlu2 %1874 }
 0x8b9   :  { %v1899_v9 = vsub.f32 %v5070_v37, %v1875_v44  ;;  %v2085_v37 = vpop.f32.mrf.mxu2 }
 0x8bb   :  { %v1926_v19 = vmul.f32 1.442695, %v1899_v9 }
 0x8bd   :  { %3778 = vpow2.f32 %v1926_v19 }
 0x8be   :  { %3780 = vpow2.f32 %v1930_v42 }
 0x8bf   :  { %3782 = vpow2.f32 %v1932_v39 }
 0x8c0   :  { %v1887_v58 = vpop.xlane.xlu2 %1886 }
 0x8c1   :  { %v1903_v20 = vsub.f32 %v5074_v14, %v1887_v58  ;;  %v2087_v7 = vpop.f32.mrf.mxu2 }
 0x8c2   :  { %1967 = vadd.xlane.f32.xlu0 %v1966_v61  ;;  %v3557_v32 = vpack.i.bf16 %v2087_v7, %v2085_v37 }
 0x8c3   :  { %v5130_v3 = vpop.eup %3778  ;;  %v1934_v29 = vmul.f32 1.442695, %v1903_v20 }
 0x8c4   :  { %v1969_v26 = vsel %vm1347_vm9, %v5130_v3, 0.0  ;;  %v5134_v4 = vpop.eup %3780 }
 0x8c5   :  { %3784 = vpow2.f32 %v1934_v29  ;;  %1970 = vadd.xlane.f32.xlu1 %v1969_v26  ;;  %v5136_v47 = vpop.eup %3782  ;;  %v1975_v14 = vsel %vm1347_vm9, %v5134_v4, 0.0 }
 0x8c6   :  { %v1978_v35 = vsel %vm1347_vm9, %v5136_v47, 0.0 }
 0x8c9   :  { %v2090_v15 = vpop.f32.mrf.mxu2 }
 0x8ca   :  { %1976 = vadd.xlane.f32.xlu0 %v1975_v14 }
 0x8cb   :  { %v5140_v5 = vpop.eup %3784 }
 0x8cc   :  { %v1981_v11 = vsel %vm1347_vm9, %v5140_v5, 0.0 }
 0x8cd   :  { %1982 = vadd.xlane.f32.xlu2 %v1981_v11  ;;  %1979 = vadd.xlane.f32.xlu1 %v1978_v35  ;;  %v2126_v35 = vpop.permute.xlu2 %2125 }
 0x8d1   :  { %v2092_v52 = vpop.f32.mrf.mxu2 }
 0x8d2   :  { %v3562_v31 = vpack.i.bf16 %v2092_v52, %v2090_v15 }
 0x8de   :  { %3558 = vrot.lane.b32.xlu0 %v3557_v32, %s3905_s28 }
 0x8e6   :  { %3563 = vrot.lane.b32.xlu1 %v3562_v31, %s3905_s28 }
 0x8ea   :  { %v2095_v38 = vpop.f32.mrf.mxu2 }
 0x8ef   :  { %v1962_v59 = vpop.xlane.xlu1 %1961 }
 0x8f2   :  { %v2097_v6 = vpop.f32.mrf.mxu2 }
 0x8f3   :  { %v3567_v46 = vpack.i.bf16 %v2097_v6, %v2095_v38 }
 0x8f5   :  { %3568 = vrot.lane.b32.xlu2 %v3567_v46, %s3905_s28 }
 0x8f7   :  { %v1965_v44 = vpop.xlane.xlu0 %1964 }
 0x8f8   :  { %3786 = vrcp.f32 %v1965_v44 }
 0x8f9   :  { %3788 = vrcp.f32 %v1962_v59 }
 0x8fa   :  { %v2100_v9 = vpop.f32.mrf.mxu2 }
 0x8fe   :  { %v3787_v19 = vpop.eup %3786 }
 0x8ff   :  { %v3789_v58 = vpop.eup %3788  ;;  %v2009_v20 = vmul.f32 %v3787_v19, %v5096_v33  ;;  %v3539_v33 = vld [vmem:[%s5809_s9 + $0x8] sm:$0xff] }
 0x900   :  { %v2008_v61 = vmul.f32 %v3789_v58, %v5090_v18  ;;  %2311 = vmatpush.bf16.msra.mxu1 %v3539_v33  ;;  %v3538_v18 = vld [vmem:[%s5809_s9] sm:$0xff] }
 0x901   :  { %v2025_v29 = vpack.c.bf16 %v2009_v20, %v2009_v20 }
 0x902   :  { %v2102_v42 = vpop.f32.mrf.mxu2  ;;  %v2024_v14 = vpack.c.bf16 %v2008_v61, %v2008_v61 }
 0x903   :  { %v3572_v39 = vpack.i.bf16 %v2102_v42, %v2100_v9  ;;  %v2114_v11 = vunpack.c.l.b16 %v2025_v29 }
 0x904   :  { %v2113_v7 = vunpack.c.l.b16 %v2024_v14  ;;  %2312 = vmatpush.bf16.msra.mxu1 %v3538_v18 }
 0x905   :  { %3573 = vrot.lane.b32.xlu0 %v3572_v39, %s3905_s28 }
 0x906   :  { %v2121_v15 = vpack.c.b16 %v2114_v11, %v2113_v7 }
 0x907   :  { %v2130_v37 = vpop.permute.xlu1 %2129 }
 0x908   :  { %2154 = vmatpush.bf16.msrb.mxu3 %v2130_v37 }
 0x90a   :  { %v2128_v26 = vpop.permute.xlu0 %2127 }
 0x90c   :  { %2155 = vmatpush.bf16.msrb.mxu3 %v2128_v26 }
 0x90f   :  { %v1974_v44 = vpop.xlane.xlu2 %1973 }
 0x910   :  { %2156 = vmatpush.bf16.msrb.mxu3 %v2126_v35 }
 0x913   :  { %3444 = vmatmul.msk.bf16.vlgmr.msrb.gmra.mxu3 %vm1347_vm9, %v2121_v15 }
 0x935   :  { %v1968_v32 = vpop.xlane.xlu0 %1967 }
 0x936   :  { %3790 = vrcp.f32 %v1968_v32 }
 0x938   :  { %v1971_v52 = vpop.xlane.xlu1 %1970 }
 0x939   :  { %3792 = vrcp.f32 %v1971_v52 }
 0x93c   :  { %v3791_v31 = vpop.eup %3790 }
 0x93d   :  { %v2010_v38 = vmul.f32 %v3791_v31, %v5125_v48  ;;  %v1977_v6 = vpop.xlane.xlu0 %1976 }
 0x93e   :  { %3794 = vrcp.f32 %v1977_v6 }
 0x93f   :  { %v3793_v46 = vpop.eup %3792  ;;  %v2026_v9 = vpack.c.bf16 %v2010_v38, %v2010_v38  ;;  %3796 = vrcp.f32 %v1974_v44 }
 0x940   :  { %v2011_v59 = vmul.f32 %v3793_v46, %v5130_v3  ;;  %v1983_v29 = vpop.xlane.xlu2 %1982  ;;  %v1980_v14 = vpop.xlane.xlu1 %1979 }
 0x941   :  { %v2115_v42 = vunpack.c.l.b16 %v2026_v9  ;;  %3798 = vrcp.f32 %v1983_v29 }
 0x942   :  { %v2027_v19 = vpack.c.bf16 %v2011_v59, %v2011_v59  ;;  %3800 = vrcp.f32 %v1980_v14 }
 0x944   :  { %v2116_v39 = vunpack.c.l.b16 %v2027_v19  ;;  %v3795_v20 = vpop.eup %3794 }
 0x945   :  { %v3797_v61 = vpop.eup %3796  ;;  %v2013_v37 = vmul.f32 %v3795_v20, %v5134_v4 }
 0x946   :  { %v2122_v58 = vpack.c.b16 %v2116_v39, %v2115_v42  ;;  %v2012_v48 = vmul.f32 %v3797_v61, %v5109_v21 }
 0x947   :  { %v2029_v26 = vpack.c.bf16 %v2013_v37, %v2013_v37  ;;  %v3799_v52 = vpop.eup %3798 }
 0x948   :  { %3445 = vmatmul.msk.bf16.gmra.mxu3 %vm1347_vm9, %v2122_v58  ;;  %v2028_v11 = vpack.c.bf16 %v2012_v48, %v2012_v48  ;;  %v3801_v31 = vpop.eup %3800  ;;  %v2015_v38 = vmul.f32 %v3799_v52, %v5140_v5 }
 0x949   :  { %v2118_v15 = vunpack.c.l.b16 %v2029_v26  ;;  %v2014_v6 = vmul.f32 %v3801_v31, %v5136_v47 }
 0x94a   :  { %v2117_v32 = vunpack.c.l.b16 %v2028_v11 }
 0x94b   :  { %v2030_v59 = vpack.c.bf16 %v2014_v6, %v2014_v6 }
 0x94c   :  { %v2123_v21 = vpack.c.b16 %v2118_v15, %v2117_v32 }
 0x94d   :  { %v2119_v39 = vunpack.c.l.b16 %v2030_v59 }
 0x94f   :  { %v3569_v47 = vpop.permute.xlu2 %3568 }
 0x950   :  { %v3559_v3 = vpop.permute.xlu0 %3558  ;;  %v3571_v5 = vunpack.i.h.bf16 %v3569_v47  ;;  %v3570_v61 = vunpack.i.l.bf16 %v3569_v47 }
 0x951   :  { %v3561_v35 = vunpack.i.h.bf16 %v3559_v3  ;;  %v3560_v7 = vunpack.i.l.bf16 %v3559_v3 }
 0x952   :  { %v2247_v37 = vsel %vm1196_vm8, %v5115_v62, %v3571_v5 }
 0x953   :  { %v2243_v33 = vsel %vm1196_vm8, %v5094_v30, %v3561_v35  ;;  %v2242_v18 = vsel %vm1196_vm8, %v5086_v25, %v3560_v7  ;;  %v2031_v30 = vpack.c.bf16 %v2015_v38, %v2015_v38  ;;  %v5194_v38 = vld [vmem:[%s5810_s10] ss:$0 sm:$0xff] }
 0x954   :  { %v2258_v4 = vpack.c.bf16 %v2243_v33, %v2242_v18 }
 0x955   :  { %v2120_v42 = vunpack.c.l.b16 %v2031_v30 }
 0x956   :  { %3456 = vmatmul.msk.bf16.vlgmr.msra.gmra.mxu1 %vm268_vm0, %v2258_v4 }
 0x957   :  { %v2124_v20 = vpack.c.b16 %v2120_v42, %v2119_v39 }
 0x958   :  { %3446 = vmatmul.msk.bf16.gmra.mxu3 %vm1347_vm9, %v2123_v21  ;;  %v3564_v46 = vpop.permute.xlu1 %3563 }
 0x959   :  { %v3566_v44 = vunpack.i.h.bf16 %v3564_v46  ;;  %v3565_v9 = vunpack.i.l.bf16 %v3564_v46 }
 0x95b   :  { %v2245_v25 = vsel %vm1196_vm8, %v5103_v0, %v3566_v44  ;;  %v2244_v19 = vsel %vm1196_vm8, %v5100_v41, %v3565_v9  ;;  %v2246_v0 = vsel %vm1196_vm8, %v5113_v55, %v3570_v61 }
 0x95c   :  { %v2259_v58 = vpack.c.bf16 %v2245_v25, %v2244_v19  ;;  %v2260_v48 = vpack.c.bf16 %v2247_v37, %v2246_v0 }
 0x966   :  { %3457 = vmatmul.msk.bf16.gmra.mxu1 %vm268_vm0, %v2259_v58 }
 0x968   :  { %3447 = vmatmul.msk.bf16.gmra.mxu3 %vm1347_vm9, %v2124_v20 }
 0x976   :  { %3458 = vmatmul.msk.bf16.gmra.mxu1 %vm268_vm0, %v2260_v48 }
 0x977   :  { %v3574_v41 = vpop.permute.xlu0 %3573 }
 0x978   :  { %v3576_v29 = vunpack.i.h.bf16 %v3574_v41  ;;  %v3575_v26 = vunpack.i.l.bf16 %v3574_v41 }
 0x97a   :  { %v2249_v14 = vsel %vm1196_vm8, %v5122_v17, %v3576_v29  ;;  %v2248_v11 = vsel %vm1196_vm8, %v5118_v36, %v3575_v26 }
 0x97b   :  { %v2261_v3 = vpack.c.bf16 %v2249_v14, %v2248_v11 }
 0x986   :  { %3459 = vmatmul.msk.bf16.gmra.mxu1 %vm268_vm0, %v2261_v3 }
 0x996   :  { %v2158_v35 = vpop.f32.mrf.mxu3 }
 0x99e   :  { %v2160_v62 = vpop.f32.mrf.mxu3 }
 0x99f   :  { %v3577_v7 = vpack.i.bf16 %v2160_v62, %v2158_v35 }
 0x9a1   :  { %3578 = vrot.lane.b32.xlu1 %v3577_v7, %s3905_s28 }
 0x9cb   :  { %v2163_v55 = vpop.f32.mrf.mxu3 }
 0x9d3   :  { %v2165_v15 = vpop.f32.mrf.mxu3  ;;  %v2314_v18 = vpop.f32.mrf.mxu1 }
 0x9d4   :  { %v3582_v33 = vpack.i.bf16 %v2165_v15, %v2163_v55  ;;  %v2315_v44 = vadd.f32 %v5194_v38, %v2314_v18 }
 0x9d6   :  { %3583 = vrot.lane.b32.xlu0 %v3582_v33, %s3905_s28  ;;  %v5199_v9 = vadd.f32 %v2315_v44, %v4218_v57 }
 0x9d8   :  { %v2370_v25 = vsel %vm268_vm0, %v5199_v9, 0.0 }
 0x9db   :  { %v2168_v32 = vpop.f32.mrf.mxu3  ;;  %v2316_v4 = vpop.f32.mrf.mxu1 }
 0x9dc   :  { %v2317_v42 = vadd.f32 %v5194_v38, %v2316_v4 }
 0x9de   :  { %v5211_v58 = vadd.f32 %v2317_v42, %v4215_v56 }
 0x9e0   :  { %v2373_v20 = vsel %vm268_vm0, %v5211_v58, 0.0 }
 0x9e3   :  { %v2170_v17 = vpop.f32.mrf.mxu3  ;;  %v2319_v36 = vpop.f32.mrf.mxu1 }
 0x9e4   :  { %v3587_v52 = vpack.i.bf16 %v2170_v17, %v2168_v32  ;;  %v2320_v48 = vadd.f32 %v5194_v38, %v2319_v36 }
 0x9e6   :  { %3588 = vrot.lane.b32.xlu2 %v3587_v52, %s3905_s28  ;;  %v5228_v29 = vadd.f32 %v2320_v48, %v4235_v63 }
 0x9eb   :  { %v2173_v21 = vpop.f32.mrf.mxu3  ;;  %v2321_v31 = vpop.f32.mrf.mxu1 }
 0x9ec   :  { %v2322_v57 = vadd.f32 %v5194_v38, %v2321_v31 }
 0x9ee   :  { %v5217_v47 = vadd.f32 %v2322_v57, %v4249_v40 }
 0x9f0   :  { %v2379_v56 = vsel %vm268_vm0, %v5217_v47, 0.0 }
 0x9f3   :  { %v2175_v6 = vpop.f32.mrf.mxu3  ;;  %v2324_v30 = vpop.f32.mrf.mxu1 }
 0x9f4   :  { %v3592_v46 = vpack.i.bf16 %v2175_v6, %v2173_v21  ;;  %v2325_v59 = vadd.f32 %v5194_v38, %v2324_v30 }
 0x9f6   :  { %3593 = vrot.lane.b32.xlu1 %v3592_v46, %s3905_s28  ;;  %v5205_v19 = vadd.f32 %v2325_v59, %v4263_v60 }
 0x9f8   :  { %v2382_v39 = vsel %vm268_vm0, %v5205_v19, 0.0 }
 0x9fb   :  { %v2326_v40 = vpop.f32.mrf.mxu1 }
 0x9fc   :  { %v2327_v26 = vadd.f32 %v5194_v38, %v2326_v40 }
 0xa00   :  { %2371 = vadd.xlane.f32.xlu0 %v2370_v25 }
 0xa03   :  { %v2329_v14 = vpop.f32.mrf.mxu1 }
 0xa04   :  { %v2330_v11 = vadd.f32 %v5194_v38, %v2329_v14 }
 0xa06   :  { %v5240_v35 = vadd.f32 %v2330_v11, %v4310_v10 }
 0xa08   :  { %2383 = vadd.xlane.f32.xlu0 %v2382_v39  ;;  %v2388_v63 = vsel %vm268_vm0, %v5240_v35, 0.0 }
 0xa0b   :  { %v2331_v44 = vpop.f32.mrf.mxu1 }
 0xa0c   :  { %v2332_v59 = vadd.f32 %v5194_v38, %v2331_v44 }
 0xa0f   :  { %2374 = vadd.xlane.f32.xlu2 %v2373_v20 }
 0xa13   :  { %v3579_v60 = vpop.permute.xlu1 %3578 }
 0xa14   :  { %v3581_v5 = vunpack.i.h.bf16 %v3579_v60  ;;  %v3580_v61 = vunpack.i.l.bf16 %v3579_v60 }
 0xa16   :  { %v2251_v37 = vsel %vm1196_vm8, %v4998_v13, %v3581_v5  ;;  %v2250_v0 = vsel %vm1196_vm8, %v4996_v27, %v3580_v61  ;;  %v2376_v13 = vsel %vm268_vm0, %v5228_v29, 0.0  ;;  %v5234_v27 = vadd.f32 %v2327_v26, %v4277_v8 }
 0xa17   :  { %v2262_v41 = vpack.c.bf16 %v2251_v37, %v2250_v0  ;;  %2380 = vadd.xlane.f32.xlu2 %v2379_v56 }
 0xa18   :  { %v2385_v3 = vsel %vm268_vm0, %v5234_v27, 0.0 }
 0xa19   :  { %3460 = vmatmul.msk.bf16.gmra.mxu1 %vm268_vm0, %v2262_v41 }
 0xa20   :  { %2377 = vadd.xlane.f32.xlu1 %v2376_v13 }
 0xa28   :  { %2386 = vadd.xlane.f32.xlu1 %v2385_v3 }
 0xa30   :  { %2389 = vadd.xlane.f32.xlu1 %v2388_v63 }
 0xa40   :  { %v3589_v18 = vpop.permute.xlu2 %3588 }
 0xa41   :  { %v3591_v32 = vunpack.i.h.bf16 %v3589_v18  ;;  %v3590_v10 = vunpack.i.l.bf16 %v3589_v18 }
 0xa43   :  { %v2255_v4 = vsel %vm1196_vm8, %v5018_v2, %v3591_v32  ;;  %v2254_v17 = vsel %vm1196_vm8, %v5011_v22, %v3590_v10 }
 0xa44   :  { %v2264_v52 = vpack.c.bf16 %v2255_v4, %v2254_v17 }
 0xa48   :  { %v3584_v62 = vpop.permute.xlu0 %3583 }
 0xa49   :  { %v3586_v7 = vunpack.i.h.bf16 %v3584_v62  ;;  %v3585_v55 = vunpack.i.l.bf16 %v3584_v62 }
 0xa4b   :  { %v2253_v8 = vsel %vm1196_vm8, %v5006_v53, %v3586_v7  ;;  %v2252_v15 = vsel %vm1196_vm8, %v5002_v51, %v3585_v55 }
 0xa4c   :  { %v2263_v33 = vpack.c.bf16 %v2253_v8, %v2252_v15 }
 0xa4e   :  { %3461 = vmatmul.msk.bf16.gmra.mxu1 %vm268_vm0, %v2263_v33 }
 0xa5e   :  { %3462 = vmatmul.msk.bf16.gmra.mxu1 %vm268_vm0, %v2264_v52 }
 0xa68   :  { %v3594_v36 = vpop.permute.xlu1 %3593 }
 0xa69   :  { %v3596_v53 = vunpack.i.h.bf16 %v3594_v36  ;;  %v3595_v21 = vunpack.i.l.bf16 %v3594_v36 }
 0xa6b   :  { %v2257_v51 = vsel %vm1196_vm8, %v5035_v54, %v3596_v53  ;;  %v2256_v31 = vsel %vm1196_vm8, %v5031_v12, %v3595_v21  ;;  %v5268_v12 = vadd.f32 %v2332_v59, %v4342_v43 }
 0xa6c   :  { %v2265_v6 = vpack.c.bf16 %v2257_v51, %v2256_v31 }
 0xa6d   :  { %v2391_v42 = vsel %vm268_vm0, %v5268_v12, 0.0 }
 0xa6e   :  { %3463 = vmatmul.msk.bf16.gmra.mxu1 %vm268_vm0, %v2265_v6 }
 0xa73   :  { %v2372_v46 = vpop.xlane.xlu0 %2371 }
 0xa74   :  { %v2418_v2 = vmul.f32 %v2372_v46, %v4072_v45 }
 0xa76   :  { %v5261_v22 = vsub.f32 %v5199_v9, %v2418_v2 }
 0xa78   :  { %v2450_v30 = vmul.f32 %v5261_v22, %v5261_v22 }
 0xa7a   :  { %v2466_v54 = vsel %vm268_vm0, %v2450_v30, 0.0 }
 0xa7b   :  { %2467 = vadd.xlane.f32.xlu2 %v2466_v54  ;;  %v2384_v5 = vpop.xlane.xlu0 %2383 }
 0xa7c   :  { %v2422_v37 = vmul.f32 %v2384_v5, %v4072_v45 }
 0xa7e   :  { %v5287_v48 = vsub.f32 %v5205_v19, %v2422_v37 }
 0xa80   :  { %v2454_v13 = vmul.f32 %v5287_v48, %v5287_v48 }
 0xa82   :  { %v2375_v25 = vpop.xlane.xlu2 %2374  ;;  %v2478_v7 = vsel %vm268_vm0, %v2454_v13, 0.0 }
 0xa83   :  { %v2419_v39 = vmul.f32 %v2375_v25, %v4072_v45  ;;  %2392 = vadd.xlane.f32.xlu2 %v2391_v42 }
 0xa85   :  { %v5274_v57 = vsub.f32 %v5211_v58, %v2419_v39 }
 0xa87   :  { %v2451_v20 = vmul.f32 %v5274_v57, %v5274_v57 }
 0xa89   :  { %v2469_v60 = vsel %vm268_vm0, %v2451_v20, 0.0 }
 0xa8a   :  { %v2381_v61 = vpop.xlane.xlu2 %2380  ;;  %2470 = vadd.xlane.f32.xlu0 %v2469_v60 }
 0xa8b   :  { %v2421_v43 = vmul.f32 %v2381_v61, %v4072_v45 }
 0xa8d   :  { %v5282_v0 = vsub.f32 %v5217_v47, %v2421_v43 }
 0xa8f   :  { %v2453_v56 = vmul.f32 %v5282_v0, %v5282_v0 }
 0xa91   :  { %v2475_v41 = vsel %vm268_vm0, %v2453_v56, 0.0 }
 0xa92   :  { %2476 = vadd.xlane.f32.xlu1 %v2475_v41 }
 0xa93   :  { %v2378_v40 = vpop.xlane.xlu1 %2377 }
 0xa94   :  { %v2420_v26 = vmul.f32 %v2378_v40, %v4072_v45 }
 0xa96   :  { %v5294_v14 = vsub.f32 %v5228_v29, %v2420_v26  ;;  %v2334_v11 = vpop.f32.mrf.mxu1 }
 0xa97   :  { %v2335_v3 = vadd.f32 %v5194_v38, %v2334_v11 }
 0xa98   :  { %v2452_v63 = vmul.f32 %v5294_v14, %v5294_v14 }
 0xa99   :  { %v5300_v62 = vadd.f32 %v2335_v3, %v4363_v24 }
 0xa9a   :  { %2479 = vadd.xlane.f32.xlu1 %v2478_v7  ;;  %v2472_v55 = vsel %vm268_vm0, %v2452_v63, 0.0 }
 0xa9b   :  { %v2387_v8 = vpop.xlane.xlu1 %2386  ;;  %2473 = vadd.xlane.f32.xlu0 %v2472_v55  ;;  %v2394_v15 = vsel %vm268_vm0, %v5300_v62, 0.0 }
 0xa9c   :  { %v2423_v33 = vmul.f32 %v2387_v8, %v4072_v45  ;;  %2395 = vadd.xlane.f32.xlu2 %v2394_v15 }
 0xa9e   :  { %v5308_v18 = vsub.f32 %v5234_v27, %v2423_v33  ;;  %v2336_v32 = vpop.f32.mrf.mxu1 }
 0xa9f   :  { %v2337_v24 = vadd.f32 %v5194_v38, %v2336_v32 }
 0xaa0   :  { %v2455_v10 = vmul.f32 %v5308_v18, %v5308_v18 }
 0xaa1   :  { %v5314_v4 = vadd.f32 %v2337_v24, %v4360_v28 }
 0xaa2   :  { %v2481_v17 = vsel %vm268_vm0, %v2455_v10, 0.0 }
 0xaa3   :  { %v2390_v52 = vpop.xlane.xlu1 %2389  ;;  %v2397_v36 = vsel %vm268_vm0, %v5314_v4, 0.0 }
 0xaa4   :  { %v2424_v53 = vmul.f32 %v2390_v52, %v4072_v45  ;;  %2398 = vadd.xlane.f32.xlu0 %v2397_v36  ;;  %2482 = vadd.xlane.f32.xlu2 %v2481_v17 }
 0xaa6   :  { %v5321_v21 = vsub.f32 %v5240_v35, %v2424_v53 }
 0xaa8   :  { %v2456_v51 = vmul.f32 %v5321_v21, %v5321_v21 }
 0xaaa   :  { %v2484_v31 = vsel %vm268_vm0, %v2456_v51, 0.0 }
 0xaac   :  { %2485 = vadd.xlane.f32.xlu2 %v2484_v31 }
 0xacb   :  { %v2339_v28 = vpop.f32.mrf.mxu1 }
 0xacc   :  { %v2340_v6 = vadd.f32 %v5194_v38, %v2339_v28 }
 0xace   :  { %v5328_v46 = vadd.f32 %v2340_v6, %v4380_v34 }
 0xad0   :  { %v2400_v2 = vsel %vm268_vm0, %v5328_v46, 0.0 }
 0xad1   :  { %2401 = vadd.xlane.f32.xlu0 %v2400_v2 }
 0xad3   :  { %v2341_v44 = vpop.f32.mrf.mxu1 }
 0xad4   :  { %v2342_v30 = vadd.f32 %v5194_v38, %v2341_v44 }
 0xad6   :  { %v5334_v59 = vadd.f32 %v2342_v30, %v4394_v16 }
 0xad8   :  { %v2403_v54 = vsel %vm268_vm0, %v5334_v59, 0.0 }
 0xad9   :  { %2404 = vadd.xlane.f32.xlu1 %v2403_v54 }
 0xadb   :  { %v2344_v25 = vpop.f32.mrf.mxu1 }
 0xadc   :  { %v2345_v42 = vadd.f32 %v5194_v38, %v2344_v25 }
 0xade   :  { %v5340_v34 = vadd.f32 %v2345_v42, %v4402_v1 }
 0xae0   :  { %v2406_v39 = vsel %vm268_vm0, %v5340_v34, 0.0 }
 0xae1   :  { %2407 = vadd.xlane.f32.xlu1 %v2406_v39 }
 0xae3   :  { %v2346_v20 = vpop.f32.mrf.mxu1 }
 0xae4   :  { %v2347_v60 = vadd.f32 %v5194_v38, %v2346_v20 }
 0xae6   :  { %v5346_v16 = vadd.f32 %v2347_v60, %v4439_v23  ;;  %v3541_v23 = vld [vmem:[%s5813_s13 + $0x8] sm:$0xff] }
 0xae7   :  { %2813 = vmatpush.bf16.msra.mxu0 %v3541_v23 }
 0xae8   :  { %v2409_v5 = vsel %vm268_vm0, %v5346_v16, 0.0 }
 0xae9   :  { %2410 = vadd.xlane.f32.xlu2 %v2409_v5 }
 0xaeb   :  { %v2349_v61 = vpop.f32.mrf.mxu1 }
 0xaec   :  { %v2350_v43 = vadd.f32 %v5194_v38, %v2349_v61  ;;  %v5383_v61 = vld [vmem:[%s5811_s11] ss:$0 sm:$0xff] }
 0xaee   :  { %v5352_v1 = vadd.f32 %v2350_v43, %v4456_v49  ;;  %v2468_v37 = vpop.xlane.xlu2 %2467  ;;  %v3540_v49 = vld [vmem:[%s5813_s13] sm:$0xff] }
 0xaef   :  { %v2514_v56 = vmul.f32 %v2468_v37, %v4072_v45  ;;  %2814 = vmatpush.bf16.msra.mxu0 %v3540_v49 }
 0xaf0   :  { %v2412_v41 = vsel %vm268_vm0, %v5352_v1, 0.0 }
 0xaf1   :  { %v2530_v40 = vadd.f32 1e-05, %v2514_v56  ;;  %2413 = vadd.xlane.f32.xlu2 %v2412_v41 }
 0xaf3   :  { %3802 = vrsqrt.f32 %v2530_v40  ;;  %vm2552_vm11 = vweird.f32 %v2530_v40 }
 0xaf6   :  { %v2393_v26 = vpop.xlane.xlu2 %2392 }
 0xaf7   :  { %v2425_v13 = vmul.f32 %v2393_v26, %v4072_v45 }
 0xaf9   :  { %v3803_v11 = vpop.eup %3802  ;;  %v5365_v3 = vsub.f32 %v5268_v12, %v2425_v13 }
 0xafa   :  { %v2547_v63 = vmul.f32 %v3803_v11, %v2530_v40  ;;  %vm2553_vm10 = vweird.f32 %v3803_v11  ;;  %v2351_v40 = vpop.f32.mrf.mxu1 }
 0xafb   :  { %v2457_v7 = vmul.f32 %v5365_v3, %v5365_v3  ;;  %vm2554_vm12 = vmor %vm2552_vm11, %vm2553_vm10 }
 0xafc   :  { %v2548_v15 = vmul.f32 %v3803_v11, %v2547_v63 }
 0xafd   :  { %v2471_v55 = vpop.xlane.xlu0 %2470  ;;  %v2487_v8 = vsel %vm268_vm0, %v2457_v7, 0.0  ;;  %v2352_v7 = vadd.f32 %v5194_v38, %v2351_v40 }
 0xafe   :  { %v2515_v33 = vmul.f32 %v2471_v55, %v4072_v45  ;;  %2488 = vadd.xlane.f32.xlu0 %v2487_v8  ;;  %v2549_v24 = vmul.f32 0.5, %v2548_v15 }
 0xaff   :  { %v5408_v38 = vadd.f32 %v2352_v7, %v4516_v50 }
 0xb00   :  { %v2531_v32 = vadd.f32 1e-05, %v2515_v33  ;;  %v2550_v17 = vsub.f32 1.5, %v2549_v24 }
 0xb02   :  { %3804 = vrsqrt.f32 %v2531_v32  ;;  %v2551_v31 = vmul.f32 %v3803_v11, %v2550_v17  ;;  %vm2562_vm14 = vweird.f32 %v2531_v32 }
 0xb04   :  { %v2555_v44 = vsel %vm2554_vm12, %v3803_v11, %v2551_v31 }
 0xb05   :  { %v2477_v10 = vpop.xlane.xlu1 %2476  ;;  %v2706_v43 = vmul.f32 %v2555_v44, %v5261_v22  ;;  %v5397_v22 = vld [vmem:[%s5812_s12] ss:$0 sm:$0xff] }
 0xb06   :  { %v2517_v52 = vmul.f32 %v2477_v10, %v4072_v45 }
 0xb07   :  { %v2725_v63 = vmul.f32 %v5383_v61, %v2706_v43 }
 0xb08   :  { %v3805_v36 = vpop.eup %3804  ;;  %v5372_v53 = vadd.f32 1e-05, %v2517_v52 }
 0xb09   :  { %v2557_v51 = vmul.f32 %v3805_v36, %v2531_v32  ;;  %vm2563_vm13 = vweird.f32 %v3805_v36 }
 0xb0a   :  { %3806 = vrsqrt.f32 %v5372_v53  ;;  %vm2564_vm15 = vmor %vm2562_vm14, %vm2563_vm13  ;;  %vm2582_vm2 = vweird.f32 %v5372_v53 }
 0xb0b   :  { %v2558_v28 = vmul.f32 %v3805_v36, %v2557_v51  ;;  %v2744_v51 = vadd.f32 %v5397_v22, %v2725_v63 }
 0xb0d   :  { %v2559_v6 = vmul.f32 0.5, %v2558_v28  ;;  %v2480_v2 = vpop.xlane.xlu1 %2479 }
 0xb0e   :  { %v2518_v30 = vmul.f32 %v2480_v2, %v4072_v45  ;;  %v2474_v54 = vpop.xlane.xlu0 %2473 }
 0xb0f   :  { %v2560_v25 = vsub.f32 1.5, %v2559_v6  ;;  %v2516_v42 = vmul.f32 %v2474_v54, %v4072_v45  ;;  %v2396_v39 = vpop.xlane.xlu2 %2395 }
 0xb10   :  { %v3807_v20 = vpop.eup %3806  ;;  %v5377_v60 = vadd.f32 1e-05, %v2518_v30  ;;  %v2426_v5 = vmul.f32 %v2396_v39, %v4072_v45 }
 0xb11   :  { %v2561_v37 = vmul.f32 %v3805_v36, %v2560_v25  ;;  %v2577_v56 = vmul.f32 %v3807_v20, %v5372_v53  ;;  %v2532_v41 = vadd.f32 1e-05, %v2516_v42  ;;  %vm2583_vm1 = vweird.f32 %v3807_v20 }
 0xb12   :  { %3808 = vrsqrt.f32 %v5377_v60  ;;  %v5389_v23 = vsub.f32 %v5300_v62, %v2426_v5  ;;  %vm2584_vm3 = vmor %vm2582_vm2, %vm2583_vm1  ;;  %v2415_v5 = vsel %vm268_vm0, %v5408_v38, 0.0  ;;  %vm2592_vm11 = vweird.f32 %v5377_v60 }
 0xb13   :  { %v2565_v26 = vsel %vm2564_vm15, %v3805_v36, %v2561_v37  ;;  %v2578_v13 = vmul.f32 %v3807_v20, %v2577_v56  ;;  %3810 = vrsqrt.f32 %v2532_v41  ;;  %vm2572_vm5 = vweird.f32 %v2532_v41 }
 0xb14   :  { %v2707_v49 = vmul.f32 %v2565_v26, %v5274_v57  ;;  %v2458_v11 = vmul.f32 %v5389_v23, %v5389_v23 }
 0xb15   :  { %v2579_v55 = vmul.f32 0.5, %v2578_v13 }
 0xb16   :  { %v2726_v8 = vmul.f32 %v5383_v61, %v2707_v49  ;;  %v2490_v15 = vsel %vm268_vm0, %v2458_v11, 0.0 }
 0xb17   :  { %v2580_v33 = vsub.f32 1.5, %v2579_v55  ;;  %2491 = vadd.xlane.f32.xlu0 %v2490_v15  ;;  %v2483_v57 = vpop.xlane.xlu2 %2482  ;;  %v2399_v32 = vpop.xlane.xlu0 %2398 }
 0xb18   :  { %v3809_v24 = vpop.eup %3808  ;;  %v2745_v10 = vadd.f32 %v5397_v22, %v2726_v8  ;;  %v2519_v17 = vmul.f32 %v2483_v57, %v4072_v45  ;;  %v2427_v52 = vmul.f32 %v2399_v32, %v4072_v45 }
 0xb19   :  { %v3811_v36 = vpop.eup %3810  ;;  %v2581_v31 = vmul.f32 %v3807_v20, %v2580_v33  ;;  %v2587_v28 = vmul.f32 %v3809_v24, %v5377_v60  ;;  %vm2593_vm8 = vweird.f32 %v3809_v24 }
 0xb1a   :  { %v2567_v6 = vmul.f32 %v3811_v36, %v2532_v41  ;;  %v2535_v2 = vadd.f32 1e-05, %v2519_v17  ;;  %v5412_v44 = vsub.f32 %v5314_v4, %v2427_v52  ;;  %v2760_v30 = vpack.c.bf16 %v2745_v10, %v2744_v51  ;;  %vm2594_vm13 = vmor %vm2592_vm11, %vm2593_vm8 }
 0xb1b   :  { %v2585_v25 = vsel %vm2584_vm3, %v3807_v20, %v2581_v31  ;;  %v2588_v42 = vmul.f32 %v3809_v24, %v2587_v28  ;;  %vm2573_vm4 = vweird.f32 %v3811_v36 }
 0xb1c   :  { %v2568_v54 = vmul.f32 %v3811_v36, %v2567_v6  ;;  %3812 = vrsqrt.f32 %v2535_v2  ;;  %3472 = vmatmul.msk.bf16.vlgmr.msra.gmra.mxu0 %vm268_vm0, %v2760_v30  ;;  %v2459_v50 = vmul.f32 %v5412_v44, %v5412_v44  ;;  %v2709_v53 = vmul.f32 %v2585_v25, %v5282_v0  ;;  %vm2574_vm6 = vmor %vm2572_vm5, %vm2573_vm4 }
 0xb1d   :  { %v2589_v40 = vmul.f32 0.5, %v2588_v42  ;;  %vm2602_vm10 = vweird.f32 %v2535_v2 }
 0xb1e   :  { %v2569_v39 = vmul.f32 0.5, %v2568_v54  ;;  %v2493_v43 = vsel %vm268_vm0, %v2459_v50, 0.0  ;;  %v2728_v63 = vmul.f32 %v5383_v61, %v2709_v53 }
 0xb1f   :  { %2416 = vadd.xlane.f32.xlu0 %v2415_v5  ;;  %2494 = vadd.xlane.f32.xlu1 %v2493_v43  ;;  %v2590_v7 = vsub.f32 1.5, %v2589_v40 }
 0xb20   :  { %v2570_v37 = vsub.f32 1.5, %v2569_v39  ;;  %v2747_v33 = vadd.f32 %v5397_v22, %v2728_v63  ;;  %v2486_v39 = vpop.xlane.xlu2 %2485 }
 0xb21   :  { %v2591_v57 = vmul.f32 %v3809_v24, %v2590_v7  ;;  %v2520_v40 = vmul.f32 %v2486_v39, %v4072_v45 }
 0xb22   :  { %v3813_v56 = vpop.eup %3812  ;;  %v2571_v26 = vmul.f32 %v3811_v36, %v2570_v37 }
 0xb23   :  { %v2597_v13 = vmul.f32 %v3813_v56, %v2535_v2  ;;  %vm2603_vm7 = vweird.f32 %v3813_v56  ;;  %v2595_v10 = vsel %vm2594_vm13, %v3809_v24, %v2591_v57 }
 0xb24   :  { %v2575_v20 = vsel %vm2574_vm6, %v3811_v36, %v2571_v26  ;;  %vm2604_vm12 = vmor %vm2602_vm10, %vm2603_vm7  ;;  %v2710_v52 = vmul.f32 %v2595_v10, %v5287_v48 }
 0xb25   :  { %v2708_v49 = vmul.f32 %v2575_v20, %v5294_v14  ;;  %v2598_v11 = vmul.f32 %v3813_v56, %v2597_v13 }
 0xb26   :  { %v2729_v51 = vmul.f32 %v5383_v61, %v2710_v52 }
 0xb27   :  { %v2599_v55 = vmul.f32 0.5, %v2598_v11  ;;  %v2727_v8 = vmul.f32 %v5383_v61, %v2708_v49  ;;  %v2536_v49 = vadd.f32 1e-05, %v2520_v40 }
 0xb28   :  { %v2748_v28 = vadd.f32 %v5397_v22, %v2729_v51 }
 0xb29   :  { %v2600_v15 = vsub.f32 1.5, %v2599_v55  ;;  %v2746_v0 = vadd.f32 %v5397_v22, %v2727_v8  ;;  %3814 = vrsqrt.f32 %v2536_v49  ;;  %vm2612_vm15 = vweird.f32 %v2536_v49 }
 0xb2b   :  { %v2601_v41 = vmul.f32 %v3813_v56, %v2600_v15  ;;  %v2761_v32 = vpack.c.bf16 %v2747_v33, %v2746_v0 }
 0xb2d   :  { %v2605_v14 = vsel %vm2604_vm12, %v3813_v56, %v2601_v41  ;;  %3473 = vmatmul.msk.bf16.gmra.mxu0 %vm268_vm0, %v2761_v32 }
 0xb2e   :  { %v2711_v17 = vmul.f32 %v2605_v14, %v5308_v18 }
 0xb2f   :  { %v3815_v0 = vpop.eup %3814 }
 0xb30   :  { %v2730_v36 = vmul.f32 %v5383_v61, %v2711_v17  ;;  %v2607_v57 = vmul.f32 %v3815_v0, %v2536_v49  ;;  %vm2613_vm14 = vweird.f32 %v3815_v0 }
 0xb31   :  { %vm2614_vm1 = vmor %vm2612_vm15, %vm2613_vm14 }
 0xb32   :  { %v2749_v31 = vadd.f32 %v5397_v22, %v2730_v36  ;;  %v2608_v41 = vmul.f32 %v3815_v0, %v2607_v57 }
 0xb34   :  { %v2762_v6 = vpack.c.bf16 %v2749_v31, %v2748_v28  ;;  %v2609_v17 = vmul.f32 0.5, %v2608_v41 }
 0xb36   :  { %v2610_v52 = vsub.f32 1.5, %v2609_v17 }
 0xb38   :  { %v2611_v51 = vmul.f32 %v3815_v0, %v2610_v52 }
 0xb3d   :  { %3474 = vmatmul.msk.bf16.gmra.mxu0 %vm268_vm0, %v2762_v6  ;;  %v2615_v6 = vsel %vm2614_vm1, %v3815_v0, %v2611_v51  ;;  %v3545_v0 = vld [vmem:[%s5815_s15 + $0x18] sm:$0xff] }
 0xb3e   :  { %3255 = vmatpush.bf16.msrb.mxu2 %v3545_v0 }
 0xb44   :  { %v2402_v60 = vpop.xlane.xlu0 %2401 }
 0xb45   :  { %v2428_v2 = vmul.f32 %v2402_v60, %v4072_v45 }
 0xb47   :  { %v5438_v24 = vsub.f32 %v5328_v46, %v2428_v2 }
 0xb49   :  { %v2460_v48 = vmul.f32 %v5438_v24, %v5438_v24 }
 0xb4b   :  { %v2496_v18 = vsel %vm268_vm0, %v2460_v48, 0.0  ;;  %v2712_v48 = vmul.f32 %v2615_v6, %v5321_v21  ;;  %v3543_v6 = vld [vmem:[%s5815_s15 + $0x8] sm:$0xff] }
 0xb4c   :  { %v2405_v30 = vpop.xlane.xlu1 %2404  ;;  %2497 = vadd.xlane.f32.xlu1 %v2496_v18 }
 0xb4d   :  { %v2429_v54 = vmul.f32 %v2405_v30, %v4072_v45 }
 0xb4f   :  { %v5445_v50 = vsub.f32 %v5334_v59, %v2429_v54 }
 0xb51   :  { %v2461_v25 = vmul.f32 %v5445_v50, %v5445_v50 }
 0xb53   :  { %v2499_v42 = vsel %vm268_vm0, %v2461_v25, 0.0  ;;  %v2731_v25 = vmul.f32 %v5383_v61, %v2712_v48 }
 0xb54   :  { %2500 = vadd.xlane.f32.xlu2 %v2499_v42  ;;  %v2408_v5 = vpop.xlane.xlu1 %2407 }
 0xb55   :  { %v2430_v43 = vmul.f32 %v2408_v5, %v4072_v45 }
 0xb57   :  { %v5452_v37 = vsub.f32 %v5340_v34, %v2430_v43  ;;  %v2750_v43 = vadd.f32 %v5397_v22, %v2731_v25 }
 0xb59   :  { %v2462_v53 = vmul.f32 %v5452_v37, %v5452_v37 }
 0xb5b   :  { %v2502_v56 = vsel %vm268_vm0, %v2462_v53, 0.0 }
 0xb5c   :  { %v2411_v26 = vpop.xlane.xlu2 %2410  ;;  %2503 = vadd.xlane.f32.xlu0 %v2502_v56 }
 0xb5d   :  { %v2431_v13 = vmul.f32 %v2411_v26, %v4072_v45 }
 0xb5f   :  { %v5460_v20 = vsub.f32 %v5346_v16, %v2431_v13 }
 0xb61   :  { %v2463_v11 = vmul.f32 %v5460_v20, %v5460_v20 }
 0xb63   :  { %v2505_v63 = vsel %vm268_vm0, %v2463_v11, 0.0 }
 0xb64   :  { %v2414_v7 = vpop.xlane.xlu2 %2413  ;;  %2506 = vadd.xlane.f32.xlu1 %v2505_v63 }
 0xb65   :  { %v2432_v55 = vmul.f32 %v2414_v7, %v4072_v45 }
 0xb67   :  { %v5467_v8 = vsub.f32 %v5352_v1, %v2432_v55  ;;  %v5489_v55 = vld [vmem:[%s5814_s14] ss:$0 sm:$0xff] }
 0xb69   :  { %v2464_v15 = vmul.f32 %v5467_v8, %v5467_v8 }
 0xb6b   :  { %v2508_v33 = vsel %vm268_vm0, %v2464_v15, 0.0 }
 0xb6c   :  { %2509 = vadd.xlane.f32.xlu2 %v2508_v33 }
 0xb71   :  { %v2489_v32 = vpop.xlane.xlu0 %2488 }
 0xb72   :  { %v2521_v14 = vmul.f32 %v2489_v32, %v4072_v45 }
 0xb74   :  { %v2537_v10 = vadd.f32 1e-05, %v2521_v14 }
 0xb76   :  { %3816 = vrsqrt.f32 %v2537_v10  ;;  %vm2622_vm3 = vweird.f32 %v2537_v10 }
 0xb7c   :  { %v3817_v36 = vpop.eup %3816 }
 0xb7d   :  { %v2617_v31 = vmul.f32 %v3817_v36, %v2537_v10  ;;  %vm2623_vm2 = vweird.f32 %v3817_v36  ;;  %v3544_v10 = vld [vmem:[%s5815_s15 + $0x10] sm:$0xff] }
 0xb7e   :  { %vm2624_vm4 = vmor %vm2622_vm3, %vm2623_vm2  ;;  %3256 = vmatpush.bf16.msrb.mxu2 %v3544_v10 }
 0xb7f   :  { %v2618_v28 = vmul.f32 %v3817_v36, %v2617_v31 }
 0xb81   :  { %v2619_v60 = vmul.f32 0.5, %v2618_v28 }
 0xb82   :  { %3257 = vmatpush.bf16.msrb.mxu2 %v3543_v6 }
 0xb83   :  { %v2620_v2 = vsub.f32 1.5, %v2619_v60 }
 0xb85   :  { %v2621_v18 = vmul.f32 %v3817_v36, %v2620_v2 }
 0xb87   :  { %v2625_v30 = vsel %vm2624_vm4, %v3817_v36, %v2621_v18 }
 0xb88   :  { %v2713_v54 = vmul.f32 %v2625_v30, %v5365_v3 }
 0xb8a   :  { %v2492_v42 = vpop.xlane.xlu0 %2491  ;;  %v2732_v39 = vmul.f32 %v5383_v61, %v2713_v54  ;;  %v3542_v54 = vld [vmem:[%s5815_s15] sm:$0xff] }
 0xb8b   :  { %v2522_v5 = vmul.f32 %v2492_v42, %v4072_v45  ;;  %3258 = vmatpush.bf16.msrb.mxu2 %v3542_v54 }
 0xb8c   :  { %v2751_v53 = vadd.f32 %v5397_v22, %v2732_v39 }
 0xb8d   :  { %v2538_v56 = vadd.f32 1e-05, %v2522_v5 }
 0xb8e   :  { %v2763_v40 = vpack.c.bf16 %v2751_v53, %v2750_v43 }
 0xb8f   :  { %3818 = vrsqrt.f32 %v2538_v56  ;;  %vm2632_vm6 = vweird.f32 %v2538_v56 }
 0xb90   :  { %3475 = vmatmul.msk.bf16.gmra.mxu0 %vm268_vm0, %v2763_v40 }
 0xb92   :  { %v2417_v21 = vpop.xlane.xlu0 %2416  ;;  %v2495_v26 = vpop.xlane.xlu1 %2494 }
 0xb93   :  { %v2433_v3 = vmul.f32 %v2417_v21, %v4072_v45  ;;  %v2523_v13 = vmul.f32 %v2495_v26, %v4072_v45 }
 0xb95   :  { %v3819_v49 = vpop.eup %3818  ;;  %v5484_v11 = vsub.f32 %v5408_v38, %v2433_v3  ;;  %v2539_v7 = vadd.f32 1e-05, %v2523_v13 }
 0xb96   :  { %v2627_v63 = vmul.f32 %v3819_v49, %v2538_v56  ;;  %vm2633_vm5 = vweird.f32 %v3819_v49 }
 0xb97   :  { %v2465_v15 = vmul.f32 %v5484_v11, %v5484_v11  ;;  %3820 = vrsqrt.f32 %v2539_v7  ;;  %vm2634_vm7 = vmor %vm2632_vm6, %vm2633_vm5  ;;  %vm2642_vm10 = vweird.f32 %v2539_v7 }
 0xb98   :  { %v2628_v33 = vmul.f32 %v3819_v49, %v2627_v63 }
 0xb99   :  { %v2511_v57 = vsel %vm268_vm0, %v2465_v15, 0.0  ;;  %v2816_v32 = vpop.f32.mrf.mxu0 }
 0xb9a   :  { %v2629_v41 = vmul.f32 0.5, %v2628_v33  ;;  %2512 = vadd.xlane.f32.xlu0 %v2511_v57  ;;  %v5498_v14 = vadd.f32 %v5489_v55, %v2816_v32 }
 0xb9c   :  { %v2630_v17 = vsub.f32 1.5, %v2629_v41  ;;  %v3480_v52 = vmul.f32 -1.702, %v5498_v14 }
 0xb9d   :  { %v3821_v36 = vpop.eup %3820 }
 0xb9e   :  { %v2631_v51 = vmul.f32 %v3819_v49, %v2630_v17  ;;  %v2637_v31 = vmul.f32 %v3821_v36, %v2539_v7  ;;  %v2888_v28 = vmul.f32 1.442695, %v3480_v52  ;;  %vm2643_vm8 = vweird.f32 %v3821_v36 }
 0xb9f   :  { %vm2644_vm11 = vmor %vm2642_vm10, %vm2643_vm8 }
 0xba0   :  { %v2638_v60 = vmul.f32 %v3821_v36, %v2637_v31  ;;  %3822 = vpow2.f32 %v2888_v28  ;;  %v2635_v48 = vsel %vm2634_vm7, %v3819_v49, %v2631_v51 }
 0xba1   :  { %v2818_v2 = vpop.f32.mrf.mxu0  ;;  %v2714_v39 = vmul.f32 %v2635_v48, %v5389_v23 }
 0xba2   :  { %v2639_v18 = vmul.f32 0.5, %v2638_v60  ;;  %v5508_v30 = vadd.f32 %v5489_v55, %v2818_v2 }
 0xba3   :  { %v2733_v3 = vmul.f32 %v5383_v61, %v2714_v39 }
 0xba4   :  { %v2640_v25 = vsub.f32 1.5, %v2639_v18  ;;  %v3481_v42 = vmul.f32 -1.702, %v5508_v30 }
 0xba5   :  { %v2752_v63 = vadd.f32 %v5397_v22, %v2733_v3 }
 0xba6   :  { %v3823_v5 = vpop.eup %3822  ;;  %v2641_v43 = vmul.f32 %v3821_v36, %v2640_v25  ;;  %v2890_v53 = vmul.f32 1.442695, %v3481_v42 }
 0xba7   :  { %v2920_v56 = vadd.f32 1.0, %v3823_v5 }
 0xba8   :  { %v2645_v40 = vsel %vm2644_vm11, %v3821_v36, %v2641_v43  ;;  %3824 = vpow2.f32 %v2890_v53 }
 0xba9   :  { %v2715_v21 = vmul.f32 %v2645_v40, %v5412_v44  ;;  %3826 = vrcp.f32 %v2920_v56  ;;  %v2947_v48 = vand.u32 2147483648, %v2920_v56  ;;  %vm2941_vm13 = vweird.f32 %v2920_v56 }
 0xbaa   :  { %v2821_v26 = vpop.f32.mrf.mxu0  ;;  %v2945_v54 = vand.u32 2147483647, %v2920_v56 }
 0xbab   :  { %v5518_v13 = vadd.f32 %v5489_v55, %v2821_v26  ;;  %v2734_v23 = vmul.f32 %v5383_v61, %v2715_v21  ;;  %v2948_v26 = vor.u32 1.1754944e-38, %v2947_v48 }
 0xbac   :  { %vm2946_vm1 = vcmp.eq.f32.partialorder %v2945_v54, 8.507059e+37 }
 0xbad   :  { %v3482_v49 = vmul.f32 -1.702, %v5518_v13  ;;  %v2753_v7 = vadd.f32 %v5397_v22, %v2734_v23 }
 0xbae   :  { %v3825_v15 = vpop.eup %3824 }
 0xbaf   :  { %v2892_v0 = vmul.f32 1.442695, %v3482_v49  ;;  %v3827_v33 = vpop.eup %3826  ;;  %v2921_v57 = vadd.f32 1.0, %v3825_v15  ;;  %v2764_v44 = vpack.c.bf16 %v2753_v7, %v2752_v63 }
 0xbb0   :  { %v2937_v41 = vmul.f32 %v3827_v33, %v2920_v56  ;;  %vm2942_vm12 = vweird.f32 %v3827_v33 }
 0xbb1   :  { %3828 = vpow2.f32 %v2892_v0  ;;  %3476 = vmatmul.msk.bf16.gmra.mxu0 %vm268_vm0, %v2764_v44  ;;  %vm5535_vm14 = vmor %vm2941_vm13, %vm2942_vm12  ;;  %v2960_v5 = vand.u32 2147483647, %v2921_v57  ;;  %v2962_v43 = vand.u32 2147483648, %v2921_v57  ;;  %vm2956_vm2 = vweird.f32 %v2921_v57 }
 0xbb2   :  { %3830 = vrcp.f32 %v2921_v57  ;;  %v2823_v32 = vpop.f32.mrf.mxu0  ;;  %v2938_v10 = vsub.f32 1.0, %v2937_v41 }
 0xbb3   :  { %v5526_v17 = vadd.f32 %v5489_v55, %v2823_v32  ;;  %v2963_v15 = vor.u32 1.1754944e-38, %v2962_v43  ;;  %vm2961_vm4 = vcmp.eq.f32.partialorder %v2960_v5, 8.507059e+37 }
 0xbb4   :  { %v2939_v52 = vmul.f32 %v3827_v33, %v2938_v10 }
 0xbb5   :  { %v3483_v36 = vmul.f32 -1.702, %v5526_v17 }
 0xbb6   :  { %v2940_v60 = vadd.f32 %v3827_v33, %v2939_v52 }
 0xbb7   :  { %v3829_v51 = vpop.eup %3828  ;;  %v2894_v31 = vmul.f32 1.442695, %v3483_v36 }
 0xbb8   :  { %v3831_v28 = vpop.eup %3830  ;;  %v5529_v6 = vadd.f32 1.0, %v3829_v51  ;;  %v2944_v53 = vsel %vm5535_vm14, %v3827_v33, %v2940_v60 }
 0xbb9   :  { %v2952_v2 = vmul.f32 %v3831_v28, %v2921_v57  ;;  %3832 = vpow2.f32 %v2894_v31  ;;  %vm2957_vm15 = vweird.f32 %v3831_v28  ;;  %v2949_v7 = vsel %vm2946_vm1, %v2948_v26, %v2944_v53 }
 0xbba   :  { %3834 = vrcp.f32 %v5529_v6  ;;  %v2826_v18 = vpop.f32.mrf.mxu0  ;;  %vm2958_vm3 = vmor %vm2956_vm2, %vm2957_vm15  ;;  %v3176_v57 = vmul.f32 %v2949_v7, %v5498_v14  ;;  %v2975_v43 = vand.u32 2147483647, %v5529_v6  ;;  %vm2971_vm7 = vweird.f32 %v5529_v6 }
 0xbbb   :  { %v2953_v25 = vsub.f32 1.0, %v2952_v2  ;;  %v5533_v42 = vadd.f32 %v5489_v55, %v2826_v18 }
 0xbbc   :  { %vm5581_vm10 = vcmp.eq.f32.partialorder %v2975_v43, 8.507059e+37 }
 0xbbd   :  { %v2954_v40 = vmul.f32 %v3831_v28, %v2953_v25  ;;  %v3484_v21 = vmul.f32 -1.702, %v5533_v42 }
 0xbbf   :  { %v3833_v3 = vpop.eup %3832  ;;  %v2955_v56 = vadd.f32 %v3831_v28, %v2954_v40  ;;  %v2896_v23 = vmul.f32 1.442695, %v3484_v21  ;;  %v2498_v49 = vpop.xlane.xlu1 %2497 }
 0xbc0   :  { %v5542_v63 = vpop.eup %3834  ;;  %v2923_v0 = vadd.f32 1.0, %v3833_v3  ;;  %v2524_v44 = vmul.f32 %v2498_v49, %v4072_v45 }
 0xbc1   :  { %v2959_v33 = vsel %vm2958_vm3, %v3831_v28, %v2955_v56  ;;  %v2967_v41 = vmul.f32 %v5542_v63, %v5529_v6  ;;  %3836 = vpow2.f32 %v2896_v23  ;;  %vm2972_vm5 = vweird.f32 %v5542_v63 }
 0xbc2   :  { %v2964_v32 = vsel %vm2961_vm4, %v2963_v15, %v2959_v33  ;;  %3838 = vrcp.f32 %v2923_v0  ;;  %v2828_v10 = vpop.f32.mrf.mxu0  ;;  %v5549_v36 = vadd.f32 1e-05, %v2524_v44  ;;  %v2992_v21 = vand.u32 2147483648, %v2923_v0  ;;  %vm5577_vm8 = vmor %vm2971_vm7, %vm2972_vm5 }
 0xbc3   :  { %v3177_v52 = vmul.f32 %v2964_v32, %v5508_v30  ;;  %v2968_v51 = vsub.f32 1.0, %v2967_v41  ;;  %v5552_v31 = vadd.f32 %v5489_v55, %v2828_v10  ;;  %v2977_v56 = vand.u32 2147483648, %v5529_v6 }
 0xbc4   :  { %3840 = vrsqrt.f32 %v5549_v36  ;;  %v2990_v49 = vand.u32 2147483647, %v2923_v0  ;;  %vm2986_vm11 = vweird.f32 %v2923_v0  ;;  %v2993_v10 = vor.u32 1.1754944e-38, %v2992_v21 }
 0xbc5   :  { %v3192_v60 = vpack.c.bf16 %v3177_v52, %v3176_v57  ;;  %v3485_v28 = vmul.f32 -1.702, %v5552_v31  ;;  %v2969_v14 = vmul.f32 %v5542_v63, %v2968_v51  ;;  %vm2652_vm15 = vweird.f32 %v5549_v36 }
 0xbc6   :  { %vm2991_vm13 = vcmp.eq.f32.partialorder %v2990_v49, 8.507059e+37 }
 0xbc7   :  { %v3837_v2 = vpop.eup %3836  ;;  %3512 = vmatmul.msk.bf16.vlgmr.msrb.gmra.mxu2 %vm1347_vm9, %v3192_v60  ;;  %v2501_v48 = vpop.xlane.xlu2 %2500  ;;  %v2898_v30 = vmul.f32 1.442695, %v3485_v28  ;;  %v2970_v40 = vadd.f32 %v5542_v63, %v2969_v14  ;;  %v2978_v60 = vor.u32 1.1754944e-38, %v2977_v56 }
 0xbc8   :  { %v3839_v18 = vpop.eup %3838  ;;  %v5558_v54 = vadd.f32 1.0, %v3837_v2  ;;  %v2525_v25 = vmul.f32 %v2501_v48, %v4072_v45 }
 0xbc9   :  { %v2982_v39 = vmul.f32 %v3839_v18, %v2923_v0  ;;  %vm2987_vm6 = vweird.f32 %v3839_v18  ;;  %v2974_v6 = vsel %vm5577_vm8, %v5542_v63, %v2970_v40 }
 0xbca   :  { %3842 = vrcp.f32 %v5558_v54  ;;  %v5562_v5 = vpop.eup %3840  ;;  %v5569_v3 = vadd.f32 1e-05, %v2525_v25  ;;  %vm2988_vm12 = vmor %vm2986_vm11, %vm2987_vm6  ;;  %v2979_v63 = vsel %vm5581_vm10, %v2978_v60, %v2974_v6  ;;  %vm3001_vm3 = vweird.f32 %v5558_v54 }
 0xbcb   :  { %v2983_v53 = vsub.f32 1.0, %v2982_v39  ;;  %3844 = vpow2.f32 %v2898_v30  ;;  %v2647_v26 = vmul.f32 %v5562_v5, %v5549_v36  ;;  %vm2653_vm14 = vweird.f32 %v5562_v5 }
 0xbcc   :  { %3846 = vrsqrt.f32 %v5569_v3  ;;  %v3178_v40 = vmul.f32 %v2979_v63, %v5518_v13  ;;  %vm5605_vm1 = vmor %vm2652_vm15, %vm2653_vm14  ;;  %vm2662_vm6 = vweird.f32 %v5569_v3 }
 0xbcd   :  { %v2984_v23 = vmul.f32 %v3839_v18, %v2983_v53  ;;  %v2648_v7 = vmul.f32 %v5562_v5, %v2647_v26 }
 0xbcf   :  { %v2985_v33 = vadd.f32 %v3839_v18, %v2984_v23  ;;  %v2504_v41 = vpop.xlane.xlu0 %2503  ;;  %v2649_v57 = vmul.f32 0.5, %v2648_v7 }
 0xbd0   :  { %v5585_v32 = vpop.eup %3842  ;;  %v2526_v52 = vmul.f32 %v2504_v41, %v4072_v45 }
 0xbd1   :  { %v3845_v51 = vpop.eup %3844  ;;  %v2989_v28 = vsel %vm2988_vm12, %v3839_v18, %v2985_v33  ;;  %v2997_v2 = vmul.f32 %v5585_v32, %v5558_v54  ;;  %v2650_v48 = vsub.f32 1.5, %v2649_v57  ;;  %vm3002_vm2 = vweird.f32 %v5585_v32 }
 0xbd2   :  { %v2994_v0 = vsel %vm2991_vm13, %v2993_v10, %v2989_v28  ;;  %v2925_v14 = vadd.f32 1.0, %v3845_v51  ;;  %v5593_v30 = vadd.f32 1e-05, %v2526_v52  ;;  %v3847_v39 = vpop.eup %3846  ;;  %v3005_v10 = vand.u32 2147483647, %v5558_v54  ;;  %vm5620_vm5 = vmor %vm3001_vm3, %vm3002_vm2 }
 0xbd3   :  { %v2998_v25 = vsub.f32 1.0, %v2997_v2  ;;  %v3179_v43 = vmul.f32 %v2994_v0, %v5526_v17  ;;  %v2651_v53 = vmul.f32 %v5562_v5, %v2650_v48  ;;  %v2657_v18 = vmul.f32 %v3847_v39, %v5569_v3 }
 0xbd4   :  { %3848 = vrcp.f32 %v2925_v14  ;;  %vm2663_vm4 = vweird.f32 %v3847_v39  ;;  %v3007_v57 = vand.u32 2147483648, %v5558_v54  ;;  %v3020_v0 = vand.u32 2147483647, %v2925_v14 }
 0xbd5   :  { %v2999_v21 = vmul.f32 %v5585_v32, %v2998_v25  ;;  %3850 = vrsqrt.f32 %v5593_v30  ;;  %v2658_v26 = vmul.f32 %v3847_v39, %v2657_v18  ;;  %v3193_v17 = vpack.c.bf16 %v3179_v43, %v3178_v40  ;;  %vm2664_vm7 = vmor %vm2662_vm6, %vm2663_vm4 }
 0xbd6   :  { %v2655_v7 = vsel %vm5605_vm1, %v5562_v5, %v2651_v53  ;;  %v3022_v48 = vand.u32 2147483648, %v2925_v14  ;;  %v3008_v25 = vor.u32 1.1754944e-38, %v3007_v57  ;;  %vm3006_vm10 = vcmp.eq.f32.partialorder %v3005_v10, 8.507059e+37 }
 0xbd7   :  { %v2507_v56 = vpop.xlane.xlu1 %2506  ;;  %v2659_v13 = vmul.f32 0.5, %v2658_v26  ;;  %v3000_v44 = vadd.f32 %v5585_v32, %v2999_v21  ;;  %3513 = vmatmul.msk.bf16.gmra.mxu2 %vm1347_vm9, %v3193_v17  ;;  %v2716_v5 = vmul.f32 %v2655_v7, %v5438_v24  ;;  %vm3016_vm11 = vweird.f32 %v2925_v14 }
 0xbd8   :  { %v2527_v49 = vmul.f32 %v2507_v56, %v4072_v45  ;;  %vm3021_vm13 = vcmp.eq.f32.partialorder %v3020_v0, 8.507059e+37  ;;  %vm2672_vm15 = vweird.f32 %v5593_v30 }
 0xbd9   :  { %v2660_v41 = vsub.f32 1.5, %v2659_v13  ;;  %v3004_v2 = vsel %vm5620_vm5, %v5585_v32, %v3000_v44  ;;  %v2735_v53 = vmul.f32 %v5383_v61, %v2716_v5  ;;  %v3023_v32 = vor.u32 1.1754944e-38, %v3022_v48 }
 0xbda   :  { %v3849_v15 = vpop.eup %3848  ;;  %v2543_v36 = vadd.f32 1e-05, %v2527_v49  ;;  %v3009_v21 = vsel %vm3006_vm10, %v3008_v25, %v3004_v2 }
 0xbdb   :  { %v3012_v33 = vmul.f32 %v3849_v15, %v2925_v14  ;;  %v3851_v6 = vpop.eup %3850  ;;  %v2661_v60 = vmul.f32 %v3847_v39, %v2660_v41  ;;  %vm3017_vm8 = vweird.f32 %v3849_v15  ;;  %v3180_v14 = vmul.f32 %v3009_v21, %v5533_v42 }
 0xbdc   :  { %3852 = vrsqrt.f32 %v2543_v36  ;;  %v2667_v28 = vmul.f32 %v3851_v6, %v5593_v30  ;;  %vm3018_vm12 = vmor %vm3016_vm11, %vm3017_vm8  ;;  %vm2673_vm14 = vweird.f32 %v3851_v6  ;;  %vm2682_vm3 = vweird.f32 %v2543_v36 }
 0xbdd   :  { %v3013_v51 = vsub.f32 1.0, %v3012_v33  ;;  %v2665_v24 = vsel %vm2664_vm7, %v3847_v39, %v2661_v60  ;;  %vm2674_vm1 = vmor %vm2672_vm15, %vm2673_vm14 }
 0xbde   :  { %v2668_v63 = vmul.f32 %v3851_v6, %v2667_v28  ;;  %v2717_v43 = vmul.f32 %v2665_v24, %v5445_v50  ;;  %v2754_v50 = vadd.f32 %v5397_v22, %v2735_v53 }
 0xbdf   :  { %v3014_v54 = vmul.f32 %v3849_v15, %v3013_v51  ;;  %v2510_v2 = vpop.xlane.xlu2 %2509 }
 0xbe0   :  { %v2669_v18 = vmul.f32 0.5, %v2668_v63  ;;  %v2736_v26 = vmul.f32 %v5383_v61, %v2717_v43 }
 0xbe1   :  { %v3015_v3 = vadd.f32 %v3849_v15, %v3014_v54 }
 0xbe2   :  { %v3853_v40 = vpop.eup %3852  ;;  %v2670_v23 = vsub.f32 1.5, %v2669_v18  ;;  %v2755_v49 = vadd.f32 %v5397_v22, %v2736_v26 }
 0xbe3   :  { %v3019_v56 = vsel %vm3018_vm12, %v3849_v15, %v3015_v3  ;;  %v2677_v39 = vmul.f32 %v3853_v40, %v2543_v36  ;;  %vm2683_vm2 = vweird.f32 %v3853_v40 }
 0xbe4   :  { %v3024_v17 = vsel %vm3021_vm13, %v3023_v32, %v3019_v56  ;;  %v2671_v13 = vmul.f32 %v3851_v6, %v2670_v23  ;;  %v2765_v33 = vpack.c.bf16 %v2755_v49, %v2754_v50  ;;  %vm2684_vm4 = vmor %vm2682_vm3, %vm2683_vm2 }
 0xbe5   :  { %v3181_v7 = vmul.f32 %v3024_v17, %v5552_v31  ;;  %v2678_v44 = vmul.f32 %v3853_v40, %v2677_v39 }
 0xbe6   :  { %v2675_v15 = vsel %vm2674_vm1, %v3851_v6, %v2671_v13  ;;  %3477 = vmatmul.msk.bf16.gmra.mxu0 %vm268_vm0, %v2765_v33 }
 0xbe7   :  { %v3194_v41 = vpack.c.bf16 %v3181_v7, %v3180_v14  ;;  %v2679_v10 = vmul.f32 0.5, %v2678_v44  ;;  %v2718_v30 = vmul.f32 %v2675_v15, %v5452_v37  ;;  %v2528_v37 = vmul.f32 %v2510_v2, %v4072_v45 }
 0xbe9   :  { %v2680_v57 = vsub.f32 1.5, %v2679_v10  ;;  %3514 = vmatmul.msk.bf16.gmra.mxu2 %vm1347_vm9, %v3194_v41  ;;  %v2737_v52 = vmul.f32 %v5383_v61, %v2718_v30  ;;  %v2544_v0 = vadd.f32 1e-05, %v2528_v37 }
 0xbeb   :  { %v2681_v5 = vmul.f32 %v3853_v40, %v2680_v57  ;;  %v2756_v6 = vadd.f32 %v5397_v22, %v2737_v52  ;;  %3854 = vrsqrt.f32 %v2544_v0  ;;  %vm2692_vm6 = vweird.f32 %v2544_v0 }
 0xbed   :  { %v2685_v42 = vsel %vm2684_vm4, %v3853_v40, %v2681_v5 }
 0xbee   :  { %v2719_v31 = vmul.f32 %v2685_v42, %v5460_v20 }
 0xbf0   :  { %v2738_v51 = vmul.f32 %v5383_v61, %v2719_v31 }
 0xbf1   :  { %v3855_v36 = vpop.eup %3854 }
 0xbf2   :  { %v2757_v60 = vadd.f32 %v5397_v22, %v2738_v51  ;;  %v2687_v48 = vmul.f32 %v3855_v36, %v2544_v0  ;;  %vm2693_vm5 = vweird.f32 %v3855_v36 }
 0xbf3   :  { %vm2694_vm7 = vmor %vm2692_vm6, %vm2693_vm5 }
 0xbf4   :  { %v2766_v28 = vpack.c.bf16 %v2757_v60, %v2756_v6  ;;  %v2688_v24 = vmul.f32 %v3855_v36, %v2687_v48 }
 0xbf6   :  { %3478 = vmatmul.msk.bf16.gmra.mxu0 %vm268_vm0, %v2766_v28  ;;  %v2689_v3 = vmul.f32 0.5, %v2688_v24 }
 0xbf8   :  { %v2690_v21 = vsub.f32 1.5, %v2689_v3 }
 0xbfa   :  { %v2691_v17 = vmul.f32 %v3855_v36, %v2690_v21 }
 0xbfc   :  { %v2695_v14 = vsel %vm2694_vm7, %v3855_v36, %v2691_v17 }
 0xbfd   :  { %v2720_v44 = vmul.f32 %v2695_v14, %v5467_v8 }
 0xbff   :  { %v2739_v42 = vmul.f32 %v5383_v61, %v2720_v44 }
 0xc01   :  { %v2758_v6 = vadd.f32 %v5397_v22, %v2739_v42 }
 0xc0d   :  { %v2831_v54 = vpop.f32.mrf.mxu0  ;;  %v2513_v20 = vpop.xlane.xlu0 %2512 }
 0xc0e   :  { %v5648_v63 = vadd.f32 %v5489_v55, %v2831_v54  ;;  %v2529_v25 = vmul.f32 %v2513_v20, %v4072_v45 }
 0xc10   :  { %v3486_v43 = vmul.f32 -1.702, %v5648_v63  ;;  %v2545_v53 = vadd.f32 1e-05, %v2529_v25 }
 0xc12   :  { %v2900_v18 = vmul.f32 1.442695, %v3486_v43  ;;  %3856 = vrsqrt.f32 %v2545_v53  ;;  %vm2702_vm10 = vweird.f32 %v2545_v53 }
 0xc14   :  { %3858 = vpow2.f32 %v2900_v18 }
 0xc15   :  { %v2833_v40 = vpop.f32.mrf.mxu0 }
 0xc16   :  { %v5653_v32 = vadd.f32 %v5489_v55, %v2833_v40 }
 0xc18   :  { %v3857_v26 = vpop.eup %3856  ;;  %v3487_v56 = vmul.f32 -1.702, %v5653_v32 }
 0xc19   :  { %v2697_v23 = vmul.f32 %v3857_v26, %v2545_v53  ;;  %vm2703_vm8 = vweird.f32 %v3857_v26 }
 0xc1a   :  { %v3859_v39 = vpop.eup %3858  ;;  %v2902_v45 = vmul.f32 1.442695, %v3487_v56  ;;  %vm2704_vm11 = vmor %vm2702_vm10, %vm2703_vm8 }
 0xc1b   :  { %v2926_v50 = vadd.f32 1.0, %v3859_v39  ;;  %v2698_v49 = vmul.f32 %v3857_v26, %v2697_v23 }
 0xc1c   :  { %3860 = vpow2.f32 %v2902_v45 }
 0xc1d   :  { %3862 = vrcp.f32 %v2926_v50  ;;  %v2699_v7 = vmul.f32 0.5, %v2698_v49  ;;  %v3037_v0 = vand.u32 2147483648, %v2926_v50  ;;  %vm3031_vm13 = vweird.f32 %v2926_v50 }
 0xc1f   :  { %v2700_v13 = vsub.f32 1.5, %v2699_v7  ;;  %v3038_v25 = vor.u32 1.1754944e-38, %v3037_v0 }
 0xc21   :  { %v2701_v41 = vmul.f32 %v3857_v26, %v2700_v13 }
 0xc22   :  { %v3861_v33 = vpop.eup %3860 }
 0xc23   :  { %v3863_v15 = vpop.eup %3862  ;;  %v2927_v10 = vadd.f32 1.0, %v3861_v33  ;;  %v2705_v30 = vsel %vm2704_vm11, %v3857_v26, %v2701_v41 }
 0xc24   :  { %v3027_v57 = vmul.f32 %v3863_v15, %v2926_v50  ;;  %v2721_v5 = vmul.f32 %v2705_v30, %v5484_v11  ;;  %vm3032_vm12 = vweird.f32 %v3863_v15  ;;  %v3035_v11 = vand.u32 2147483647, %v2926_v50 }
 0xc25   :  { %3864 = vrcp.f32 %v2927_v10  ;;  %vm3033_vm14 = vmor %vm3031_vm13, %vm3032_vm12  ;;  %v3050_v48 = vand.u32 2147483647, %v2927_v10  ;;  %v3052_v54 = vand.u32 2147483648, %v2927_v10  ;;  %vm3046_vm2 = vweird.f32 %v2927_v10 }
 0xc26   :  { %v3028_v31 = vsub.f32 1.0, %v3027_v57  ;;  %v2740_v52 = vmul.f32 %v5383_v61, %v2721_v5  ;;  %vm3036_vm1 = vcmp.eq.f32.partialorder %v3035_v11, 8.507059e+37 }
 0xc27   :  { %v3053_v18 = vor.u32 1.1754944e-38, %v3052_v54  ;;  %vm3051_vm4 = vcmp.eq.f32.partialorder %v3050_v48, 8.507059e+37 }
 0xc28   :  { %v3029_v51 = vmul.f32 %v3863_v15, %v3028_v31  ;;  %v2759_v8 = vadd.f32 %v5397_v22, %v2740_v52 }
 0xc2a   :  { %v2767_v28 = vpack.c.bf16 %v2759_v8, %v2758_v6  ;;  %v3030_v2 = vadd.f32 %v3863_v15, %v3029_v51 }
 0xc2b   :  { %v3865_v60 = vpop.eup %3864 }
 0xc2c   :  { %v3042_v37 = vmul.f32 %v3865_v60, %v2927_v10  ;;  %3479 = vmatmul.msk.bf16.gmra.mxu0 %vm268_vm0, %v2767_v28  ;;  %v3034_v20 = vsel %vm3033_vm14, %v3863_v15, %v3030_v2  ;;  %vm3047_vm15 = vweird.f32 %v3865_v60 }
 0xc2d   :  { %v3039_v3 = vsel %vm3036_vm1, %v3038_v25, %v3034_v20  ;;  %vm3048_vm3 = vmor %vm3046_vm2, %vm3047_vm15 }
 0xc2e   :  { %v3043_v36 = vsub.f32 1.0, %v3042_v37  ;;  %v2836_v61 = vpop.f32.mrf.mxu0  ;;  %v3182_v56 = vmul.f32 %v3039_v3, %v5648_v63  ;;  %v5674_v63 = vld [vmem:[%s5816_s16] ss:$0 sm:$0xff] }
 0xc2f   :  { %v5664_v22 = vadd.f32 %v5489_v55, %v2836_v61 }
 0xc30   :  { %v3044_v24 = vmul.f32 %v3865_v60, %v3043_v36 }
 0xc31   :  { %v3488_v53 = vmul.f32 -1.702, %v5664_v22 }
 0xc32   :  { %v3045_v43 = vadd.f32 %v3865_v60, %v3044_v24 }
 0xc33   :  { %v2904_v21 = vmul.f32 1.442695, %v3488_v53 }
 0xc34   :  { %v3049_v40 = vsel %vm3048_vm3, %v3865_v60, %v3045_v43 }
 0xc35   :  { %v3054_v26 = vsel %vm3051_vm4, %v3053_v18, %v3049_v40  ;;  %3866 = vpow2.f32 %v2904_v21 }
 0xc36   :  { %v3183_v23 = vmul.f32 %v3054_v26, %v5653_v32  ;;  %v2838_v39 = vpop.f32.mrf.mxu0 }
 0xc37   :  { %v2839_v45 = vadd.f32 %v5489_v55, %v2838_v39 }
 0xc38   :  { %v3195_v17 = vpack.c.bf16 %v3183_v23, %v3182_v56 }
 0xc39   :  { %v3489_v50 = vmul.f32 -1.702, %v2839_v45 }
 0xc3a   :  { %3515 = vmatmul.msk.bf16.gmra.mxu2 %vm1347_vm9, %v3195_v17 }
 0xc3b   :  { %v3867_v49 = vpop.eup %3866  ;;  %v2906_v14 = vmul.f32 1.442695, %v3489_v50 }
 0xc3c   :  { %v2928_v7 = vadd.f32 1.0, %v3867_v49 }
 0xc3d   :  { %3868 = vpow2.f32 %v2906_v14 }
 0xc3e   :  { %3870 = vrcp.f32 %v2928_v7  ;;  %v3067_v52 = vand.u32 2147483648, %v2928_v7  ;;  %vm3061_vm6 = vweird.f32 %v2928_v7  ;;  %v3065_v51 = vand.u32 2147483647, %v2928_v7 }
 0xc40   :  { %vm3066_vm10 = vcmp.eq.f32.partialorder %v3065_v51, 8.507059e+37 }
 0xc43   :  { %v3869_v13 = vpop.eup %3868 }
 0xc44   :  { %v3871_v44 = vpop.eup %3870  ;;  %v2929_v33 = vadd.f32 1.0, %v3869_v13 }
 0xc45   :  { %v3057_v41 = vmul.f32 %v3871_v44, %v2928_v7  ;;  %vm3062_vm5 = vweird.f32 %v3871_v44 }
 0xc46   :  { %3872 = vrcp.f32 %v2929_v33  ;;  %vm3063_vm7 = vmor %vm3061_vm6, %vm3062_vm5  ;;  %v3082_v8 = vand.u32 2147483648, %v2929_v33  ;;  %v3080_v2 = vand.u32 2147483647, %v2929_v33  ;;  %vm3076_vm11 = vweird.f32 %v2929_v33 }
 0xc47   :  { %v3058_v32 = vsub.f32 1.0, %v3057_v41 }
 0xc48   :  { %v3083_v48 = vor.u32 1.1754944e-38, %v3082_v8  ;;  %vm3081_vm13 = vcmp.eq.f32.partialorder %v3080_v2, 8.507059e+37 }
 0xc49   :  { %v3059_v15 = vmul.f32 %v3871_v44, %v3058_v32 }
 0xc4a   :  { %v3260_v10 = vpop.f32.mrf.mxu2 }
 0xc4b   :  { %v3261_v57 = vadd.f32 %v5674_v63, %v3260_v10  ;;  %v3060_v42 = vadd.f32 %v3871_v44, %v3059_v15 }
 0xc4c   :  { %v3873_v30 = vpop.eup %3872 }
 0xc4d   :  { %v3300_v5 = vadd.f32 %v3261_v57, %v5199_v9  ;;  %v3072_v31 = vmul.f32 %v3873_v30, %v2929_v33  ;;  %v3064_v60 = vsel %vm3063_vm7, %v3871_v44, %v3060_v42  ;;  %vm3077_vm8 = vweird.f32 %v3873_v30 }
 0xc4e   :  { %v3068_v9 = vor.u32 1.1754944e-38, %v3067_v52  ;;  %vm3078_vm12 = vmor %vm3076_vm11, %vm3077_vm8 }
 0xc4f   :  { %3316 = vst.msk [vmem:[%s5817_s17] sm:$0xff] %vm268_vm0, %v3300_v5  ;;  %v3073_v6 = vsub.f32 1.0, %v3072_v31 }
 0xc50   :  { %v3069_v36 = vsel %vm3066_vm10, %v3068_v9, %v3064_v60 }
 0xc51   :  { %v3074_v28 = vmul.f32 %v3873_v30, %v3073_v6  ;;  %v3184_v24 = vmul.f32 %v3069_v36, %v5664_v22 }
 0xc52   :  { %v3262_v37 = vpop.f32.mrf.mxu2 }
 0xc53   :  { %v3263_v0 = vadd.f32 %v5674_v63, %v3262_v37  ;;  %v3075_v11 = vadd.f32 %v3873_v30, %v3074_v28 }
 0xc55   :  { %v3301_v54 = vadd.f32 %v3263_v0, %v5211_v58  ;;  %v3079_v61 = vsel %vm3078_vm12, %v3873_v30, %v3075_v11 }
 0xc56   :  { %v3084_v20 = vsel %vm3081_vm13, %v3083_v48, %v3079_v61 }
 0xc57   :  { %3317 = vst.msk [vmem:[%s5817_s17 + $0x8] sm:$0xff] %vm268_vm0, %v3301_v54  ;;  %v3185_v25 = vmul.f32 %v3084_v20, %v2839_v45 }
 0xc59   :  { %v3196_v43 = vpack.c.bf16 %v3185_v25, %v3184_v24 }
 0xc5a   :  { %v3265_v53 = vpop.f32.mrf.mxu2 }
 0xc5b   :  { %3516 = vmatmul.msk.bf16.gmra.mxu2 %vm1347_vm9, %v3196_v43  ;;  %v3266_v3 = vadd.f32 %v5674_v63, %v3265_v53 }
 0xc5d   :  { %v3302_v18 = vadd.f32 %v3266_v3, %v5228_v29 }
 0xc5f   :  { %3318 = vst.msk [vmem:[%s5817_s17 + $0x10] sm:$0xff] %vm268_vm0, %v3302_v18 }
 0xc62   :  { %v3267_v58 = vpop.f32.mrf.mxu2 }
 0xc63   :  { %v2841_v40 = vpop.f32.mrf.mxu0  ;;  %v3268_v21 = vadd.f32 %v5674_v63, %v3267_v58 }
 0xc64   :  { %v5698_v22 = vadd.f32 %v5489_v55, %v2841_v40 }
 0xc65   :  { %v3303_v26 = vadd.f32 %v3268_v21, %v5217_v47 }
 0xc66   :  { %v3490_v56 = vmul.f32 -1.702, %v5698_v22 }
 0xc67   :  { %3319 = vst.msk [vmem:[%s5817_s17 + $0x18] sm:$0xff] %vm268_vm0, %v3303_v26 }
 0xc68   :  { %v2908_v29 = vmul.f32 1.442695, %v3490_v56 }
 0xc6a   :  { %3874 = vpow2.f32 %v2908_v29 }
 0xc6b   :  { %v2843_v39 = vpop.f32.mrf.mxu0 }
 0xc6c   :  { %v3270_v23 = vpop.f32.mrf.mxu2  ;;  %v5708_v45 = vadd.f32 %v5489_v55, %v2843_v39 }
 0xc6d   :  { %v3271_v17 = vadd.f32 %v5674_v63, %v3270_v23 }
 0xc6e   :  { %v3491_v47 = vmul.f32 -1.702, %v5708_v45 }
 0xc6f   :  { %v3304_v50 = vadd.f32 %v3271_v17, %v5205_v19 }
 0xc70   :  { %v3875_v49 = vpop.eup %3874  ;;  %v2910_v14 = vmul.f32 1.442695, %v3491_v47 }
 0xc71   :  { %3320 = vst.msk [vmem:[%s5817_s17 + $0x20] sm:$0xff] %vm268_vm0, %v3304_v50  ;;  %v2930_v7 = vadd.f32 1.0, %v3875_v49 }
 0xc72   :  { %3876 = vpow2.f32 %v2910_v14 }
 0xc73   :  { %3878 = vrcp.f32 %v2930_v7  ;;  %v2846_v44 = vpop.f32.mrf.mxu0  ;;  %v3097_v9 = vand.u32 2147483648, %v2930_v7  ;;  %vm3091_vm15 = vweird.f32 %v2930_v7  ;;  %v3095_v0 = vand.u32 2147483647, %v2930_v7 }
 0xc74   :  { %v3272_v13 = vpop.f32.mrf.mxu2  ;;  %v5718_v41 = vadd.f32 %v5489_v55, %v2846_v44 }
 0xc75   :  { %v3273_v33 = vadd.f32 %v5674_v63, %v3272_v13  ;;  %v3098_v61 = vor.u32 1.1754944e-38, %v3097_v9  ;;  %vm3096_vm3 = vcmp.eq.f32.partialorder %v3095_v0, 8.507059e+37 }
 0xc76   :  { %v3492_v32 = vmul.f32 -1.702, %v5718_v41 }
 0xc77   :  { %v3305_v19 = vadd.f32 %v3273_v33, %v5234_v27 }
 0xc78   :  { %v3877_v15 = vpop.eup %3876  ;;  %v2912_v10 = vmul.f32 1.442695, %v3492_v32 }
 0xc79   :  { %3321 = vst.msk [vmem:[%s5817_s17 + $0x28] sm:$0xff] %vm268_vm0, %v3305_v19  ;;  %v3879_v57 = vpop.eup %3878  ;;  %v2931_v30 = vadd.f32 1.0, %v3877_v15 }
 0xc7a   :  { %v3087_v5 = vmul.f32 %v3879_v57, %v2930_v7  ;;  %3880 = vpow2.f32 %v2912_v10  ;;  %vm3092_vm14 = vweird.f32 %v3879_v57 }
 0xc7b   :  { %3882 = vrcp.f32 %v2931_v30  ;;  %v2848_v42 = vpop.f32.mrf.mxu0  ;;  %vm3093_vm1 = vmor %vm3091_vm15, %vm3092_vm14  ;;  %v3112_v36 = vand.u32 2147483648, %v2931_v30  ;;  %v3110_v54 = vand.u32 2147483647, %v2931_v30  ;;  %vm3106_vm4 = vweird.f32 %v2931_v30 }
 0xc7c   :  { %v3088_v31 = vsub.f32 1.0, %v3087_v5  ;;  %v5727_v52 = vadd.f32 %v5489_v55, %v2848_v42 }
 0xc7d   :  { %v3113_v53 = vor.u32 1.1754944e-38, %v3112_v36  ;;  %vm3111_vm6 = vcmp.eq.f32.partialorder %v3110_v54, 8.507059e+37 }
 0xc7e   :  { %v3089_v27 = vmul.f32 %v3879_v57, %v3088_v31  ;;  %v3493_v51 = vmul.f32 -1.702, %v5727_v52  ;;  %v3898_v31 = vld [vmem:[%s5814_s14] ss:$0 sm:$0xff] }
 0xc80   :  { %v3881_v6 = vpop.eup %3880  ;;  %v2914_v8 = vmul.f32 1.442695, %v3493_v51  ;;  %v3090_v2 = vadd.f32 %v3879_v57, %v3089_v27 }
 0xc81   :  { %v3883_v60 = vpop.eup %3882  ;;  %v2932_v28 = vadd.f32 1.0, %v3881_v6 }
 0xc82   :  { %v3102_v37 = vmul.f32 %v3883_v60, %v2931_v30  ;;  %3884 = vpow2.f32 %v2914_v8  ;;  %v3094_v55 = vsel %vm3093_vm1, %v3879_v57, %v3090_v2  ;;  %vm3107_vm2 = vweird.f32 %v3883_v60 }
 0xc83   :  { %3886 = vrcp.f32 %v2932_v28  ;;  %v3099_v43 = vsel %vm3096_vm3, %v3098_v61, %v3094_v55  ;;  %vm3108_vm5 = vmor %vm3106_vm4, %vm3107_vm2  ;;  %v3127_v47 = vand.u32 2147483648, %v2932_v28  ;;  %vm3121_vm8 = vweird.f32 %v2932_v28 }
 0xc84   :  { %v3103_v11 = vsub.f32 1.0, %v3102_v37  ;;  %v3186_v21 = vmul.f32 %v3099_v43, %v5698_v22  ;;  %v3125_v49 = vand.u32 2147483647, %v2932_v28 }
 0xc86   :  { %v3104_v48 = vmul.f32 %v3883_v60, %v3103_v11  ;;  %vm3126_vm12 = vcmp.eq.f32.partialorder %v3125_v49, 8.507059e+37 }
 0xc88   :  { %v3885_v20 = vpop.eup %3884  ;;  %v3105_v24 = vadd.f32 %v3883_v60, %v3104_v48 }
 0xc89   :  { %v3887_v25 = vpop.eup %3886  ;;  %v2933_v3 = vadd.f32 1.0, %v3885_v20 }
 0xc8a   :  { %v3109_v18 = vsel %vm3108_vm5, %v3883_v60, %v3105_v24  ;;  %v3117_v58 = vmul.f32 %v3887_v25, %v2932_v28  ;;  %vm3122_vm7 = vweird.f32 %v3887_v25 }
 0xc8b   :  { %v3114_v40 = vsel %vm3111_vm6, %v3113_v53, %v3109_v18  ;;  %3888 = vrcp.f32 %v2933_v3  ;;  %vm3123_vm10 = vmor %vm3121_vm8, %vm3122_vm7  ;;  %v3142_v7 = vand.u32 2147483648, %v2933_v3  ;;  %v3140_v22 = vand.u32 2147483647, %v2933_v3 }
 0xc8c   :  { %v3187_v26 = vmul.f32 %v3114_v40, %v5708_v45  ;;  %v3118_v56 = vsub.f32 1.0, %v3117_v58  ;;  %v3128_v45 = vor.u32 1.1754944e-38, %v3127_v47  ;;  %vm3136_vm13 = vweird.f32 %v2933_v3 }
 0xc8d   :  { %v3143_v32 = vor.u32 1.1754944e-38, %v3142_v7  ;;  %vm3141_vm15 = vcmp.eq.f32.partialorder %v3140_v22, 8.507059e+37 }
 0xc8e   :  { %v3197_v29 = vpack.c.bf16 %v3187_v26, %v3186_v21  ;;  %v3119_v23 = vmul.f32 %v3887_v25, %v3118_v56 }
 0xc90   :  { %3517 = vmatmul.msk.bf16.gmra.mxu2 %vm1347_vm9, %v3197_v29  ;;  %v3120_v17 = vadd.f32 %v3887_v25, %v3119_v23 }
 0xc91   :  { %v3889_v39 = vpop.eup %3888 }
 0xc92   :  { %v3132_v50 = vmul.f32 %v3889_v39, %v2933_v3  ;;  %v3124_v13 = vsel %vm3123_vm10, %v3887_v25, %v3120_v17  ;;  %vm3137_vm11 = vweird.f32 %v3889_v39 }
 0xc93   :  { %v3129_v19 = vsel %vm3126_vm12, %v3128_v45, %v3124_v13  ;;  %vm3138_vm14 = vmor %vm3136_vm13, %vm3137_vm11 }
 0xc94   :  { %v3133_v14 = vsub.f32 1.0, %v3132_v50  ;;  %v3188_v57 = vmul.f32 %v3129_v19, %v5718_v41 }
 0xc96   :  { %v3134_v44 = vmul.f32 %v3889_v39, %v3133_v14 }
 0xc98   :  { %v3135_v33 = vadd.f32 %v3889_v39, %v3134_v44 }
 0xc9a   :  { %v3139_v15 = vsel %vm3138_vm14, %v3889_v39, %v3135_v33 }
 0xc9b   :  { %v3144_v10 = vsel %vm3141_vm15, %v3143_v32, %v3139_v15 }
 0xc9c   :  { %v3189_v30 = vmul.f32 %v3144_v10, %v5727_v52 }
 0xc9e   :  { %v3198_v5 = vpack.c.bf16 %v3189_v30, %v3188_v57 }
 0xca0   :  { %3518 = vmatmul.msk.bf16.gmra.mxu2 %vm1347_vm9, %v3198_v5 }
 0xca9   :  { %v2851_v42 = vpop.f32.mrf.mxu0 }
 0xcaa   :  { %v2852_v27 = vadd.f32 %v3898_v31, %v2851_v42 }
 0xcac   :  { %v3494_v51 = vmul.f32 -1.702, %v2852_v27 }
 0xcae   :  { %v2916_v6 = vmul.f32 1.442695, %v3494_v51 }
 0xcb0   :  { %3890 = vpow2.f32 %v2916_v6 }
 0xcb1   :  { %v2853_v8 = vpop.f32.mrf.mxu0 }
 0xcb2   :  { %v2854_v60 = vadd.f32 %v3898_v31, %v2853_v8 }
 0xcb4   :  { %v3495_v28 = vmul.f32 -1.702, %v2854_v60 }
 0xcb6   :  { %v3891_v2 = vpop.eup %3890  ;;  %v2918_v37 = vmul.f32 1.442695, %v3495_v28 }
 0xcb7   :  { %v2934_v41 = vadd.f32 1.0, %v3891_v2 }
 0xcb8   :  { %3892 = vpow2.f32 %v2918_v37 }
 0xcb9   :  { %3894 = vrcp.f32 %v2934_v41  ;;  %v3157_v18 = vand.u32 2147483648, %v2934_v41  ;;  %vm3151_vm2 = vweird.f32 %v2934_v41 }
 0xcbb   :  { %v3158_v29 = vor.u32 1.1754944e-38, %v3157_v18 }
 0xcbd   :  { %v3275_v52 = vpop.f32.mrf.mxu2 }
 0xcbe   :  { %v3276_v9 = vadd.f32 %v5674_v63, %v3275_v52  ;;  %v3893_v0 = vpop.eup %3892 }
 0xcbf   :  { %v3895_v11 = vpop.eup %3894  ;;  %v2935_v36 = vadd.f32 1.0, %v3893_v0 }
 0xcc0   :  { %v3306_v55 = vadd.f32 %v3276_v9, %v5240_v35  ;;  %v3147_v48 = vmul.f32 %v3895_v11, %v2934_v41  ;;  %vm3152_vm1 = vweird.f32 %v3895_v11  ;;  %v3155_v35 = vand.u32 2147483647, %v2934_v41 }
 0xcc1   :  { %3896 = vrcp.f32 %v2935_v36  ;;  %vm3153_vm3 = vmor %vm3151_vm2, %vm3152_vm1  ;;  %v3172_v40 = vand.u32 2147483648, %v2935_v36  ;;  %v3170_v56 = vand.u32 2147483647, %v2935_v36  ;;  %vm3166_vm6 = vweird.f32 %v2935_v36 }
 0xcc2   :  { %3322 = vst.msk [vmem:[%s5817_s17 + $0x30] sm:$0xff] %vm268_vm0, %v3306_v55  ;;  %v3148_v54 = vsub.f32 1.0, %v3147_v48  ;;  %vm3156_vm5 = vcmp.eq.f32.partialorder %v3155_v35, 8.507059e+37 }
 0xcc3   :  { %v3173_v39 = vor.u32 1.1754944e-38, %v3172_v40  ;;  %vm3171_vm8 = vcmp.eq.f32.partialorder %v3170_v56, 8.507059e+37 }
 0xcc4   :  { %v3149_v61 = vmul.f32 %v3895_v11, %v3148_v54 }
 0xcc5   :  { %v3277_v20 = vpop.f32.mrf.mxu2 }
 0xcc6   :  { %v3278_v24 = vadd.f32 %v5674_v63, %v3277_v20  ;;  %v3150_v53 = vadd.f32 %v3895_v11, %v3149_v61 }
 0xcc7   :  { %v3897_v25 = vpop.eup %3896 }
 0xcc8   :  { %v3307_v43 = vadd.f32 %v3278_v24, %v5268_v12  ;;  %v3162_v3 = vmul.f32 %v3897_v25, %v2935_v36  ;;  %v3154_v21 = vsel %vm3153_vm3, %v3895_v11, %v3150_v53  ;;  %vm3167_vm4 = vweird.f32 %v3897_v25 }
 0xcc9   :  { %v3159_v23 = vsel %vm3156_vm5, %v3158_v29, %v3154_v21  ;;  %vm3168_vm7 = vmor %vm3166_vm6, %vm3167_vm4 }
 0xcca   :  { %3323 = vst.msk [vmem:[%s5817_s17 + $0x38] sm:$0xff] %vm268_vm0, %v3307_v43  ;;  %v3163_v58 = vsub.f32 1.0, %v3162_v3  ;;  %v3190_v47 = vmul.f32 %v3159_v23, %v2852_v27 }
 0xccc   :  { %v3164_v26 = vmul.f32 %v3897_v25, %v3163_v58 }
 0xcce   :  { %v3165_v12 = vadd.f32 %v3897_v25, %v3164_v26 }
 0xcd0   :  { %v3169_v17 = vsel %vm3168_vm7, %v3897_v25, %v3165_v12 }
 0xcd1   :  { %v3174_v50 = vsel %vm3171_vm8, %v3173_v39, %v3169_v17 }
 0xcd2   :  { %v3191_v49 = vmul.f32 %v3174_v50, %v2854_v60 }
 0xcd4   :  { %v3199_v14 = vpack.c.bf16 %v3191_v49, %v3190_v47 }
 0xcd6   :  { %3519 = vmatmul.msk.bf16.gmra.mxu2 %vm1347_vm9, %v3199_v14 }
 0xcde   :  { %v3280_v7 = vpop.f32.mrf.mxu2 }
 0xcdf   :  { %v3281_v13 = vadd.f32 %v5674_v63, %v3280_v7 }
 0xce1   :  { %v3308_v44 = vadd.f32 %v3281_v13, %v5300_v62 }
 0xce3   :  { %3324 = vst.msk [vmem:[%s5817_s17 + $0x40] sm:$0xff] %vm268_vm0, %v3308_v44 }
 0xce6   :  { %v3282_v22 = vpop.f32.mrf.mxu2 }
 0xce7   :  { %v3283_v45 = vadd.f32 %v5674_v63, %v3282_v22 }
 0xce9   :  { %v3309_v33 = vadd.f32 %v3283_v45, %v5314_v4 }
 0xceb   :  { %3325 = vst.msk [vmem:[%s5817_s17 + $0x48] sm:$0xff] %vm268_vm0, %v3309_v33 }
 0xd13   :  { %v3285_v19 = vpop.f32.mrf.mxu2 }
 0xd14   :  { %v3286_v32 = vadd.f32 %v5674_v63, %v3285_v19 }
 0xd16   :  { %v3310_v62 = vadd.f32 %v3286_v32, %v5328_v46 }
 0xd18   :  { %3326 = vst.msk [vmem:[%s5817_s17 + $0x50] sm:$0xff] %vm268_vm0, %v3310_v62 }
 0xd1b   :  { %v3287_v15 = vpop.f32.mrf.mxu2 }
 0xd1c   :  { %v3288_v10 = vadd.f32 %v5674_v63, %v3287_v15 }
 0xd1e   :  { %v3311_v4 = vadd.f32 %v3288_v10, %v5334_v59 }
 0xd20   :  { %3327 = vst.msk [vmem:[%s5817_s17 + $0x58] sm:$0xff] %vm268_vm0, %v3311_v4 }
 0xd23   :  { %v3290_v57 = vpop.f32.mrf.mxu2 }
 0xd24   :  { %v3291_v30 = vadd.f32 %v5674_v63, %v3290_v57 }
 0xd26   :  { %v3312_v46 = vadd.f32 %v3291_v30, %v5340_v34 }
 0xd28   :  { %3328 = vst.msk [vmem:[%s5817_s17 + $0x60] sm:$0xff] %vm268_vm0, %v3312_v46 }
 0xd2b   :  { %v3292_v5 = vpop.f32.mrf.mxu2 }
 0xd2c   :  { %v3293_v42 = vadd.f32 %v5674_v63, %v3292_v5 }
 0xd2e   :  { %v3313_v59 = vadd.f32 %v3293_v42, %v5346_v16 }
 0xd30   :  { %3329 = vst.msk [vmem:[%s5817_s17 + $0x68] sm:$0xff] %vm268_vm0, %v3313_v59 }
 0xd59   :  { %v3295_v31 = vpop.f32.mrf.mxu2 }
 0xd5a   :  { %v3296_v27 = vadd.f32 %v5674_v63, %v3295_v31 }
 0xd5c   :  { %v3314_v34 = vadd.f32 %v3296_v27, %v5352_v1 }
 0xd5e   :  { %3330 = vst.msk [vmem:[%s5817_s17 + $0x70] sm:$0xff] %vm268_vm0, %v3314_v34 }
 0xd61   :  { %v3297_v51 = vpop.f32.mrf.mxu2 }
 0xd62   :  { %v3298_v6 = vadd.f32 %v5674_v63, %v3297_v51 }
 0xd64   :  { %v3315_v16 = vadd.f32 %v3298_v6, %v5408_v38 }
 0xd66   :  { %3331 = vst.msk [vmem:[%s5817_s17 + $0x78] sm:$0xff] %vm268_vm0, %v3315_v16 }

// kernel: conv_vision_transformer.3
= control target key start
LH: loop header
LB: loop body
LE: loop exit
PB: predicated region body
PF: predicated region fallthrough
CT: control target
= control target key end

     0   :  { %s3216_s0 = inlined_call_operand.vmem [shape: bf16[32,384], index: 0, kind: input, shape index: {}]   ;;  %s3217_s1 = inlined_call_operand.vmem [shape: bf16[384,64], index: 1, kind: input, shape index: {}]   ;;  %s3218_s2 = inlined_call_operand.vmem [shape: f32[1,64], index: 2, kind: input, shape index: {}]   ;;  %s3219_s3 = inlined_call_operand.vmem [shape: f32[1,64], index: 3, kind: input, shape index: {}]   ;;  %s3220_s4 = inlined_call_operand.vmem [shape: f32[1,64], index: 4, kind: input, shape index: {}]   ;;  %s3221_s5 = inlined_call_operand.vmem [shape: f32[1,64], index: 5, kind: input, shape index: {}]   ;;  %s3222_s6 = inlined_call_operand.vmem [shape: f32[1,64], index: 6, kind: input, shape index: {}]   ;;  %s3223_s7 = inlined_call_operand.vmem [shape: bf16[64,192], index: 7, kind: input, shape index: {}]   ;;  %s3224_s8 = inlined_call_operand.vmem [shape: f32[1,192], index: 8, kind: input, shape index: {}]   ;;  %s3225_s9 = inlined_call_operand.vmem [shape: bf16[64,64], index: 9, kind: input, shape index: {}]   ;;  %s3226_s10 = inlined_call_operand.vmem [shape: f32[1,64], index: 10, kind: input, shape index: {}]   ;;  %s3227_s11 = inlined_call_operand.vmem [shape: f32[1,64], index: 11, kind: input, shape index: {}]   ;;  %s3228_s12 = inlined_call_operand.vmem [shape: f32[1,64], index: 12, kind: input, shape index: {}]   ;;  %s3229_s13 = inlined_call_operand.vmem [shape: bf16[64,128], index: 13, kind: input, shape index: {}]   ;;  %s3230_s14 = inlined_call_operand.vmem [shape: f32[1,128], index: 14, kind: input, shape index: {}]   ;;  %s3231_s15 = inlined_call_operand.vmem [shape: bf16[128,64], index: 15, kind: input, shape index: {}]   ;;  %s3232_s16 = inlined_call_operand.vmem [shape: f32[1,64], index: 16, kind: input, shape index: {}]   ;;  %s3233_s17 = inlined_call_operand.vmem [shape: f32[1,64], index: 17, kind: input, shape index: {}]   ;;  %s3234_s18 = inlined_call_operand.vmem [shape: f32[1,64], index: 18, kind: input, shape index: {}]   ;;  %s3235_s19 = inlined_call_operand.vmem [shape: bf16[64,128], index: 19, kind: input, shape index: {}]   ;;  %s3236_s20 = inlined_call_operand.vmem [shape: f32[1,128], index: 20, kind: input, shape index: {}]   ;;  %s3237_s21 = inlined_call_operand.hbm [shape: f32[2,128], index: 21, kind: output, shape index: {}]  }
   0x1   :  { %3240 = sst [smem:[#allocation5_spill]] %s3216_s0 }
   0x2   :  { %3241 = sst [smem:[#allocation6_spill]] %s3217_s1 }
   0x3   :  { %3242 = sst [smem:[#allocation7_spill]] %s3218_s2 }
   0x4   :  { %3243 = sst [smem:[#allocation8_spill]] %s3219_s3 }
   0x5   :  { %3244 = sst [smem:[#allocation9_spill]] %s3220_s4 }
   0x6   :  { %3245 = sst [smem:[#allocation10_spill]] %s3221_s5 }
   0x7   :  { %s3246_s26 = sld [smem:[#allocation6_spill]] }
   0xd   :  { %v2208_v0 = vld [vmem:[%s3246_s26 + $0x38] sm:$0xff]  ;;  %v2207_v3 = vld [vmem:[%s3246_s26 + $0x30] sm:$0xff]  ;;  %v2206_v6 = vld [vmem:[%s3246_s26 + $0x28] sm:$0xff] }
   0xe   :  { %v2216_v1 = vld [vmem:[%s3246_s26 + $0x78] sm:$0xff]  ;;  %367 = vmatpush.bf16.msra.mxu0 %v2208_v0  ;;  %v2215_v4 = vld [vmem:[%s3246_s26 + $0x70] sm:$0xff]  ;;  %v2214_v7 = vld [vmem:[%s3246_s26 + $0x68] sm:$0xff] }
   0xf   :  { %v2224_v2 = vld [vmem:[%s3246_s26 + $0xb8] sm:$0xff]  ;;  %386 = vmatpush.bf16.msra.mxu1 %v2216_v1  ;;  %v2223_v5 = vld [vmem:[%s3246_s26 + $0xb0] sm:$0xff]  ;;  %v2222_v8 = vld [vmem:[%s3246_s26 + $0xa8] sm:$0xff] }
  0x10   :  { %405 = vmatpush.bf16.msra.mxu2 %v2224_v2  ;;  %v2205_v9 = vld [vmem:[%s3246_s26 + $0x20] sm:$0xff]  ;;  %v2204_v12 = vld [vmem:[%s3246_s26 + $0x18] sm:$0xff] }
  0x11   :  { %v2213_v10 = vld [vmem:[%s3246_s26 + $0x60] sm:$0xff]  ;;  %v2212_v13 = vld [vmem:[%s3246_s26 + $0x58] sm:$0xff] }
  0x12   :  { %368 = vmatpush.bf16.msra.mxu0 %v2207_v3  ;;  %v2221_v11 = vld [vmem:[%s3246_s26 + $0xa0] sm:$0xff] }
  0x13   :  { %387 = vmatpush.bf16.msra.mxu1 %v2215_v4 }
  0x14   :  { %406 = vmatpush.bf16.msra.mxu2 %v2223_v5 }
  0x16   :  { %369 = vmatpush.bf16.msra.mxu0 %v2206_v6 }
  0x17   :  { %388 = vmatpush.bf16.msra.mxu1 %v2214_v7 }
  0x18   :  { %407 = vmatpush.bf16.msra.mxu2 %v2222_v8 }
  0x1a   :  { %370 = vmatpush.bf16.msra.mxu0 %v2205_v9 }
  0x1b   :  { %389 = vmatpush.bf16.msra.mxu1 %v2213_v10 }
  0x1c   :  { %26 = vsyncpa [#allocation3], 0  ;;  %408 = vmatpush.bf16.msra.mxu2 %v2221_v11  ;;  %v2220_v14 = vld [vmem:[%s3246_s26 + $0x98] sm:$0xff]  ;;  %v2203_v15 = vld [vmem:[%s3246_s26 + $0x10] sm:$0xff]  ;;  %s3247_s0 = sld [smem:[#allocation5_spill]]  ;;  %vm424_vm0 = vcmask 523264  }
  0x1d   :  { %v2211_v16 = vld [vmem:[%s3246_s26 + $0x50] sm:$0xff]  ;;  %v2202_v18 = vld [vmem:[%s3246_s26 + $0x8] sm:$0xff]  ;;  %v2201_v21 = vld [vmem:[%s3246_s26] sm:$0xff]  ;;  %v2442_v48 = vmov 64.0   ;;  %s3250_s22 = sld [smem:[#allocation9_spill]]  ;;  %s2443_s28 = smov 64  }
  0x1e   :  { %371 = vmatpush.bf16.msra.mxu0 %v2204_v12  ;;  %v2219_v17 = vld [vmem:[%s3246_s26 + $0x90] sm:$0xff]  ;;  %v2210_v19 = vld [vmem:[%s3246_s26 + $0x48] sm:$0xff]  ;;  %v2209_v22 = vld [vmem:[%s3246_s26 + $0x40] sm:$0xff]  ;;  %2306 = vrcp.f32 %v2442_v48  ;;  %s3251_s2 = sld [smem:[#allocation10_spill]]  ;;  %s2447_s4 = smov 112  }
  0x1f   :  { %390 = vmatpush.bf16.msra.mxu1 %v2212_v13  ;;  %v2218_v20 = vld [vmem:[%s3246_s26 + $0x88] sm:$0xff]  ;;  %v2217_v27 = vld [vmem:[%s3246_s26 + $0x80] sm:$0xff]  ;;  %s3248_s26 = sld [smem:[#allocation7_spill]] }
  0x20   :  { %409 = vmatpush.bf16.msra.mxu2 %v2220_v14 }
  0x22   :  { %372 = vmatpush.bf16.msra.mxu0 %v2203_v15  ;;  %v1936_v23 = vld [vmem:[%s3247_s0] sm:$0xf]  ;;  %v2196_v24 = vld [vmem:[%s3247_s0 + $0x8] sm:$0xf0]  ;;  %v2195_v25 = vld [vmem:[%s3247_s0 + $0x4] sm:$0xf] }
  0x23   :  { %391 = vmatpush.bf16.msra.mxu1 %v2211_v16  ;;  %v1938_v26 = vld [vmem:[%s3247_s0 + $0xc] sm:$0xf0]  ;;  %v1944_v28 = vld [vmem:[%s3247_s0 + $0x8] sm:$0xf]  ;;  %v2197_v29 = vld [vmem:[%s3247_s0 + $0x10] sm:$0xf0]  ;;  %v1937_v30 = vor.u32 %v2196_v24, %v1936_v23 }
  0x24   :  { %410 = vmatpush.bf16.msra.mxu2 %v2219_v17  ;;  %v1941_v31 = vor.u32 %v2195_v25, %v1938_v26  ;;  %v1945_v32 = vor.u32 %v2197_v29, %v1944_v28  ;;  %v2307_v49 = vpop.eup %2306  ;;  %v1956_v51 = vld [vmem:[%s3247_s0 + $0x20] sm:$0xf]  ;;  %v2200_v52 = vld [vmem:[%s3247_s0 + $0x28] sm:$0xf0]  ;;  %v1948_v53 = vld [vmem:[%s3247_s0 + $0x18] sm:$0xf] }
  0x25   :  { %v2655_v33 = vld [vmem:[%s3248_s26] ss:$0 sm:$0xff]  ;;  %v438_v50 = vmul.f32 64.0, %v2307_v49  ;;  %v1957_v54 = vor.u32 %v2200_v52, %v1956_v51  ;;  %v2199_v55 = vld [vmem:[%s3247_s0 + $0x20] sm:$0xf0]  ;;  %vm442_vm1 = vweird.f32 %v2307_v49  ;;  %s3249_s26 = sld [smem:[#allocation8_spill]] }
  0x26   :  { %373 = vmatpush.bf16.msra.mxu0 %v2202_v18  ;;  %v2198_v56 = vld [vmem:[%s3247_s0 + $0x1c] sm:$0xf]  ;;  %v1950_v57 = vld [vmem:[%s3247_s0 + $0x24] sm:$0xf0]  ;;  %v1949_v59 = vor.u32 %v2199_v55, %v1948_v53  ;;  %v2695_v28 = vld [vmem:[%s3250_s22] ss:$0 sm:$0xff] }
  0x27   :  { %392 = vmatpush.bf16.msra.mxu1 %v2210_v19  ;;  %v439_v58 = vsub.f32 1.0, %v438_v50  ;;  %v1953_v60 = vor.u32 %v2198_v56, %v1950_v57  ;;  %s2446_s0 = smov 96  }
  0x28   :  { %411 = vmatpush.bf16.msra.mxu2 %v2218_v20 }
  0x29   :  { %v440_v61 = vmul.f32 %v2307_v49, %v439_v58 }
  0x2a   :  { %374 = vmatpush.bf16.msra.mxu0 %v2201_v21 }
  0x2b   :  { %393 = vmatpush.bf16.msra.mxu1 %v2209_v22  ;;  %v441_v62 = vadd.f32 %v2307_v49, %v440_v61  ;;  %v2690_v24 = vld [vmem:[%s3249_s26] ss:$0 sm:$0xff]  ;;  %s2448_s26 = smov 16  }
  0x2c   :  { %412 = vmatpush.bf16.msra.mxu2 %v2217_v27 }
  0x2d   :  { %375 = vmatmul.bf16.vlgmr.msra.gmra.mxu0 %v1937_v30  ;;  %v2679_v63 = vsel %vm442_vm1, %v2307_v49, %v441_v62 }
  0x2e   :  { %394 = vmatmul.bf16.vlgmr.msra.gmra.mxu1 %v1941_v31 }
  0x2f   :  { %413 = vmatmul.bf16.vlgmr.msra.gmra.mxu2 %v1945_v32 }
  0x3d   :  { %380 = vmatmul.bf16.gmra.mxu0 %v1949_v59 }
  0x3e   :  { %399 = vmatmul.bf16.gmra.mxu1 %v1953_v60 }
  0x3f   :  { %418 = vmatmul.bf16.gmra.mxu2 %v1957_v54 }
  0xaa   :  { %v376_v34 = vpop.f32.mrf.mxu0 }
  0xab   :  { %v377_v35 = vadd.f32 %v2655_v33, %v376_v34  ;;  %v395_v36 = vpop.f32.mrf.mxu1 }
  0xad   :  { %v396_v37 = vadd.f32 %v395_v36, %v377_v35 }
  0xb2   :  { %v414_v38 = vpop.f32.mrf.mxu2  ;;  %v378_v40 = vpop.f32.mrf.mxu0 }
  0xb3   :  { %v415_v39 = vadd.f32 %v414_v38, %v396_v37  ;;  %v379_v41 = vadd.f32 %v2655_v33, %v378_v40  ;;  %v397_v43 = vpop.f32.mrf.mxu1 }
  0xb5   :  { %v425_v42 = vsel %vm424_vm0, %v415_v39, 0.0  ;;  %v398_v44 = vadd.f32 %v397_v43, %v379_v41 }
  0xb6   :  { %426 = vadd.xlane.f32.xlu0 %v425_v42 }
  0xba   :  { %v416_v45 = vpop.f32.mrf.mxu2  ;;  %v381_v35 = vpop.f32.mrf.mxu0 }
  0xbb   :  { %v417_v46 = vadd.f32 %v416_v45, %v398_v44  ;;  %v382_v38 = vadd.f32 %v2655_v33, %v381_v35  ;;  %v400_v40 = vpop.f32.mrf.mxu1 }
  0xbd   :  { %v428_v47 = vsel %vm424_vm0, %v417_v46, 0.0  ;;  %v401_v43 = vadd.f32 %v400_v40, %v382_v38 }
  0xbe   :  { %429 = vadd.xlane.f32.xlu0 %v428_v47 }
  0xc2   :  { %v419_v44 = vpop.f32.mrf.mxu2  ;;  %v383_v48 = vpop.f32.mrf.mxu0 }
  0xc3   :  { %v384_v51 = vadd.f32 %v2655_v33, %v383_v48  ;;  %v402_v53 = vpop.f32.mrf.mxu1 }
  0xc5   :  { %v403_v55 = vadd.f32 %v402_v53, %v384_v51  ;;  %v2770_v51 = vld [vmem:[%s3251_s2] ss:$0 sm:$0xff] }
  0xca   :  { %v421_v57 = vpop.f32.mrf.mxu2 }
  0xcb   :  { %v422_v60 = vadd.f32 %v421_v57, %v403_v55 }
  0xcd   :  { %v434_v62 = vsel %vm424_vm0, %v422_v60, 0.0 }
 0x129   :  { %v427_v0 = vpop.xlane.xlu0 %426 }
 0x12a   :  { %v444_v1 = vmul.f32 %v2679_v63, %v427_v0 }
 0x12c   :  { %v448_v2 = vsub.f32 %v415_v39, %v444_v1 }
 0x12e   :  { %v452_v3 = vmul.f32 %v448_v2, %v448_v2 }
 0x130   :  { %v456_v4 = vsel %vm424_vm0, %v452_v3, 0.0 }
 0x131   :  { %457 = vadd.xlane.f32.xlu1 %v456_v4  ;;  %v430_v5 = vpop.xlane.xlu0 %429 }
 0x132   :  { %v445_v6 = vmul.f32 %v2679_v63, %v430_v5 }
 0x134   :  { %v449_v7 = vsub.f32 %v417_v46, %v445_v6  ;;  %v420_v46 = vadd.f32 %v419_v44, %v401_v43  ;;  %v2080_v6 = vld [vmem:[%s3223_s7 + $0x30] sm:$0xf] }
 0x136   :  { %v453_v8 = vmul.f32 %v449_v7, %v449_v7  ;;  %v431_v47 = vsel %vm424_vm0, %v420_v46, 0.0 }
 0x138   :  { %v459_v9 = vsel %vm424_vm0, %v453_v8, 0.0 }
 0x139   :  { %460 = vadd.xlane.f32.xlu1 %v459_v9  ;;  %v2072_v9 = vld [vmem:[%s3223_s7 + $0x20] sm:$0xf] }
 0x1a4   :  { %v458_v10 = vpop.xlane.xlu1 %457 }
 0x1a5   :  { %v468_v11 = vmul.f32 %v458_v10, %v2679_v63  ;;  %v2230_v10 = vld [vmem:[%s3223_s7 + $0x24] sm:$0xf0] }
 0x1a7   :  { %v472_v12 = vadd.f32 1e-05, %v468_v11  ;;  %v2073_v11 = vor.u32 %v2230_v10, %v2072_v9 }
 0x1a9   :  { %2308 = vrsqrt.f32 %v472_v12  ;;  %vm482_vm3 = vweird.f32 %v472_v12 }
 0x1ac   :  { %v461_v13 = vpop.xlane.xlu1 %460 }
 0x1ad   :  { %v469_v14 = vmul.f32 %v461_v13, %v2679_v63  ;;  %v2228_v13 = vld [vmem:[%s3223_s7 + $0x14] sm:$0xf0] }
 0x1af   :  { %v2309_v15 = vpop.eup %2308  ;;  %v473_v16 = vadd.f32 1e-05, %v469_v14 }
 0x1b0   :  { %v477_v17 = vmul.f32 %v2309_v15, %v472_v12  ;;  %vm483_vm2 = vweird.f32 %v2309_v15  ;;  %v2064_v12 = vld [vmem:[%s3223_s7 + $0x10] sm:$0xf] }
 0x1b1   :  { %2310 = vrsqrt.f32 %v473_v16  ;;  %vm484_vm4 = vmor %vm482_vm3, %vm483_vm2  ;;  %vm492_vm6 = vweird.f32 %v473_v16  ;;  %v2065_v14 = vor.u32 %v2228_v13, %v2064_v12 }
 0x1b2   :  { %v478_v18 = vmul.f32 %v2309_v15, %v477_v17  ;;  %v2056_v17 = vld [vmem:[%s3223_s7] sm:$0xf] }
 0x1b4   :  { %v479_v19 = vmul.f32 0.5, %v478_v18  ;;  %v2226_v18 = vld [vmem:[%s3223_s7 + $0x4] sm:$0xf0] }
 0x1b6   :  { %v480_v20 = vsub.f32 1.5, %v479_v19  ;;  %v2057_v19 = vor.u32 %v2226_v18, %v2056_v17 }
 0x1b7   :  { %v2311_v21 = vpop.eup %2310 }
 0x1b8   :  { %v481_v22 = vmul.f32 %v2309_v15, %v480_v20  ;;  %v487_v23 = vmul.f32 %v2311_v21, %v473_v16  ;;  %vm493_vm5 = vweird.f32 %v2311_v21 }
 0x1b9   :  { %vm494_vm7 = vmor %vm492_vm6, %vm493_vm5  ;;  %vm742_vm5 = vcmask 130048  }
 0x1ba   :  { %v485_v25 = vsel %vm484_vm4, %v2309_v15, %v481_v22  ;;  %v488_v26 = vmul.f32 %v2311_v21, %v487_v23 }
 0x1bb   :  { %v516_v27 = vmul.f32 %v485_v25, %v448_v2 }
 0x1bc   :  { %v489_v29 = vmul.f32 0.5, %v488_v26 }
 0x1bd   :  { %v523_v30 = vmul.f32 %v2690_v24, %v516_v27 }
 0x1be   :  { %v490_v31 = vsub.f32 1.5, %v489_v29 }
 0x1bf   :  { %v2699_v32 = vadd.f32 %v2695_v28, %v523_v30 }
 0x1c0   :  { %v491_v34 = vmul.f32 %v2311_v21, %v490_v31 }
 0x1c1   :  { %v534_v36 = vsel %vm424_vm0, %v2699_v32, 0.0 }
 0x1c2   :  { %v495_v37 = vsel %vm494_vm7, %v2311_v21, %v491_v34  ;;  %535 = vadd.xlane.f32.xlu2 %v534_v36 }
 0x1c3   :  { %v517_v39 = vmul.f32 %v495_v37, %v449_v7  ;;  %v2232_v7 = vld [vmem:[%s3223_s7 + $0x34] sm:$0xf0] }
 0x1c4   :  { %v2081_v8 = vor.u32 %v2232_v7, %v2080_v6 }
 0x1c5   :  { %v524_v41 = vmul.f32 %v2690_v24, %v517_v39 }
 0x1c6   :  { %693 = vmatpush.bf16.msra.mxu3 %v2081_v8 }
 0x1c7   :  { %v2706_v42 = vadd.f32 %v2695_v28, %v524_v41 }
 0x1c9   :  { %v537_v45 = vsel %vm424_vm0, %v2706_v42, 0.0 }
 0x1ca   :  { %538 = vadd.xlane.f32.xlu2 %v537_v45  ;;  %694 = vmatpush.bf16.msra.mxu3 %v2073_v11 }
 0x1ce   :  { %695 = vmatpush.bf16.msra.mxu3 %v2065_v14 }
 0x1d2   :  { %432 = vadd.xlane.f32.xlu2 %v431_v47  ;;  %696 = vmatpush.bf16.msra.mxu3 %v2057_v19 }
 0x235   :  { %v536_v49 = vpop.xlane.xlu2 %535 }
 0x236   :  { %v546_v50 = vmul.f32 %v536_v49, %v2679_v63 }
 0x238   :  { %v2714_v52 = vsub.f32 %v2699_v32, %v546_v50 }
 0x23a   :  { %v554_v54 = vmul.f32 %v2714_v52, %v2714_v52 }
 0x23c   :  { %v558_v56 = vsel %vm424_vm0, %v554_v54, 0.0 }
 0x23d   :  { %559 = vadd.xlane.f32.xlu0 %v558_v56  ;;  %v539_v58 = vpop.xlane.xlu2 %538 }
 0x23e   :  { %v547_v59 = vmul.f32 %v539_v58, %v2679_v63 }
 0x240   :  { %v2721_v61 = vsub.f32 %v2706_v42, %v547_v59  ;;  %v2777_v59 = vld [vmem:[%s3222_s6] ss:$0 sm:$0xff] }
 0x242   :  { %v555_v33 = vmul.f32 %v2721_v61, %v2721_v61 }
 0x244   :  { %v561_v0 = vsel %vm424_vm0, %v555_v33, 0.0 }
 0x245   :  { %435 = vadd.xlane.f32.xlu0 %v434_v62  ;;  %562 = vadd.xlane.f32.xlu1 %v561_v0  ;;  %v433_v1 = vpop.xlane.xlu2 %432 }
 0x246   :  { %v446_v2 = vmul.f32 %v2679_v63, %v433_v1 }
 0x248   :  { %v2728_v3 = vsub.f32 %v420_v46, %v446_v2 }
 0x24a   :  { %v454_v4 = vmul.f32 %v2728_v3, %v2728_v3 }
 0x24c   :  { %v462_v5 = vsel %vm424_vm0, %v454_v4, 0.0 }
 0x24d   :  { %463 = vadd.xlane.f32.xlu1 %v462_v5 }
 0x2b0   :  { %v560_v15 = vpop.xlane.xlu0 %559 }
 0x2b1   :  { %v570_v16 = vmul.f32 %v560_v15, %v2679_v63 }
 0x2b3   :  { %v574_v20 = vadd.f32 1e-05, %v570_v16 }
 0x2b5   :  { %2312 = vrsqrt.f32 %v574_v20  ;;  %vm584_vm9 = vweird.f32 %v574_v20 }
 0x2b8   :  { %v563_v21 = vpop.xlane.xlu1 %562  ;;  %v436_v22 = vpop.xlane.xlu0 %435 }
 0x2b9   :  { %v571_v23 = vmul.f32 %v563_v21, %v2679_v63  ;;  %v447_v25 = vmul.f32 %v2679_v63, %v436_v22 }
 0x2bb   :  { %v2313_v26 = vpop.eup %2312  ;;  %v575_v27 = vadd.f32 1e-05, %v571_v23  ;;  %v2760_v29 = vsub.f32 %v422_v60, %v447_v25 }
 0x2bc   :  { %v579_v30 = vmul.f32 %v2313_v26, %v574_v20  ;;  %vm585_vm8 = vweird.f32 %v2313_v26 }
 0x2bd   :  { %2314 = vrsqrt.f32 %v575_v27  ;;  %v455_v31 = vmul.f32 %v2760_v29, %v2760_v29  ;;  %vm586_vm10 = vmor %vm584_vm9, %vm585_vm8  ;;  %vm594_vm12 = vweird.f32 %v575_v27 }
 0x2be   :  { %v580_v34 = vmul.f32 %v2313_v26, %v579_v30 }
 0x2bf   :  { %v465_v35 = vsel %vm424_vm0, %v455_v31, 0.0 }
 0x2c0   :  { %v581_v36 = vmul.f32 0.5, %v580_v34  ;;  %v464_v37 = vpop.xlane.xlu1 %463  ;;  %466 = vadd.xlane.f32.xlu2 %v465_v35 }
 0x2c1   :  { %v470_v38 = vmul.f32 %v464_v37, %v2679_v63 }
 0x2c2   :  { %v582_v39 = vsub.f32 1.5, %v581_v36 }
 0x2c3   :  { %v2315_v40 = vpop.eup %2314  ;;  %v474_v41 = vadd.f32 1e-05, %v470_v38 }
 0x2c4   :  { %v583_v43 = vmul.f32 %v2313_v26, %v582_v39  ;;  %v589_v44 = vmul.f32 %v2315_v40, %v575_v27  ;;  %vm595_vm11 = vweird.f32 %v2315_v40 }
 0x2c5   :  { %2316 = vrsqrt.f32 %v474_v41  ;;  %vm596_vm13 = vmor %vm594_vm12, %vm595_vm11  ;;  %vm502_vm15 = vweird.f32 %v474_v41  ;;  %vm1400_vm12 = vcmask 261120  }
 0x2c6   :  { %v590_v45 = vmul.f32 %v2315_v40, %v589_v44  ;;  %v587_v46 = vsel %vm586_vm10, %v2313_v26, %v583_v43 }
 0x2c7   :  { %v618_v50 = vmul.f32 %v587_v46, %v2714_v52 }
 0x2c8   :  { %v591_v47 = vmul.f32 0.5, %v590_v45 }
 0x2c9   :  { %v625_v58 = vmul.f32 %v2770_v51, %v618_v50 }
 0x2ca   :  { %v592_v48 = vsub.f32 1.5, %v591_v47 }
 0x2cb   :  { %v2317_v49 = vpop.eup %2316  ;;  %v632_v62 = vadd.f32 %v2777_v59, %v625_v58  ;;  %v2074_v58 = vld [vmem:[%s3223_s7 + $0x28] sm:$0xf0] }
 0x2cc   :  { %v593_v53 = vmul.f32 %v2315_v40, %v592_v48  ;;  %v497_v54 = vmul.f32 %v2317_v49, %v474_v41  ;;  %vm503_vm14 = vweird.f32 %v2317_v49 }
 0x2cd   :  { %vm504_vm1 = vmor %vm502_vm15, %vm503_vm14 }
 0x2ce   :  { %v597_v55 = vsel %vm596_vm13, %v2315_v40, %v593_v53  ;;  %v498_v56 = vmul.f32 %v2317_v49, %v497_v54  ;;  %v2231_v54 = vld [vmem:[%s3223_s7 + $0x34] sm:$0xf]  ;;  %vm1405_vm13 = vcmask 392192  }
 0x2cf   :  { %v619_v57 = vmul.f32 %v597_v55, %v2721_v61  ;;  %v2082_v55 = vld [vmem:[%s3223_s7 + $0x38] sm:$0xf0] }
 0x2d0   :  { %v499_v52 = vmul.f32 0.5, %v498_v56  ;;  %v2085_v56 = vor.u32 %v2231_v54, %v2082_v55 }
 0x2d1   :  { %v626_v60 = vmul.f32 %v2770_v51, %v619_v57  ;;  %v2229_v57 = vld [vmem:[%s3223_s7 + $0x24] sm:$0xf] }
 0x2d2   :  { %v500_v33 = vsub.f32 1.5, %v499_v52  ;;  %712 = vmatpush.bf16.msrb.mxu3 %v2085_v56 }
 0x2d3   :  { %v633_v0 = vadd.f32 %v2777_v59, %v626_v60 }
 0x2d4   :  { %v501_v1 = vmul.f32 %v2317_v49, %v500_v33  ;;  %v2077_v33 = vor.u32 %v2229_v57, %v2074_v58 }
 0x2d5   :  { %v2782_v61 = vpack.c.bf16 %v633_v0, %v632_v62  ;;  %v2227_v0 = vld [vmem:[%s3223_s7 + $0x14] sm:$0xf] }
 0x2d6   :  { %v505_v2 = vsel %vm504_vm1, %v2317_v49, %v501_v1  ;;  %v2066_v1 = vld [vmem:[%s3223_s7 + $0x18] sm:$0xf0]  ;;  %713 = vmatpush.bf16.msrb.mxu3 %v2077_v33 }
 0x2d7   :  { %2086 = vmatmul.msk.bf16.vlgmr.msra.gmra.mxu3 %vm424_vm0, %v2782_v61  ;;  %v518_v4 = vmul.f32 %v505_v2, %v2728_v3 }
 0x2d9   :  { %v525_v5 = vmul.f32 %v2690_v24, %v518_v4 }
 0x2db   :  { %v2789_v6 = vadd.f32 %v2695_v28, %v525_v5  ;;  %v2069_v5 = vor.u32 %v2227_v0, %v2066_v1 }
 0x2dd   :  { %v540_v7 = vsel %vm424_vm0, %v2789_v6, 0.0  ;;  %714 = vmatpush.bf16.msrb.mxu3 %v2069_v5 }
 0x2de   :  { %541 = vadd.xlane.f32.xlu0 %v540_v7  ;;  %v2225_v7 = vld [vmem:[%s3223_s7 + $0x4] sm:$0xf] }
 0x333   :  { %v467_v8 = vpop.xlane.xlu2 %466 }
 0x334   :  { %v471_v9 = vmul.f32 %v467_v8, %v2679_v63  ;;  %v2058_v8 = vld [vmem:[%s3223_s7 + $0x8] sm:$0xf0]  ;;  %s2445_s7 = smov 32  }
 0x336   :  { %v475_v10 = vadd.f32 1e-05, %v471_v9 }
 0x338   :  { %2318 = vrsqrt.f32 %v475_v10  ;;  %vm512_vm3 = vweird.f32 %v475_v10 }
 0x33e   :  { %v2319_v11 = vpop.eup %2318 }
 0x33f   :  { %v507_v12 = vmul.f32 %v2319_v11, %v475_v10  ;;  %vm513_vm2 = vweird.f32 %v2319_v11  ;;  %v2061_v10 = vor.u32 %v2225_v7, %v2058_v8 }
 0x340   :  { %vm514_vm4 = vmor %vm512_vm3, %vm513_vm2 }
 0x341   :  { %v508_v13 = vmul.f32 %v2319_v11, %v507_v12  ;;  %715 = vmatpush.bf16.msrb.mxu3 %v2061_v10 }
 0x343   :  { %v509_v14 = vmul.f32 0.5, %v508_v13 }
 0x345   :  { %v510_v15 = vsub.f32 1.5, %v509_v14 }
 0x347   :  { %v511_v3 = vmul.f32 %v2319_v11, %v510_v15 }
 0x349   :  { %v515_v16 = vsel %vm514_vm4, %v2319_v11, %v511_v3 }
 0x34a   :  { %v519_v17 = vmul.f32 %v515_v16, %v2760_v29 }
 0x34c   :  { %v526_v18 = vmul.f32 %v2690_v24, %v519_v17  ;;  %v2811_v24 = vld [vmem:[%s3224_s8] sm:$0x3]  ;;  %s2444_s8 = smov 48  }
 0x34d   :  { %v2814_v27 = vperm.slane %v2811_v24, 0 }
 0x34e   :  { %v2797_v19 = vadd.f32 %v2695_v28, %v526_v18 }
 0x350   :  { %v543_v20 = vsel %vm424_vm0, %v2797_v19, 0.0 }
 0x351   :  { %544 = vadd.xlane.f32.xlu1 %v543_v20  ;;  %v542_v21 = vpop.xlane.xlu0 %541 }
 0x352   :  { %v548_v22 = vmul.f32 %v542_v21, %v2679_v63 }
 0x354   :  { %v2803_v23 = vsub.f32 %v2789_v6, %v548_v22 }
 0x356   :  { %v556_v25 = vmul.f32 %v2803_v23, %v2803_v23 }
 0x358   :  { %v564_v26 = vsel %vm424_vm0, %v556_v25, 0.0 }
 0x359   :  { %565 = vadd.xlane.f32.xlu0 %v564_v26 }
 0x35a   :  { %v698_v28 = vpop.f32.mrf.mxu3 }
 0x35b   :  { %v699_v29 = vadd.f32 %v698_v28, %v2814_v27 }
 0x35d   :  { %v727_v31 = vpack.c.bf16 %v699_v29, %v699_v29 }
 0x35f   :  { %v737_v36 = vunpack.c.l.b16 %v727_v31 }
 0x362   :  { %v700_v30 = vpop.f32.mrf.mxu3 }
 0x363   :  { %v701_v34 = vadd.f32 %v700_v30, %v2814_v27 }
 0x365   :  { %v728_v35 = vpack.c.bf16 %v701_v34, %v701_v34 }
 0x367   :  { %v738_v37 = vunpack.c.l.b16 %v728_v35 }
 0x369   :  { %v2818_v38 = vpack.c.b16 %v738_v37, %v737_v36 }
 0x36b   :  { %740 = vrot.lane.b32.xlu2 %v2818_v38, %s2443_s28 }
 0x3c4   :  { %v545_v39 = vpop.xlane.xlu1 %544 }
 0x3c5   :  { %v549_v40 = vmul.f32 %v545_v39, %v2679_v63  ;;  %v741_v41 = vpop.permute.xlu2 %740 }
 0x3c6   :  { %v747_v43 = vsel %vm742_vm5, %v741_v41, 0 }
 0x3c7   :  { %v553_v44 = vsub.f32 %v2797_v19, %v549_v40  ;;  %756 = vmatpush.bf16.xpose.msrb.mxu0 %v747_v43 }
 0x3c9   :  { %v557_v45 = vmul.f32 %v553_v44, %v553_v44 }
 0x3cb   :  { %v567_v46 = vsel %vm424_vm0, %v557_v45, 0.0 }
 0x3cc   :  { %568 = vadd.xlane.f32.xlu1 %v567_v46  ;;  %v566_v47 = vpop.xlane.xlu0 %565 }
 0x3cd   :  { %v572_v48 = vmul.f32 %v566_v47, %v2679_v63 }
 0x3ce   :  { %2090 = vmatmul.msk.bf16.vlgmr.msrb.gmra.mxu0 %vm742_vm5, %v2818_v38 }
 0x3cf   :  { %v576_v49 = vadd.f32 1e-05, %v572_v48 }
 0x3d1   :  { %2320 = vrsqrt.f32 %v576_v49  ;;  %vm604_vm7 = vweird.f32 %v576_v49 }
 0x3d7   :  { %v2321_v50 = vpop.eup %2320 }
 0x3d8   :  { %v599_v53 = vmul.f32 %v2321_v50, %v576_v49  ;;  %vm605_vm6 = vweird.f32 %v2321_v50 }
 0x3d9   :  { %vm606_vm8 = vmor %vm604_vm7, %vm605_vm6 }
 0x3da   :  { %v600_v52 = vmul.f32 %v2321_v50, %v599_v53 }
 0x3dc   :  { %v601_v4 = vmul.f32 0.5, %v600_v52  ;;  %v640_v52 = vperm.slane %v2811_v24, 1 }
 0x3de   :  { %v602_v9 = vsub.f32 1.5, %v601_v4 }
 0x3e0   :  { %v603_v12 = vmul.f32 %v2321_v50, %v602_v9 }
 0x3e2   :  { %v607_v17 = vsel %vm606_vm8, %v2321_v50, %v603_v12 }
 0x3e3   :  { %v620_v21 = vmul.f32 %v607_v17, %v2803_v23 }
 0x3e5   :  { %900 = vrot.lane.b32.xlu1 %v2818_v38, %s2444_s8  ;;  %v627_v31 = vmul.f32 %v2770_v51, %v620_v21 }
 0x3e7   :  { %v634_v35 = vadd.f32 %v2777_v59, %v627_v31 }
 0x43f   :  { %v569_v60 = vpop.xlane.xlu1 %568 }
 0x440   :  { %v573_v62 = vmul.f32 %v569_v60, %v2679_v63 }
 0x442   :  { %v577_v2 = vadd.f32 1e-05, %v573_v62 }
 0x444   :  { %2322 = vrsqrt.f32 %v577_v2  ;;  %vm614_vm10 = vweird.f32 %v577_v2 }
 0x44a   :  { %v2323_v11 = vpop.eup %2322 }
 0x44b   :  { %v609_v13 = vmul.f32 %v2323_v11, %v577_v2  ;;  %v758_v14 = vpop.f32.mrf.mxu0  ;;  %vm615_vm9 = vweird.f32 %v2323_v11 }
 0x44c   :  { %v790_v15 = vmul.f32 0.125, %v758_v14  ;;  %vm616_vm11 = vmor %vm614_vm10, %vm615_vm9 }
 0x44d   :  { %v610_v3 = vmul.f32 %v2323_v11, %v609_v13 }
 0x44e   :  { %v794_v16 = vsel %vm742_vm5, %v790_v15, -inf }
 0x44f   :  { %v611_v18 = vmul.f32 0.5, %v610_v3  ;;  %795 = vmax.xlane.f32.xlu0 %v794_v16 }
 0x451   :  { %v612_v20 = vsub.f32 1.5, %v611_v18 }
 0x453   :  { %v613_v22 = vmul.f32 %v2323_v11, %v612_v20  ;;  %v760_v25 = vpop.f32.mrf.mxu0 }
 0x454   :  { %v791_v26 = vmul.f32 0.125, %v760_v25 }
 0x455   :  { %v617_v28 = vsel %vm616_vm11, %v2323_v11, %v613_v22 }
 0x456   :  { %v621_v29 = vmul.f32 %v617_v28, %v553_v44  ;;  %v797_v30 = vsel %vm742_vm5, %v791_v26, -inf }
 0x457   :  { %798 = vmax.xlane.f32.xlu1 %v797_v30  ;;  %v2869_v23 = vpop.permute.xlu1 %900 }
 0x458   :  { %v628_v34 = vmul.f32 %v2770_v51, %v621_v29  ;;  %v906_v30 = vsel %vm742_vm5, %v2869_v23, 0 }
 0x45a   :  { %v635_v36 = vadd.f32 %v2777_v59, %v628_v34 }
 0x45c   :  { %v637_v37 = vpack.c.bf16 %v635_v36, %v634_v35 }
 0x45e   :  { %2087 = vmatmul.msk.bf16.gmra.mxu3 %vm424_vm0, %v637_v37 }
 0x46e   :  { %2088 = vmatmul.msk.bf16.vlgmr.msrb.gmra.mxu3 %vm424_vm0, %v2782_v61 }
 0x470   :  { %1050 = vrot.lane.b32.xlu1 %v2818_v38, %s2445_s7 }
 0x47e   :  { %2089 = vmatmul.msk.bf16.gmra.mxu3 %vm424_vm0, %v637_v37 }
 0x4c2   :  { %v796_v39 = vpop.xlane.xlu0 %795 }
 0x4c3   :  { %v806_v51 = vsub.f32 %v790_v15, %v796_v39 }
 0x4c5   :  { %v810_v40 = vmul.f32 1.442695, %v806_v51 }
 0x4c7   :  { %2324 = vpow2.f32 %v810_v40 }
 0x4ca   :  { %v799_v41 = vpop.xlane.xlu1 %798 }
 0x4cb   :  { %v807_v59 = vsub.f32 %v791_v26, %v799_v41 }
 0x4cd   :  { %v2325_v43 = vpop.eup %2324  ;;  %v812_v44 = vmul.f32 1.442695, %v807_v59 }
 0x4ce   :  { %v818_v45 = vsel %vm742_vm5, %v2325_v43, 0.0 }
 0x4cf   :  { %2326 = vpow2.f32 %v812_v44  ;;  %819 = vadd.xlane.f32.xlu1 %v818_v45 }
 0x4d5   :  { %v2327_v61 = vpop.eup %2326 }
 0x4d6   :  { %v821_v46 = vsel %vm742_vm5, %v2327_v61, 0.0 }
 0x4d7   :  { %822 = vadd.xlane.f32.xlu2 %v821_v46 }
 0x4e1   :  { %v703_v47 = vpop.f32.mrf.mxu3 }
 0x4e2   :  { %v704_v48 = vadd.f32 %v703_v47, %v2814_v27  ;;  %v1051_v14 = vpop.permute.xlu1 %1050 }
 0x4e3   :  { %v1056_v35 = vsel %vm742_vm5, %v1051_v14, 0 }
 0x4e4   :  { %v729_v50 = vpack.c.bf16 %v704_v48, %v704_v48 }
 0x4e6   :  { %v765_v55 = vunpack.c.l.b16 %v729_v50 }
 0x4e8   :  { %1048 = vrot.lane.b32.xlu1 %v2818_v38, %s2446_s0 }
 0x4e9   :  { %v705_v49 = vpop.f32.mrf.mxu3 }
 0x4ea   :  { %v706_v53 = vadd.f32 %v705_v49, %v2814_v27 }
 0x4ec   :  { %v730_v54 = vpack.c.bf16 %v706_v53, %v706_v53 }
 0x4ee   :  { %v766_v56 = vunpack.c.l.b16 %v730_v54 }
 0x4f0   :  { %v767_v57 = vpack.c.b16 %v766_v56, %v765_v55 }
 0x4f1   :  { %v717_v58 = vpop.f32.mrf.mxu3 }
 0x4f2   :  { %1074 = vrot.lane.b32.xlu2 %v767_v57, %s2445_s7  ;;  %768 = vrot.lane.b32.xlu0 %v767_v57, %s2443_s28  ;;  %v718_v60 = vadd.f32 %v717_v58, %v640_v52  ;;  %s2449_s28 = smov 80  }
 0x4f3   :  { %1072 = vrot.lane.b32.xlu1 %v767_v57, %s2446_s0 }
 0x4f4   :  { %v731_v62 = vpack.c.bf16 %v718_v60, %v718_v60 }
 0x4f6   :  { %v849_v1 = vunpack.c.l.b16 %v731_v62 }
 0x4f9   :  { %v719_v33 = vpop.f32.mrf.mxu3 }
 0x4fa   :  { %v720_v0 = vadd.f32 %v719_v33, %v640_v52  ;;  %898 = vrot.lane.b32.xlu0 %v2818_v38, %s2447_s4 }
 0x4fb   :  { %1224 = vrot.lane.b32.xlu1 %v767_v57, %s2448_s26 }
 0x4fc   :  { %v732_v27 = vpack.c.bf16 %v720_v0, %v720_v0 }
 0x4fe   :  { %v850_v24 = vunpack.c.l.b16 %v732_v27 }
 0x500   :  { %v2884_v2 = vpack.c.b16 %v850_v24, %v849_v1 }
 0x501   :  { %v722_v4 = vpop.f32.mrf.mxu3 }
 0x502   :  { %863 = vmatpush.bf16.msrb.mxu2 %v2884_v2  ;;  %924 = vrot.lane.b32.xlu0 %v767_v57, %s2444_s8  ;;  %v723_v5 = vadd.f32 %v722_v4, %v640_v52 }
 0x504   :  { %v733_v8 = vpack.c.bf16 %v723_v5, %v723_v5 }
 0x506   :  { %v877_v11 = vunpack.c.l.b16 %v733_v8 }
 0x509   :  { %v724_v7 = vpop.f32.mrf.mxu3 }
 0x50a   :  { %v725_v9 = vadd.f32 %v724_v7, %v640_v52  ;;  %922 = vrot.lane.b32.xlu0 %v767_v57, %s2447_s4 }
 0x50c   :  { %v734_v10 = vpack.c.bf16 %v725_v9, %v725_v9 }
 0x50e   :  { %v878_v12 = vunpack.c.l.b16 %v734_v10 }
 0x510   :  { %v2889_v13 = vpack.c.b16 %v878_v12, %v877_v11 }
 0x512   :  { %891 = vmatpush.bf16.msra.mxu0 %v2889_v13  ;;  %1200 = vrot.lane.b32.xlu0 %v2818_v38, %s2448_s26 }
 0x51a   :  { %1198 = vrot.lane.b32.xlu0 %v2818_v38, %s2449_s28 }
 0x522   :  { %1222 = vrot.lane.b32.xlu0 %v767_v57, %s2449_s28 }
 0x542   :  { %v820_v15 = vpop.xlane.xlu1 %819 }
 0x543   :  { %2328 = vrcp.f32 %v820_v15 }
 0x549   :  { %v2329_v16 = vpop.eup %2328 }
 0x54a   :  { %v823_v3 = vpop.xlane.xlu2 %822  ;;  %v834_v17 = vmul.f32 %v2329_v16, %v2325_v43 }
 0x54b   :  { %2330 = vrcp.f32 %v823_v3 }
 0x54c   :  { %v838_v20 = vpack.c.bf16 %v834_v17, %v834_v17 }
 0x54e   :  { %v844_v25 = vunpack.c.l.b16 %v838_v20 }
 0x551   :  { %v2331_v18 = vpop.eup %2330 }
 0x552   :  { %v835_v21 = vmul.f32 %v2331_v18, %v2327_v61  ;;  %v1075_v37 = vpop.permute.xlu2 %1074 }
 0x553   :  { %v1080_v40 = vsel %vm742_vm5, %v1075_v37, 0 }
 0x554   :  { %v839_v22 = vpack.c.bf16 %v835_v21, %v835_v21 }
 0x556   :  { %v845_v26 = vunpack.c.l.b16 %v839_v22 }
 0x558   :  { %v846_v28 = vpack.c.b16 %v845_v26, %v844_v25 }
 0x55a   :  { %2092 = vmatmul.msk.bf16.vlgmr.msrb.gmra.mxu2 %vm742_vm5, %v846_v28  ;;  %v1049_v31 = vpop.permute.xlu1 %1048 }
 0x564   :  { %v769_v29 = vpop.permute.xlu0 %768 }
 0x565   :  { %v774_v38 = vsel %vm742_vm5, %v769_v29, 0  ;;  %v1073_v36 = vpop.permute.xlu1 %1072 }
 0x566   :  { %783 = vmatpush.bf16.xpose.msrb.mxu1 %v774_v38 }
 0x56c   :  { %v899_v34 = vpop.permute.xlu0 %898 }
 0x56d   :  { %2091 = vmatmul.msk.bf16.vlgmr.msrb.gmra.mxu1 %vm742_vm5, %v767_v57  ;;  %v1225_v41 = vpop.permute.xlu1 %1224 }
 0x56e   :  { %915 = vmatpush.bf16.xpose.msra.mxu1 %v906_v30  ;;  %v1230_v59 = vsel %vm742_vm5, %v1225_v41, 0 }
 0x574   :  { %v925_v39 = vpop.permute.xlu0 %924 }
 0x575   :  { %v930_v51 = vsel %vm742_vm5, %v925_v39, 0 }
 0x576   :  { %1065 = vmatpush.bf16.xpose.msrb.mxu1 %v1056_v35  ;;  %939 = vmatpush.bf16.xpose.msra.mxu2 %v930_v51 }
 0x57c   :  { %v923_v23 = vpop.permute.xlu0 %922 }
 0x57d   :  { %2094 = vmatmul.msk.bf16.vlgmr.msra.gmra.mxu1 %vm742_vm5, %v899_v34  ;;  %2095 = vmatmul.msk.bf16.vlgmr.msra.gmra.mxu2 %vm742_vm5, %v923_v23 }
 0x57e   :  { %1089 = vmatpush.bf16.xpose.msrb.mxu2 %v1080_v40 }
 0x584   :  { %v1201_v43 = vpop.permute.xlu0 %1200 }
 0x585   :  { %v1206_v44 = vsel %vm742_vm5, %v1201_v43, 0 }
 0x586   :  { %1239 = vmatpush.bf16.xpose.msra.mxu2 %v1230_v59  ;;  %1215 = vmatpush.bf16.xpose.msra.mxu1 %v1206_v44 }
 0x58c   :  { %v1199_v45 = vpop.permute.xlu0 %1198 }
 0x58d   :  { %2098 = vmatmul.msk.bf16.vlgmr.msrb.gmra.mxu1 %vm742_vm5, %v1049_v31  ;;  %2099 = vmatmul.msk.bf16.vlgmr.msrb.gmra.mxu2 %vm742_vm5, %v1073_v36 }
 0x594   :  { %v1223_v61 = vpop.permute.xlu0 %1222 }
 0x59d   :  { %2102 = vmatmul.msk.bf16.vlgmr.msra.gmra.mxu1 %vm742_vm5, %v1199_v45  ;;  %2103 = vmatmul.msk.bf16.vlgmr.msra.gmra.mxu2 %vm742_vm5, %v1223_v61 }
 0x5dd   :  { %v2926_v15 = vpop.f32.mrf.mxu2 }
 0x5e5   :  { %v2930_v20 = vpop.f32.mrf.mxu2 }
 0x5ea   :  { %v785_v46 = vpop.f32.mrf.mxu1 }
 0x5eb   :  { %v792_v47 = vmul.f32 0.125, %v785_v46 }
 0x5ed   :  { %v800_v48 = vsel %vm742_vm5, %v792_v47, -inf }
 0x5ee   :  { %801 = vmax.xlane.f32.xlu0 %v800_v48 }
 0x5f2   :  { %v787_v49 = vpop.f32.mrf.mxu1 }
 0x5f3   :  { %v793_v58 = vmul.f32 0.125, %v787_v49 }
 0x5f5   :  { %v803_v62 = vsel %vm742_vm5, %v793_v58, -inf }
 0x5fa   :  { %v917_v50 = vpop.f32.mrf.mxu1 }
 0x5fb   :  { %v946_v53 = vmul.f32 0.125, %v917_v50 }
 0x5fd   :  { %v950_v54 = vsel %vm742_vm5, %v946_v53, -inf }
 0x5fe   :  { %951 = vmax.xlane.f32.xlu1 %v950_v54 }
 0x600   :  { %v941_v29 = vpop.f32.mrf.mxu2 }
 0x601   :  { %v2936_v38 = vmul.f32 0.125, %v941_v29 }
 0x602   :  { %v919_v55 = vpop.f32.mrf.mxu1 }
 0x603   :  { %v947_v56 = vmul.f32 0.125, %v919_v55  ;;  %v956_v51 = vsel %vm742_vm5, %v2936_v38, -inf }
 0x605   :  { %v953_v57 = vsel %vm742_vm5, %v947_v56, -inf }
 0x606   :  { %954 = vmax.xlane.f32.xlu2 %v953_v57 }
 0x608   :  { %v943_v59 = vpop.f32.mrf.mxu2 }
 0x60a   :  { %v1067_v52 = vpop.f32.mrf.mxu1 }
 0x60b   :  { %v1096_v60 = vmul.f32 0.125, %v1067_v52 }
 0x60d   :  { %v1100_v33 = vsel %vm742_vm5, %v1096_v60, -inf }
 0x60e   :  { %1101 = vmax.xlane.f32.xlu1 %v1100_v33  ;;  %804 = vmax.xlane.f32.xlu2 %v803_v62 }
 0x610   :  { %v1091_v54 = vpop.f32.mrf.mxu2 }
 0x611   :  { %v2960_v57 = vmul.f32 0.125, %v1091_v54 }
 0x612   :  { %v1069_v0 = vpop.f32.mrf.mxu1 }
 0x613   :  { %v1097_v27 = vmul.f32 0.125, %v1069_v0  ;;  %v1106_v52 = vsel %vm742_vm5, %v2960_v57, -inf }
 0x615   :  { %v1103_v1 = vsel %vm742_vm5, %v1097_v27, -inf }
 0x616   :  { %1104 = vmax.xlane.f32.xlu0 %v1103_v1 }
 0x618   :  { %v1093_v33 = vpop.f32.mrf.mxu2 }
 0x619   :  { %v2970_v62 = vmul.f32 0.125, %v1093_v33 }
 0x61a   :  { %v1217_v24 = vpop.f32.mrf.mxu1 }
 0x61b   :  { %v1246_v4 = vmul.f32 0.125, %v1217_v24  ;;  %v1109_v0 = vsel %vm742_vm5, %v2970_v62, -inf }
 0x61d   :  { %v1250_v5 = vsel %vm742_vm5, %v1246_v4, -inf }
 0x61e   :  { %1251 = vmax.xlane.f32.xlu0 %v1250_v5 }
 0x622   :  { %v1219_v7 = vpop.f32.mrf.mxu1 }
 0x623   :  { %v2920_v8 = vmul.f32 0.125, %v1219_v7 }
 0x625   :  { %v1253_v9 = vsel %vm742_vm5, %v2920_v8, -inf }
 0x626   :  { %1254 = vmax.xlane.f32.xlu2 %v1253_v9 }
 0x661   :  { %v802_v10 = vpop.xlane.xlu0 %801 }
 0x662   :  { %v808_v11 = vsub.f32 %v792_v47, %v802_v10  ;;  %v2952_v47 = vmul.f32 0.125, %v943_v59 }
 0x664   :  { %v814_v12 = vmul.f32 1.442695, %v808_v11  ;;  %v959_v55 = vsel %vm742_vm5, %v2952_v47, -inf }
 0x666   :  { %2332 = vpow2.f32 %v814_v12 }
 0x66c   :  { %v2924_v14 = vpop.eup %2332 }
 0x66d   :  { %v824_v3 = vsel %vm742_vm5, %v2924_v14, 0.0 }
 0x66e   :  { %825 = vadd.xlane.f32.xlu1 %v824_v3 }
 0x671   :  { %v952_v16 = vpop.xlane.xlu1 %951 }
 0x672   :  { %v962_v17 = vsub.f32 %v946_v53, %v952_v16 }
 0x674   :  { %v966_v18 = vmul.f32 1.442695, %v962_v17 }
 0x676   :  { %2334 = vpow2.f32 %v966_v18 }
 0x679   :  { %v955_v21 = vpop.xlane.xlu2 %954 }
 0x67a   :  { %v963_v22 = vsub.f32 %v947_v56, %v955_v21 }
 0x67c   :  { %v2932_v25 = vpop.eup %2334  ;;  %v968_v26 = vmul.f32 1.442695, %v963_v22 }
 0x67d   :  { %v974_v28 = vsel %vm742_vm5, %v2932_v25, 0.0 }
 0x67e   :  { %2336 = vpow2.f32 %v968_v26  ;;  %975 = vadd.xlane.f32.xlu2 %v974_v28 }
 0x681   :  { %v1102_v30 = vpop.xlane.xlu1 %1101  ;;  %v805_v31 = vpop.xlane.xlu2 %804 }
 0x682   :  { %v1112_v34 = vsub.f32 %v1096_v60, %v1102_v30  ;;  %v809_v35 = vsub.f32 %v793_v58, %v805_v31 }
 0x684   :  { %v2938_v36 = vpop.eup %2336  ;;  %v1116_v37 = vmul.f32 1.442695, %v1112_v34  ;;  %v816_v39 = vmul.f32 1.442695, %v809_v35 }
 0x685   :  { %v977_v40 = vsel %vm742_vm5, %v2938_v36, 0.0 }
 0x686   :  { %2338 = vpow2.f32 %v1116_v37  ;;  %957 = vmax.xlane.f32.xlu2 %v956_v51  ;;  %978 = vadd.xlane.f32.xlu1 %v977_v40 }
 0x687   :  { %2340 = vpow2.f32 %v816_v39 }
 0x689   :  { %v1105_v41 = vpop.xlane.xlu0 %1104 }
 0x68a   :  { %v1113_v23 = vsub.f32 %v1097_v27, %v1105_v41 }
 0x68c   :  { %v2944_v43 = vpop.eup %2338  ;;  %v1118_v44 = vmul.f32 1.442695, %v1113_v23 }
 0x68d   :  { %v2946_v45 = vpop.eup %2340  ;;  %v1124_v61 = vsel %vm742_vm5, %v2944_v43, 0.0 }
 0x68e   :  { %2342 = vpow2.f32 %v1118_v44  ;;  %v827_v46 = vsel %vm742_vm5, %v2946_v45, 0.0  ;;  %1125 = vadd.xlane.f32.xlu1 %v1124_v61 }
 0x68f   :  { %828 = vadd.xlane.f32.xlu0 %v827_v46 }
 0x691   :  { %v1252_v48 = vpop.xlane.xlu0 %1251 }
 0x692   :  { %v1262_v49 = vsub.f32 %v1246_v4, %v1252_v48  ;;  %v1241_v4 = vpop.f32.mrf.mxu2 }
 0x693   :  { %v2987_v11 = vmul.f32 0.125, %v1241_v4 }
 0x694   :  { %v2954_v50 = vpop.eup %2342  ;;  %v1266_v53 = vmul.f32 1.442695, %v1262_v49 }
 0x695   :  { %v1127_v56 = vsel %vm742_vm5, %v2954_v50, 0.0  ;;  %v1256_v12 = vsel %vm742_vm5, %v2987_v11, -inf }
 0x696   :  { %2344 = vpow2.f32 %v1266_v53  ;;  %960 = vmax.xlane.f32.xlu1 %v959_v55 }
 0x697   :  { %1128 = vadd.xlane.f32.xlu0 %v1127_v56 }
 0x699   :  { %v1255_v27 = vpop.xlane.xlu2 %1254 }
 0x69a   :  { %v1263_v1 = vsub.f32 %v2920_v8, %v1255_v27  ;;  %v1243_v9 = vpop.f32.mrf.mxu2 }
 0x69b   :  { %v2983_v10 = vmul.f32 0.125, %v1243_v9 }
 0x69c   :  { %v2962_v58 = vpop.eup %2344  ;;  %v1268_v24 = vmul.f32 1.442695, %v1263_v1 }
 0x69d   :  { %v1274_v60 = vsel %vm742_vm5, %v2962_v58, 0.0  ;;  %v1259_v8 = vsel %vm742_vm5, %v2983_v10, -inf }
 0x69e   :  { %1003 = vrot.lane.b32.xlu2 %v2884_v2, %s2447_s4  ;;  %1107 = vmax.xlane.f32.xlu1 %v1106_v52  ;;  %2346 = vpow2.f32 %v1268_v24 }
 0x69f   :  { %1275 = vadd.xlane.f32.xlu0 %v1274_v60 }
 0x6a4   :  { %v2979_v5 = vpop.eup %2346 }
 0x6a5   :  { %v1277_v7 = vsel %vm742_vm5, %v2979_v5, 0.0 }
 0x6a7   :  { %1110 = vmax.xlane.f32.xlu0 %v1109_v0 }
 0x6b7   :  { %1153 = vrot.lane.b32.xlu1 %v2884_v2, %s2446_s0 }
 0x6bb   :  { %1028 = vrot.lane.b32.xlu0 %v2889_v13, %s2447_s4 }
 0x6c7   :  { %1278 = vadd.xlane.f32.xlu2 %v1277_v7 }
 0x6cf   :  { %1260 = vmax.xlane.f32.xlu2 %v1259_v8 }
 0x6e1   :  { %v826_v3 = vpop.xlane.xlu1 %825 }
 0x6e5   :  { %1257 = vmax.xlane.f32.xlu0 %v1256_v12 }
 0x6e7   :  { %1303 = vrot.lane.b32.xlu2 %v2884_v2, %s2449_s28 }
 0x6f1   :  { %v976_v16 = vpop.xlane.xlu2 %975 }
 0x6f2   :  { %2348 = vrcp.f32 %v976_v16 }
 0x6f8   :  { %v2349_v21 = vpop.eup %2348 }
 0x6f9   :  { %v958_v17 = vpop.xlane.xlu2 %957  ;;  %v979_v18 = vpop.xlane.xlu1 %978  ;;  %v990_v28 = vmul.f32 %v2349_v21, %v2932_v25 }
 0x6fa   :  { %v964_v22 = vsub.f32 %v2936_v38, %v958_v17  ;;  %2350 = vrcp.f32 %v979_v18 }
 0x6fb   :  { %2352 = vrcp.f32 %v826_v3  ;;  %v994_v30 = vpack.c.bf16 %v990_v28, %v990_v28 }
 0x6fc   :  { %v970_v26 = vmul.f32 1.442695, %v964_v22 }
 0x6fd   :  { %v1000_v38 = vunpack.c.l.b16 %v994_v30 }
 0x6fe   :  { %2354 = vpow2.f32 %v970_v26 }
 0x700   :  { %v2351_v29 = vpop.eup %2350 }
 0x701   :  { %v991_v31 = vmul.f32 %v2351_v29, %v2938_v36  ;;  %v1004_v34 = vpop.permute.xlu2 %1003  ;;  %v1126_v2 = vpop.xlane.xlu1 %1125 }
 0x702   :  { %v829_v35 = vpop.xlane.xlu0 %828  ;;  %1016 = vmatpush.bf16.msra.mxu3 %v1004_v34  ;;  %v2353_v37 = vpop.eup %2352 }
 0x703   :  { %v995_v39 = vpack.c.bf16 %v991_v31, %v991_v31  ;;  %2356 = vrcp.f32 %v829_v35  ;;  %v836_v25 = vmul.f32 %v2353_v37, %v2924_v14 }
 0x704   :  { %v2996_v51 = vpop.eup %2354 }
 0x705   :  { %v1001_v40 = vunpack.c.l.b16 %v995_v39  ;;  %v980_v41 = vsel %vm742_vm5, %v2996_v51, 0.0  ;;  %v840_v44 = vpack.c.bf16 %v836_v25, %v836_v25 }
 0x706   :  { %981 = vadd.xlane.f32.xlu1 %v980_v41 }
 0x707   :  { %v1002_v23 = vpack.c.b16 %v1001_v40, %v1000_v38  ;;  %v872_v54 = vunpack.c.l.b16 %v840_v44 }
 0x709   :  { %v2357_v59 = vpop.eup %2356  ;;  %2096 = vmatmul.msk.bf16.vlgmr.msra.gmra.mxu3 %vm742_vm5, %v1002_v23  ;;  %v961_v36 = vpop.xlane.xlu1 %960 }
 0x70a   :  { %v837_v61 = vmul.f32 %v2357_v59, %v2946_v45  ;;  %v965_v46 = vsub.f32 %v2952_v47, %v961_v36  ;;  %v1129_v48 = vpop.xlane.xlu0 %1128 }
 0x70c   :  { %v841_v49 = vpack.c.bf16 %v837_v61, %v837_v61  ;;  %v972_v53 = vmul.f32 1.442695, %v965_v46 }
 0x70e   :  { %v873_v55 = vunpack.c.l.b16 %v841_v49  ;;  %2358 = vpow2.f32 %v972_v53 }
 0x70f   :  { %2360 = vrcp.f32 %v1129_v48 }
 0x710   :  { %v874_v56 = vpack.c.b16 %v873_v55, %v872_v54 }
 0x711   :  { %v1108_v52 = vpop.xlane.xlu1 %1107 }
 0x712   :  { %v1114_v14 = vsub.f32 %v2960_v57, %v1108_v52  ;;  %2093 = vmatmul.msk.bf16.vlgmr.msra.gmra.mxu0 %vm742_vm5, %v874_v56  ;;  %v1276_v60 = vpop.xlane.xlu0 %1275 }
 0x714   :  { %v3006_v33 = vpop.eup %2358  ;;  %v1120_v0 = vmul.f32 1.442695, %v1114_v14 }
 0x715   :  { %v983_v45 = vsel %vm742_vm5, %v3006_v33, 0.0  ;;  %v2361_v27 = vpop.eup %2360 }
 0x716   :  { %2362 = vpow2.f32 %v1120_v0  ;;  %984 = vadd.xlane.f32.xlu0 %v983_v45  ;;  %v1141_v9 = vmul.f32 %v2361_v27, %v2954_v50 }
 0x717   :  { %2364 = vrcp.f32 %v1126_v2 }
 0x718   :  { %v1145_v12 = vpack.c.bf16 %v1141_v9, %v1141_v9 }
 0x71a   :  { %v1111_v47 = vpop.xlane.xlu0 %1110  ;;  %v1151_v17 = vunpack.c.l.b16 %v1145_v12 }
 0x71b   :  { %v1115_v1 = vsub.f32 %v2970_v62, %v1111_v47 }
 0x71c   :  { %v3011_v24 = vpop.eup %2362 }
 0x71d   :  { %v1122_v57 = vmul.f32 1.442695, %v1115_v1  ;;  %v1130_v4 = vsel %vm742_vm5, %v3011_v24, 0.0  ;;  %v2365_v7 = vpop.eup %2364 }
 0x71e   :  { %1131 = vadd.xlane.f32.xlu1 %v1130_v4  ;;  %v1140_v8 = vmul.f32 %v2365_v7, %v2944_v43 }
 0x71f   :  { %2366 = vpow2.f32 %v1122_v57 }
 0x720   :  { %v1144_v16 = vpack.c.bf16 %v1140_v8, %v1140_v8  ;;  %2368 = vrcp.f32 %v1276_v60 }
 0x722   :  { %v1150_v18 = vunpack.c.l.b16 %v1144_v16 }
 0x724   :  { %v1152_v22 = vpack.c.b16 %v1151_v17, %v1150_v18 }
 0x725   :  { %v3017_v3 = vpop.eup %2366 }
 0x726   :  { %v1133_v62 = vsel %vm742_vm5, %v3017_v3, 0.0  ;;  %v2369_v50 = vpop.eup %2368 }
 0x727   :  { %1134 = vadd.xlane.f32.xlu0 %v1133_v62  ;;  %v1290_v29 = vmul.f32 %v2369_v50, %v2962_v58 }
 0x729   :  { %v1154_v21 = vpop.permute.xlu1 %1153  ;;  %v1294_v37 = vpack.c.bf16 %v1290_v29, %v1290_v29 }
 0x72a   :  { %1166 = vmatpush.bf16.msrb.mxu3 %v1154_v21 }
 0x72b   :  { %v1300_v38 = vunpack.c.l.b16 %v1294_v37 }
 0x72d   :  { %v1029_v26 = vpop.permute.xlu0 %1028  ;;  %2100 = vmatmul.msk.bf16.vlgmr.msrb.gmra.mxu3 %vm742_vm5, %v1152_v22 }
 0x72e   :  { %1041 = vmatpush.bf16.msrb.mxu0 %v1029_v26 }
 0x737   :  { %1178 = vrot.lane.b32.xlu1 %v2889_v13, %s2446_s0 }
 0x73a   :  { %v1279_v43 = vpop.xlane.xlu2 %1278 }
 0x73b   :  { %2370 = vrcp.f32 %v1279_v43 }
 0x741   :  { %v2371_v28 = vpop.eup %2370 }
 0x742   :  { %v1291_v30 = vmul.f32 %v2371_v28, %v2979_v5  ;;  %v1261_v31 = vpop.xlane.xlu2 %1260 }
 0x743   :  { %v1265_v34 = vsub.f32 %v2983_v10, %v1261_v31 }
 0x744   :  { %v1295_v2 = vpack.c.bf16 %v1291_v30, %v1291_v30 }
 0x745   :  { %v1272_v35 = vmul.f32 1.442695, %v1265_v34 }
 0x746   :  { %v1301_v39 = vunpack.c.l.b16 %v1295_v2 }
 0x747   :  { %2372 = vpow2.f32 %v1272_v35 }
 0x748   :  { %v1302_v41 = vpack.c.b16 %v1301_v39, %v1300_v38  ;;  %v2236_v39 = vld [vmem:[%s3225_s9 + $0x18] sm:$0xff] }
 0x749   :  { %1449 = vmatpush.bf16.msrb.mxu1 %v2236_v39 }
 0x74a   :  { %v1304_v40 = vpop.permute.xlu2 %1303 }
 0x74b   :  { %1316 = vmatpush.bf16.msra.mxu3 %v1304_v40  ;;  %v2235_v40 = vld [vmem:[%s3225_s9 + $0x10] sm:$0xff] }
 0x74d   :  { %v2373_v25 = vpop.eup %2372  ;;  %1450 = vmatpush.bf16.msrb.mxu1 %v2235_v40 }
 0x74e   :  { %2104 = vmatmul.msk.bf16.vlgmr.msra.gmra.mxu3 %vm742_vm5, %v1302_v41  ;;  %v1283_v23 = vsel %vm742_vm5, %v2373_v25, 0.0  ;;  %v2234_v41 = vld [vmem:[%s3225_s9 + $0x8] sm:$0xff] }
 0x74f   :  { %1284 = vadd.xlane.f32.xlu0 %v1283_v23 }
 0x751   :  { %1451 = vmatpush.bf16.msrb.mxu1 %v2234_v41 }
 0x758   :  { %v1258_v58 = vpop.xlane.xlu0 %1257 }
 0x759   :  { %v1264_v5 = vsub.f32 %v2987_v11, %v1258_v58 }
 0x75b   :  { %v1270_v59 = vmul.f32 1.442695, %v1264_v5  ;;  %v2233_v5 = vld [vmem:[%s3225_s9] sm:$0xff]  ;;  %s1925_s9 = sshll.u32 %s3237_s21, 4  ;;  %s1926_s9 = int_to_ptr.hbm [resolvable:$true] %s1925_s9 }
 0x75c   :  { %1452 = vmatpush.bf16.msrb.mxu1 %v2233_v5 }
 0x75d   :  { %2374 = vpow2.f32 %v1270_v59 }
 0x763   :  { %v2375_v10 = vpop.eup %2374  ;;  %1328 = vrot.lane.b32.xlu0 %v2889_v13, %s2449_s28 }
 0x764   :  { %v1280_v36 = vsel %vm742_vm5, %v2375_v10, 0.0 }
 0x765   :  { %1281 = vadd.xlane.f32.xlu2 %v1280_v36 }
 0x779   :  { %v982_v44 = vpop.xlane.xlu1 %981 }
 0x77a   :  { %2376 = vrcp.f32 %v982_v44 }
 0x780   :  { %v2377_v46 = vpop.eup %2376 }
 0x781   :  { %v992_v49 = vmul.f32 %v2377_v46, %v2996_v51 }
 0x783   :  { %v996_v54 = vpack.c.bf16 %v992_v49, %v992_v49 }
 0x785   :  { %v1025_v52 = vunpack.c.l.b16 %v996_v54 }
 0x789   :  { %v985_v61 = vpop.xlane.xlu0 %984 }
 0x78a   :  { %2378 = vrcp.f32 %v985_v61 }
 0x78c   :  { %v1018_v48 = vpop.f32.mrf.mxu3 }
 0x78f   :  { %v893_v35 = vpop.f32.mrf.mxu0 }
 0x790   :  { %v2379_v53 = vpop.eup %2378 }
 0x791   :  { %v993_v11 = vmul.f32 %v2379_v53, %v3006_v33  ;;  %v1132_v13 = vpop.xlane.xlu1 %1131 }
 0x792   :  { %2380 = vrcp.f32 %v1132_v13 }
 0x793   :  { %v997_v55 = vpack.c.bf16 %v993_v11, %v993_v11 }
 0x794   :  { %v1020_v56 = vpop.f32.mrf.mxu3 }
 0x795   :  { %v1026_v14 = vunpack.c.l.b16 %v997_v55  ;;  %v2263_v60 = vpack.i.bf16 %v1020_v56, %v1018_v48 }
 0x797   :  { %v1027_v0 = vpack.c.b16 %v1026_v14, %v1025_v52  ;;  %2264 = vrot.lane.b32.xlu1 %v2263_v60, %s2448_s26  ;;  %v895_v37 = vpop.f32.mrf.mxu0 }
 0x798   :  { %v2381_v47 = vpop.eup %2380 }
 0x799   :  { %2097 = vmatmul.msk.bf16.vlgmr.msrb.gmra.mxu0 %vm742_vm5, %v1027_v0  ;;  %v1142_v27 = vmul.f32 %v2381_v47, %v3011_v24 }
 0x79a   :  { %v1135_v45 = vpop.xlane.xlu0 %1134 }
 0x79b   :  { %2382 = vrcp.f32 %v1135_v45  ;;  %v1146_v57 = vpack.c.bf16 %v1142_v27, %v1142_v27 }
 0x79d   :  { %v1175_v7 = vunpack.c.l.b16 %v1146_v57 }
 0x7a1   :  { %v2383_v51 = vpop.eup %2382 }
 0x7a2   :  { %v1143_v33 = vmul.f32 %v2383_v51, %v3017_v3 }
 0x7a4   :  { %v1147_v1 = vpack.c.bf16 %v1143_v33, %v1143_v33 }
 0x7a6   :  { %v1176_v4 = vunpack.c.l.b16 %v1147_v1 }
 0x7a8   :  { %v1177_v8 = vpack.c.b16 %v1176_v4, %v1175_v7 }
 0x7a9   :  { %v1179_v9 = vpop.permute.xlu1 %1178 }
 0x7aa   :  { %1191 = vmatpush.bf16.msra.mxu0 %v1179_v9 }
 0x7ad   :  { %2101 = vmatmul.msk.bf16.vlgmr.msra.gmra.mxu0 %vm742_vm5, %v1177_v8 }
 0x7b0   :  { %v1168_v12 = vpop.f32.mrf.mxu3 }
 0x7b8   :  { %v1170_v16 = vpop.f32.mrf.mxu3 }
 0x7b9   :  { %v2268_v62 = vpack.i.bf16 %v1170_v16, %v1168_v12 }
 0x7bb   :  { %2269 = vrot.lane.b32.xlu1 %v2268_v62, %s2445_s7 }
 0x7c2   :  { %v1285_v17 = vpop.xlane.xlu0 %1284 }
 0x7c3   :  { %2384 = vrcp.f32 %v1285_v17 }
 0x7c9   :  { %v2385_v21 = vpop.eup %2384 }
 0x7ca   :  { %v1293_v43 = vmul.f32 %v2385_v21, %v2373_v25 }
 0x7cc   :  { %v1297_v28 = vpack.c.bf16 %v1293_v43, %v1293_v43 }
 0x7ce   :  { %v1326_v31 = vunpack.c.l.b16 %v1297_v28 }
 0x7d1   :  { %v1318_v18 = vpop.f32.mrf.mxu3 }
 0x7d5   :  { %v1329_v24 = vpop.permute.xlu0 %1328 }
 0x7d6   :  { %1341 = vmatpush.bf16.msrb.mxu0 %v1329_v24 }
 0x7d8   :  { %v1282_v3 = vpop.xlane.xlu2 %1281 }
 0x7d9   :  { %2386 = vrcp.f32 %v1282_v3  ;;  %v1320_v22 = vpop.f32.mrf.mxu3  ;;  %v2298_v3 = vld [vmem:[%s3226_s10] ss:$0 sm:$0xff] }
 0x7da   :  { %v2273_v26 = vpack.i.bf16 %v1320_v22, %v1318_v18 }
 0x7dc   :  { %2274 = vrot.lane.b32.xlu0 %v2273_v26, %s2444_s8 }
 0x7df   :  { %v2387_v50 = vpop.eup %2386 }
 0x7e0   :  { %v1292_v29 = vmul.f32 %v2387_v50, %v2375_v10 }
 0x7e2   :  { %v1296_v30 = vpack.c.bf16 %v1292_v29, %v1292_v29 }
 0x7e4   :  { %v1325_v34 = vunpack.c.l.b16 %v1296_v30 }
 0x7e6   :  { %v1327_v2 = vpack.c.b16 %v1326_v31, %v1325_v34 }
 0x7e8   :  { %2105 = vmatmul.msk.bf16.vlgmr.msrb.gmra.mxu0 %vm742_vm5, %v1327_v2 }
 0x809   :  { %v2265_v36 = vpop.permute.xlu1 %2264 }
 0x80a   :  { %v2267_v61 = vunpack.i.h.bf16 %v2265_v36  ;;  %v2266_v46 = vunpack.i.l.bf16 %v2265_v36  ;;  %v2240_v36 = vld [vmem:[%s3229_s13 + $0x18] sm:$0xff] }
 0x80b   :  { %1609 = vmatpush.bf16.msrb.mxu2 %v2240_v36 }
 0x80c   :  { %v1397_v54 = vsel %vm742_vm5, %v2930_v20, %v2267_v61  ;;  %v1396_v11 = vsel %vm742_vm5, %v2926_v15, %v2266_v46 }
 0x816   :  { %v1043_v38 = vpop.f32.mrf.mxu0 }
 0x81e   :  { %v1045_v25 = vpop.f32.mrf.mxu0 }
 0x81f   :  { %v2278_v23 = vpack.i.bf16 %v1045_v25, %v1043_v38 }
 0x821   :  { %2279 = vrot.lane.b32.xlu1 %v2278_v23, %s2448_s26 }
 0x82a   :  { %v1193_v58 = vpop.f32.mrf.mxu0 }
 0x82d   :  { %v2270_v44 = vpop.permute.xlu1 %2269 }
 0x82e   :  { %v2272_v48 = vunpack.i.h.bf16 %v2270_v44  ;;  %v2271_v49 = vunpack.i.l.bf16 %v2270_v44 }
 0x830   :  { %v1402_v52 = vsel %vm1400_vm12, %v1397_v54, %v2272_v48  ;;  %v1401_v14 = vsel %vm1400_vm12, %v1396_v11, %v2271_v49  ;;  %v2239_v49 = vld [vmem:[%s3229_s13 + $0x10] sm:$0xff]  ;;  %v2238_v11 = vld [vmem:[%s3229_s13 + $0x8] sm:$0xff] }
 0x831   :  { %1610 = vmatpush.bf16.msrb.mxu2 %v2239_v49 }
 0x832   :  { %v1195_v59 = vpop.f32.mrf.mxu0 }
 0x833   :  { %v2283_v10 = vpack.i.bf16 %v1195_v59, %v1193_v58 }
 0x835   :  { %2284 = vrot.lane.b32.xlu0 %v2283_v10, %s2445_s7  ;;  %1611 = vmatpush.bf16.msrb.mxu2 %v2238_v11 }
 0x84e   :  { %v2275_v53 = vpop.permute.xlu0 %2274 }
 0x84f   :  { %v2277_v55 = vunpack.i.h.bf16 %v2275_v53  ;;  %v2276_v56 = vunpack.i.l.bf16 %v2275_v53 }
 0x851   :  { %v1407_v13 = vsel %vm1405_vm13, %v1402_v52, %v2277_v55  ;;  %v1406_v60 = vsel %vm1405_vm13, %v1401_v14, %v2276_v56 }
 0x852   :  { %v1410_v0 = vpack.c.bf16 %v1407_v13, %v1406_v60  ;;  %v2237_v13 = vld [vmem:[%s3229_s13] sm:$0xff] }
 0x853   :  { %1612 = vmatpush.bf16.msrb.mxu2 %v2237_v13  ;;  %v2245_v13 = vld [vmem:[%s3231_s15 + $0x20] sm:$0xff] }
 0x854   :  { %2122 = vmatmul.msk.bf16.vlgmr.msrb.gmra.mxu1 %vm424_vm0, %v1410_v0 }
 0x865   :  { %v1343_v45 = vpop.f32.mrf.mxu0 }
 0x86d   :  { %v1345_v47 = vpop.f32.mrf.mxu0 }
 0x86e   :  { %v2288_v51 = vpack.i.bf16 %v1345_v47, %v1343_v45 }
 0x870   :  { %2289 = vrot.lane.b32.xlu2 %v2288_v51, %s2444_s8 }
 0x893   :  { %v2280_v20 = vpop.permute.xlu1 %2279 }
 0x894   :  { %v2282_v27 = vunpack.i.h.bf16 %v2280_v20  ;;  %v2281_v33 = vunpack.i.l.bf16 %v2280_v20 }
 0x896   :  { %v1399_v7 = vsel %vm742_vm5, %v895_v37, %v2282_v27  ;;  %v1398_v9 = vsel %vm742_vm5, %v893_v35, %v2281_v33 }
 0x8a7   :  { %v2285_v15 = vpop.permute.xlu0 %2284 }
 0x8a8   :  { %v2287_v1 = vunpack.i.h.bf16 %v2285_v15  ;;  %v2286_v57 = vunpack.i.l.bf16 %v2285_v15 }
 0x8aa   :  { %v1404_v16 = vsel %vm1400_vm12, %v1399_v7, %v2287_v1  ;;  %v1403_v62 = vsel %vm1400_vm12, %v1398_v9, %v2286_v57 }
 0x8ca   :  { %v2290_v4 = vpop.permute.xlu2 %2289 }
 0x8cb   :  { %v2292_v8 = vunpack.i.h.bf16 %v2290_v4  ;;  %v2291_v12 = vunpack.i.l.bf16 %v2290_v4 }
 0x8cd   :  { %v1408_v17 = vsel %vm1405_vm13, %v1403_v62, %v2291_v12  ;;  %v1409_v18 = vsel %vm1405_vm13, %v1404_v16, %v2292_v8  ;;  %v2299_v62 = vld [vmem:[%s3227_s11] ss:$0 sm:$0xff] }
 0x8ce   :  { %v1411_v24 = vpack.c.bf16 %v1409_v18, %v1408_v17 }
 0x8d0   :  { %2123 = vmatmul.msk.bf16.gmra.mxu1 %vm424_vm0, %v1411_v24 }
 0x8d1   :  { %v1454_v21 = vpop.f32.mrf.mxu1 }
 0x8d2   :  { %v1455_v22 = vadd.f32 %v2298_v3, %v1454_v21 }
 0x8d4   :  { %v3078_v26 = vadd.f32 %v1455_v22, %v2699_v32 }
 0x8d6   :  { %v1468_v43 = vsel %vm424_vm0, %v3078_v26, 0.0 }
 0x8d7   :  { %1469 = vadd.xlane.f32.xlu1 %v1468_v43 }
 0x8d9   :  { %v1456_v50 = vpop.f32.mrf.mxu1 }
 0x8da   :  { %v1457_v28 = vadd.f32 %v2298_v3, %v1456_v50 }
 0x8dc   :  { %v3083_v29 = vadd.f32 %v1457_v28, %v2706_v42 }
 0x8de   :  { %v1471_v30 = vsel %vm424_vm0, %v3083_v29, 0.0 }
 0x8df   :  { %1472 = vadd.xlane.f32.xlu0 %v1471_v30 }
 0x94a   :  { %v1470_v31 = vpop.xlane.xlu1 %1469 }
 0x94b   :  { %v1480_v34 = vmul.f32 %v1470_v31, %v2679_v63 }
 0x94d   :  { %v3089_v2 = vsub.f32 %v3078_v26, %v1480_v34  ;;  %v1459_v32 = vpop.f32.mrf.mxu1 }
 0x94e   :  { %v1460_v35 = vadd.f32 %v2298_v3, %v1459_v32 }
 0x94f   :  { %v1488_v37 = vmul.f32 %v3089_v2, %v3089_v2 }
 0x950   :  { %v3094_v39 = vadd.f32 %v1460_v35, %v2789_v6 }
 0x951   :  { %v1492_v42 = vsel %vm424_vm0, %v1488_v37, 0.0 }
 0x952   :  { %v1474_v38 = vsel %vm424_vm0, %v3094_v39, 0.0  ;;  %1493 = vadd.xlane.f32.xlu0 %v1492_v42  ;;  %v1473_v40 = vpop.xlane.xlu0 %1472 }
 0x953   :  { %1475 = vadd.xlane.f32.xlu2 %v1474_v38  ;;  %v1481_v25 = vmul.f32 %v1473_v40, %v2679_v63 }
 0x955   :  { %v1461_v41 = vpop.f32.mrf.mxu1  ;;  %v1485_v5 = vsub.f32 %v3083_v29, %v1481_v25 }
 0x956   :  { %v1462_v23 = vadd.f32 %v2298_v3, %v1461_v41  ;;  %v2300_v3 = vld [vmem:[%s3228_s12] ss:$0 sm:$0xff] }
 0x957   :  { %v1489_v59 = vmul.f32 %v1485_v5, %v1485_v5 }
 0x958   :  { %v3101_v58 = vadd.f32 %v1462_v23, %v2797_v19 }
 0x959   :  { %v1495_v10 = vsel %vm424_vm0, %v1489_v59, 0.0 }
 0x95a   :  { %v1477_v6 = vsel %vm424_vm0, %v3101_v58, 0.0 }
 0x95b   :  { %1478 = vadd.xlane.f32.xlu1 %v1477_v6 }
 0x963   :  { %1496 = vadd.xlane.f32.xlu1 %v1495_v10 }
 0x9c5   :  { %v1494_v44 = vpop.xlane.xlu0 %1493 }
 0x9c6   :  { %v1476_v61 = vpop.xlane.xlu2 %1475  ;;  %v1504_v46 = vmul.f32 %v1494_v44, %v2679_v63 }
 0x9c7   :  { %v1482_v19 = vmul.f32 %v1476_v61, %v2679_v63 }
 0x9c8   :  { %v1508_v48 = vadd.f32 1e-05, %v1504_v46 }
 0x9c9   :  { %v3116_v53 = vsub.f32 %v3094_v39, %v1482_v19 }
 0x9ca   :  { %2388 = vrsqrt.f32 %v1508_v48  ;;  %vm1518_vm15 = vweird.f32 %v1508_v48 }
 0x9cb   :  { %v1490_v54 = vmul.f32 %v3116_v53, %v3116_v53 }
 0x9cd   :  { %v1498_v55 = vsel %vm424_vm0, %v1490_v54, 0.0 }
 0x9ce   :  { %1499 = vadd.xlane.f32.xlu0 %v1498_v55  ;;  %v1479_v56 = vpop.xlane.xlu1 %1478 }
 0x9cf   :  { %v1483_v52 = vmul.f32 %v1479_v56, %v2679_v63  ;;  %v2248_v56 = vld [vmem:[%s3231_s15 + $0x38] sm:$0xff] }
 0x9d0   :  { %v2389_v14 = vpop.eup %2388  ;;  %1761 = vmatpush.bf16.msrb.mxu3 %v2248_v56 }
 0x9d1   :  { %v3129_v60 = vsub.f32 %v3101_v58, %v1483_v52  ;;  %v1513_v0 = vmul.f32 %v2389_v14, %v1508_v48  ;;  %vm1519_vm14 = vweird.f32 %v2389_v14 }
 0x9d2   :  { %vm1520_vm1 = vmor %vm1518_vm15, %vm1519_vm14 }
 0x9d3   :  { %v1491_v45 = vmul.f32 %v3129_v60, %v3129_v60  ;;  %v1514_v51 = vmul.f32 %v2389_v14, %v1513_v0  ;;  %v2301_v0 = vld [vmem:[%s3230_s14] ss:$0 sm:$0xff] }
 0x9d5   :  { %v1501_v47 = vsel %vm424_vm0, %v1491_v45, 0.0  ;;  %v1515_v33 = vmul.f32 0.5, %v1514_v51 }
 0x9d6   :  { %1502 = vadd.xlane.f32.xlu1 %v1501_v47  ;;  %v1497_v20 = vpop.xlane.xlu1 %1496  ;;  %v2243_v47 = vld [vmem:[%s3231_s15 + $0x10] sm:$0xff] }
 0x9d7   :  { %v1505_v15 = vmul.f32 %v1497_v20, %v2679_v63  ;;  %v1516_v1 = vsub.f32 1.5, %v1515_v33 }
 0x9d9   :  { %v1509_v27 = vadd.f32 1e-05, %v1505_v15  ;;  %v1517_v4 = vmul.f32 %v2389_v14, %v1516_v1  ;;  %v2242_v15 = vld [vmem:[%s3231_s15 + $0x8] sm:$0xff]  ;;  %v2241_v1 = vld [vmem:[%s3231_s15] sm:$0xff] }
 0x9db   :  { %2390 = vrsqrt.f32 %v1509_v27  ;;  %v1521_v8 = vsel %vm1520_vm1, %v2389_v14, %v1517_v4  ;;  %vm1528_vm3 = vweird.f32 %v1509_v27  ;;  %v2246_v14 = vld [vmem:[%s3231_s15 + $0x28] sm:$0xff] }
 0x9dc   :  { %v1552_v17 = vmul.f32 %v1521_v8, %v3089_v2 }
 0x9de   :  { %v1559_v21 = vmul.f32 %v2299_v62, %v1552_v17 }
 0x9e0   :  { %v1566_v50 = vadd.f32 %v2300_v3, %v1559_v21 }
 0x9e1   :  { %v2391_v57 = vpop.eup %2390 }
 0x9e2   :  { %v1523_v7 = vmul.f32 %v2391_v57, %v1509_v27  ;;  %vm1529_vm2 = vweird.f32 %v2391_v57 }
 0x9e3   :  { %vm1530_vm4 = vmor %vm1528_vm3, %vm1529_vm2 }
 0x9e4   :  { %v1524_v9 = vmul.f32 %v2391_v57, %v1523_v7 }
 0x9e6   :  { %v1525_v12 = vmul.f32 0.5, %v1524_v9 }
 0x9e8   :  { %v1526_v16 = vsub.f32 1.5, %v1525_v12 }
 0x9ea   :  { %v1527_v18 = vmul.f32 %v2391_v57, %v1526_v16 }
 0x9ec   :  { %v1531_v24 = vsel %vm1530_vm4, %v2391_v57, %v1527_v18 }
 0x9ed   :  { %v1553_v22 = vmul.f32 %v1531_v24, %v1485_v5 }
 0x9ef   :  { %v1560_v43 = vmul.f32 %v2299_v62, %v1553_v22 }
 0x9f1   :  { %v1567_v28 = vadd.f32 %v2300_v3, %v1560_v43 }
 0x9f3   :  { %v1570_v30 = vpack.c.bf16 %v1567_v28, %v1566_v50 }
 0x9f5   :  { %2140 = vmatmul.msk.bf16.vlgmr.msrb.gmra.mxu2 %vm424_vm0, %v1570_v30 }
 0xa41   :  { %v1500_v31 = vpop.xlane.xlu0 %1499 }
 0xa42   :  { %v1506_v34 = vmul.f32 %v1500_v31, %v2679_v63 }
 0xa44   :  { %v1510_v2 = vadd.f32 1e-05, %v1506_v34 }
 0xa46   :  { %2392 = vrsqrt.f32 %v1510_v2  ;;  %vm1538_vm6 = vweird.f32 %v1510_v2 }
 0xa49   :  { %v1503_v32 = vpop.xlane.xlu1 %1502 }
 0xa4a   :  { %v1507_v35 = vmul.f32 %v1503_v32, %v2679_v63 }
 0xa4c   :  { %v2393_v37 = vpop.eup %2392  ;;  %v1511_v42 = vadd.f32 1e-05, %v1507_v35 }
 0xa4d   :  { %v1533_v38 = vmul.f32 %v2393_v37, %v1510_v2  ;;  %vm1539_vm5 = vweird.f32 %v2393_v37 }
 0xa4e   :  { %2394 = vrsqrt.f32 %v1511_v42  ;;  %vm1540_vm7 = vmor %vm1538_vm6, %vm1539_vm5  ;;  %vm1548_vm9 = vweird.f32 %v1511_v42 }
 0xa4f   :  { %v1534_v40 = vmul.f32 %v2393_v37, %v1533_v38 }
 0xa51   :  { %v1535_v41 = vmul.f32 0.5, %v1534_v40 }
 0xa53   :  { %v1536_v25 = vsub.f32 1.5, %v1535_v41 }
 0xa54   :  { %v2395_v23 = vpop.eup %2394 }
 0xa55   :  { %v1537_v5 = vmul.f32 %v2393_v37, %v1536_v25  ;;  %v1543_v6 = vmul.f32 %v2395_v23, %v1511_v42  ;;  %vm1549_vm8 = vweird.f32 %v2395_v23 }
 0xa56   :  { %vm1550_vm10 = vmor %vm1548_vm9, %vm1549_vm8 }
 0xa57   :  { %v1544_v59 = vmul.f32 %v2395_v23, %v1543_v6  ;;  %v1541_v10 = vsel %vm1540_vm7, %v2393_v37, %v1537_v5 }
 0xa58   :  { %v1554_v61 = vmul.f32 %v1541_v10, %v3116_v53  ;;  %v2247_v53 = vld [vmem:[%s3231_s15 + $0x30] sm:$0xff] }
 0xa59   :  { %v1545_v36 = vmul.f32 0.5, %v1544_v59  ;;  %1762 = vmatpush.bf16.msrb.mxu3 %v2247_v53 }
 0xa5a   :  { %v1561_v49 = vmul.f32 %v2299_v62, %v1554_v61 }
 0xa5b   :  { %v1546_v44 = vsub.f32 1.5, %v1545_v36 }
 0xa5c   :  { %v1568_v11 = vadd.f32 %v2300_v3, %v1561_v49 }
 0xa5d   :  { %v1547_v46 = vmul.f32 %v2395_v23, %v1546_v44  ;;  %1763 = vmatpush.bf16.msrb.mxu3 %v2246_v14 }
 0xa5f   :  { %v1551_v19 = vsel %vm1550_vm10, %v2395_v23, %v1547_v46 }
 0xa60   :  { %v1555_v48 = vmul.f32 %v1551_v19, %v3129_v60  ;;  %v2244_v60 = vld [vmem:[%s3231_s15 + $0x18] sm:$0xff] }
 0xa61   :  { %1764 = vmatpush.bf16.msrb.mxu3 %v2245_v13 }
 0xa62   :  { %v1562_v54 = vmul.f32 %v2299_v62, %v1555_v48 }
 0xa64   :  { %v1569_v55 = vadd.f32 %v2300_v3, %v1562_v54 }
 0xa65   :  { %1765 = vmatpush.bf16.msrb.mxu3 %v2244_v60 }
 0xa66   :  { %v1571_v52 = vpack.c.bf16 %v1569_v55, %v1568_v11 }
 0xa68   :  { %2141 = vmatmul.msk.bf16.gmra.mxu2 %vm424_vm0, %v1571_v52 }
 0xa69   :  { %1766 = vmatpush.bf16.msrb.mxu3 %v2243_v47 }
 0xa6d   :  { %1767 = vmatpush.bf16.msrb.mxu3 %v2242_v15 }
 0xa71   :  { %1768 = vmatpush.bf16.msrb.mxu3 %v2241_v1 }
 0xa78   :  { %v1614_v45 = vpop.f32.mrf.mxu2 }
 0xa79   :  { %v1615_v51 = vadd.f32 %v2301_v0, %v1614_v45 }
 0xa7b   :  { %v2142_v20 = vmul.f32 -1.702, %v1615_v51 }
 0xa7d   :  { %v1632_v27 = vmul.f32 1.442695, %v2142_v20 }
 0xa7f   :  { %2396 = vpow2.f32 %v1632_v27 }
 0xa80   :  { %v1616_v33 = vpop.f32.mrf.mxu2 }
 0xa81   :  { %v1617_v57 = vadd.f32 %v2301_v0, %v1616_v33 }
 0xa83   :  { %v2143_v4 = vmul.f32 -1.702, %v1617_v57 }
 0xa85   :  { %v2397_v7 = vpop.eup %2396  ;;  %v1634_v9 = vmul.f32 1.442695, %v2143_v4 }
 0xa86   :  { %v1640_v8 = vadd.f32 1.0, %v2397_v7 }
 0xa87   :  { %2398 = vpow2.f32 %v1634_v9 }
 0xa88   :  { %2400 = vrcp.f32 %v1640_v8  ;;  %v1655_v43 = vand.u32 2147483648, %v1640_v8  ;;  %vm1649_vm12 = vweird.f32 %v1640_v8  ;;  %v1653_v50 = vand.u32 2147483647, %v1640_v8 }
 0xa8a   :  { %v1656_v32 = vor.u32 1.1754944e-38, %v1655_v43  ;;  %vm1654_vm15 = vcmp.eq.f32.partialorder %v1653_v50, 8.507059e+37 }
 0xa8d   :  { %v2399_v12 = vpop.eup %2398 }
 0xa8e   :  { %v2401_v16 = vpop.eup %2400  ;;  %v1641_v62 = vadd.f32 1.0, %v2399_v12 }
 0xa8f   :  { %v1645_v17 = vmul.f32 %v2401_v16, %v1640_v8  ;;  %vm1650_vm11 = vweird.f32 %v2401_v16 }
 0xa90   :  { %2402 = vrcp.f32 %v1641_v62  ;;  %vm1651_vm13 = vmor %vm1649_vm12, %vm1650_vm11  ;;  %v1670_v30 = vand.u32 2147483648, %v1641_v62  ;;  %v1668_v2 = vand.u32 2147483647, %v1641_v62  ;;  %vm1664_vm1 = vweird.f32 %v1641_v62 }
 0xa91   :  { %v1646_v18 = vsub.f32 1.0, %v1645_v17  ;;  %v2302_v17 = vld [vmem:[%s3232_s16] ss:$0 sm:$0xff] }
 0xa92   :  { %v1671_v42 = vor.u32 1.1754944e-38, %v1670_v30  ;;  %vm1669_vm3 = vcmp.eq.f32.partialorder %v1668_v2, 8.507059e+37  ;;  %v2450_v30 = vmov 16.0  }
 0xa93   :  { %v1647_v24 = vmul.f32 %v2401_v16, %v1646_v18 }
 0xa95   :  { %v1648_v21 = vadd.f32 %v2401_v16, %v1647_v24 }
 0xa96   :  { %v2403_v3 = vpop.eup %2402 }
 0xa97   :  { %v1660_v22 = vmul.f32 %v2403_v3, %v1641_v62  ;;  %v1652_v31 = vsel %vm1651_vm13, %v2401_v16, %v1648_v21  ;;  %vm1665_vm14 = vweird.f32 %v2403_v3  ;;  %vm1813_vm13 = vcmask 1041409  }
 0xa98   :  { %v1657_v37 = vsel %vm1654_vm15, %v1656_v32, %v1652_v31  ;;  %vm1666_vm2 = vmor %vm1664_vm1, %vm1665_vm14  ;;  %vm1816_vm14 = vcmask 517120  }
 0xa99   :  { %v1661_v28 = vsub.f32 1.0, %v1660_v22  ;;  %v1704_v41 = vmul.f32 %v1657_v37, %v1615_v51 }
 0xa9b   :  { %v1662_v34 = vmul.f32 %v2403_v3, %v1661_v28 }
 0xa9d   :  { %v1663_v35 = vadd.f32 %v2403_v3, %v1662_v34 }
 0xa9f   :  { %v1667_v38 = vsel %vm1666_vm2, %v2403_v3, %v1663_v35 }
 0xaa0   :  { %v1672_v40 = vsel %vm1669_vm3, %v1671_v42, %v1667_v38 }
 0xaa1   :  { %v1705_v25 = vmul.f32 %v1672_v40, %v1617_v57 }
 0xaa3   :  { %v1708_v23 = vpack.c.bf16 %v1705_v25, %v1704_v41 }
 0xaa5   :  { %1769 = vmatmul.bf16.vlgmr.msrb.gmra.mxu3 %v1708_v23 }
 0xaeb   :  { %v1619_v5 = vpop.f32.mrf.mxu2 }
 0xaec   :  { %v1620_v6 = vadd.f32 %v2301_v0, %v1619_v5 }
 0xaee   :  { %v2144_v59 = vmul.f32 -1.702, %v1620_v6 }
 0xaf0   :  { %v1636_v10 = vmul.f32 1.442695, %v2144_v59 }
 0xaf2   :  { %2404 = vpow2.f32 %v1636_v10 }
 0xaf3   :  { %v1621_v36 = vpop.f32.mrf.mxu2 }
 0xaf4   :  { %v1622_v44 = vadd.f32 %v2301_v0, %v1621_v36 }
 0xaf6   :  { %v2145_v61 = vmul.f32 -1.702, %v1622_v44 }
 0xaf8   :  { %v2405_v46 = vpop.eup %2404  ;;  %v1638_v19 = vmul.f32 1.442695, %v2145_v61 }
 0xaf9   :  { %v1642_v48 = vadd.f32 1.0, %v2405_v46 }
 0xafa   :  { %2406 = vpow2.f32 %v1638_v19 }
 0xafb   :  { %2408 = vrcp.f32 %v1642_v48  ;;  %v1685_v60 = vand.u32 2147483648, %v1642_v48  ;;  %vm1679_vm5 = vweird.f32 %v1642_v48  ;;  %v1683_v0 = vand.u32 2147483647, %v1642_v48 }
 0xafd   :  { %v1686_v27 = vor.u32 1.1754944e-38, %v1685_v60  ;;  %vm1684_vm8 = vcmp.eq.f32.partialorder %v1683_v0, 8.507059e+37 }
 0xb00   :  { %v2407_v49 = vpop.eup %2406 }
 0xb01   :  { %v2409_v54 = vpop.eup %2408  ;;  %v1643_v11 = vadd.f32 1.0, %v2407_v49 }
 0xb02   :  { %v1675_v55 = vmul.f32 %v2409_v54, %v1642_v48  ;;  %vm1680_vm4 = vweird.f32 %v2409_v54 }
 0xb03   :  { %2410 = vrcp.f32 %v1643_v11  ;;  %vm1681_vm6 = vmor %vm1679_vm5, %vm1680_vm4  ;;  %v1700_v47 = vand.u32 2147483648, %v1643_v11  ;;  %v1698_v15 = vand.u32 2147483647, %v1643_v11  ;;  %vm1694_vm9 = vweird.f32 %v1643_v11 }
 0xb04   :  { %v1676_v56 = vsub.f32 1.0, %v1675_v55  ;;  %2412 = vrcp.f32 %v2450_v30 }
 0xb05   :  { %v1701_v57 = vor.u32 1.1754944e-38, %v1700_v47  ;;  %vm1699_vm11 = vcmp.eq.f32.partialorder %v1698_v15, 8.507059e+37  ;;  %v2251_v15 = vld [vmem:[%s3235_s19 + $0x10] sm:$0xff] }
 0xb06   :  { %v1677_v52 = vmul.f32 %v2409_v54, %v1676_v56 }
 0xb08   :  { %v1678_v14 = vadd.f32 %v2409_v54, %v1677_v52 }
 0xb09   :  { %v2411_v53 = vpop.eup %2410 }
 0xb0a   :  { %v1690_v13 = vmul.f32 %v2411_v53, %v1643_v11  ;;  %v1682_v51 = vsel %vm1681_vm6, %v2409_v54, %v1678_v14  ;;  %vm1695_vm7 = vweird.f32 %v2411_v53  ;;  %v2413_v2 = vpop.eup %2412 }
 0xb0b   :  { %v1687_v1 = vsel %vm1684_vm8, %v1686_v27, %v1682_v51  ;;  %vm1696_vm10 = vmor %vm1694_vm9, %vm1695_vm7  ;;  %v1803_v38 = vmul.f32 16.0, %v2413_v2  ;;  %vm1807_vm12 = vweird.f32 %v2413_v2  ;;  %v2250_v27 = vld [vmem:[%s3235_s19 + $0x8] sm:$0xff] }
 0xb0c   :  { %v1691_v45 = vsub.f32 1.0, %v1690_v13  ;;  %v1706_v9 = vmul.f32 %v1687_v1, %v1620_v6 }
 0xb0d   :  { %v1804_v25 = vsub.f32 1.0, %v1803_v38 }
 0xb0e   :  { %v1692_v20 = vmul.f32 %v2411_v53, %v1691_v45 }
 0xb0f   :  { %v1805_v59 = vmul.f32 %v2413_v2, %v1804_v25 }
 0xb10   :  { %v1693_v33 = vadd.f32 %v2411_v53, %v1692_v20  ;;  %v2252_v20 = vld [vmem:[%s3235_s19 + $0x18] sm:$0xff] }
 0xb11   :  { %v1806_v61 = vadd.f32 %v2413_v2, %v1805_v59  ;;  %1908 = vmatpush.bf16.msra.mxu0 %v2252_v20 }
 0xb12   :  { %v1697_v4 = vsel %vm1696_vm10, %v2411_v53, %v1693_v33 }
 0xb13   :  { %v1702_v7 = vsel %vm1699_vm11, %v1701_v57, %v1697_v4  ;;  %v1808_v48 = vsel %vm1807_vm12, %v2413_v2, %v1806_v61  ;;  %v2249_v57 = vld [vmem:[%s3235_s19] sm:$0xff] }
 0xb14   :  { %v1707_v8 = vmul.f32 %v1702_v7, %v1622_v44 }
 0xb15   :  { %1909 = vmatpush.bf16.msra.mxu0 %v2251_v15 }
 0xb16   :  { %v1709_v12 = vpack.c.bf16 %v1707_v8, %v1706_v9 }
 0xb18   :  { %1774 = vmatmul.bf16.gmra.mxu3 %v1709_v12 }
 0xb19   :  { %1910 = vmatpush.bf16.msra.mxu0 %v2250_v27 }
 0xb1d   :  { %1911 = vmatpush.bf16.msra.mxu0 %v2249_v57 }
 0xb28   :  { %v1770_v16 = vpop.f32.mrf.mxu3 }
 0xb29   :  { %v1771_v24 = vadd.f32 %v2302_v17, %v1770_v16 }
 0xb2b   :  { %v1780_v21 = vadd.f32 %v1771_v24, %v3078_v26 }
 0xb2d   :  { %v1784_v43 = vsel %vm424_vm0, %v1780_v21, 0.0 }
 0xb30   :  { %v1772_v62 = vpop.f32.mrf.mxu3 }
 0xb31   :  { %v1773_v18 = vadd.f32 %v2302_v17, %v1772_v62 }
 0xb33   :  { %v1781_v3 = vadd.f32 %v1773_v18, %v3083_v29  ;;  %v2304_v18 = vld [vmem:[%s3234_s18] ss:$0 sm:$0xff]  ;;  %s2451_s18 = smov [#allocation2]  }
 0xb34   :  { %s1923_s24 = sshll.u32 %s2451_s18, 4  ;;  %s1924_s24 = int_to_ptr.vmem [resolvable:$true] %s1923_s24 }
 0xb35   :  { %v1785_v22 = vsel %vm424_vm0, %v1781_v3, 0.0 }
 0xb36   :  { %v1786_v50 = vadd.f32 %v1785_v22, %v1784_v43 }
 0xb38   :  { %v1787_v31 = vrot.slane %v1786_v50, 4 }
 0xb3a   :  { %v1788_v32 = vadd.f32 %v1787_v31, %v1786_v50 }
 0xb3c   :  { %v1789_v26 = vrot.slane %v1788_v32, 2 }
 0xb3e   :  { %v1790_v5 = vadd.f32 %v1789_v26, %v1788_v32 }
 0xb40   :  { %v1791_v44 = vrot.slane %v1790_v5, 1 }
 0xb9b   :  { %v1775_v28 = vpop.f32.mrf.mxu3 }
 0xb9c   :  { %v1776_v34 = vadd.f32 %v2302_v17, %v1775_v28 }
 0xb9e   :  { %v1782_v37 = vadd.f32 %v1776_v34, %v3094_v39  ;;  %v1792_v39 = vadd.f32 %v1791_v44, %v1790_v5 }
 0xba0   :  { %v1793_v40 = vsel %vm424_vm0, %v1782_v37, 0.0  ;;  %v1809_v49 = vmul.f32 %v1808_v48, %v1792_v39 }
 0xba3   :  { %v1777_v35 = vpop.f32.mrf.mxu3 }
 0xba4   :  { %v1778_v42 = vadd.f32 %v2302_v17, %v1777_v35 }
 0xba6   :  { %v1783_v29 = vadd.f32 %v1778_v42, %v3101_v58  ;;  %v2305_v42 = vld [vmem:[%s3236_s20] ss:$0 sm:$0xff] }
 0xba8   :  { %v1794_v41 = vsel %vm424_vm0, %v1783_v29, 0.0 }
 0xba9   :  { %v1795_v23 = vadd.f32 %v1794_v41, %v1793_v40 }
 0xbab   :  { %v1796_v6 = vrot.slane %v1795_v23, 4 }
 0xbad   :  { %v1797_v10 = vadd.f32 %v1796_v6, %v1795_v23 }
 0xbaf   :  { %v1798_v36 = vrot.slane %v1797_v10, 2 }
 0xbb1   :  { %v1799_v46 = vadd.f32 %v1798_v36, %v1797_v10 }
 0xbb3   :  { %v1800_v19 = vrot.slane %v1799_v46, 1 }
 0xbb5   :  { %v1801_v58 = vadd.f32 %v1800_v19, %v1799_v46 }
 0xbb7   :  { %v1810_v54 = vmul.f32 %v1808_v48, %v1801_v58 }
 0xbb9   :  { %v1814_v11 = vsel %vm1813_vm13, %v1810_v54, %v1809_v49 }
 0xbba   :  { %v1817_v55 = vsel %vm1816_vm14, %v1814_v11, 0.0 }
 0xbbb   :  { %1818 = vadd.xlane.f32.xlu0 %v1817_v55 }
 0xc2e   :  { %v1819_v56 = vpop.xlane.xlu0 %1818 }
 0xc2f   :  { %v1820_v52 = vmul.f32 %v1819_v56, %v2679_v63 }
 0xc31   :  { %v1822_v53 = vrot.slane %v1820_v52, 1  ;;  %v1825_v14 = vsub.f32 %v1809_v49, %v1820_v52 }
 0xc33   :  { %v1826_v13 = vsub.f32 %v1810_v54, %v1822_v53  ;;  %v1827_v0 = vmul.f32 %v1825_v14, %v1825_v14 }
 0xc35   :  { %v1828_v60 = vmul.f32 %v1826_v13, %v1826_v13 }
 0xc37   :  { %v1831_v45 = vrot.slane %v1828_v60, 7 }
 0xc39   :  { %v1832_v47 = vsel %vm1813_vm13, %v1831_v45, %v1827_v0 }
 0xc3a   :  { %v1834_v51 = vsel %vm1816_vm14, %v1832_v47, 0.0 }
 0xc3b   :  { %1835 = vadd.xlane.f32.xlu2 %v1834_v51 }
 0xcae   :  { %v1836_v33 = vpop.xlane.xlu2 %1835 }
 0xcaf   :  { %v1837_v1 = vmul.f32 %v1836_v33, %v2679_v63  ;;  %v2303_v63 = vld [vmem:[%s3233_s17] ss:$0 sm:$0xff] }
 0xcb1   :  { %v1838_v4 = vadd.f32 1e-05, %v1837_v1 }
 0xcb3   :  { %2414 = vrsqrt.f32 %v1838_v4  ;;  %vm1845_vm1 = vweird.f32 %v1838_v4 }
 0xcb9   :  { %v2415_v7 = vpop.eup %2414 }
 0xcba   :  { %v1840_v9 = vmul.f32 %v2415_v7, %v1838_v4  ;;  %vm1846_vm15 = vweird.f32 %v2415_v7 }
 0xcbb   :  { %vm1847_vm2 = vmor %vm1845_vm1, %vm1846_vm15 }
 0xcbc   :  { %v1841_v8 = vmul.f32 %v2415_v7, %v1840_v9 }
 0xcbe   :  { %v1842_v12 = vmul.f32 0.5, %v1841_v8 }
 0xcc0   :  { %v1843_v16 = vsub.f32 1.5, %v1842_v12 }
 0xcc2   :  { %v1844_v62 = vmul.f32 %v2415_v7, %v1843_v16 }
 0xcc4   :  { %v1848_v17 = vsel %vm1847_vm2, %v2415_v7, %v1844_v62 }
 0xcc5   :  { %v1850_v24 = vrot.slane %v1848_v17, 1  ;;  %v1853_v3 = vmul.f32 %v1848_v17, %v1825_v14 }
 0xcc7   :  { %v1854_v21 = vmul.f32 %v1850_v24, %v1826_v13  ;;  %v1858_v22 = vmul.f32 %v2303_v63, %v1853_v3 }
 0xcc9   :  { %v1859_v43 = vmul.f32 %v2303_v63, %v1854_v21  ;;  %v1863_v50 = vadd.f32 %v2304_v18, %v1858_v22 }
 0xccb   :  { %v1864_v28 = vadd.f32 %v2304_v18, %v1859_v43  ;;  %v1865_v30 = vpack.c.bf16 %v1863_v50, %v1863_v50 }
 0xccd   :  { %v1866_v31 = vpack.c.bf16 %v1864_v28, %v1864_v28  ;;  %v1872_v2 = vunpack.c.l.b16 %v1865_v30 }
 0xccf   :  { %v1873_v34 = vunpack.c.l.b16 %v1866_v31 }
 0xcd1   :  { %v1874_v32 = vrot.slane %v1873_v34, 7 }
 0xcd3   :  { %v1875_v35 = vsel %vm1813_vm13, %v1874_v32, %v1872_v2 }
 0xcd4   :  { %v1876_v37 = vpack.c.b16 %v1875_v35, %v1875_v35 }
 0xcd6   :  { %2194 = vmatmul.msk.bf16.vlgmr.msra.gmra.mxu0 %vm424_vm0, %v1876_v37 }
 0xd53   :  { %v1913_v38 = vpop.f32.mrf.mxu0 }
 0xd54   :  { %v1914_v29 = vadd.f32 %v2305_v42, %v1913_v38 }
 0xd56   :  { %1917 = vst [vmem:[#allocation2] sm:$0x3] %v1914_v29 }
 0xd57   :  { %1928 = dma.vmem_to_hbm [thread:$0]  %s1924_s24, 32, %s1926_s9, [#allocation3]  }
 0xd5b   :  { %v1915_v26 = vpop.f32.mrf.mxu0 }
 0xd5c   :  { %2440 = dma.done.wait [#allocation3], 32  }
 0xd5d   :  { %2441 = vsyncadd [#allocation3], 4294967264 }
 0xd5e   :  { %1933 = vsyncpa [#allocation3], 1 }

</bundles_post_ra>
